<compile_context>
chip_gen: v6e
topology: v6e:2x2x1
jax: 0.10.0
libtpu: 0.0.40
codegen_flags: <defaults>
</compile_context>

<pallas_src>
import functools
import math

import numpy as np
import jax
import jax.numpy as jnp
from jax.experimental import pallas as pl
from jax.experimental.pallas import tpu as pltpu

F32 = jnp.float32
BF16 = jnp.bfloat16
PAD_ID = 0              # constant.PAD_ID
INFINITY_NUMBER = 1e12  # constant.INFINITY_NUMBER
VMEM_LIMIT = 64 * 1024 * 1024


# ----------------------------------------------------------------------------
# Small helpers
# ----------------------------------------------------------------------------

def _round_up(x, m):
    return ((x + m - 1) // m) * m


def _pick_batch_block(B, cap=8):
    for c in range(min(B, cap), 0, -1):
        if B % c == 0:
            return c
    return 1


def _pick_pool_block(B, cap=64):
    for t in range(min(B, cap), 7, -1):
        if t % 8 == 0 and B % t == 0:
            return t
    return B


def _row_tile(M, target=512):
    if M <= target:
        return M
    for t in (target, 256, 128, 64, 32, 16, 8):
        if M % t == 0:
            return t
    return M


def _cparams():
    return pltpu.CompilerParams(dimension_semantics=("parallel",),
                                vmem_limit_bytes=VMEM_LIMIT)


# ----------------------------------------------------------------------------
# Pallas kernels
# ----------------------------------------------------------------------------

def _split_linear_kernel(*refs, n_in):
    # xs_i (tm, Ki) f32, W_i (Ki, Dp) bf16, b (1, Dp) f32 -> o (tm, Dp) f32
    # concat-then-matmul is replaced by a sum of per-piece matmuls (no in-VMEM concat).
    xs = refs[0:n_in]
    ws = refs[n_in:2 * n_in]
    b_ref = refs[2 * n_in]
    o_ref = refs[2 * n_in + 1]
    y = b_ref[...]
    for i in range(n_in):
        y = y + jnp.dot(xs[i][...].astype(BF16), ws[i][...],
                        preferred_element_type=F32)
    o_ref[...] = y


def _dense_gcn_block_kernel(adj_ref, x_ref, w_ref, b2_ref, wc_ref, ob_ref,
                            o_ref, cache_ref, *, mem_p, L, hd, Bblk, N):
    # One full DenseGCN (GraphConvLayer) block for Bblk batch elements.
    # adj: (Bblk, N, N) f32, x: (Bblk*N, mem_p) f32 (pad cols are exact zeros)
    # w: (L, mem_p + mem, hd) bf16 (rows laid out to match the cache columns)
    # b2: (L, 1, hd) f32 (= 2*bias), wc: (mem_p + mem, mem_p) bf16 (combined out weight)
    # ob: (1, mem_p) f32 -> o: (Bblk*N, mem_p) f32
    # cache scratch: (Bblk*N, mem_p + mem) f32
    M = Bblk * N
    cache_ref[:, :mem_p] = x_ref[...]
    adj = adj_ref[...]
    adj_bf = adj.astype(BF16)
    inv_den = [pl.reciprocal(jnp.sum(adj[b], axis=1, keepdims=True) + 1.0,
                             approx=True) for b in range(Bblk)]
    for l in range(L):
        Ka = mem_p + l * hd                              # active cache width (static)
        w_l = w_ref[l][:Ka, :]                           # trimmed K -> no padded MACs
        # (Ax + cache) @ W == adj @ (cache @ W) + cache @ W ; bias added twice (torch).
        t = jnp.dot(cache_ref[:, :Ka].astype(BF16), w_l,
                    preferred_element_type=F32)          # (M, hd), batched over Bblk*N
        b2 = b2_ref[l]
        for b in range(Bblk):
            tb = t[b * N:(b + 1) * N, :]
            ax = jnp.dot(adj_bf[b], tb.astype(BF16), preferred_element_type=F32)
            gax = jnp.maximum((ax + tb + b2) * inv_den[b], 0.0)
            cache_ref[b * N:(b + 1) * N, Ka:Ka + hd] = gax
    # out = (cat(outs) + x) @ OW + ob  == cache @ Wc + ob  (Wc holds OW twice)
    o_ref[...] = (jnp.dot(cache_ref[...].astype(BF16), wc_ref[...],
                          preferred_element_type=F32) + ob_ref[...])


def _multi_gcn_block_kernel(x_ref, pmask_ref, qw_ref, qb_ref, kw_ref, kb_ref,
                            w_ref, b2_ref, wc_ref, ob_ref, o_ref,
                            cache_ref, attn_ref, acc_ref,
                            *, mem_p, heads, L, hd, dk, Bblk, N):
    # Fused MultiHeadAttention (per-head Q/K projection + masked softmax) +
    # MultiGraphConvLayer for Bblk batch elements.
    # x: (Bblk*N, mem_p) f32, pmask: (Bblk, 1, N) f32 (1.0 where PAD token)
    # qw/kw: (heads, mem_p, dk) bf16, qb/kb: (heads, 1, dk) f32
    # w: (heads*L, mem_p + mem, hd) bf16, b2: (heads*L, 1, hd) f32
    # wc: (heads, mem_p + mem, mem_p) bf16, ob: (1, mem_p) f32
    # scratches: cache (Bblk*N, mem_p + mem) f32, attn (Bblk, N, N) f32,
    #            acc (Bblk*N, mem_p) f32
    M = Bblk * N
    x = x_ref[...]
    x_bf = x.astype(BF16)
    cache_ref[:, :mem_p] = x
    pmask = pmask_ref[...]
    acc_ref[...] = jnp.zeros_like(acc_ref)
    scale = 1.0 / math.sqrt(dk)
    for h in range(heads):
        q = jnp.dot(x_bf, qw_ref[h], preferred_element_type=F32) + qb_ref[h]
        k = jnp.dot(x_bf, kw_ref[h], preferred_element_type=F32) + kb_ref[h]
        q_bf = q.astype(BF16)
        k_bf = k.astype(BF16)
        for b in range(Bblk):
            scores = jax.lax.dot_general(
                q_bf[b * N:(b + 1) * N, :], k_bf[b * N:(b + 1) * N, :],
                (((1,), (1,)), ((), ())), preferred_element_type=F32) * scale
            scores = jnp.where(pmask[b] != 0.0, -1e9, scores)     # masked_fill(mask==0)
            scores = scores - jnp.max(scores, axis=-1, keepdims=True)
            e = jnp.exp(scores)
            attn_ref[b] = e * pl.reciprocal(jnp.sum(e, axis=-1, keepdims=True),
                                            approx=True)
        for l in range(L):
            Ka = mem_p + l * hd
            w_l = w_ref[h * L + l][:Ka, :]
            t = jnp.dot(cache_ref[:, :Ka].astype(BF16), w_l,
                        preferred_element_type=F32)
            b2 = b2_ref[h * L + l]
            for b in range(Bblk):
                tb = t[b * N:(b + 1) * N, :]
                ax = jnp.dot(attn_ref[b].astype(BF16), tb.astype(BF16),
                             preferred_element_type=F32)
                # softmax rows sum to 1 exactly => denom (attn.sum(-1) + 1) == 2
                gax = jnp.maximum((ax + tb + b2) * 0.5, 0.0)
                cache_ref[b * N:(b + 1) * N, Ka:Ka + hd] = gax
        # per-head output contribution accumulated in VMEM (no head concat / vreg blowup)
        acc_ref[...] += jnp.dot(cache_ref[...].astype(BF16), wc_ref[h],
                                preferred_element_type=F32)
    o_ref[...] = acc_ref[...] + ob_ref[...]


def _pool_mlp_kernel(h_ref, m0_ref, m1_ref, m2_ref, *rest, n_rest):
    # h: (Bt, N, mem_p) f32, masks: (Bt, N, 1) f32 (nonzero => masked out)
    # rest: W1_0, W1_1, W1_2 (mem_p, mem_p) bf16, b1 (1, mem_p) f32,
    #       then (W_j, b_j)*n_rest, then out_ref, hout_ref.
    w1 = rest[0:3]
    b1_ref = rest[3]
    layer_refs = rest[4:4 + 2 * n_rest]
    out_ref = rest[4 + 2 * n_rest]
    hout_ref = rest[5 + 2 * n_rest]
    h = h_ref[...]
    pooled = []
    for m_ref in (m0_ref, m1_ref, m2_ref):
        hm = jnp.where(m_ref[...] != 0.0, -INFINITY_NUMBER, h)
        pooled.append(jnp.max(hm, axis=1))                       # (Bt, mem_p)
    y = b1_ref[...]
    for i in range(3):                                           # split first MLP layer
        y = y + jnp.dot(pooled[i].astype(BF16), w1[i][...],
                        preferred_element_type=F32)
    y = jnp.maximum(y, 0.0)
    for j in range(n_rest):
        w = layer_refs[2 * j][...]
        b = layer_refs[2 * j + 1][...]
        y = jnp.maximum(jnp.dot(y.astype(BF16), w, preferred_element_type=F32) + b,
                        0.0)
    out_ref[...] = y
    hout_ref[...] = pooled[0]


# ----------------------------------------------------------------------------
# Kernel wrappers
# ----------------------------------------------------------------------------

def split_linear(xs, w_pieces, b, d_out):
    M = xs[0].shape[0]
    n_in = len(xs)
    tm = _row_tile(M)
    in_specs = ([pl.BlockSpec((tm, int(x.shape[1])), lambda i: (i, 0)) for x in xs]
                + [pl.BlockSpec(tuple(w.shape), lambda i: (0, 0)) for w in w_pieces]
                + [pl.BlockSpec((1, d_out), lambda i: (0, 0))])
    return pl.pallas_call(
        functools.partial(_split_linear_kernel, n_in=n_in),
        out_shape=jax.ShapeDtypeStruct((M, d_out), F32),
        grid=(M // tm,),
        in_specs=in_specs,
        out_specs=pl.BlockSpec((tm, d_out), lambda i: (i, 0)),
        compiler_params=_cparams(),
    )(*xs, *w_pieces, b)


def dense_gcn_block(adj, x2d, blk, mem_p, N, Bblk):
    B = adj.shape[0]
    M = Bblk * N
    L, hd = blk['L'], blk['hd']
    Ctot = blk['W'].shape[1]
    kern = functools.partial(_dense_gcn_block_kernel, mem_p=mem_p, L=L, hd=hd,
                             Bblk=Bblk, N=N)
    return pl.pallas_call(
        kern,
        out_shape=jax.ShapeDtypeStruct((B * N, mem_p), F32),
        grid=(B // Bblk,),
        in_specs=[
            pl.BlockSpec((Bblk, N, N), lambda i: (i, 0, 0)),
            pl.BlockSpec((M, mem_p), lambda i: (i, 0)),
            pl.BlockSpec(tuple(blk['W'].shape), lambda i: (0, 0, 0)),
            pl.BlockSpec(tuple(blk['b2'].shape), lambda i: (0, 0, 0)),
            pl.BlockSpec(tuple(blk['Wc'].shape), lambda i: (0, 0)),
            pl.BlockSpec(tuple(blk['ob'].shape), lambda i: (0, 0)),
        ],
        out_specs=pl.BlockSpec((M, mem_p), lambda i: (i, 0)),
        scratch_shapes=[pltpu.VMEM((M, Ctot), F32)],
        compiler_params=_cparams(),
    )(adj, x2d, blk['W'], blk['b2'], blk['Wc'], blk['ob'])


def attn_multi_gcn_block(x2d, pad_mask, attn_p, blk, mem_p, N, Bblk, heads, mem):
    B = pad_mask.shape[0]
    M = Bblk * N
    L, hd = blk['L'], blk['hd']
    Ctot = blk['W'].shape[1]
    dk = mem // heads
    kern = functools.partial(_multi_gcn_block_kernel, mem_p=mem_p, heads=heads,
                             L=L, hd=hd, dk=dk, Bblk=Bblk, N=N)
    return pl.pallas_call(
        kern,
        out_shape=jax.ShapeDtypeStruct((B * N, mem_p), F32),
        grid=(B // Bblk,),
        in_specs=[
            pl.BlockSpec((M, mem_p), lambda i: (i, 0)),
            pl.BlockSpec((Bblk, 1, N), lambda i: (i, 0, 0)),
            pl.BlockSpec(tuple(attn_p['qW'].shape), lambda i: (0, 0, 0)),
            pl.BlockSpec(tuple(attn_p['qb'].shape), lambda i: (0, 0, 0)),
            pl.BlockSpec(tuple(attn_p['kW'].shape), lambda i: (0, 0, 0)),
            pl.BlockSpec(tuple(attn_p['kb'].shape), lambda i: (0, 0, 0)),
            pl.BlockSpec(tuple(blk['W'].shape), lambda i: (0, 0, 0)),
            pl.BlockSpec(tuple(blk['b2'].shape), lambda i: (0, 0, 0)),
            pl.BlockSpec(tuple(blk['Wc'].shape), lambda i: (0, 0, 0)),
            pl.BlockSpec(tuple(blk['ob'].shape), lambda i: (0, 0)),
        ],
        out_specs=pl.BlockSpec((M, mem_p), lambda i: (i, 0)),
        scratch_shapes=[pltpu.VMEM((M, Ctot), F32),
                        pltpu.VMEM((Bblk, N, N), F32),
                        pltpu.VMEM((M, mem_p), F32)],
        compiler_params=_cparams(),
    )(x2d, pad_mask, attn_p['qW'], attn_p['qb'], attn_p['kW'], attn_p['kb'],
      blk['W'], blk['b2'], blk['Wc'], blk['ob'])


def pool_and_mlp(h, pool_mask, subj_mask, obj_mask, mlp_p, mem_p):
    B, N, _ = h.shape
    Bt = _pick_pool_block(B)
    n_rest = len(mlp_p['rest'])
    flat = list(mlp_p['W1']) + [mlp_p['b1']]
    for (W, b) in mlp_p['rest']:
        flat += [W, b]
    kern = functools.partial(_pool_mlp_kernel, n_rest=n_rest)
    return pl.pallas_call(
        kern,
        out_shape=(jax.ShapeDtypeStruct((B, mem_p), F32),
                   jax.ShapeDtypeStruct((B, mem_p), F32)),
        grid=(B // Bt,),
        in_specs=[pl.BlockSpec((Bt, N, mem_p), lambda i: (i, 0, 0)),
                  pl.BlockSpec((Bt, N, 1), lambda i: (i, 0, 0)),
                  pl.BlockSpec((Bt, N, 1), lambda i: (i, 0, 0)),
                  pl.BlockSpec((Bt, N, 1), lambda i: (i, 0, 0))]
                 + [pl.BlockSpec(tuple(a.shape), lambda i: (0, 0)) for a in flat],
        out_specs=(pl.BlockSpec((Bt, mem_p), lambda i: (i, 0)),
                   pl.BlockSpec((Bt, mem_p), lambda i: (i, 0))),
        compiler_params=_cparams(),
    )(h, pool_mask, subj_mask, obj_mask, *flat)


# ----------------------------------------------------------------------------
# Model forward (glue in plain JAX, hot paths in the fused Pallas kernels above)
# ----------------------------------------------------------------------------

def aggcn_forward(adj, words, pos, ner, p, opt):
    B, N = words.shape
    mem = opt['hidden_dim']
    mem_p = p['mem_p']
    pad_mask = (words == PAD_ID).astype(F32)[:, None, :]             # (B, 1, N)

    embs = [p['emb'][words].reshape(B * N, -1)]
    if opt['pos_dim'] > 0:
        embs.append(p['pos_emb'][pos].reshape(B * N, -1))
    if opt['ner_dim'] > 0:
        embs.append(p['ner_emb'][ner].reshape(B * N, -1))
    # in_drop: identity (eval). RNN branch disabled (opt['rnn'] falsy).
    gcn_inputs = split_linear(embs, p['input_W'], p['input_b'], mem_p)  # (B*N, mem_p)

    pool_mask = ((adj.sum(2) + adj.sum(1)) == 0)[:, :, None].astype(F32)  # (B, N, 1)

    Bblk = _pick_batch_block(B)
    outputs = gcn_inputs
    layer_list = []
    for blk in p['blocks']:
        if blk['type'] == 'dense':
            outputs = dense_gcn_block(adj, outputs, blk, mem_p, N, Bblk)
        else:
            outputs = attn_multi_gcn_block(outputs, pad_mask, p['attn'], blk,
                                           mem_p, N, Bblk, opt['heads'], mem)
        layer_list.append(outputs)

    dcgcn = split_linear(layer_list, p['aggregate_W'], p['aggregate_b'], mem_p)
    return dcgcn.reshape(B, N, mem_p), pool_mask


def gcn_relation_model_forward(inputs, adj, params, opt):
    (words, masks, pos, ner, deprel, head,
     subj_pos, obj_pos, subj_type, obj_type) = inputs

    h, pool_mask = aggcn_forward(adj, words, pos, ner, params['gcn'], opt)

    subj_mask = (subj_pos != 0)[:, :, None].astype(F32)
    obj_mask = (obj_pos != 0)[:, :, None].astype(F32)

    # TODO(synk): only opt['pooling'] == 'max' is implemented (subj/obj pooling is
    # always 'max' in the reference; h_out pooling type is 'max' in this config).
    mem = opt['hidden_dim']
    out_p, hout_p = pool_and_mlp(h, pool_mask, subj_mask, obj_mask,
                                 params['out_mlp'], params['gcn']['mem_p'])
    return out_p[:, :mem], hout_p[:, :mem]


# ----------------------------------------------------------------------------
# Deterministic parameter construction + packing for the fused kernels
# ----------------------------------------------------------------------------

def build_params(opt, n_pos, n_ner):
    keys = iter(jax.random.split(jax.random.PRNGKey(0), 256))

    def nk():
        return next(keys)

    def init_linear(din, dout):
        W = jax.random.uniform(nk(), (din, dout), F32, -0.1, 0.1)
        b = jax.random.uniform(nk(), (dout,), F32, -0.1, 0.1)
        return W, b

    mem = opt['hidden_dim']

    emb = jax.random.uniform(nk(), (opt['vocab_size'], opt['emb_dim']), F32, -1.0, 1.0)
    emb = emb.at[PAD_ID].set(0.0)  # padding_idx row zeroed
    pos_emb = jax.random.uniform(nk(), (n_pos, opt['pos_dim']), F32, -0.1, 0.1)
    ner_emb = jax.random.uniform(nk(), (n_ner, opt['ner_dim']), F32, -0.1, 0.1)

    def init_dense_gcn(sublayers):
        head_dim = mem // sublayers
        weights = [init_linear(mem + head_dim * l, head_dim) for l in range(sublayers)]
        out_W, out_b = init_linear(mem, mem)
        return dict(weights=weights, out_W=out_W, out_b=out_b)

    def init_multi_dense_gcn(heads, sublayers):
        head_dim = mem // sublayers
        head_params = [[init_linear(mem + head_dim * l, head_dim) for l in range(sublayers)]
                       for _ in range(heads)]
        out_W, out_b = init_linear(mem * heads, mem)
        return dict(heads=head_params, out_W=out_W, out_b=out_b)

    layers = []
    for i in range(opt['num_layers']):
        if i == 0:
            layers.append(init_dense_gcn(opt['sublayer_first']))
            layers.append(init_dense_gcn(opt['sublayer_second']))
        else:
            layers.append(init_multi_dense_gcn(opt['heads'], opt['sublayer_first']))
            layers.append(init_multi_dense_gcn(opt['heads'], opt['sublayer_second']))

    in_dim = opt['emb_dim'] + opt['pos_dim'] + opt['ner_dim']
    input_W_G_W, input_W_G_b = init_linear(in_dim, mem)
    aggregate_W_W, aggregate_W_b = init_linear(len(layers) * mem, mem)
    q_W, q_b = init_linear(mem, mem)
    k_W, k_b = init_linear(mem, mem)

    gcn_params = dict(
        emb=emb, pos_emb=pos_emb, ner_emb=ner_emb,
        input_W_G_W=input_W_G_W, input_W_G_b=input_W_G_b,
        layers=layers,
        aggregate_W_W=aggregate_W_W, aggregate_W_b=aggregate_W_b,
        attn=dict(q_W=q_W, q_b=q_b, k_W=k_W, k_b=k_b),
    )

    out_mlp = [init_linear(mem * 3, mem)]
    for _ in range(opt['mlp_layers'] - 1):
        out_mlp.append(init_linear(mem, mem))

    return dict(gcn=gcn_params, out_mlp=out_mlp)


def prepare_params(raw, opt):
    """Pack raw per-sublayer weights into lane-dense, bf16, kernel-ready tensors."""
    mem = opt['hidden_dim']
    mem_p = _round_up(mem, 128)
    heads = opt['heads']
    gcn = raw['gcn']
    Ctot = mem_p + mem      # cache width: padded x | cat(sublayer outs)

    def pad_cols(W):
        return jnp.pad(W, ((0, 0), (0, mem_p - W.shape[1])))

    def pad_vec(b):
        b = b.reshape(1, -1)
        return jnp.pad(b, ((0, 0), (0, mem_p - b.shape[-1])))

    def pack_sub_W(W, l):
        # W: (mem + l*hd, hd). Rows [0,mem) act on x (placed at cache cols [0,mem)),
        # rows [mem, mem+l*hd) act on previous sublayer outputs (cache cols mem_p+...).
        out = jnp.zeros((Ctot, W.shape[1]), F32).at[:mem, :].set(W[:mem, :])
        if l > 0:
            out = out.at[mem_p:mem_p + (W.shape[0] - mem), :].set(W[mem:, :])
        return out

    def pack_out_W(ow):
        # Combined output weight: out = (cat(outs) + x) @ ow  == cache @ Wc.
        owp = pad_cols(ow)                                     # (mem, mem_p)
        return (jnp.zeros((Ctot, mem_p), F32)
                .at[:mem, :].set(owp)
                .at[mem_p:mem_p + mem, :].set(owp))

    blocks = []
    for lp in gcn['layers']:
        if 'weights' in lp:                                    # DenseGCN block
            L = len(lp['weights'])
            hd = mem // L
            W = jnp.stack([pack_sub_W(w, l) for l, (w, _) in enumerate(lp['weights'])]
                          ).astype(BF16)
            b2 = jnp.stack([(2.0 * b).reshape(1, hd) for (_, b) in lp['weights']])
            blocks.append(dict(type='dense', L=L, hd=hd, W=W, b2=b2,
                               Wc=pack_out_W(lp['out_W']).astype(BF16),
                               ob=pad_vec(lp['out_b'])))
        else:                                                  # MultiDenseGCN block
            L = len(lp['heads'][0])
            hd = mem // L
            flat = [wb for head_ws in lp['heads'] for wb in head_ws]   # index = h*L + l
            W = jnp.stack([pack_sub_W(w, i % L) for i, (w, _) in enumerate(flat)]
                          ).astype(BF16)
            b2 = jnp.stack([(2.0 * b).reshape(1, hd) for (_, b) in flat])
            Wc = jnp.stack([pack_out_W(lp['out_W'][h * mem:(h + 1) * mem, :])
                            for h in range(heads)]).astype(BF16)
            blocks.append(dict(type='multi', L=L, hd=hd, W=W, b2=b2, Wc=Wc,
                               ob=pad_vec(lp['out_b'])))

    dk = mem // heads

    def pack_qk(W, b):
        Wp = jnp.pad(W, ((0, mem_p - mem), (0, 0)))            # (mem_p, mem)
        Ws = jnp.stack([Wp[:, h * dk:(h + 1) * dk] for h in range(heads)]).astype(BF16)
        bs = jnp.stack([b[h * dk:(h + 1) * dk].reshape(1, dk) for h in range(heads)])
        return Ws, bs

    qW, qb = pack_qk(gcn['attn']['q_W'], gcn['attn']['q_b'])
    kW, kb = pack_qk(gcn['attn']['k_W'], gcn['attn']['k_b'])

    # Input linear split per embedding piece (no in-kernel concat).
    dims = [opt['emb_dim']]
    if opt['pos_dim'] > 0:
        dims.append(opt['pos_dim'])
    if opt['ner_dim'] > 0:
        dims.append(opt['ner_dim'])
    in_W, off = [], 0
    for d in dims:
        in_W.append(pad_cols(gcn['input_W_G_W'][off:off + d, :]).astype(BF16))
        off += d
    in_b = pad_vec(gcn['input_W_G_b'])

    # Aggregate linear split per layer output; pieces padded to (mem_p, mem_p).
    agg_W = []
    for j in range(len(gcn['layers'])):
        piece = pad_cols(gcn['aggregate_W_W'][j * mem:(j + 1) * mem, :])
        agg_W.append(jnp.pad(piece, ((0, mem_p - mem), (0, 0))).astype(BF16))
    agg_b = pad_vec(gcn['aggregate_W_b'])

    gcn_p = dict(mem_p=mem_p, emb=gcn['emb'], pos_emb=gcn['pos_emb'],
                 ner_emb=gcn['ner_emb'],
                 input_W=in_W, input_b=in_b,
                 aggregate_W=agg_W, aggregate_b=agg_b,
                 blocks=blocks, attn=dict(qW=qW, qb=qb, kW=kW, kb=kb))

    # out_mlp: split first layer per pooled piece (h_out, subj, obj); pad the rest.
    W1, b1 = raw['out_mlp'][0]
    W1_pieces = []
    for kpc in range(3):
        piece = pad_cols(W1[kpc * mem:(kpc + 1) * mem, :])
        W1_pieces.append(jnp.pad(piece, ((0, mem_p - mem), (0, 0))).astype(BF16))
    rest = []
    for (W, b) in raw['out_mlp'][1:]:
        Wp = jnp.zeros((mem_p, mem_p), F32).at[:mem, :mem].set(W).astype(BF16)
        rest.append((Wp, pad_vec(b)))
    out_mlp = dict(W1=W1_pieces, b1=pad_vec(b1), rest=rest)

    return dict(gcn=gcn_p, out_mlp=out_mlp)


# ----------------------------------------------------------------------------
# Adjacency construction from dependency heads (host-side glue)
# ----------------------------------------------------------------------------

def build_adj(head_np, lengths, maxlen):
    # TODO(synk): full Tree object construction (pruning etc.) not needed for the
    # base forward; we build the undirected dependency adjacency directly.
    B = head_np.shape[0]
    adj = np.zeros((B, maxlen, maxlen), dtype=np.float32)
    for b in range(B):
        for j in range(int(lengths[b])):
            hd = int(head_np[b, j])
            if hd > 0:
                adj[b, hd - 1, j] = 1.0
                adj[b, j, hd - 1] = 1.0
    return jnp.asarray(adj)


# ----------------------------------------------------------------------------
# Main
# ----------------------------------------------------------------------------

if __name__ == "__main__":
    opt = dict(
        vocab_size=50, emb_dim=16, pos_dim=4, ner_dim=4,
        hidden_dim=32, num_layers=2, heads=2,
        sublayer_first=2, sublayer_second=4,
        mlp_layers=2, pooling='max',
        input_dropout=0.0, gcn_dropout=0.0, cuda=False, topn=0,
    )
    N_POS, N_NER = 10, 8
    B, N = 2, 8

    raw_params = build_params(opt, N_POS, N_NER)
    params = prepare_params(raw_params, opt)

    key = jax.random.PRNGKey(0)
    k1, k2, k3 = jax.random.split(key, 3)
    words = jax.random.randint(k1, (B, N), 1, opt['vocab_size'], dtype=jnp.int32)
    pos = jax.random.randint(k2, (B, N), 0, N_POS, dtype=jnp.int32)
    ner = jax.random.randint(k3, (B, N), 0, N_NER, dtype=jnp.int32)
    masks = jnp.zeros((B, N), dtype=jnp.int32)                       # 0 = real token
    deprel = jnp.zeros((B, N), dtype=jnp.int32)
    head = jnp.broadcast_to(jnp.arange(N, dtype=jnp.int32), (B, N))  # chain tree (0=root)
    subj_pos = jnp.broadcast_to(jnp.arange(N, dtype=jnp.int32) - 1, (B, N))  # subj @ token 1
    obj_pos = jnp.broadcast_to(jnp.arange(N, dtype=jnp.int32) - 5, (B, N))   # obj  @ token 5
    subj_type = jnp.zeros((B,), dtype=jnp.int32)
    obj_type = jnp.zeros((B,), dtype=jnp.int32)

    inputs = (words, masks, pos, ner, deprel, head,
              subj_pos, obj_pos, subj_type, obj_type)

    lengths = (np.asarray(masks) == 0).astype(np.int64).sum(1)
    maxlen = int(max(lengths))
    adj = build_adj(np.asarray(head), lengths, maxlen)

    fwd = jax.jit(lambda ins, a: gcn_relation_model_forward(ins, a, params, opt))
    outputs, h_out = fwd(inputs, adj)
    jax.block_until_ready((outputs, h_out))

    assert outputs.shape == (B, opt['hidden_dim'])
    assert h_out.shape == (B, opt['hidden_dim'])
    assert bool(jnp.all(jnp.isfinite(outputs))) and bool(jnp.all(jnp.isfinite(h_out)))
    print("KERNEL_OK")
</pallas_src>

<mosaic_0001>
module attributes {stable_mosaic.version = 11 : i64} {
  func.func @_split_linear_kernel(%arg0: i32, %arg1: memref<16x16xf32, #tpu.memory_space<vmem>>, %arg2: memref<16x4xf32, #tpu.memory_space<vmem>>, %arg3: memref<16x4xf32, #tpu.memory_space<vmem>>, %arg4: memref<16x128xbf16, #tpu.memory_space<vmem>>, %arg5: memref<4x128xbf16, #tpu.memory_space<vmem>>, %arg6: memref<4x128xbf16, #tpu.memory_space<vmem>>, %arg7: memref<1x128xf32, #tpu.memory_space<vmem>>, %arg8: memref<16x128xf32, #tpu.memory_space<vmem>>) attributes {dimension_semantics = [#tpu.dimension_semantics<parallel>], iteration_bounds = array<i64: 1>, scalar_prefetch = 0 : i64, scratch_operands = 0 : i64, tpu.core_type = #tpu.core_type<tc>, window_params = [{transform_indices = @transform_0, window_bounds = array<i64: 16, 16>}, {transform_indices = @transform_1, window_bounds = array<i64: 16, 4>}, {transform_indices = @transform_2, window_bounds = array<i64: 16, 4>}, {pipeline_mode = #tpu.pipeline_mode<synchronous>, transform_indices = @transform_3, window_bounds = array<i64: 16, 128>}, {pipeline_mode = #tpu.pipeline_mode<synchronous>, transform_indices = @transform_4, window_bounds = array<i64: 4, 128>}, {pipeline_mode = #tpu.pipeline_mode<synchronous>, transform_indices = @transform_5, window_bounds = array<i64: 4, 128>}, {pipeline_mode = #tpu.pipeline_mode<synchronous>, transform_indices = @transform_6, window_bounds = array<i64: 1, 128>}, {transform_indices = @transform_7, window_bounds = array<i64: 16, 128>}]} {
    %c0 = arith.constant 0 : index
    %c0_0 = arith.constant 0 : index
    %0 = vector.load %arg7[%c0, %c0_0] : memref<1x128xf32, #tpu.memory_space<vmem>>, vector<1x128xf32>
    %c0_1 = arith.constant 0 : index
    %c0_2 = arith.constant 0 : index
    %1 = vector.load %arg1[%c0_1, %c0_2] : memref<16x16xf32, #tpu.memory_space<vmem>>, vector<16x16xf32>
    %2 = arith.truncf %1 : vector<16x16xf32> to vector<16x16xbf16>
    %c0_3 = arith.constant 0 : index
    %c0_4 = arith.constant 0 : index
    %3 = vector.load %arg4[%c0_3, %c0_4] : memref<16x128xbf16, #tpu.memory_space<vmem>>, vector<16x128xbf16>
    %cst = arith.constant dense<0.000000e+00> : vector<16x128xf32>
    %4 = tpu.matmul %2, %3, %cst {dimension_numbers = #tpu.dot_dimension_numbers<[1], [0], [0], [1], [0, 0, 1, 1], [], []>} : vector<16x16xbf16>, vector<16x128xbf16>, vector<16x128xf32> -> vector<16x128xf32>
    %5 = vector.broadcast %0 : vector<1x128xf32> to vector<16x128xf32>
    %6 = arith.addf %5, %4 : vector<16x128xf32>
    %c0_5 = arith.constant 0 : index
    %c0_6 = arith.constant 0 : index
    %7 = vector.load %arg2[%c0_5, %c0_6] : memref<16x4xf32, #tpu.memory_space<vmem>>, vector<16x4xf32>
    %8 = arith.truncf %7 : vector<16x4xf32> to vector<16x4xbf16>
    %c0_7 = arith.constant 0 : index
    %c0_8 = arith.constant 0 : index
    %9 = vector.load %arg5[%c0_7, %c0_8] : memref<4x128xbf16, #tpu.memory_space<vmem>>, vector<4x128xbf16>
    %cst_9 = arith.constant dense<0.000000e+00> : vector<16x128xf32>
    %10 = tpu.matmul %8, %9, %cst_9 {dimension_numbers = #tpu.dot_dimension_numbers<[1], [0], [0], [1], [0, 0, 1, 1], [], []>} : vector<16x4xbf16>, vector<4x128xbf16>, vector<16x128xf32> -> vector<16x128xf32>
    %11 = arith.addf %6, %10 : vector<16x128xf32>
    %c0_10 = arith.constant 0 : index
    %c0_11 = arith.constant 0 : index
    %12 = vector.load %arg3[%c0_10, %c0_11] : memref<16x4xf32, #tpu.memory_space<vmem>>, vector<16x4xf32>
    %13 = arith.truncf %12 : vector<16x4xf32> to vector<16x4xbf16>
    %c0_12 = arith.constant 0 : index
    %c0_13 = arith.constant 0 : index
    %14 = vector.load %arg6[%c0_12, %c0_13] : memref<4x128xbf16, #tpu.memory_space<vmem>>, vector<4x128xbf16>
    %cst_14 = arith.constant dense<0.000000e+00> : vector<16x128xf32>
    %15 = tpu.matmul %13, %14, %cst_14 {dimension_numbers = #tpu.dot_dimension_numbers<[1], [0], [0], [1], [0, 0, 1, 1], [], []>} : vector<16x4xbf16>, vector<4x128xbf16>, vector<16x128xf32> -> vector<16x128xf32>
    %16 = arith.addf %11, %15 : vector<16x128xf32>
    %c0_15 = arith.constant 0 : index
    %c0_16 = arith.constant 0 : index
    %17 = vector.load %arg8[%c0_15, %c0_16] : memref<16x128xf32, #tpu.memory_space<vmem>>, vector<16x128xf32>
    tpu.vector_store %arg8[%c0_15, %c0_16], %16 {strides = array<i32>} : memref<16x128xf32, #tpu.memory_space<vmem>>, vector<16x128xf32>,
    return
  }
  func.func @transform_0(%arg0: i32) -> (i32, i32) {
    %c0_i32 = arith.constant 0 : i32
    %c0_i32_0 = arith.constant 0 : i32
    return %arg0, %c0_i32 : i32, i32
  }
  func.func @transform_1(%arg0: i32) -> (i32, i32) {
    %c0_i32 = arith.constant 0 : i32
    %c0_i32_0 = arith.constant 0 : i32
    return %arg0, %c0_i32 : i32, i32
  }
  func.func @transform_2(%arg0: i32) -> (i32, i32) {
    %c0_i32 = arith.constant 0 : i32
    %c0_i32_0 = arith.constant 0 : i32
    return %arg0, %c0_i32 : i32, i32
  }
  func.func @transform_3(%arg0: i32) -> (i32, i32) {
    %c0_i32 = arith.constant 0 : i32
    %c0_i32_0 = arith.constant 0 : i32
    %c0_i32_1 = arith.constant 0 : i32
    return %c0_i32, %c0_i32_0 : i32, i32
  }
  func.func @transform_4(%arg0: i32) -> (i32, i32) {
    %c0_i32 = arith.constant 0 : i32
    %c0_i32_0 = arith.constant 0 : i32
    %c0_i32_1 = arith.constant 0 : i32
    return %c0_i32, %c0_i32_0 : i32, i32
  }
  func.func @transform_5(%arg0: i32) -> (i32, i32) {
    %c0_i32 = arith.constant 0 : i32
    %c0_i32_0 = arith.constant 0 : i32
    %c0_i32_1 = arith.constant 0 : i32
    return %c0_i32, %c0_i32_0 : i32, i32
  }
  func.func @transform_6(%arg0: i32) -> (i32, i32) {
    %c0_i32 = arith.constant 0 : i32
    %c0_i32_0 = arith.constant 0 : i32
    %c0_i32_1 = arith.constant 0 : i32
    return %c0_i32, %c0_i32_0 : i32, i32
  }
  func.func @transform_7(%arg0: i32) -> (i32, i32) {
    %c0_i32 = arith.constant 0 : i32
    %c0_i32_0 = arith.constant 0 : i32
    return %arg0, %c0_i32 : i32, i32
  }
}

module attributes {stable_mosaic.version = 11 : i64} {
  func.func @_dense_gcn_block_kernel(%arg0: i32, %arg1: memref<2x8x8xf32, #tpu.memory_space<vmem>>, %arg2: memref<16x128xf32, #tpu.memory_space<vmem>>, %arg3: memref<2x160x16xbf16, #tpu.memory_space<vmem>>, %arg4: memref<2x1x16xf32, #tpu.memory_space<vmem>>, %arg5: memref<160x128xbf16, #tpu.memory_space<vmem>>, %arg6: memref<1x128xf32, #tpu.memory_space<vmem>>, %arg7: memref<16x128xf32, #tpu.memory_space<vmem>>, %arg8: memref<16x160xf32, #tpu.memory_space<vmem>>) attributes {dimension_semantics = [#tpu.dimension_semantics<parallel>], iteration_bounds = array<i64: 1>, scalar_prefetch = 0 : i64, scratch_operands = 1 : i64, tpu.core_type = #tpu.core_type<tc>, window_params = [{transform_indices = @transform_0, window_bounds = array<i64: 2, 8, 8>}, {transform_indices = @transform_1, window_bounds = array<i64: 16, 128>}, {pipeline_mode = #tpu.pipeline_mode<synchronous>, transform_indices = @transform_2, window_bounds = array<i64: 2, 160, 16>}, {pipeline_mode = #tpu.pipeline_mode<synchronous>, transform_indices = @transform_3, window_bounds = array<i64: 2, 1, 16>}, {pipeline_mode = #tpu.pipeline_mode<synchronous>, transform_indices = @transform_4, window_bounds = array<i64: 160, 128>}, {pipeline_mode = #tpu.pipeline_mode<synchronous>, transform_indices = @transform_5, window_bounds = array<i64: 1, 128>}, {transform_indices = @transform_6, window_bounds = array<i64: 16, 128>}]} {
    %c0 = arith.constant 0 : index
    %c0_0 = arith.constant 0 : index
    %0 = vector.load %arg2[%c0, %c0_0] : memref<16x128xf32, #tpu.memory_space<vmem>>, vector<16x128xf32>
    %c0_1 = arith.constant 0 : index
    %c0_2 = arith.constant 0 : index
    %1 = vector.load %arg8[%c0_1, %c0_2] : memref<16x160xf32, #tpu.memory_space<vmem>>, vector<16x128xf32>
    tpu.vector_store %arg8[%c0_1, %c0_2], %0 {strides = array<i32>} : memref<16x160xf32, #tpu.memory_space<vmem>>, vector<16x128xf32>,
    %c0_3 = arith.constant 0 : index
    %c0_4 = arith.constant 0 : index
    %c0_5 = arith.constant 0 : index
    %2 = vector.load %arg1[%c0_3, %c0_4, %c0_5] : memref<2x8x8xf32, #tpu.memory_space<vmem>>, vector<2x8x8xf32>
    %3 = arith.truncf %2 : vector<2x8x8xf32> to vector<2x8x8xbf16>
    %4 = vector.extract_strided_slice %2 {offsets = [0, 0, 0], sizes = [1, 8, 8], strides = [1, 1, 1]} : vector<2x8x8xf32> to vector<1x8x8xf32>
    %5 = vector.shape_cast %4 : vector<1x8x8xf32> to vector<8x8xf32>
    %cst = arith.constant dense<0.000000e+00> : vector<8xf32>
    %6 = vector.multi_reduction <add>, %5, %cst [1] : vector<8x8xf32> to vector<8xf32>
    %7 = vector.shape_cast %6 : vector<8xf32> to vector<8x1xf32>
    %cst_6 = arith.constant 1.000000e+00 : f32
    %8 = vector.broadcast %cst_6 : f32 to vector<8x1xf32>
    %9 = arith.addf %7, %8 : vector<8x1xf32>
    %10 = tpu.reciprocal %9 {approx = true} : vector<8x1xf32> -> vector<8x1xf32>
    %11 = vector.extract_strided_slice %2 {offsets = [1, 0, 0], sizes = [1, 8, 8], strides = [1, 1, 1]} : vector<2x8x8xf32> to vector<1x8x8xf32>
    %12 = vector.shape_cast %11 : vector<1x8x8xf32> to vector<8x8xf32>
    %cst_7 = arith.constant dense<0.000000e+00> : vector<8xf32>
    %13 = vector.multi_reduction <add>, %12, %cst_7 [1] : vector<8x8xf32> to vector<8xf32>
    %14 = vector.shape_cast %13 : vector<8xf32> to vector<8x1xf32>
    %cst_8 = arith.constant 1.000000e+00 : f32
    %15 = vector.broadcast %cst_8 : f32 to vector<8x1xf32>
    %16 = arith.addf %14, %15 : vector<8x1xf32>
    %17 = tpu.reciprocal %16 {approx = true} : vector<8x1xf32> -> vector<8x1xf32>
    %c0_9 = arith.constant 0 : index
    %c0_10 = arith.constant 0 : index
    %c0_11 = arith.constant 0 : index
    %18 = vector.load %arg3[%c0_9, %c0_10, %c0_11] : memref<2x160x16xbf16, #tpu.memory_space<vmem>>, vector<1x160x16xbf16>
    %19 = vector.shape_cast %18 : vector<1x160x16xbf16> to vector<160x16xbf16>
    %20 = vector.extract_strided_slice %19 {offsets = [0, 0], sizes = [128, 16], strides = [1, 1]} : vector<160x16xbf16> to vector<128x16xbf16>
    %c0_12 = arith.constant 0 : index
    %c0_13 = arith.constant 0 : index
    %21 = vector.load %arg8[%c0_12, %c0_13] : memref<16x160xf32, #tpu.memory_space<vmem>>, vector<16x128xf32>
    %22 = arith.truncf %21 : vector<16x128xf32> to vector<16x128xbf16>
    %cst_14 = arith.constant dense<0.000000e+00> : vector<16x16xf32>
    %23 = tpu.matmul %22, %20, %cst_14 {dimension_numbers = #tpu.dot_dimension_numbers<[1], [0], [0], [1], [0, 0, 1, 1], [], []>} : vector<16x128xbf16>, vector<128x16xbf16>, vector<16x16xf32> -> vector<16x16xf32>
    %c0_15 = arith.constant 0 : index
    %c0_16 = arith.constant 0 : index
    %c0_17 = arith.constant 0 : index
    %24 = vector.load %arg4[%c0_15, %c0_16, %c0_17] : memref<2x1x16xf32, #tpu.memory_space<vmem>>, vector<1x1x16xf32>
    %25 = vector.shape_cast %24 : vector<1x1x16xf32> to vector<1x16xf32>
    %26 = vector.extract_strided_slice %23 {offsets = [0, 0], sizes = [8, 16], strides = [1, 1]} : vector<16x16xf32> to vector<8x16xf32>
    %27 = vector.extract_strided_slice %3 {offsets = [0, 0, 0], sizes = [1, 8, 8], strides = [1, 1, 1]} : vector<2x8x8xbf16> to vector<1x8x8xbf16>
    %28 = vector.shape_cast %27 : vector<1x8x8xbf16> to vector<8x8xbf16>
    %29 = arith.truncf %26 : vector<8x16xf32> to vector<8x16xbf16>
    %cst_18 = arith.constant dense<0.000000e+00> : vector<8x16xf32>
    %30 = tpu.matmul %28, %29, %cst_18 {dimension_numbers = #tpu.dot_dimension_numbers<[1], [0], [0], [1], [0, 0, 1, 1], [], []>} : vector<8x8xbf16>, vector<8x16xbf16>, vector<8x16xf32> -> vector<8x16xf32>
    %31 = arith.addf %30, %26 : vector<8x16xf32>
    %32 = vector.broadcast %25 : vector<1x16xf32> to vector<8x16xf32>
    %33 = arith.addf %31, %32 : vector<8x16xf32>
    %34 = vector.broadcast %10 : vector<8x1xf32> to vector<8x16xf32>
    %35 = arith.mulf %33, %34 : vector<8x16xf32>
    %cst_19 = arith.constant 0.000000e+00 : f32
    %36 = vector.broadcast %cst_19 : f32 to vector<8x16xf32>
    %37 = arith.maximumf %35, %36 : vector<8x16xf32>
    %c0_20 = arith.constant 0 : index
    %c128 = arith.constant 128 : index
    %38 = vector.load %arg8[%c0_20, %c128] : memref<16x160xf32, #tpu.memory_space<vmem>>, vector<8x16xf32>
    tpu.vector_store %arg8[%c0_20, %c128], %37 {strides = array<i32>} : memref<16x160xf32, #tpu.memory_space<vmem>>, vector<8x16xf32>,
    %39 = vector.extract_strided_slice %23 {offsets = [8, 0], sizes = [8, 16], strides = [1, 1]} : vector<16x16xf32> to vector<8x16xf32>
    %40 = vector.extract_strided_slice %3 {offsets = [1, 0, 0], sizes = [1, 8, 8], strides = [1, 1, 1]} : vector<2x8x8xbf16> to vector<1x8x8xbf16>
    %41 = vector.shape_cast %40 : vector<1x8x8xbf16> to vector<8x8xbf16>
    %42 = arith.truncf %39 : vector<8x16xf32> to vector<8x16xbf16>
    %cst_21 = arith.constant dense<0.000000e+00> : vector<8x16xf32>
    %43 = tpu.matmul %41, %42, %cst_21 {dimension_numbers = #tpu.dot_dimension_numbers<[1], [0], [0], [1], [0, 0, 1, 1], [], []>} : vector<8x8xbf16>, vector<8x16xbf16>, vector<8x16xf32> -> vector<8x16xf32>
    %44 = arith.addf %43, %39 : vector<8x16xf32>
    %45 = vector.broadcast %25 : vector<1x16xf32> to vector<8x16xf32>
    %46 = arith.addf %44, %45 : vector<8x16xf32>
    %47 = vector.broadcast %17 : vector<8x1xf32> to vector<8x16xf32>
    %48 = arith.mulf %46, %47 : vector<8x16xf32>
    %cst_22 = arith.constant 0.000000e+00 : f32
    %49 = vector.broadcast %cst_22 : f32 to vector<8x16xf32>
    %50 = arith.maximumf %48, %49 : vector<8x16xf32>
    %c8 = arith.constant 8 : index
    %c128_23 = arith.constant 128 : index
    %51 = vector.load %arg8[%c8, %c128_23] : memref<16x160xf32, #tpu.memory_space<vmem>>, vector<8x16xf32>
    tpu.vector_store %arg8[%c8, %c128_23], %50 {strides = array<i32>} : memref<16x160xf32, #tpu.memory_space<vmem>>, vector<8x16xf32>,
    %c1 = arith.constant 1 : index
    %c0_24 = arith.constant 0 : index
    %c0_25 = arith.constant 0 : index
    %52 = vector.load %arg3[%c1, %c0_24, %c0_25] : memref<2x160x16xbf16, #tpu.memory_space<vmem>>, vector<1x160x16xbf16>
    %53 = vector.shape_cast %52 : vector<1x160x16xbf16> to vector<160x16xbf16>
    %54 = vector.extract_strided_slice %53 {offsets = [0, 0], sizes = [144, 16], strides = [1, 1]} : vector<160x16xbf16> to vector<144x16xbf16>
    %c0_26 = arith.constant 0 : index
    %c0_27 = arith.constant 0 : index
    %55 = vector.load %arg8[%c0_26, %c0_27] : memref<16x160xf32, #tpu.memory_space<vmem>>, vector<16x144xf32>
    %56 = arith.truncf %55 : vector<16x144xf32> to vector<16x144xbf16>
    %cst_28 = arith.constant dense<0.000000e+00> : vector<16x16xf32>
    %57 = tpu.matmul %56, %54, %cst_28 {dimension_numbers = #tpu.dot_dimension_numbers<[1], [0], [0], [1], [0, 0, 1, 1], [], []>} : vector<16x144xbf16>, vector<144x16xbf16>, vector<16x16xf32> -> vector<16x16xf32>
    %c1_29 = arith.constant 1 : index
    %c0_30 = arith.constant 0 : index
    %c0_31 = arith.constant 0 : index
    %58 = vector.load %arg4[%c1_29, %c0_30, %c0_31] : memref<2x1x16xf32, #tpu.memory_space<vmem>>, vector<1x1x16xf32>
    %59 = vector.shape_cast %58 : vector<1x1x16xf32> to vector<1x16xf32>
    %60 = vector.extract_strided_slice %57 {offsets = [0, 0], sizes = [8, 16], strides = [1, 1]} : vector<16x16xf32> to vector<8x16xf32>
    %61 = vector.extract_strided_slice %3 {offsets = [0, 0, 0], sizes = [1, 8, 8], strides = [1, 1, 1]} : vector<2x8x8xbf16> to vector<1x8x8xbf16>
    %62 = vector.shape_cast %61 : vector<1x8x8xbf16> to vector<8x8xbf16>
    %63 = arith.truncf %60 : vector<8x16xf32> to vector<8x16xbf16>
    %cst_32 = arith.constant dense<0.000000e+00> : vector<8x16xf32>
    %64 = tpu.matmul %62, %63, %cst_32 {dimension_numbers = #tpu.dot_dimension_numbers<[1], [0], [0], [1], [0, 0, 1, 1], [], []>} : vector<8x8xbf16>, vector<8x16xbf16>, vector<8x16xf32> -> vector<8x16xf32>
    %65 = arith.addf %64, %60 : vector<8x16xf32>
    %66 = vector.broadcast %59 : vector<1x16xf32> to vector<8x16xf32>
    %67 = arith.addf %65, %66 : vector<8x16xf32>
    %68 = vector.broadcast %10 : vector<8x1xf32> to vector<8x16xf32>
    %69 = arith.mulf %67, %68 : vector<8x16xf32>
    %cst_33 = arith.constant 0.000000e+00 : f32
    %70 = vector.broadcast %cst_33 : f32 to vector<8x16xf32>
    %71 = arith.maximumf %69, %70 : vector<8x16xf32>
    %c0_34 = arith.constant 0 : index
    %c144 = arith.constant 144 : index
    %72 = vector.load %arg8[%c0_34, %c144] : memref<16x160xf32, #tpu.memory_space<vmem>>, vector<8x16xf32>
    tpu.vector_store %arg8[%c0_34, %c144], %71 {strides = array<i32>} : memref<16x160xf32, #tpu.memory_space<vmem>>, vector<8x16xf32>,
    %73 = vector.extract_strided_slice %57 {offsets = [8, 0], sizes = [8, 16], strides = [1, 1]} : vector<16x16xf32> to vector<8x16xf32>
    %74 = vector.extract_strided_slice %3 {offsets = [1, 0, 0], sizes = [1, 8, 8], strides = [1, 1, 1]} : vector<2x8x8xbf16> to vector<1x8x8xbf16>
    %75 = vector.shape_cast %74 : vector<1x8x8xbf16> to vector<8x8xbf16>
    %76 = arith.truncf %73 : vector<8x16xf32> to vector<8x16xbf16>
    %cst_35 = arith.constant dense<0.000000e+00> : vector<8x16xf32>
    %77 = tpu.matmul %75, %76, %cst_35 {dimension_numbers = #tpu.dot_dimension_numbers<[1], [0], [0], [1], [0, 0, 1, 1], [], []>} : vector<8x8xbf16>, vector<8x16xbf16>, vector<8x16xf32> -> vector<8x16xf32>
    %78 = arith.addf %77, %73 : vector<8x16xf32>
    %79 = vector.broadcast %59 : vector<1x16xf32> to vector<8x16xf32>
    %80 = arith.addf %78, %79 : vector<8x16xf32>
    %81 = vector.broadcast %17 : vector<8x1xf32> to vector<8x16xf32>
    %82 = arith.mulf %80, %81 : vector<8x16xf32>
    %cst_36 = arith.constant 0.000000e+00 : f32
    %83 = vector.broadcast %cst_36 : f32 to vector<8x16xf32>
    %84 = arith.maximumf %82, %83 : vector<8x16xf32>
    %c8_37 = arith.constant 8 : index
    %c144_38 = arith.constant 144 : index
    %85 = vector.load %arg8[%c8_37, %c144_38] : memref<16x160xf32, #tpu.memory_space<vmem>>, vector<8x16xf32>
    tpu.vector_store %arg8[%c8_37, %c144_38], %84 {strides = array<i32>} : memref<16x160xf32, #tpu.memory_space<vmem>>, vector<8x16xf32>,
    %c0_39 = arith.constant 0 : index
    %c0_40 = arith.constant 0 : index
    %86 = vector.load %arg8[%c0_39, %c0_40] : memref<16x160xf32, #tpu.memory_space<vmem>>, vector<16x160xf32>
    %87 = arith.truncf %86 : vector<16x160xf32> to vector<16x160xbf16>
    %c0_41 = arith.constant 0 : index
    %c0_42 = arith.constant 0 : index
    %88 = vector.load %arg5[%c0_41, %c0_42] : memref<160x128xbf16, #tpu.memory_space<vmem>>, vector<160x128xbf16>
    %cst_43 = arith.constant dense<0.000000e+00> : vector<16x128xf32>
    %89 = tpu.matmul %87, %88, %cst_43 {dimension_numbers = #tpu.dot_dimension_numbers<[1], [0], [0], [1], [0, 0, 1, 1], [], []>} : vector<16x160xbf16>, vector<160x128xbf16>, vector<16x128xf32> -> vector<16x128xf32>
    %c0_44 = arith.constant 0 : index
    %c0_45 = arith.constant 0 : index
    %90 = vector.load %arg6[%c0_44, %c0_45] : memref<1x128xf32, #tpu.memory_space<vmem>>, vector<1x128xf32>
    %91 = vector.broadcast %90 : vector<1x128xf32> to vector<16x128xf32>
    %92 = arith.addf %89, %91 : vector<16x128xf32>
    %c0_46 = arith.constant 0 : index
    %c0_47 = arith.constant 0 : index
    %93 = vector.load %arg7[%c0_46, %c0_47] : memref<16x128xf32, #tpu.memory_space<vmem>>, vector<16x128xf32>
    tpu.vector_store %arg7[%c0_46, %c0_47], %92 {strides = array<i32>} : memref<16x128xf32, #tpu.memory_space<vmem>>, vector<16x128xf32>,
    return
  }
  func.func @transform_0(%arg0: i32) -> (i32, i32, i32) {
    %c0_i32 = arith.constant 0 : i32
    %c0_i32_0 = arith.constant 0 : i32
    %c0_i32_1 = arith.constant 0 : i32
    return %arg0, %c0_i32, %c0_i32_0 : i32, i32, i32
  }
  func.func @transform_1(%arg0: i32) -> (i32, i32) {
    %c0_i32 = arith.constant 0 : i32
    %c0_i32_0 = arith.constant 0 : i32
    return %arg0, %c0_i32 : i32, i32
  }
  func.func @transform_2(%arg0: i32) -> (i32, i32, i32) {
    %c0_i32 = arith.constant 0 : i32
    %c0_i32_0 = arith.constant 0 : i32
    %c0_i32_1 = arith.constant 0 : i32
    %c0_i32_2 = arith.constant 0 : i32
    return %c0_i32, %c0_i32_0, %c0_i32_1 : i32, i32, i32
  }
  func.func @transform_3(%arg0: i32) -> (i32, i32, i32) {
    %c0_i32 = arith.constant 0 : i32
    %c0_i32_0 = arith.constant 0 : i32
    %c0_i32_1 = arith.constant 0 : i32
    %c0_i32_2 = arith.constant 0 : i32
    return %c0_i32, %c0_i32_0, %c0_i32_1 : i32, i32, i32
  }
  func.func @transform_4(%arg0: i32) -> (i32, i32) {
    %c0_i32 = arith.constant 0 : i32
    %c0_i32_0 = arith.constant 0 : i32
    %c0_i32_1 = arith.constant 0 : i32
    return %c0_i32, %c0_i32_0 : i32, i32
  }
  func.func @transform_5(%arg0: i32) -> (i32, i32) {
    %c0_i32 = arith.constant 0 : i32
    %c0_i32_0 = arith.constant 0 : i32
    %c0_i32_1 = arith.constant 0 : i32
    return %c0_i32, %c0_i32_0 : i32, i32
  }
  func.func @transform_6(%arg0: i32) -> (i32, i32) {
    %c0_i32 = arith.constant 0 : i32
    %c0_i32_0 = arith.constant 0 : i32
    return %arg0, %c0_i32 : i32, i32
  }
}

module attributes {stable_mosaic.version = 11 : i64} {
  func.func @_dense_gcn_block_kernel(%arg0: i32, %arg1: memref<2x8x8xf32, #tpu.memory_space<vmem>>, %arg2: memref<16x128xf32, #tpu.memory_space<vmem>>, %arg3: memref<4x160x8xbf16, #tpu.memory_space<vmem>>, %arg4: memref<4x1x8xf32, #tpu.memory_space<vmem>>, %arg5: memref<160x128xbf16, #tpu.memory_space<vmem>>, %arg6: memref<1x128xf32, #tpu.memory_space<vmem>>, %arg7: memref<16x128xf32, #tpu.memory_space<vmem>>, %arg8: memref<16x160xf32, #tpu.memory_space<vmem>>) attributes {dimension_semantics = [#tpu.dimension_semantics<parallel>], iteration_bounds = array<i64: 1>, scalar_prefetch = 0 : i64, scratch_operands = 1 : i64, tpu.core_type = #tpu.core_type<tc>, window_params = [{transform_indices = @transform_0, window_bounds = array<i64: 2, 8, 8>}, {transform_indices = @transform_1, window_bounds = array<i64: 16, 128>}, {pipeline_mode = #tpu.pipeline_mode<synchronous>, transform_indices = @transform_2, window_bounds = array<i64: 4, 160, 8>}, {pipeline_mode = #tpu.pipeline_mode<synchronous>, transform_indices = @transform_3, window_bounds = array<i64: 4, 1, 8>}, {pipeline_mode = #tpu.pipeline_mode<synchronous>, transform_indices = @transform_4, window_bounds = array<i64: 160, 128>}, {pipeline_mode = #tpu.pipeline_mode<synchronous>, transform_indices = @transform_5, window_bounds = array<i64: 1, 128>}, {transform_indices = @transform_6, window_bounds = array<i64: 16, 128>}]} {
    %c0 = arith.constant 0 : index
    %c0_0 = arith.constant 0 : index
    %0 = vector.load %arg2[%c0, %c0_0] : memref<16x128xf32, #tpu.memory_space<vmem>>, vector<16x128xf32>
    %c0_1 = arith.constant 0 : index
    %c0_2 = arith.constant 0 : index
    %1 = vector.load %arg8[%c0_1, %c0_2] : memref<16x160xf32, #tpu.memory_space<vmem>>, vector<16x128xf32>
    tpu.vector_store %arg8[%c0_1, %c0_2], %0 {strides = array<i32>} : memref<16x160xf32, #tpu.memory_space<vmem>>, vector<16x128xf32>,
    %c0_3 = arith.constant 0 : index
    %c0_4 = arith.constant 0 : index
    %c0_5 = arith.constant 0 : index
    %2 = vector.load %arg1[%c0_3, %c0_4, %c0_5] : memref<2x8x8xf32, #tpu.memory_space<vmem>>, vector<2x8x8xf32>
    %3 = arith.truncf %2 : vector<2x8x8xf32> to vector<2x8x8xbf16>
    %4 = vector.extract_strided_slice %2 {offsets = [0, 0, 0], sizes = [1, 8, 8], strides = [1, 1, 1]} : vector<2x8x8xf32> to vector<1x8x8xf32>
    %5 = vector.shape_cast %4 : vector<1x8x8xf32> to vector<8x8xf32>
    %cst = arith.constant dense<0.000000e+00> : vector<8xf32>
    %6 = vector.multi_reduction <add>, %5, %cst [1] : vector<8x8xf32> to vector<8xf32>
    %7 = vector.shape_cast %6 : vector<8xf32> to vector<8x1xf32>
    %cst_6 = arith.constant 1.000000e+00 : f32
    %8 = vector.broadcast %cst_6 : f32 to vector<8x1xf32>
    %9 = arith.addf %7, %8 : vector<8x1xf32>
    %10 = tpu.reciprocal %9 {approx = true} : vector<8x1xf32> -> vector<8x1xf32>
    %11 = vector.extract_strided_slice %2 {offsets = [1, 0, 0], sizes = [1, 8, 8], strides = [1, 1, 1]} : vector<2x8x8xf32> to vector<1x8x8xf32>
    %12 = vector.shape_cast %11 : vector<1x8x8xf32> to vector<8x8xf32>
    %cst_7 = arith.constant dense<0.000000e+00> : vector<8xf32>
    %13 = vector.multi_reduction <add>, %12, %cst_7 [1] : vector<8x8xf32> to vector<8xf32>
    %14 = vector.shape_cast %13 : vector<8xf32> to vector<8x1xf32>
    %cst_8 = arith.constant 1.000000e+00 : f32
    %15 = vector.broadcast %cst_8 : f32 to vector<8x1xf32>
    %16 = arith.addf %14, %15 : vector<8x1xf32>
    %17 = tpu.reciprocal %16 {approx = true} : vector<8x1xf32> -> vector<8x1xf32>
    %c0_9 = arith.constant 0 : index
    %c0_10 = arith.constant 0 : index
    %c0_11 = arith.constant 0 : index
    %18 = vector.load %arg3[%c0_9, %c0_10, %c0_11] : memref<4x160x8xbf16, #tpu.memory_space<vmem>>, vector<1x160x8xbf16>
    %19 = vector.shape_cast %18 : vector<1x160x8xbf16> to vector<160x8xbf16>
    %20 = vector.extract_strided_slice %19 {offsets = [0, 0], sizes = [128, 8], strides = [1, 1]} : vector<160x8xbf16> to vector<128x8xbf16>
    %c0_12 = arith.constant 0 : index
    %c0_13 = arith.constant 0 : index
    %21 = vector.load %arg8[%c0_12, %c0_13] : memref<16x160xf32, #tpu.memory_space<vmem>>, vector<16x128xf32>
    %22 = arith.truncf %21 : vector<16x128xf32> to vector<16x128xbf16>
    %cst_14 = arith.constant dense<0.000000e+00> : vector<16x8xf32>
    %23 = tpu.matmul %22, %20, %cst_14 {dimension_numbers = #tpu.dot_dimension_numbers<[1], [0], [0], [1], [0, 0, 1, 1], [], []>} : vector<16x128xbf16>, vector<128x8xbf16>, vector<16x8xf32> -> vector<16x8xf32>
    %c0_15 = arith.constant 0 : index
    %c0_16 = arith.constant 0 : index
    %c0_17 = arith.constant 0 : index
    %24 = vector.load %arg4[%c0_15, %c0_16, %c0_17] : memref<4x1x8xf32, #tpu.memory_space<vmem>>, vector<1x1x8xf32>
    %25 = vector.shape_cast %24 : vector<1x1x8xf32> to vector<1x8xf32>
    %26 = vector.extract_strided_slice %23 {offsets = [0, 0], sizes = [8, 8], strides = [1, 1]} : vector<16x8xf32> to vector<8x8xf32>
    %27 = vector.extract_strided_slice %3 {offsets = [0, 0, 0], sizes = [1, 8, 8], strides = [1, 1, 1]} : vector<2x8x8xbf16> to vector<1x8x8xbf16>
    %28 = vector.shape_cast %27 : vector<1x8x8xbf16> to vector<8x8xbf16>
    %29 = arith.truncf %26 : vector<8x8xf32> to vector<8x8xbf16>
    %cst_18 = arith.constant dense<0.000000e+00> : vector<8x8xf32>
    %30 = tpu.matmul %28, %29, %cst_18 {dimension_numbers = #tpu.dot_dimension_numbers<[1], [0], [0], [1], [0, 0, 1, 1], [], []>} : vector<8x8xbf16>, vector<8x8xbf16>, vector<8x8xf32> -> vector<8x8xf32>
    %31 = arith.addf %30, %26 : vector<8x8xf32>
    %32 = vector.broadcast %25 : vector<1x8xf32> to vector<8x8xf32>
    %33 = arith.addf %31, %32 : vector<8x8xf32>
    %34 = vector.broadcast %10 : vector<8x1xf32> to vector<8x8xf32>
    %35 = arith.mulf %33, %34 : vector<8x8xf32>
    %cst_19 = arith.constant 0.000000e+00 : f32
    %36 = vector.broadcast %cst_19 : f32 to vector<8x8xf32>
    %37 = arith.maximumf %35, %36 : vector<8x8xf32>
    %c0_20 = arith.constant 0 : index
    %c128 = arith.constant 128 : index
    %38 = vector.load %arg8[%c0_20, %c128] : memref<16x160xf32, #tpu.memory_space<vmem>>, vector<8x8xf32>
    tpu.vector_store %arg8[%c0_20, %c128], %37 {strides = array<i32>} : memref<16x160xf32, #tpu.memory_space<vmem>>, vector<8x8xf32>,
    %39 = vector.extract_strided_slice %23 {offsets = [8, 0], sizes = [8, 8], strides = [1, 1]} : vector<16x8xf32> to vector<8x8xf32>
    %40 = vector.extract_strided_slice %3 {offsets = [1, 0, 0], sizes = [1, 8, 8], strides = [1, 1, 1]} : vector<2x8x8xbf16> to vector<1x8x8xbf16>
    %41 = vector.shape_cast %40 : vector<1x8x8xbf16> to vector<8x8xbf16>
    %42 = arith.truncf %39 : vector<8x8xf32> to vector<8x8xbf16>
    %cst_21 = arith.constant dense<0.000000e+00> : vector<8x8xf32>
    %43 = tpu.matmul %41, %42, %cst_21 {dimension_numbers = #tpu.dot_dimension_numbers<[1], [0], [0], [1], [0, 0, 1, 1], [], []>} : vector<8x8xbf16>, vector<8x8xbf16>, vector<8x8xf32> -> vector<8x8xf32>
    %44 = arith.addf %43, %39 : vector<8x8xf32>
    %45 = vector.broadcast %25 : vector<1x8xf32> to vector<8x8xf32>
    %46 = arith.addf %44, %45 : vector<8x8xf32>
    %47 = vector.broadcast %17 : vector<8x1xf32> to vector<8x8xf32>
    %48 = arith.mulf %46, %47 : vector<8x8xf32>
    %cst_22 = arith.constant 0.000000e+00 : f32
    %49 = vector.broadcast %cst_22 : f32 to vector<8x8xf32>
    %50 = arith.maximumf %48, %49 : vector<8x8xf32>
    %c8 = arith.constant 8 : index
    %c128_23 = arith.constant 128 : index
    %51 = vector.load %arg8[%c8, %c128_23] : memref<16x160xf32, #tpu.memory_space<vmem>>, vector<8x8xf32>
    tpu.vector_store %arg8[%c8, %c128_23], %50 {strides = array<i32>} : memref<16x160xf32, #tpu.memory_space<vmem>>, vector<8x8xf32>,
    %c1 = arith.constant 1 : index
    %c0_24 = arith.constant 0 : index
    %c0_25 = arith.constant 0 : index
    %52 = vector.load %arg3[%c1, %c0_24, %c0_25] : memref<4x160x8xbf16, #tpu.memory_space<vmem>>, vector<1x160x8xbf16>
    %53 = vector.shape_cast %52 : vector<1x160x8xbf16> to vector<160x8xbf16>
    %54 = vector.extract_strided_slice %53 {offsets = [0, 0], sizes = [136, 8], strides = [1, 1]} : vector<160x8xbf16> to vector<136x8xbf16>
    %c0_26 = arith.constant 0 : index
    %c0_27 = arith.constant 0 : index
    %55 = vector.load %arg8[%c0_26, %c0_27] : memref<16x160xf32, #tpu.memory_space<vmem>>, vector<16x136xf32>
    %56 = arith.truncf %55 : vector<16x136xf32> to vector<16x136xbf16>
    %cst_28 = arith.constant dense<0.000000e+00> : vector<16x8xf32>
    %57 = tpu.matmul %56, %54, %cst_28 {dimension_numbers = #tpu.dot_dimension_numbers<[1], [0], [0], [1], [0, 0, 1, 1], [], []>} : vector<16x136xbf16>, vector<136x8xbf16>, vector<16x8xf32> -> vector<16x8xf32>
    %c1_29 = arith.constant 1 : index
    %c0_30 = arith.constant 0 : index
    %c0_31 = arith.constant 0 : index
    %58 = vector.load %arg4[%c1_29, %c0_30, %c0_31] : memref<4x1x8xf32, #tpu.memory_space<vmem>>, vector<1x1x8xf32>
    %59 = vector.shape_cast %58 : vector<1x1x8xf32> to vector<1x8xf32>
    %60 = vector.extract_strided_slice %57 {offsets = [0, 0], sizes = [8, 8], strides = [1, 1]} : vector<16x8xf32> to vector<8x8xf32>
    %61 = vector.extract_strided_slice %3 {offsets = [0, 0, 0], sizes = [1, 8, 8], strides = [1, 1, 1]} : vector<2x8x8xbf16> to vector<1x8x8xbf16>
    %62 = vector.shape_cast %61 : vector<1x8x8xbf16> to vector<8x8xbf16>
    %63 = arith.truncf %60 : vector<8x8xf32> to vector<8x8xbf16>
    %cst_32 = arith.constant dense<0.000000e+00> : vector<8x8xf32>
    %64 = tpu.matmul %62, %63, %cst_32 {dimension_numbers = #tpu.dot_dimension_numbers<[1], [0], [0], [1], [0, 0, 1, 1], [], []>} : vector<8x8xbf16>, vector<8x8xbf16>, vector<8x8xf32> -> vector<8x8xf32>
    %65 = arith.addf %64, %60 : vector<8x8xf32>
    %66 = vector.broadcast %59 : vector<1x8xf32> to vector<8x8xf32>
    %67 = arith.addf %65, %66 : vector<8x8xf32>
    %68 = vector.broadcast %10 : vector<8x1xf32> to vector<8x8xf32>
    %69 = arith.mulf %67, %68 : vector<8x8xf32>
    %cst_33 = arith.constant 0.000000e+00 : f32
    %70 = vector.broadcast %cst_33 : f32 to vector<8x8xf32>
    %71 = arith.maximumf %69, %70 : vector<8x8xf32>
    %c0_34 = arith.constant 0 : index
    %c136 = arith.constant 136 : index
    %72 = vector.load %arg8[%c0_34, %c136] : memref<16x160xf32, #tpu.memory_space<vmem>>, vector<8x8xf32>
    tpu.vector_store %arg8[%c0_34, %c136], %71 {strides = array<i32>} : memref<16x160xf32, #tpu.memory_space<vmem>>, vector<8x8xf32>,
    %73 = vector.extract_strided_slice %57 {offsets = [8, 0], sizes = [8, 8], strides = [1, 1]} : vector<16x8xf32> to vector<8x8xf32>
    %74 = vector.extract_strided_slice %3 {offsets = [1, 0, 0], sizes = [1, 8, 8], strides = [1, 1, 1]} : vector<2x8x8xbf16> to vector<1x8x8xbf16>
    %75 = vector.shape_cast %74 : vector<1x8x8xbf16> to vector<8x8xbf16>
    %76 = arith.truncf %73 : vector<8x8xf32> to vector<8x8xbf16>
    %cst_35 = arith.constant dense<0.000000e+00> : vector<8x8xf32>
    %77 = tpu.matmul %75, %76, %cst_35 {dimension_numbers = #tpu.dot_dimension_numbers<[1], [0], [0], [1], [0, 0, 1, 1], [], []>} : vector<8x8xbf16>, vector<8x8xbf16>, vector<8x8xf32> -> vector<8x8xf32>
    %78 = arith.addf %77, %73 : vector<8x8xf32>
    %79 = vector.broadcast %59 : vector<1x8xf32> to vector<8x8xf32>
    %80 = arith.addf %78, %79 : vector<8x8xf32>
    %81 = vector.broadcast %17 : vector<8x1xf32> to vector<8x8xf32>
    %82 = arith.mulf %80, %81 : vector<8x8xf32>
    %cst_36 = arith.constant 0.000000e+00 : f32
    %83 = vector.broadcast %cst_36 : f32 to vector<8x8xf32>
    %84 = arith.maximumf %82, %83 : vector<8x8xf32>
    %c8_37 = arith.constant 8 : index
    %c136_38 = arith.constant 136 : index
    %85 = vector.load %arg8[%c8_37, %c136_38] : memref<16x160xf32, #tpu.memory_space<vmem>>, vector<8x8xf32>
    tpu.vector_store %arg8[%c8_37, %c136_38], %84 {strides = array<i32>} : memref<16x160xf32, #tpu.memory_space<vmem>>, vector<8x8xf32>,
    %c2 = arith.constant 2 : index
    %c0_39 = arith.constant 0 : index
    %c0_40 = arith.constant 0 : index
    %86 = vector.load %arg3[%c2, %c0_39, %c0_40] : memref<4x160x8xbf16, #tpu.memory_space<vmem>>, vector<1x160x8xbf16>
    %87 = vector.shape_cast %86 : vector<1x160x8xbf16> to vector<160x8xbf16>
    %88 = vector.extract_strided_slice %87 {offsets = [0, 0], sizes = [144, 8], strides = [1, 1]} : vector<160x8xbf16> to vector<144x8xbf16>
    %c0_41 = arith.constant 0 : index
    %c0_42 = arith.constant 0 : index
    %89 = vector.load %arg8[%c0_41, %c0_42] : memref<16x160xf32, #tpu.memory_space<vmem>>, vector<16x144xf32>
    %90 = arith.truncf %89 : vector<16x144xf32> to vector<16x144xbf16>
    %cst_43 = arith.constant dense<0.000000e+00> : vector<16x8xf32>
    %91 = tpu.matmul %90, %88, %cst_43 {dimension_numbers = #tpu.dot_dimension_numbers<[1], [0], [0], [1], [0, 0, 1, 1], [], []>} : vector<16x144xbf16>, vector<144x8xbf16>, vector<16x8xf32> -> vector<16x8xf32>
    %c2_44 = arith.constant 2 : index
    %c0_45 = arith.constant 0 : index
    %c0_46 = arith.constant 0 : index
    %92 = vector.load %arg4[%c2_44, %c0_45, %c0_46] : memref<4x1x8xf32, #tpu.memory_space<vmem>>, vector<1x1x8xf32>
    %93 = vector.shape_cast %92 : vector<1x1x8xf32> to vector<1x8xf32>
    %94 = vector.extract_strided_slice %91 {offsets = [0, 0], sizes = [8, 8], strides = [1, 1]} : vector<16x8xf32> to vector<8x8xf32>
    %95 = vector.extract_strided_slice %3 {offsets = [0, 0, 0], sizes = [1, 8, 8], strides = [1, 1, 1]} : vector<2x8x8xbf16> to vector<1x8x8xbf16>
    %96 = vector.shape_cast %95 : vector<1x8x8xbf16> to vector<8x8xbf16>
    %97 = arith.truncf %94 : vector<8x8xf32> to vector<8x8xbf16>
    %cst_47 = arith.constant dense<0.000000e+00> : vector<8x8xf32>
    %98 = tpu.matmul %96, %97, %cst_47 {dimension_numbers = #tpu.dot_dimension_numbers<[1], [0], [0], [1], [0, 0, 1, 1], [], []>} : vector<8x8xbf16>, vector<8x8xbf16>, vector<8x8xf32> -> vector<8x8xf32>
    %99 = arith.addf %98, %94 : vector<8x8xf32>
    %100 = vector.broadcast %93 : vector<1x8xf32> to vector<8x8xf32>
    %101 = arith.addf %99, %100 : vector<8x8xf32>
    %102 = vector.broadcast %10 : vector<8x1xf32> to vector<8x8xf32>
    %103 = arith.mulf %101, %102 : vector<8x8xf32>
    %cst_48 = arith.constant 0.000000e+00 : f32
    %104 = vector.broadcast %cst_48 : f32 to vector<8x8xf32>
    %105 = arith.maximumf %103, %104 : vector<8x8xf32>
    %c0_49 = arith.constant 0 : index
    %c144 = arith.constant 144 : index
    %106 = vector.load %arg8[%c0_49, %c144] : memref<16x160xf32, #tpu.memory_space<vmem>>, vector<8x8xf32>
    tpu.vector_store %arg8[%c0_49, %c144], %105 {strides = array<i32>} : memref<16x160xf32, #tpu.memory_space<vmem>>, vector<8x8xf32>,
    %107 = vector.extract_strided_slice %91 {offsets = [8, 0], sizes = [8, 8], strides = [1, 1]} : vector<16x8xf32> to vector<8x8xf32>
    %108 = vector.extract_strided_slice %3 {offsets = [1, 0, 0], sizes = [1, 8, 8], strides = [1, 1, 1]} : vector<2x8x8xbf16> to vector<1x8x8xbf16>
    %109 = vector.shape_cast %108 : vector<1x8x8xbf16> to vector<8x8xbf16>
    %110 = arith.truncf %107 : vector<8x8xf32> to vector<8x8xbf16>
    %cst_50 = arith.constant dense<0.000000e+00> : vector<8x8xf32>
    %111 = tpu.matmul %109, %110, %cst_50 {dimension_numbers = #tpu.dot_dimension_numbers<[1], [0], [0], [1], [0, 0, 1, 1], [], []>} : vector<8x8xbf16>, vector<8x8xbf16>, vector<8x8xf32> -> vector<8x8xf32>
    %112 = arith.addf %111, %107 : vector<8x8xf32>
    %113 = vector.broadcast %93 : vector<1x8xf32> to vector<8x8xf32>
    %114 = arith.addf %112, %113 : vector<8x8xf32>
    %115 = vector.broadcast %17 : vector<8x1xf32> to vector<8x8xf32>
    %116 = arith.mulf %114, %115 : vector<8x8xf32>
    %cst_51 = arith.constant 0.000000e+00 : f32
    %117 = vector.broadcast %cst_51 : f32 to vector<8x8xf32>
    %118 = arith.maximumf %116, %117 : vector<8x8xf32>
    %c8_52 = arith.constant 8 : index
    %c144_53 = arith.constant 144 : index
    %119 = vector.load %arg8[%c8_52, %c144_53] : memref<16x160xf32, #tpu.memory_space<vmem>>, vector<8x8xf32>
    tpu.vector_store %arg8[%c8_52, %c144_53], %118 {strides = array<i32>} : memref<16x160xf32, #tpu.memory_space<vmem>>, vector<8x8xf32>,
    %c3 = arith.constant 3 : index
    %c0_54 = arith.constant 0 : index
    %c0_55 = arith.constant 0 : index
    %120 = vector.load %arg3[%c3, %c0_54, %c0_55] : memref<4x160x8xbf16, #tpu.memory_space<vmem>>, vector<1x160x8xbf16>
    %121 = vector.shape_cast %120 : vector<1x160x8xbf16> to vector<160x8xbf16>
    %122 = vector.extract_strided_slice %121 {offsets = [0, 0], sizes = [152, 8], strides = [1, 1]} : vector<160x8xbf16> to vector<152x8xbf16>
    %c0_56 = arith.constant 0 : index
    %c0_57 = arith.constant 0 : index
    %123 = vector.load %arg8[%c0_56, %c0_57] : memref<16x160xf32, #tpu.memory_space<vmem>>, vector<16x152xf32>
    %124 = arith.truncf %123 : vector<16x152xf32> to vector<16x152xbf16>
    %cst_58 = arith.constant dense<0.000000e+00> : vector<16x8xf32>
    %125 = tpu.matmul %124, %122, %cst_58 {dimension_numbers = #tpu.dot_dimension_numbers<[1], [0], [0], [1], [0, 0, 1, 1], [], []>} : vector<16x152xbf16>, vector<152x8xbf16>, vector<16x8xf32> -> vector<16x8xf32>
    %c3_59 = arith.constant 3 : index
    %c0_60 = arith.constant 0 : index
    %c0_61 = arith.constant 0 : index
    %126 = vector.load %arg4[%c3_59, %c0_60, %c0_61] : memref<4x1x8xf32, #tpu.memory_space<vmem>>, vector<1x1x8xf32>
    %127 = vector.shape_cast %126 : vector<1x1x8xf32> to vector<1x8xf32>
    %128 = vector.extract_strided_slice %125 {offsets = [0, 0], sizes = [8, 8], strides = [1, 1]} : vector<16x8xf32> to vector<8x8xf32>
    %129 = vector.extract_strided_slice %3 {offsets = [0, 0, 0], sizes = [1, 8, 8], strides = [1, 1, 1]} : vector<2x8x8xbf16> to vector<1x8x8xbf16>
    %130 = vector.shape_cast %129 : vector<1x8x8xbf16> to vector<8x8xbf16>
    %131 = arith.truncf %128 : vector<8x8xf32> to vector<8x8xbf16>
    %cst_62 = arith.constant dense<0.000000e+00> : vector<8x8xf32>
    %132 = tpu.matmul %130, %131, %cst_62 {dimension_numbers = #tpu.dot_dimension_numbers<[1], [0], [0], [1], [0, 0, 1, 1], [], []>} : vector<8x8xbf16>, vector<8x8xbf16>, vector<8x8xf32> -> vector<8x8xf32>
    %133 = arith.addf %132, %128 : vector<8x8xf32>
    %134 = vector.broadcast %127 : vector<1x8xf32> to vector<8x8xf32>
    %135 = arith.addf %133, %134 : vector<8x8xf32>
    %136 = vector.broadcast %10 : vector<8x1xf32> to vector<8x8xf32>
    %137 = arith.mulf %135, %136 : vector<8x8xf32>
    %cst_63 = arith.constant 0.000000e+00 : f32
    %138 = vector.broadcast %cst_63 : f32 to vector<8x8xf32>
    %139 = arith.maximumf %137, %138 : vector<8x8xf32>
    %c0_64 = arith.constant 0 : index
    %c152 = arith.constant 152 : index
    %140 = vector.load %arg8[%c0_64, %c152] : memref<16x160xf32, #tpu.memory_space<vmem>>, vector<8x8xf32>
    tpu.vector_store %arg8[%c0_64, %c152], %139 {strides = array<i32>} : memref<16x160xf32, #tpu.memory_space<vmem>>, vector<8x8xf32>,
    %141 = vector.extract_strided_slice %125 {offsets = [8, 0], sizes = [8, 8], strides = [1, 1]} : vector<16x8xf32> to vector<8x8xf32>
    %142 = vector.extract_strided_slice %3 {offsets = [1, 0, 0], sizes = [1, 8, 8], strides = [1, 1, 1]} : vector<2x8x8xbf16> to vector<1x8x8xbf16>
    %143 = vector.shape_cast %142 : vector<1x8x8xbf16> to vector<8x8xbf16>
    %144 = arith.truncf %141 : vector<8x8xf32> to vector<8x8xbf16>
    %cst_65 = arith.constant dense<0.000000e+00> : vector<8x8xf32>
    %145 = tpu.matmul %143, %144, %cst_65 {dimension_numbers = #tpu.dot_dimension_numbers<[1], [0], [0], [1], [0, 0, 1, 1], [], []>} : vector<8x8xbf16>, vector<8x8xbf16>, vector<8x8xf32> -> vector<8x8xf32>
    %146 = arith.addf %145, %141 : vector<8x8xf32>
    %147 = vector.broadcast %127 : vector<1x8xf32> to vector<8x8xf32>
    %148 = arith.addf %146, %147 : vector<8x8xf32>
    %149 = vector.broadcast %17 : vector<8x1xf32> to vector<8x8xf32>
    %150 = arith.mulf %148, %149 : vector<8x8xf32>
    %cst_66 = arith.constant 0.000000e+00 : f32
    %151 = vector.broadcast %cst_66 : f32 to vector<8x8xf32>
    %152 = arith.maximumf %150, %151 : vector<8x8xf32>
    %c8_67 = arith.constant 8 : index
    %c152_68 = arith.constant 152 : index
    %153 = vector.load %arg8[%c8_67, %c152_68] : memref<16x160xf32, #tpu.memory_space<vmem>>, vector<8x8xf32>
    tpu.vector_store %arg8[%c8_67, %c152_68], %152 {strides = array<i32>} : memref<16x160xf32, #tpu.memory_space<vmem>>, vector<8x8xf32>,
    %c0_69 = arith.constant 0 : index
    %c0_70 = arith.constant 0 : index
    %154 = vector.load %arg8[%c0_69, %c0_70] : memref<16x160xf32, #tpu.memory_space<vmem>>, vector<16x160xf32>
    %155 = arith.truncf %154 : vector<16x160xf32> to vector<16x160xbf16>
    %c0_71 = arith.constant 0 : index
    %c0_72 = arith.constant 0 : index
    %156 = vector.load %arg5[%c0_71, %c0_72] : memref<160x128xbf16, #tpu.memory_space<vmem>>, vector<160x128xbf16>
    %cst_73 = arith.constant dense<0.000000e+00> : vector<16x128xf32>
    %157 = tpu.matmul %155, %156, %cst_73 {dimension_numbers = #tpu.dot_dimension_numbers<[1], [0], [0], [1], [0, 0, 1, 1], [], []>} : vector<16x160xbf16>, vector<160x128xbf16>, vector<16x128xf32> -> vector<16x128xf32>
    %c0_74 = arith.constant 0 : index
    %c0_75 = arith.constant 0 : index
    %158 = vector.load %arg6[%c0_74, %c0_75] : memref<1x128xf32, #tpu.memory_space<vmem>>, vector<1x128xf32>
    %159 = vector.broadcast %158 : vector<1x128xf32> to vector<16x128xf32>
    %160 = arith.addf %157, %159 : vector<16x128xf32>
    %c0_76 = arith.constant 0 : index
    %c0_77 = arith.constant 0 : index
    %161 = vector.load %arg7[%c0_76, %c0_77] : memref<16x128xf32, #tpu.memory_space<vmem>>, vector<16x128xf32>
    tpu.vector_store %arg7[%c0_76, %c0_77], %160 {strides = array<i32>} : memref<16x128xf32, #tpu.memory_space<vmem>>, vector<16x128xf32>,
    return
  }
  func.func @transform_0(%arg0: i32) -> (i32, i32, i32) {
    %c0_i32 = arith.constant 0 : i32
    %c0_i32_0 = arith.constant 0 : i32
    %c0_i32_1 = arith.constant 0 : i32
    return %arg0, %c0_i32, %c0_i32_0 : i32, i32, i32
  }
  func.func @transform_1(%arg0: i32) -> (i32, i32) {
    %c0_i32 = arith.constant 0 : i32
    %c0_i32_0 = arith.constant 0 : i32
    return %arg0, %c0_i32 : i32, i32
  }
  func.func @transform_2(%arg0: i32) -> (i32, i32, i32) {
    %c0_i32 = arith.constant 0 : i32
    %c0_i32_0 = arith.constant 0 : i32
    %c0_i32_1 = arith.constant 0 : i32
    %c0_i32_2 = arith.constant 0 : i32
    return %c0_i32, %c0_i32_0, %c0_i32_1 : i32, i32, i32
  }
  func.func @transform_3(%arg0: i32) -> (i32, i32, i32) {
    %c0_i32 = arith.constant 0 : i32
    %c0_i32_0 = arith.constant 0 : i32
    %c0_i32_1 = arith.constant 0 : i32
    %c0_i32_2 = arith.constant 0 : i32
    return %c0_i32, %c0_i32_0, %c0_i32_1 : i32, i32, i32
  }
  func.func @transform_4(%arg0: i32) -> (i32, i32) {
    %c0_i32 = arith.constant 0 : i32
    %c0_i32_0 = arith.constant 0 : i32
    %c0_i32_1 = arith.constant 0 : i32
    return %c0_i32, %c0_i32_0 : i32, i32
  }
  func.func @transform_5(%arg0: i32) -> (i32, i32) {
    %c0_i32 = arith.constant 0 : i32
    %c0_i32_0 = arith.constant 0 : i32
    %c0_i32_1 = arith.constant 0 : i32
    return %c0_i32, %c0_i32_0 : i32, i32
  }
  func.func @transform_6(%arg0: i32) -> (i32, i32) {
    %c0_i32 = arith.constant 0 : i32
    %c0_i32_0 = arith.constant 0 : i32
    return %arg0, %c0_i32 : i32, i32
  }
}

module attributes {stable_mosaic.version = 11 : i64} {
  func.func @_multi_gcn_block_kernel(%arg0: i32, %arg1: memref<16x128xf32, #tpu.memory_space<vmem>>, %arg2: memref<2x1x8xf32, #tpu.memory_space<vmem>>, %arg3: memref<2x128x16xbf16, #tpu.memory_space<vmem>>, %arg4: memref<2x1x16xf32, #tpu.memory_space<vmem>>, %arg5: memref<2x128x16xbf16, #tpu.memory_space<vmem>>, %arg6: memref<2x1x16xf32, #tpu.memory_space<vmem>>, %arg7: memref<4x160x16xbf16, #tpu.memory_space<vmem>>, %arg8: memref<4x1x16xf32, #tpu.memory_space<vmem>>, %arg9: memref<2x160x128xbf16, #tpu.memory_space<vmem>>, %arg10: memref<1x128xf32, #tpu.memory_space<vmem>>, %arg11: memref<16x128xf32, #tpu.memory_space<vmem>>, %arg12: memref<16x160xf32, #tpu.memory_space<vmem>>, %arg13: memref<2x8x8xf32, #tpu.memory_space<vmem>>, %arg14: memref<16x128xf32, #tpu.memory_space<vmem>>) attributes {dimension_semantics = [#tpu.dimension_semantics<parallel>], iteration_bounds = array<i64: 1>, scalar_prefetch = 0 : i64, scratch_operands = 3 : i64, tpu.core_type = #tpu.core_type<tc>, window_params = [{transform_indices = @transform_0, window_bounds = array<i64: 16, 128>}, {transform_indices = @transform_1, window_bounds = array<i64: 2, 1, 8>}, {pipeline_mode = #tpu.pipeline_mode<synchronous>, transform_indices = @transform_2, window_bounds = array<i64: 2, 128, 16>}, {pipeline_mode = #tpu.pipeline_mode<synchronous>, transform_indices = @transform_3, window_bounds = array<i64: 2, 1, 16>}, {pipeline_mode = #tpu.pipeline_mode<synchronous>, transform_indices = @transform_4, window_bounds = array<i64: 2, 128, 16>}, {pipeline_mode = #tpu.pipeline_mode<synchronous>, transform_indices = @transform_5, window_bounds = array<i64: 2, 1, 16>}, {pipeline_mode = #tpu.pipeline_mode<synchronous>, transform_indices = @transform_6, window_bounds = array<i64: 4, 160, 16>}, {pipeline_mode = #tpu.pipeline_mode<synchronous>, transform_indices = @transform_7, window_bounds = array<i64: 4, 1, 16>}, {pipeline_mode = #tpu.pipeline_mode<synchronous>, transform_indices = @transform_8, window_bounds = array<i64: 2, 160, 128>}, {pipeline_mode = #tpu.pipeline_mode<synchronous>, transform_indices = @transform_9, window_bounds = array<i64: 1, 128>}, {transform_indices = @transform_10, window_bounds = array<i64: 16, 128>}]} {
    %c0 = arith.constant 0 : index
    %c0_0 = arith.constant 0 : index
    %0 = vector.load %arg1[%c0, %c0_0] : memref<16x128xf32, #tpu.memory_space<vmem>>, vector<16x128xf32>
    %1 = arith.truncf %0 : vector<16x128xf32> to vector<16x128xbf16>
    %c0_1 = arith.constant 0 : index
    %c0_2 = arith.constant 0 : index
    %2 = vector.load %arg12[%c0_1, %c0_2] : memref<16x160xf32, #tpu.memory_space<vmem>>, vector<16x128xf32>
    tpu.vector_store %arg12[%c0_1, %c0_2], %0 {strides = array<i32>} : memref<16x160xf32, #tpu.memory_space<vmem>>, vector<16x128xf32>,
    %c0_3 = arith.constant 0 : index
    %c0_4 = arith.constant 0 : index
    %c0_5 = arith.constant 0 : index
    %3 = vector.load %arg2[%c0_3, %c0_4, %c0_5] : memref<2x1x8xf32, #tpu.memory_space<vmem>>, vector<2x1x8xf32>
    %cst = arith.constant 0.000000e+00 : f32
    %4 = vector.broadcast %cst : f32 to vector<16x128xf32>
    %c0_6 = arith.constant 0 : index
    %c0_7 = arith.constant 0 : index
    %5 = vector.load %arg14[%c0_6, %c0_7] : memref<16x128xf32, #tpu.memory_space<vmem>>, vector<16x128xf32>
    tpu.vector_store %arg14[%c0_6, %c0_7], %4 {strides = array<i32>} : memref<16x128xf32, #tpu.memory_space<vmem>>, vector<16x128xf32>,
    %c0_8 = arith.constant 0 : index
    %c0_9 = arith.constant 0 : index
    %c0_10 = arith.constant 0 : index
    %6 = vector.load %arg3[%c0_8, %c0_9, %c0_10] : memref<2x128x16xbf16, #tpu.memory_space<vmem>>, vector<1x128x16xbf16>
    %7 = vector.shape_cast %6 : vector<1x128x16xbf16> to vector<128x16xbf16>
    %cst_11 = arith.constant dense<0.000000e+00> : vector<16x16xf32>
    %8 = tpu.matmul %1, %7, %cst_11 {dimension_numbers = #tpu.dot_dimension_numbers<[1], [0], [0], [1], [0, 0, 1, 1], [], []>} : vector<16x128xbf16>, vector<128x16xbf16>, vector<16x16xf32> -> vector<16x16xf32>
    %c0_12 = arith.constant 0 : index
    %c0_13 = arith.constant 0 : index
    %c0_14 = arith.constant 0 : index
    %9 = vector.load %arg4[%c0_12, %c0_13, %c0_14] : memref<2x1x16xf32, #tpu.memory_space<vmem>>, vector<1x1x16xf32>
    %10 = vector.shape_cast %9 : vector<1x1x16xf32> to vector<1x16xf32>
    %11 = vector.broadcast %10 : vector<1x16xf32> to vector<16x16xf32>
    %12 = arith.addf %8, %11 : vector<16x16xf32>
    %c0_15 = arith.constant 0 : index
    %c0_16 = arith.constant 0 : index
    %c0_17 = arith.constant 0 : index
    %13 = vector.load %arg5[%c0_15, %c0_16, %c0_17] : memref<2x128x16xbf16, #tpu.memory_space<vmem>>, vector<1x128x16xbf16>
    %14 = vector.shape_cast %13 : vector<1x128x16xbf16> to vector<128x16xbf16>
    %cst_18 = arith.constant dense<0.000000e+00> : vector<16x16xf32>
    %15 = tpu.matmul %1, %14, %cst_18 {dimension_numbers = #tpu.dot_dimension_numbers<[1], [0], [0], [1], [0, 0, 1, 1], [], []>} : vector<16x128xbf16>, vector<128x16xbf16>, vector<16x16xf32> -> vector<16x16xf32>
    %c0_19 = arith.constant 0 : index
    %c0_20 = arith.constant 0 : index
    %c0_21 = arith.constant 0 : index
    %16 = vector.load %arg6[%c0_19, %c0_20, %c0_21] : memref<2x1x16xf32, #tpu.memory_space<vmem>>, vector<1x1x16xf32>
    %17 = vector.shape_cast %16 : vector<1x1x16xf32> to vector<1x16xf32>
    %18 = vector.broadcast %17 : vector<1x16xf32> to vector<16x16xf32>
    %19 = arith.addf %15, %18 : vector<16x16xf32>
    %20 = arith.truncf %12 : vector<16x16xf32> to vector<16x16xbf16>
    %21 = arith.truncf %19 : vector<16x16xf32> to vector<16x16xbf16>
    %22 = vector.extract_strided_slice %20 {offsets = [0, 0], sizes = [8, 16], strides = [1, 1]} : vector<16x16xbf16> to vector<8x16xbf16>
    %23 = vector.extract_strided_slice %21 {offsets = [0, 0], sizes = [8, 16], strides = [1, 1]} : vector<16x16xbf16> to vector<8x16xbf16>
    %cst_22 = arith.constant dense<0.000000e+00> : vector<8x8xf32>
    %24 = tpu.matmul %22, %23, %cst_22 {dimension_numbers = #tpu.dot_dimension_numbers<[1], [1], [0], [0], [0, 0, 1, 0], [], []>} : vector<8x16xbf16>, vector<8x16xbf16>, vector<8x8xf32> -> vector<8x8xf32>
    %cst_23 = arith.constant 2.500000e-01 : f32
    %25 = vector.broadcast %cst_23 : f32 to vector<8x8xf32>
    %26 = arith.mulf %24, %25 : vector<8x8xf32>
    %27 = vector.extract_strided_slice %3 {offsets = [0, 0, 0], sizes = [1, 1, 8], strides = [1, 1, 1]} : vector<2x1x8xf32> to vector<1x1x8xf32>
    %28 = vector.shape_cast %27 : vector<1x1x8xf32> to vector<1x8xf32>
    %cst_24 = arith.constant 0.000000e+00 : f32
    %29 = vector.broadcast %cst_24 : f32 to vector<1x8xf32>
    %30 = arith.cmpf one, %28, %29 : vector<1x8xf32>
    %cst_25 = arith.constant -1.000000e+09 : f32
    %31 = vector.shape_cast %30 : vector<1x8xi1> to vector<1x8xi1>
    %32 = vector.broadcast %31 : vector<1x8xi1> to vector<8x8xi1>
    %33 = vector.broadcast %cst_25 : f32 to vector<8x8xf32>
    %34 = arith.select %32, %33, %26 : vector<8x8xi1>, vector<8x8xf32>
    %cst_26 = arith.constant dense<0xFF800000> : vector<8xf32>
    %35 = vector.multi_reduction <maximumf>, %34, %cst_26 [1] : vector<8x8xf32> to vector<8xf32>
    %36 = vector.shape_cast %35 : vector<8xf32> to vector<8x1xf32>
    %37 = vector.broadcast %36 : vector<8x1xf32> to vector<8x8xf32>
    %38 = arith.subf %34, %37 : vector<8x8xf32>
    %39 = math.exp %38 : vector<8x8xf32>
    %cst_27 = arith.constant dense<0.000000e+00> : vector<8xf32>
    %40 = vector.multi_reduction <add>, %39, %cst_27 [1] : vector<8x8xf32> to vector<8xf32>
    %41 = vector.shape_cast %40 : vector<8xf32> to vector<8x1xf32>
    %42 = tpu.reciprocal %41 {approx = true} : vector<8x1xf32> -> vector<8x1xf32>
    %43 = vector.broadcast %42 : vector<8x1xf32> to vector<8x8xf32>
    %44 = arith.mulf %39, %43 : vector<8x8xf32>
    %c0_28 = arith.constant 0 : index
    %c0_29 = arith.constant 0 : index
    %c0_30 = arith.constant 0 : index
    %45 = vector.load %arg13[%c0_28, %c0_29, %c0_30] : memref<2x8x8xf32, #tpu.memory_space<vmem>>, vector<1x8x8xf32>
    %46 = vector.shape_cast %45 : vector<1x8x8xf32> to vector<8x8xf32>
    %47 = vector.shape_cast %44 : vector<8x8xf32> to vector<1x8x8xf32>
    tpu.vector_store %arg13[%c0_28, %c0_29, %c0_30], %47 {strides = array<i32>} : memref<2x8x8xf32, #tpu.memory_space<vmem>>, vector<1x8x8xf32>,
    %48 = vector.extract_strided_slice %20 {offsets = [8, 0], sizes = [8, 16], strides = [1, 1]} : vector<16x16xbf16> to vector<8x16xbf16>
    %49 = vector.extract_strided_slice %21 {offsets = [8, 0], sizes = [8, 16], strides = [1, 1]} : vector<16x16xbf16> to vector<8x16xbf16>
    %cst_31 = arith.constant dense<0.000000e+00> : vector<8x8xf32>
    %50 = tpu.matmul %48, %49, %cst_31 {dimension_numbers = #tpu.dot_dimension_numbers<[1], [1], [0], [0], [0, 0, 1, 0], [], []>} : vector<8x16xbf16>, vector<8x16xbf16>, vector<8x8xf32> -> vector<8x8xf32>
    %cst_32 = arith.constant 2.500000e-01 : f32
    %51 = vector.broadcast %cst_32 : f32 to vector<8x8xf32>
    %52 = arith.mulf %50, %51 : vector<8x8xf32>
    %53 = vector.extract_strided_slice %3 {offsets = [1, 0, 0], sizes = [1, 1, 8], strides = [1, 1, 1]} : vector<2x1x8xf32> to vector<1x1x8xf32>
    %54 = vector.shape_cast %53 : vector<1x1x8xf32> to vector<1x8xf32>
    %cst_33 = arith.constant 0.000000e+00 : f32
    %55 = vector.broadcast %cst_33 : f32 to vector<1x8xf32>
    %56 = arith.cmpf one, %54, %55 : vector<1x8xf32>
    %cst_34 = arith.constant -1.000000e+09 : f32
    %57 = vector.shape_cast %56 : vector<1x8xi1> to vector<1x8xi1>
    %58 = vector.broadcast %57 : vector<1x8xi1> to vector<8x8xi1>
    %59 = vector.broadcast %cst_34 : f32 to vector<8x8xf32>
    %60 = arith.select %58, %59, %52 : vector<8x8xi1>, vector<8x8xf32>
    %cst_35 = arith.constant dense<0xFF800000> : vector<8xf32>
    %61 = vector.multi_reduction <maximumf>, %60, %cst_35 [1] : vector<8x8xf32> to vector<8xf32>
    %62 = vector.shape_cast %61 : vector<8xf32> to vector<8x1xf32>
    %63 = vector.broadcast %62 : vector<8x1xf32> to vector<8x8xf32>
    %64 = arith.subf %60, %63 : vector<8x8xf32>
    %65 = math.exp %64 : vector<8x8xf32>
    %cst_36 = arith.constant dense<0.000000e+00> : vector<8xf32>
    %66 = vector.multi_reduction <add>, %65, %cst_36 [1] : vector<8x8xf32> to vector<8xf32>
    %67 = vector.shape_cast %66 : vector<8xf32> to vector<8x1xf32>
    %68 = tpu.reciprocal %67 {approx = true} : vector<8x1xf32> -> vector<8x1xf32>
    %69 = vector.broadcast %68 : vector<8x1xf32> to vector<8x8xf32>
    %70 = arith.mulf %65, %69 : vector<8x8xf32>
    %c1 = arith.constant 1 : index
    %c0_37 = arith.constant 0 : index
    %c0_38 = arith.constant 0 : index
    %71 = vector.load %arg13[%c1, %c0_37, %c0_38] : memref<2x8x8xf32, #tpu.memory_space<vmem>>, vector<1x8x8xf32>
    %72 = vector.shape_cast %71 : vector<1x8x8xf32> to vector<8x8xf32>
    %73 = vector.shape_cast %70 : vector<8x8xf32> to vector<1x8x8xf32>
    tpu.vector_store %arg13[%c1, %c0_37, %c0_38], %73 {strides = array<i32>} : memref<2x8x8xf32, #tpu.memory_space<vmem>>, vector<1x8x8xf32>,
    %c0_39 = arith.constant 0 : index
    %c0_40 = arith.constant 0 : index
    %c0_41 = arith.constant 0 : index
    %74 = vector.load %arg7[%c0_39, %c0_40, %c0_41] : memref<4x160x16xbf16, #tpu.memory_space<vmem>>, vector<1x160x16xbf16>
    %75 = vector.shape_cast %74 : vector<1x160x16xbf16> to vector<160x16xbf16>
    %76 = vector.extract_strided_slice %75 {offsets = [0, 0], sizes = [128, 16], strides = [1, 1]} : vector<160x16xbf16> to vector<128x16xbf16>
    %c0_42 = arith.constant 0 : index
    %c0_43 = arith.constant 0 : index
    %77 = vector.load %arg12[%c0_42, %c0_43] : memref<16x160xf32, #tpu.memory_space<vmem>>, vector<16x128xf32>
    %78 = arith.truncf %77 : vector<16x128xf32> to vector<16x128xbf16>
    %cst_44 = arith.constant dense<0.000000e+00> : vector<16x16xf32>
    %79 = tpu.matmul %78, %76, %cst_44 {dimension_numbers = #tpu.dot_dimension_numbers<[1], [0], [0], [1], [0, 0, 1, 1], [], []>} : vector<16x128xbf16>, vector<128x16xbf16>, vector<16x16xf32> -> vector<16x16xf32>
    %c0_45 = arith.constant 0 : index
    %c0_46 = arith.constant 0 : index
    %c0_47 = arith.constant 0 : index
    %80 = vector.load %arg8[%c0_45, %c0_46, %c0_47] : memref<4x1x16xf32, #tpu.memory_space<vmem>>, vector<1x1x16xf32>
    %81 = vector.shape_cast %80 : vector<1x1x16xf32> to vector<1x16xf32>
    %82 = vector.extract_strided_slice %79 {offsets = [0, 0], sizes = [8, 16], strides = [1, 1]} : vector<16x16xf32> to vector<8x16xf32>
    %c0_48 = arith.constant 0 : index
    %c0_49 = arith.constant 0 : index
    %c0_50 = arith.constant 0 : index
    %83 = vector.load %arg13[%c0_48, %c0_49, %c0_50] : memref<2x8x8xf32, #tpu.memory_space<vmem>>, vector<1x8x8xf32>
    %84 = vector.shape_cast %83 : vector<1x8x8xf32> to vector<8x8xf32>
    %85 = arith.truncf %84 : vector<8x8xf32> to vector<8x8xbf16>
    %86 = arith.truncf %82 : vector<8x16xf32> to vector<8x16xbf16>
    %cst_51 = arith.constant dense<0.000000e+00> : vector<8x16xf32>
    %87 = tpu.matmul %85, %86, %cst_51 {dimension_numbers = #tpu.dot_dimension_numbers<[1], [0], [0], [1], [0, 0, 1, 1], [], []>} : vector<8x8xbf16>, vector<8x16xbf16>, vector<8x16xf32> -> vector<8x16xf32>
    %88 = arith.addf %87, %82 : vector<8x16xf32>
    %89 = vector.broadcast %81 : vector<1x16xf32> to vector<8x16xf32>
    %90 = arith.addf %88, %89 : vector<8x16xf32>
    %cst_52 = arith.constant 5.000000e-01 : f32
    %91 = vector.broadcast %cst_52 : f32 to vector<8x16xf32>
    %92 = arith.mulf %90, %91 : vector<8x16xf32>
    %cst_53 = arith.constant 0.000000e+00 : f32
    %93 = vector.broadcast %cst_53 : f32 to vector<8x16xf32>
    %94 = arith.maximumf %92, %93 : vector<8x16xf32>
    %c0_54 = arith.constant 0 : index
    %c128 = arith.constant 128 : index
    %95 = vector.load %arg12[%c0_54, %c128] : memref<16x160xf32, #tpu.memory_space<vmem>>, vector<8x16xf32>
    tpu.vector_store %arg12[%c0_54, %c128], %94 {strides = array<i32>} : memref<16x160xf32, #tpu.memory_space<vmem>>, vector<8x16xf32>,
    %96 = vector.extract_strided_slice %79 {offsets = [8, 0], sizes = [8, 16], strides = [1, 1]} : vector<16x16xf32> to vector<8x16xf32>
    %c1_55 = arith.constant 1 : index
    %c0_56 = arith.constant 0 : index
    %c0_57 = arith.constant 0 : index
    %97 = vector.load %arg13[%c1_55, %c0_56, %c0_57] : memref<2x8x8xf32, #tpu.memory_space<vmem>>, vector<1x8x8xf32>
    %98 = vector.shape_cast %97 : vector<1x8x8xf32> to vector<8x8xf32>
    %99 = arith.truncf %98 : vector<8x8xf32> to vector<8x8xbf16>
    %100 = arith.truncf %96 : vector<8x16xf32> to vector<8x16xbf16>
    %cst_58 = arith.constant dense<0.000000e+00> : vector<8x16xf32>
    %101 = tpu.matmul %99, %100, %cst_58 {dimension_numbers = #tpu.dot_dimension_numbers<[1], [0], [0], [1], [0, 0, 1, 1], [], []>} : vector<8x8xbf16>, vector<8x16xbf16>, vector<8x16xf32> -> vector<8x16xf32>
    %102 = arith.addf %101, %96 : vector<8x16xf32>
    %103 = vector.broadcast %81 : vector<1x16xf32> to vector<8x16xf32>
    %104 = arith.addf %102, %103 : vector<8x16xf32>
    %cst_59 = arith.constant 5.000000e-01 : f32
    %105 = vector.broadcast %cst_59 : f32 to vector<8x16xf32>
    %106 = arith.mulf %104, %105 : vector<8x16xf32>
    %cst_60 = arith.constant 0.000000e+00 : f32
    %107 = vector.broadcast %cst_60 : f32 to vector<8x16xf32>
    %108 = arith.maximumf %106, %107 : vector<8x16xf32>
    %c8 = arith.constant 8 : index
    %c128_61 = arith.constant 128 : index
    %109 = vector.load %arg12[%c8, %c128_61] : memref<16x160xf32, #tpu.memory_space<vmem>>, vector<8x16xf32>
    tpu.vector_store %arg12[%c8, %c128_61], %108 {strides = array<i32>} : memref<16x160xf32, #tpu.memory_space<vmem>>, vector<8x16xf32>,
    %c1_62 = arith.constant 1 : index
    %c0_63 = arith.constant 0 : index
    %c0_64 = arith.constant 0 : index
    %110 = vector.load %arg7[%c1_62, %c0_63, %c0_64] : memref<4x160x16xbf16, #tpu.memory_space<vmem>>, vector<1x160x16xbf16>
    %111 = vector.shape_cast %110 : vector<1x160x16xbf16> to vector<160x16xbf16>
    %112 = vector.extract_strided_slice %111 {offsets = [0, 0], sizes = [144, 16], strides = [1, 1]} : vector<160x16xbf16> to vector<144x16xbf16>
    %c0_65 = arith.constant 0 : index
    %c0_66 = arith.constant 0 : index
    %113 = vector.load %arg12[%c0_65, %c0_66] : memref<16x160xf32, #tpu.memory_space<vmem>>, vector<16x144xf32>
    %114 = arith.truncf %113 : vector<16x144xf32> to vector<16x144xbf16>
    %cst_67 = arith.constant dense<0.000000e+00> : vector<16x16xf32>
    %115 = tpu.matmul %114, %112, %cst_67 {dimension_numbers = #tpu.dot_dimension_numbers<[1], [0], [0], [1], [0, 0, 1, 1], [], []>} : vector<16x144xbf16>, vector<144x16xbf16>, vector<16x16xf32> -> vector<16x16xf32>
    %c1_68 = arith.constant 1 : index
    %c0_69 = arith.constant 0 : index
    %c0_70 = arith.constant 0 : index
    %116 = vector.load %arg8[%c1_68, %c0_69, %c0_70] : memref<4x1x16xf32, #tpu.memory_space<vmem>>, vector<1x1x16xf32>
    %117 = vector.shape_cast %116 : vector<1x1x16xf32> to vector<1x16xf32>
    %118 = vector.extract_strided_slice %115 {offsets = [0, 0], sizes = [8, 16], strides = [1, 1]} : vector<16x16xf32> to vector<8x16xf32>
    %c0_71 = arith.constant 0 : index
    %c0_72 = arith.constant 0 : index
    %c0_73 = arith.constant 0 : index
    %119 = vector.load %arg13[%c0_71, %c0_72, %c0_73] : memref<2x8x8xf32, #tpu.memory_space<vmem>>, vector<1x8x8xf32>
    %120 = vector.shape_cast %119 : vector<1x8x8xf32> to vector<8x8xf32>
    %121 = arith.truncf %120 : vector<8x8xf32> to vector<8x8xbf16>
    %122 = arith.truncf %118 : vector<8x16xf32> to vector<8x16xbf16>
    %cst_74 = arith.constant dense<0.000000e+00> : vector<8x16xf32>
    %123 = tpu.matmul %121, %122, %cst_74 {dimension_numbers = #tpu.dot_dimension_numbers<[1], [0], [0], [1], [0, 0, 1, 1], [], []>} : vector<8x8xbf16>, vector<8x16xbf16>, vector<8x16xf32> -> vector<8x16xf32>
    %124 = arith.addf %123, %118 : vector<8x16xf32>
    %125 = vector.broadcast %117 : vector<1x16xf32> to vector<8x16xf32>
    %126 = arith.addf %124, %125 : vector<8x16xf32>
    %cst_75 = arith.constant 5.000000e-01 : f32
    %127 = vector.broadcast %cst_75 : f32 to vector<8x16xf32>
    %128 = arith.mulf %126, %127 : vector<8x16xf32>
    %cst_76 = arith.constant 0.000000e+00 : f32
    %129 = vector.broadcast %cst_76 : f32 to vector<8x16xf32>
    %130 = arith.maximumf %128, %129 : vector<8x16xf32>
    %c0_77 = arith.constant 0 : index
    %c144 = arith.constant 144 : index
    %131 = vector.load %arg12[%c0_77, %c144] : memref<16x160xf32, #tpu.memory_space<vmem>>, vector<8x16xf32>
    tpu.vector_store %arg12[%c0_77, %c144], %130 {strides = array<i32>} : memref<16x160xf32, #tpu.memory_space<vmem>>, vector<8x16xf32>,
    %132 = vector.extract_strided_slice %115 {offsets = [8, 0], sizes = [8, 16], strides = [1, 1]} : vector<16x16xf32> to vector<8x16xf32>
    %c1_78 = arith.constant 1 : index
    %c0_79 = arith.constant 0 : index
    %c0_80 = arith.constant 0 : index
    %133 = vector.load %arg13[%c1_78, %c0_79, %c0_80] : memref<2x8x8xf32, #tpu.memory_space<vmem>>, vector<1x8x8xf32>
    %134 = vector.shape_cast %133 : vector<1x8x8xf32> to vector<8x8xf32>
    %135 = arith.truncf %134 : vector<8x8xf32> to vector<8x8xbf16>
    %136 = arith.truncf %132 : vector<8x16xf32> to vector<8x16xbf16>
    %cst_81 = arith.constant dense<0.000000e+00> : vector<8x16xf32>
    %137 = tpu.matmul %135, %136, %cst_81 {dimension_numbers = #tpu.dot_dimension_numbers<[1], [0], [0], [1], [0, 0, 1, 1], [], []>} : vector<8x8xbf16>, vector<8x16xbf16>, vector<8x16xf32> -> vector<8x16xf32>
    %138 = arith.addf %137, %132 : vector<8x16xf32>
    %139 = vector.broadcast %117 : vector<1x16xf32> to vector<8x16xf32>
    %140 = arith.addf %138, %139 : vector<8x16xf32>
    %cst_82 = arith.constant 5.000000e-01 : f32
    %141 = vector.broadcast %cst_82 : f32 to vector<8x16xf32>
    %142 = arith.mulf %140, %141 : vector<8x16xf32>
    %cst_83 = arith.constant 0.000000e+00 : f32
    %143 = vector.broadcast %cst_83 : f32 to vector<8x16xf32>
    %144 = arith.maximumf %142, %143 : vector<8x16xf32>
    %c8_84 = arith.constant 8 : index
    %c144_85 = arith.constant 144 : index
    %145 = vector.load %arg12[%c8_84, %c144_85] : memref<16x160xf32, #tpu.memory_space<vmem>>, vector<8x16xf32>
    tpu.vector_store %arg12[%c8_84, %c144_85], %144 {strides = array<i32>} : memref<16x160xf32, #tpu.memory_space<vmem>>, vector<8x16xf32>,
    %c0_86 = arith.constant 0 : index
    %c0_87 = arith.constant 0 : index
    %146 = vector.load %arg14[%c0_86, %c0_87] : memref<16x128xf32, #tpu.memory_space<vmem>>, vector<16x128xf32>
    %c0_88 = arith.constant 0 : index
    %c0_89 = arith.constant 0 : index
    %147 = vector.load %arg12[%c0_88, %c0_89] : memref<16x160xf32, #tpu.memory_space<vmem>>, vector<16x160xf32>
    %148 = arith.truncf %147 : vector<16x160xf32> to vector<16x160xbf16>
    %c0_90 = arith.constant 0 : index
    %c0_91 = arith.constant 0 : index
    %c0_92 = arith.constant 0 : index
    %149 = vector.load %arg9[%c0_90, %c0_91, %c0_92] : memref<2x160x128xbf16, #tpu.memory_space<vmem>>, vector<1x160x128xbf16>
    %150 = vector.shape_cast %149 : vector<1x160x128xbf16> to vector<160x128xbf16>
    %cst_93 = arith.constant dense<0.000000e+00> : vector<16x128xf32>
    %151 = tpu.matmul %148, %150, %cst_93 {dimension_numbers = #tpu.dot_dimension_numbers<[1], [0], [0], [1], [0, 0, 1, 1], [], []>} : vector<16x160xbf16>, vector<160x128xbf16>, vector<16x128xf32> -> vector<16x128xf32>
    %152 = arith.addf %146, %151 : vector<16x128xf32>
    %c0_94 = arith.constant 0 : index
    %c0_95 = arith.constant 0 : index
    %153 = vector.load %arg14[%c0_94, %c0_95] : memref<16x128xf32, #tpu.memory_space<vmem>>, vector<16x128xf32>
    tpu.vector_store %arg14[%c0_94, %c0_95], %152 {strides = array<i32>} : memref<16x128xf32, #tpu.memory_space<vmem>>, vector<16x128xf32>,
    %c1_96 = arith.constant 1 : index
    %c0_97 = arith.constant 0 : index
    %c0_98 = arith.constant 0 : index
    %154 = vector.load %arg3[%c1_96, %c0_97, %c0_98] : memref<2x128x16xbf16, #tpu.memory_space<vmem>>, vector<1x128x16xbf16>
    %155 = vector.shape_cast %154 : vector<1x128x16xbf16> to vector<128x16xbf16>
    %cst_99 = arith.constant dense<0.000000e+00> : vector<16x16xf32>
    %156 = tpu.matmul %1, %155, %cst_99 {dimension_numbers = #tpu.dot_dimension_numbers<[1], [0], [0], [1], [0, 0, 1, 1], [], []>} : vector<16x128xbf16>, vector<128x16xbf16>, vector<16x16xf32> -> vector<16x16xf32>
    %c1_100 = arith.constant 1 : index
    %c0_101 = arith.constant 0 : index
    %c0_102 = arith.constant 0 : index
    %157 = vector.load %arg4[%c1_100, %c0_101, %c0_102] : memref<2x1x16xf32, #tpu.memory_space<vmem>>, vector<1x1x16xf32>
    %158 = vector.shape_cast %157 : vector<1x1x16xf32> to vector<1x16xf32>
    %159 = vector.broadcast %158 : vector<1x16xf32> to vector<16x16xf32>
    %160 = arith.addf %156, %159 : vector<16x16xf32>
    %c1_103 = arith.constant 1 : index
    %c0_104 = arith.constant 0 : index
    %c0_105 = arith.constant 0 : index
    %161 = vector.load %arg5[%c1_103, %c0_104, %c0_105] : memref<2x128x16xbf16, #tpu.memory_space<vmem>>, vector<1x128x16xbf16>
    %162 = vector.shape_cast %161 : vector<1x128x16xbf16> to vector<128x16xbf16>
    %cst_106 = arith.constant dense<0.000000e+00> : vector<16x16xf32>
    %163 = tpu.matmul %1, %162, %cst_106 {dimension_numbers = #tpu.dot_dimension_numbers<[1], [0], [0], [1], [0, 0, 1, 1], [], []>} : vector<16x128xbf16>, vector<128x16xbf16>, vector<16x16xf32> -> vector<16x16xf32>
    %c1_107 = arith.constant 1 : index
    %c0_108 = arith.constant 0 : index
    %c0_109 = arith.constant 0 : index
    %164 = vector.load %arg6[%c1_107, %c0_108, %c0_109] : memref<2x1x16xf32, #tpu.memory_space<vmem>>, vector<1x1x16xf32>
    %165 = vector.shape_cast %164 : vector<1x1x16xf32> to vector<1x16xf32>
    %166 = vector.broadcast %165 : vector<1x16xf32> to vector<16x16xf32>
    %167 = arith.addf %163, %166 : vector<16x16xf32>
    %168 = arith.truncf %160 : vector<16x16xf32> to vector<16x16xbf16>
    %169 = arith.truncf %167 : vector<16x16xf32> to vector<16x16xbf16>
    %170 = vector.extract_strided_slice %168 {offsets = [0, 0], sizes = [8, 16], strides = [1, 1]} : vector<16x16xbf16> to vector<8x16xbf16>
    %171 = vector.extract_strided_slice %169 {offsets = [0, 0], sizes = [8, 16], strides = [1, 1]} : vector<16x16xbf16> to vector<8x16xbf16>
    %cst_110 = arith.constant dense<0.000000e+00> : vector<8x8xf32>
    %172 = tpu.matmul %170, %171, %cst_110 {dimension_numbers = #tpu.dot_dimension_numbers<[1], [1], [0], [0], [0, 0, 1, 0], [], []>} : vector<8x16xbf16>, vector<8x16xbf16>, vector<8x8xf32> -> vector<8x8xf32>
    %cst_111 = arith.constant 2.500000e-01 : f32
    %173 = vector.broadcast %cst_111 : f32 to vector<8x8xf32>
    %174 = arith.mulf %172, %173 : vector<8x8xf32>
    %175 = vector.extract_strided_slice %3 {offsets = [0, 0, 0], sizes = [1, 1, 8], strides = [1, 1, 1]} : vector<2x1x8xf32> to vector<1x1x8xf32>
    %176 = vector.shape_cast %175 : vector<1x1x8xf32> to vector<1x8xf32>
    %cst_112 = arith.constant 0.000000e+00 : f32
    %177 = vector.broadcast %cst_112 : f32 to vector<1x8xf32>
    %178 = arith.cmpf one, %176, %177 : vector<1x8xf32>
    %cst_113 = arith.constant -1.000000e+09 : f32
    %179 = vector.shape_cast %178 : vector<1x8xi1> to vector<1x8xi1>
    %180 = vector.broadcast %179 : vector<1x8xi1> to vector<8x8xi1>
    %181 = vector.broadcast %cst_113 : f32 to vector<8x8xf32>
    %182 = arith.select %180, %181, %174 : vector<8x8xi1>, vector<8x8xf32>
    %cst_114 = arith.constant dense<0xFF800000> : vector<8xf32>
    %183 = vector.multi_reduction <maximumf>, %182, %cst_114 [1] : vector<8x8xf32> to vector<8xf32>
    %184 = vector.shape_cast %183 : vector<8xf32> to vector<8x1xf32>
    %185 = vector.broadcast %184 : vector<8x1xf32> to vector<8x8xf32>
    %186 = arith.subf %182, %185 : vector<8x8xf32>
    %187 = math.exp %186 : vector<8x8xf32>
    %cst_115 = arith.constant dense<0.000000e+00> : vector<8xf32>
    %188 = vector.multi_reduction <add>, %187, %cst_115 [1] : vector<8x8xf32> to vector<8xf32>
    %189 = vector.shape_cast %188 : vector<8xf32> to vector<8x1xf32>
    %190 = tpu.reciprocal %189 {approx = true} : vector<8x1xf32> -> vector<8x1xf32>
    %191 = vector.broadcast %190 : vector<8x1xf32> to vector<8x8xf32>
    %192 = arith.mulf %187, %191 : vector<8x8xf32>
    %c0_116 = arith.constant 0 : index
    %c0_117 = arith.constant 0 : index
    %c0_118 = arith.constant 0 : index
    %193 = vector.load %arg13[%c0_116, %c0_117, %c0_118] : memref<2x8x8xf32, #tpu.memory_space<vmem>>, vector<1x8x8xf32>
    %194 = vector.shape_cast %193 : vector<1x8x8xf32> to vector<8x8xf32>
    %195 = vector.shape_cast %192 : vector<8x8xf32> to vector<1x8x8xf32>
    tpu.vector_store %arg13[%c0_116, %c0_117, %c0_118], %195 {strides = array<i32>} : memref<2x8x8xf32, #tpu.memory_space<vmem>>, vector<1x8x8xf32>,
    %196 = vector.extract_strided_slice %168 {offsets = [8, 0], sizes = [8, 16], strides = [1, 1]} : vector<16x16xbf16> to vector<8x16xbf16>
    %197 = vector.extract_strided_slice %169 {offsets = [8, 0], sizes = [8, 16], strides = [1, 1]} : vector<16x16xbf16> to vector<8x16xbf16>
    %cst_119 = arith.constant dense<0.000000e+00> : vector<8x8xf32>
    %198 = tpu.matmul %196, %197, %cst_119 {dimension_numbers = #tpu.dot_dimension_numbers<[1], [1], [0], [0], [0, 0, 1, 0], [], []>} : vector<8x16xbf16>, vector<8x16xbf16>, vector<8x8xf32> -> vector<8x8xf32>
    %cst_120 = arith.constant 2.500000e-01 : f32
    %199 = vector.broadcast %cst_120 : f32 to vector<8x8xf32>
    %200 = arith.mulf %198, %199 : vector<8x8xf32>
    %201 = vector.extract_strided_slice %3 {offsets = [1, 0, 0], sizes = [1, 1, 8], strides = [1, 1, 1]} : vector<2x1x8xf32> to vector<1x1x8xf32>
    %202 = vector.shape_cast %201 : vector<1x1x8xf32> to vector<1x8xf32>
    %cst_121 = arith.constant 0.000000e+00 : f32
    %203 = vector.broadcast %cst_121 : f32 to vector<1x8xf32>
    %204 = arith.cmpf one, %202, %203 : vector<1x8xf32>
    %cst_122 = arith.constant -1.000000e+09 : f32
    %205 = vector.shape_cast %204 : vector<1x8xi1> to vector<1x8xi1>
    %206 = vector.broadcast %205 : vector<1x8xi1> to vector<8x8xi1>
    %207 = vector.broadcast %cst_122 : f32 to vector<8x8xf32>
    %208 = arith.select %206, %207, %200 : vector<8x8xi1>, vector<8x8xf32>
    %cst_123 = arith.constant dense<0xFF800000> : vector<8xf32>
    %209 = vector.multi_reduction <maximumf>, %208, %cst_123 [1] : vector<8x8xf32> to vector<8xf32>
    %210 = vector.shape_cast %209 : vector<8xf32> to vector<8x1xf32>
    %211 = vector.broadcast %210 : vector<8x1xf32> to vector<8x8xf32>
    %212 = arith.subf %208, %211 : vector<8x8xf32>
    %213 = math.exp %212 : vector<8x8xf32>
    %cst_124 = arith.constant dense<0.000000e+00> : vector<8xf32>
    %214 = vector.multi_reduction <add>, %213, %cst_124 [1] : vector<8x8xf32> to vector<8xf32>
    %215 = vector.shape_cast %214 : vector<8xf32> to vector<8x1xf32>
    %216 = tpu.reciprocal %215 {approx = true} : vector<8x1xf32> -> vector<8x1xf32>
    %217 = vector.broadcast %216 : vector<8x1xf32> to vector<8x8xf32>
    %218 = arith.mulf %213, %217 : vector<8x8xf32>
    %c1_125 = arith.constant 1 : index
    %c0_126 = arith.constant 0 : index
    %c0_127 = arith.constant 0 : index
    %219 = vector.load %arg13[%c1_125, %c0_126, %c0_127] : memref<2x8x8xf32, #tpu.memory_space<vmem>>, vector<1x8x8xf32>
    %220 = vector.shape_cast %219 : vector<1x8x8xf32> to vector<8x8xf32>
    %221 = vector.shape_cast %218 : vector<8x8xf32> to vector<1x8x8xf32>
    tpu.vector_store %arg13[%c1_125, %c0_126, %c0_127], %221 {strides = array<i32>} : memref<2x8x8xf32, #tpu.memory_space<vmem>>, vector<1x8x8xf32>,
    %c2 = arith.constant 2 : index
    %c0_128 = arith.constant 0 : index
    %c0_129 = arith.constant 0 : index
    %222 = vector.load %arg7[%c2, %c0_128, %c0_129] : memref<4x160x16xbf16, #tpu.memory_space<vmem>>, vector<1x160x16xbf16>
    %223 = vector.shape_cast %222 : vector<1x160x16xbf16> to vector<160x16xbf16>
    %224 = vector.extract_strided_slice %223 {offsets = [0, 0], sizes = [128, 16], strides = [1, 1]} : vector<160x16xbf16> to vector<128x16xbf16>
    %c0_130 = arith.constant 0 : index
    %c0_131 = arith.constant 0 : index
    %225 = vector.load %arg12[%c0_130, %c0_131] : memref<16x160xf32, #tpu.memory_space<vmem>>, vector<16x128xf32>
    %226 = arith.truncf %225 : vector<16x128xf32> to vector<16x128xbf16>
    %cst_132 = arith.constant dense<0.000000e+00> : vector<16x16xf32>
    %227 = tpu.matmul %226, %224, %cst_132 {dimension_numbers = #tpu.dot_dimension_numbers<[1], [0], [0], [1], [0, 0, 1, 1], [], []>} : vector<16x128xbf16>, vector<128x16xbf16>, vector<16x16xf32> -> vector<16x16xf32>
    %c2_133 = arith.constant 2 : index
    %c0_134 = arith.constant 0 : index
    %c0_135 = arith.constant 0 : index
    %228 = vector.load %arg8[%c2_133, %c0_134, %c0_135] : memref<4x1x16xf32, #tpu.memory_space<vmem>>, vector<1x1x16xf32>
    %229 = vector.shape_cast %228 : vector<1x1x16xf32> to vector<1x16xf32>
    %230 = vector.extract_strided_slice %227 {offsets = [0, 0], sizes = [8, 16], strides = [1, 1]} : vector<16x16xf32> to vector<8x16xf32>
    %c0_136 = arith.constant 0 : index
    %c0_137 = arith.constant 0 : index
    %c0_138 = arith.constant 0 : index
    %231 = vector.load %arg13[%c0_136, %c0_137, %c0_138] : memref<2x8x8xf32, #tpu.memory_space<vmem>>, vector<1x8x8xf32>
    %232 = vector.shape_cast %231 : vector<1x8x8xf32> to vector<8x8xf32>
    %233 = arith.truncf %232 : vector<8x8xf32> to vector<8x8xbf16>
    %234 = arith.truncf %230 : vector<8x16xf32> to vector<8x16xbf16>
    %cst_139 = arith.constant dense<0.000000e+00> : vector<8x16xf32>
    %235 = tpu.matmul %233, %234, %cst_139 {dimension_numbers = #tpu.dot_dimension_numbers<[1], [0], [0], [1], [0, 0, 1, 1], [], []>} : vector<8x8xbf16>, vector<8x16xbf16>, vector<8x16xf32> -> vector<8x16xf32>
    %236 = arith.addf %235, %230 : vector<8x16xf32>
    %237 = vector.broadcast %229 : vector<1x16xf32> to vector<8x16xf32>
    %238 = arith.addf %236, %237 : vector<8x16xf32>
    %cst_140 = arith.constant 5.000000e-01 : f32
    %239 = vector.broadcast %cst_140 : f32 to vector<8x16xf32>
    %240 = arith.mulf %238, %239 : vector<8x16xf32>
    %cst_141 = arith.constant 0.000000e+00 : f32
    %241 = vector.broadcast %cst_141 : f32 to vector<8x16xf32>
    %242 = arith.maximumf %240, %241 : vector<8x16xf32>
    %c0_142 = arith.constant 0 : index
    %c128_143 = arith.constant 128 : index
    %243 = vector.load %arg12[%c0_142, %c128_143] : memref<16x160xf32, #tpu.memory_space<vmem>>, vector<8x16xf32>
    tpu.vector_store %arg12[%c0_142, %c128_143], %242 {strides = array<i32>} : memref<16x160xf32, #tpu.memory_space<vmem>>, vector<8x16xf32>,
    %244 = vector.extract_strided_slice %227 {offsets = [8, 0], sizes = [8, 16], strides = [1, 1]} : vector<16x16xf32> to vector<8x16xf32>
    %c1_144 = arith.constant 1 : index
    %c0_145 = arith.constant 0 : index
    %c0_146 = arith.constant 0 : index
    %245 = vector.load %arg13[%c1_144, %c0_145, %c0_146] : memref<2x8x8xf32, #tpu.memory_space<vmem>>, vector<1x8x8xf32>
    %246 = vector.shape_cast %245 : vector<1x8x8xf32> to vector<8x8xf32>
    %247 = arith.truncf %246 : vector<8x8xf32> to vector<8x8xbf16>
    %248 = arith.truncf %244 : vector<8x16xf32> to vector<8x16xbf16>
    %cst_147 = arith.constant dense<0.000000e+00> : vector<8x16xf32>
    %249 = tpu.matmul %247, %248, %cst_147 {dimension_numbers = #tpu.dot_dimension_numbers<[1], [0], [0], [1], [0, 0, 1, 1], [], []>} : vector<8x8xbf16>, vector<8x16xbf16>, vector<8x16xf32> -> vector<8x16xf32>
    %250 = arith.addf %249, %244 : vector<8x16xf32>
    %251 = vector.broadcast %229 : vector<1x16xf32> to vector<8x16xf32>
    %252 = arith.addf %250, %251 : vector<8x16xf32>
    %cst_148 = arith.constant 5.000000e-01 : f32
    %253 = vector.broadcast %cst_148 : f32 to vector<8x16xf32>
    %254 = arith.mulf %252, %253 : vector<8x16xf32>
    %cst_149 = arith.constant 0.000000e+00 : f32
    %255 = vector.broadcast %cst_149 : f32 to vector<8x16xf32>
    %256 = arith.maximumf %254, %255 : vector<8x16xf32>
    %c8_150 = arith.constant 8 : index
    %c128_151 = arith.constant 128 : index
    %257 = vector.load %arg12[%c8_150, %c128_151] : memref<16x160xf32, #tpu.memory_space<vmem>>, vector<8x16xf32>
    tpu.vector_store %arg12[%c8_150, %c128_151], %256 {strides = array<i32>} : memref<16x160xf32, #tpu.memory_space<vmem>>, vector<8x16xf32>,
    %c3 = arith.constant 3 : index
    %c0_152 = arith.constant 0 : index
    %c0_153 = arith.constant 0 : index
    %258 = vector.load %arg7[%c3, %c0_152, %c0_153] : memref<4x160x16xbf16, #tpu.memory_space<vmem>>, vector<1x160x16xbf16>
    %259 = vector.shape_cast %258 : vector<1x160x16xbf16> to vector<160x16xbf16>
    %260 = vector.extract_strided_slice %259 {offsets = [0, 0], sizes = [144, 16], strides = [1, 1]} : vector<160x16xbf16> to vector<144x16xbf16>
    %c0_154 = arith.constant 0 : index
    %c0_155 = arith.constant 0 : index
    %261 = vector.load %arg12[%c0_154, %c0_155] : memref<16x160xf32, #tpu.memory_space<vmem>>, vector<16x144xf32>
    %262 = arith.truncf %261 : vector<16x144xf32> to vector<16x144xbf16>
    %cst_156 = arith.constant dense<0.000000e+00> : vector<16x16xf32>
    %263 = tpu.matmul %262, %260, %cst_156 {dimension_numbers = #tpu.dot_dimension_numbers<[1], [0], [0], [1], [0, 0, 1, 1], [], []>} : vector<16x144xbf16>, vector<144x16xbf16>, vector<16x16xf32> -> vector<16x16xf32>
    %c3_157 = arith.constant 3 : index
    %c0_158 = arith.constant 0 : index
    %c0_159 = arith.constant 0 : index
    %264 = vector.load %arg8[%c3_157, %c0_158, %c0_159] : memref<4x1x16xf32, #tpu.memory_space<vmem>>, vector<1x1x16xf32>
    %265 = vector.shape_cast %264 : vector<1x1x16xf32> to vector<1x16xf32>
    %266 = vector.extract_strided_slice %263 {offsets = [0, 0], sizes = [8, 16], strides = [1, 1]} : vector<16x16xf32> to vector<8x16xf32>
    %c0_160 = arith.constant 0 : index
    %c0_161 = arith.constant 0 : index
    %c0_162 = arith.constant 0 : index
    %267 = vector.load %arg13[%c0_160, %c0_161, %c0_162] : memref<2x8x8xf32, #tpu.memory_space<vmem>>, vector<1x8x8xf32>
    %268 = vector.shape_cast %267 : vector<1x8x8xf32> to vector<8x8xf32>
    %269 = arith.truncf %268 : vector<8x8xf32> to vector<8x8xbf16>
    %270 = arith.truncf %266 : vector<8x16xf32> to vector<8x16xbf16>
    %cst_163 = arith.constant dense<0.000000e+00> : vector<8x16xf32>
    %271 = tpu.matmul %269, %270, %cst_163 {dimension_numbers = #tpu.dot_dimension_numbers<[1], [0], [0], [1], [0, 0, 1, 1], [], []>} : vector<8x8xbf16>, vector<8x16xbf16>, vector<8x16xf32> -> vector<8x16xf32>
    %272 = arith.addf %271, %266 : vector<8x16xf32>
    %273 = vector.broadcast %265 : vector<1x16xf32> to vector<8x16xf32>
    %274 = arith.addf %272, %273 : vector<8x16xf32>
    %cst_164 = arith.constant 5.000000e-01 : f32
    %275 = vector.broadcast %cst_164 : f32 to vector<8x16xf32>
    %276 = arith.mulf %274, %275 : vector<8x16xf32>
    %cst_165 = arith.constant 0.000000e+00 : f32
    %277 = vector.broadcast %cst_165 : f32 to vector<8x16xf32>
    %278 = arith.maximumf %276, %277 : vector<8x16xf32>
    %c0_166 = arith.constant 0 : index
    %c144_167 = arith.constant 144 : index
    %279 = vector.load %arg12[%c0_166, %c144_167] : memref<16x160xf32, #tpu.memory_space<vmem>>, vector<8x16xf32>
    tpu.vector_store %arg12[%c0_166, %c144_167], %278 {strides = array<i32>} : memref<16x160xf32, #tpu.memory_space<vmem>>, vector<8x16xf32>,
    %280 = vector.extract_strided_slice %263 {offsets = [8, 0], sizes = [8, 16], strides = [1, 1]} : vector<16x16xf32> to vector<8x16xf32>
    %c1_168 = arith.constant 1 : index
    %c0_169 = arith.constant 0 : index
    %c0_170 = arith.constant 0 : index
    %281 = vector.load %arg13[%c1_168, %c0_169, %c0_170] : memref<2x8x8xf32, #tpu.memory_space<vmem>>, vector<1x8x8xf32>
    %282 = vector.shape_cast %281 : vector<1x8x8xf32> to vector<8x8xf32>
    %283 = arith.truncf %282 : vector<8x8xf32> to vector<8x8xbf16>
    %284 = arith.truncf %280 : vector<8x16xf32> to vector<8x16xbf16>
    %cst_171 = arith.constant dense<0.000000e+00> : vector<8x16xf32>
    %285 = tpu.matmul %283, %284, %cst_171 {dimension_numbers = #tpu.dot_dimension_numbers<[1], [0], [0], [1], [0, 0, 1, 1], [], []>} : vector<8x8xbf16>, vector<8x16xbf16>, vector<8x16xf32> -> vector<8x16xf32>
    %286 = arith.addf %285, %280 : vector<8x16xf32>
    %287 = vector.broadcast %265 : vector<1x16xf32> to vector<8x16xf32>
    %288 = arith.addf %286, %287 : vector<8x16xf32>
    %cst_172 = arith.constant 5.000000e-01 : f32
    %289 = vector.broadcast %cst_172 : f32 to vector<8x16xf32>
    %290 = arith.mulf %288, %289 : vector<8x16xf32>
    %cst_173 = arith.constant 0.000000e+00 : f32
    %291 = vector.broadcast %cst_173 : f32 to vector<8x16xf32>
    %292 = arith.maximumf %290, %291 : vector<8x16xf32>
    %c8_174 = arith.constant 8 : index
    %c144_175 = arith.constant 144 : index
    %293 = vector.load %arg12[%c8_174, %c144_175] : memref<16x160xf32, #tpu.memory_space<vmem>>, vector<8x16xf32>
    tpu.vector_store %arg12[%c8_174, %c144_175], %292 {strides = array<i32>} : memref<16x160xf32, #tpu.memory_space<vmem>>, vector<8x16xf32>,
    %c0_176 = arith.constant 0 : index
    %c0_177 = arith.constant 0 : index
    %294 = vector.load %arg14[%c0_176, %c0_177] : memref<16x128xf32, #tpu.memory_space<vmem>>, vector<16x128xf32>
    %c0_178 = arith.constant 0 : index
    %c0_179 = arith.constant 0 : index
    %295 = vector.load %arg12[%c0_178, %c0_179] : memref<16x160xf32, #tpu.memory_space<vmem>>, vector<16x160xf32>
    %296 = arith.truncf %295 : vector<16x160xf32> to vector<16x160xbf16>
    %c1_180 = arith.constant 1 : index
    %c0_181 = arith.constant 0 : index
    %c0_182 = arith.constant 0 : index
    %297 = vector.load %arg9[%c1_180, %c0_181, %c0_182] : memref<2x160x128xbf16, #tpu.memory_space<vmem>>, vector<1x160x128xbf16>
    %298 = vector.shape_cast %297 : vector<1x160x128xbf16> to vector<160x128xbf16>
    %cst_183 = arith.constant dense<0.000000e+00> : vector<16x128xf32>
    %299 = tpu.matmul %296, %298, %cst_183 {dimension_numbers = #tpu.dot_dimension_numbers<[1], [0], [0], [1], [0, 0, 1, 1], [], []>} : vector<16x160xbf16>, vector<160x128xbf16>, vector<16x128xf32> -> vector<16x128xf32>
    %300 = arith.addf %294, %299 : vector<16x128xf32>
    %c0_184 = arith.constant 0 : index
    %c0_185 = arith.constant 0 : index
    %301 = vector.load %arg14[%c0_184, %c0_185] : memref<16x128xf32, #tpu.memory_space<vmem>>, vector<16x128xf32>
    tpu.vector_store %arg14[%c0_184, %c0_185], %300 {strides = array<i32>} : memref<16x128xf32, #tpu.memory_space<vmem>>, vector<16x128xf32>,
    %c0_186 = arith.constant 0 : index
    %c0_187 = arith.constant 0 : index
    %302 = vector.load %arg14[%c0_186, %c0_187] : memref<16x128xf32, #tpu.memory_space<vmem>>, vector<16x128xf32>
    %c0_188 = arith.constant 0 : index
    %c0_189 = arith.constant 0 : index
    %303 = vector.load %arg10[%c0_188, %c0_189] : memref<1x128xf32, #tpu.memory_space<vmem>>, vector<1x128xf32>
    %304 = vector.broadcast %303 : vector<1x128xf32> to vector<16x128xf32>
    %305 = arith.addf %302, %304 : vector<16x128xf32>
    %c0_190 = arith.constant 0 : index
    %c0_191 = arith.constant 0 : index
    %306 = vector.load %arg11[%c0_190, %c0_191] : memref<16x128xf32, #tpu.memory_space<vmem>>, vector<16x128xf32>
    tpu.vector_store %arg11[%c0_190, %c0_191], %305 {strides = array<i32>} : memref<16x128xf32, #tpu.memory_space<vmem>>, vector<16x128xf32>,
    return
  }
  func.func @transform_0(%arg0: i32) -> (i32, i32) {
    %c0_i32 = arith.constant 0 : i32
    %c0_i32_0 = arith.constant 0 : i32
    return %arg0, %c0_i32 : i32, i32
  }
  func.func @transform_1(%arg0: i32) -> (i32, i32, i32) {
    %c0_i32 = arith.constant 0 : i32
    %c0_i32_0 = arith.constant 0 : i32
    %c0_i32_1 = arith.constant 0 : i32
    return %arg0, %c0_i32, %c0_i32_0 : i32, i32, i32
  }
  func.func @transform_2(%arg0: i32) -> (i32, i32, i32) {
    %c0_i32 = arith.constant 0 : i32
    %c0_i32_0 = arith.constant 0 : i32
    %c0_i32_1 = arith.constant 0 : i32
    %c0_i32_2 = arith.constant 0 : i32
    return %c0_i32, %c0_i32_0, %c0_i32_1 : i32, i32, i32
  }
  func.func @transform_3(%arg0: i32) -> (i32, i32, i32) {
    %c0_i32 = arith.constant 0 : i32
    %c0_i32_0 = arith.constant 0 : i32
    %c0_i32_1 = arith.constant 0 : i32
    %c0_i32_2 = arith.constant 0 : i32
    return %c0_i32, %c0_i32_0, %c0_i32_1 : i32, i32, i32
  }
  func.func @transform_4(%arg0: i32) -> (i32, i32, i32) {
    %c0_i32 = arith.constant 0 : i32
    %c0_i32_0 = arith.constant 0 : i32
    %c0_i32_1 = arith.constant 0 : i32
    %c0_i32_2 = arith.constant 0 : i32
    return %c0_i32, %c0_i32_0, %c0_i32_1 : i32, i32, i32
  }
  func.func @transform_5(%arg0: i32) -> (i32, i32, i32) {
    %c0_i32 = arith.constant 0 : i32
    %c0_i32_0 = arith.constant 0 : i32
    %c0_i32_1 = arith.constant 0 : i32
    %c0_i32_2 = arith.constant 0 : i32
    return %c0_i32, %c0_i32_0, %c0_i32_1 : i32, i32, i32
  }
  func.func @transform_6(%arg0: i32) -> (i32, i32, i32) {
    %c0_i32 = arith.constant 0 : i32
    %c0_i32_0 = arith.constant 0 : i32
    %c0_i32_1 = arith.constant 0 : i32
    %c0_i32_2 = arith.constant 0 : i32
    return %c0_i32, %c0_i32_0, %c0_i32_1 : i32, i32, i32
  }
  func.func @transform_7(%arg0: i32) -> (i32, i32, i32) {
    %c0_i32 = arith.constant 0 : i32
    %c0_i32_0 = arith.constant 0 : i32
    %c0_i32_1 = arith.constant 0 : i32
    %c0_i32_2 = arith.constant 0 : i32
    return %c0_i32, %c0_i32_0, %c0_i32_1 : i32, i32, i32
  }
  func.func @transform_8(%arg0: i32) -> (i32, i32, i32) {
    %c0_i32 = arith.constant 0 : i32
    %c0_i32_0 = arith.constant 0 : i32
    %c0_i32_1 = arith.constant 0 : i32
    %c0_i32_2 = arith.constant 0 : i32
    return %c0_i32, %c0_i32_0, %c0_i32_1 : i32, i32, i32
  }
  func.func @transform_9(%arg0: i32) -> (i32, i32) {
    %c0_i32 = arith.constant 0 : i32
    %c0_i32_0 = arith.constant 0 : i32
    %c0_i32_1 = arith.constant 0 : i32
    return %c0_i32, %c0_i32_0 : i32, i32
  }
  func.func @transform_10(%arg0: i32) -> (i32, i32) {
    %c0_i32 = arith.constant 0 : i32
    %c0_i32_0 = arith.constant 0 : i32
    return %arg0, %c0_i32 : i32, i32
  }
}

module attributes {stable_mosaic.version = 11 : i64} {
  func.func @_split_linear_kernel(%arg0: i32, %arg1: memref<16x128xf32, #tpu.memory_space<vmem>>, %arg2: memref<16x128xf32, #tpu.memory_space<vmem>>, %arg3: memref<16x128xf32, #tpu.memory_space<vmem>>, %arg4: memref<16x128xf32, #tpu.memory_space<vmem>>, %arg5: memref<128x128xbf16, #tpu.memory_space<vmem>>, %arg6: memref<128x128xbf16, #tpu.memory_space<vmem>>, %arg7: memref<128x128xbf16, #tpu.memory_space<vmem>>, %arg8: memref<128x128xbf16, #tpu.memory_space<vmem>>, %arg9: memref<1x128xf32, #tpu.memory_space<vmem>>, %arg10: memref<16x128xf32, #tpu.memory_space<vmem>>) attributes {dimension_semantics = [#tpu.dimension_semantics<parallel>], iteration_bounds = array<i64: 1>, scalar_prefetch = 0 : i64, scratch_operands = 0 : i64, tpu.core_type = #tpu.core_type<tc>, window_params = [{transform_indices = @transform_0, window_bounds = array<i64: 16, 128>}, {transform_indices = @transform_1, window_bounds = array<i64: 16, 128>}, {transform_indices = @transform_2, window_bounds = array<i64: 16, 128>}, {transform_indices = @transform_3, window_bounds = array<i64: 16, 128>}, {pipeline_mode = #tpu.pipeline_mode<synchronous>, transform_indices = @transform_4, window_bounds = array<i64: 128, 128>}, {pipeline_mode = #tpu.pipeline_mode<synchronous>, transform_indices = @transform_5, window_bounds = array<i64: 128, 128>}, {pipeline_mode = #tpu.pipeline_mode<synchronous>, transform_indices = @transform_6, window_bounds = array<i64: 128, 128>}, {pipeline_mode = #tpu.pipeline_mode<synchronous>, transform_indices = @transform_7, window_bounds = array<i64: 128, 128>}, {pipeline_mode = #tpu.pipeline_mode<synchronous>, transform_indices = @transform_8, window_bounds = array<i64: 1, 128>}, {transform_indices = @transform_9, window_bounds = array<i64: 16, 128>}]} {
    %c0 = arith.constant 0 : index
    %c0_0 = arith.constant 0 : index
    %0 = vector.load %arg9[%c0, %c0_0] : memref<1x128xf32, #tpu.memory_space<vmem>>, vector<1x128xf32>
    %c0_1 = arith.constant 0 : index
    %c0_2 = arith.constant 0 : index
    %1 = vector.load %arg1[%c0_1, %c0_2] : memref<16x128xf32, #tpu.memory_space<vmem>>, vector<16x128xf32>
    %2 = arith.truncf %1 : vector<16x128xf32> to vector<16x128xbf16>
    %c0_3 = arith.constant 0 : index
    %c0_4 = arith.constant 0 : index
    %3 = vector.load %arg5[%c0_3, %c0_4] : memref<128x128xbf16, #tpu.memory_space<vmem>>, vector<128x128xbf16>
    %cst = arith.constant dense<0.000000e+00> : vector<16x128xf32>
    %4 = tpu.matmul %2, %3, %cst {dimension_numbers = #tpu.dot_dimension_numbers<[1], [0], [0], [1], [0, 0, 1, 1], [], []>} : vector<16x128xbf16>, vector<128x128xbf16>, vector<16x128xf32> -> vector<16x128xf32>
    %5 = vector.broadcast %0 : vector<1x128xf32> to vector<16x128xf32>
    %6 = arith.addf %5, %4 : vector<16x128xf32>
    %c0_5 = arith.constant 0 : index
    %c0_6 = arith.constant 0 : index
    %7 = vector.load %arg2[%c0_5, %c0_6] : memref<16x128xf32, #tpu.memory_space<vmem>>, vector<16x128xf32>
    %8 = arith.truncf %7 : vector<16x128xf32> to vector<16x128xbf16>
    %c0_7 = arith.constant 0 : index
    %c0_8 = arith.constant 0 : index
    %9 = vector.load %arg6[%c0_7, %c0_8] : memref<128x128xbf16, #tpu.memory_space<vmem>>, vector<128x128xbf16>
    %cst_9 = arith.constant dense<0.000000e+00> : vector<16x128xf32>
    %10 = tpu.matmul %8, %9, %cst_9 {dimension_numbers = #tpu.dot_dimension_numbers<[1], [0], [0], [1], [0, 0, 1, 1], [], []>} : vector<16x128xbf16>, vector<128x128xbf16>, vector<16x128xf32> -> vector<16x128xf32>
    %11 = arith.addf %6, %10 : vector<16x128xf32>
    %c0_10 = arith.constant 0 : index
    %c0_11 = arith.constant 0 : index
    %12 = vector.load %arg3[%c0_10, %c0_11] : memref<16x128xf32, #tpu.memory_space<vmem>>, vector<16x128xf32>
    %13 = arith.truncf %12 : vector<16x128xf32> to vector<16x128xbf16>
    %c0_12 = arith.constant 0 : index
    %c0_13 = arith.constant 0 : index
    %14 = vector.load %arg7[%c0_12, %c0_13] : memref<128x128xbf16, #tpu.memory_space<vmem>>, vector<128x128xbf16>
    %cst_14 = arith.constant dense<0.000000e+00> : vector<16x128xf32>
    %15 = tpu.matmul %13, %14, %cst_14 {dimension_numbers = #tpu.dot_dimension_numbers<[1], [0], [0], [1], [0, 0, 1, 1], [], []>} : vector<16x128xbf16>, vector<128x128xbf16>, vector<16x128xf32> -> vector<16x128xf32>
    %16 = arith.addf %11, %15 : vector<16x128xf32>
    %c0_15 = arith.constant 0 : index
    %c0_16 = arith.constant 0 : index
    %17 = vector.load %arg4[%c0_15, %c0_16] : memref<16x128xf32, #tpu.memory_space<vmem>>, vector<16x128xf32>
    %18 = arith.truncf %17 : vector<16x128xf32> to vector<16x128xbf16>
    %c0_17 = arith.constant 0 : index
    %c0_18 = arith.constant 0 : index
    %19 = vector.load %arg8[%c0_17, %c0_18] : memref<128x128xbf16, #tpu.memory_space<vmem>>, vector<128x128xbf16>
    %cst_19 = arith.constant dense<0.000000e+00> : vector<16x128xf32>
    %20 = tpu.matmul %18, %19, %cst_19 {dimension_numbers = #tpu.dot_dimension_numbers<[1], [0], [0], [1], [0, 0, 1, 1], [], []>} : vector<16x128xbf16>, vector<128x128xbf16>, vector<16x128xf32> -> vector<16x128xf32>
    %21 = arith.addf %16, %20 : vector<16x128xf32>
    %c0_20 = arith.constant 0 : index
    %c0_21 = arith.constant 0 : index
    %22 = vector.load %arg10[%c0_20, %c0_21] : memref<16x128xf32, #tpu.memory_space<vmem>>, vector<16x128xf32>
    tpu.vector_store %arg10[%c0_20, %c0_21], %21 {strides = array<i32>} : memref<16x128xf32, #tpu.memory_space<vmem>>, vector<16x128xf32>,
    return
  }
  func.func @transform_0(%arg0: i32) -> (i32, i32) {
    %c0_i32 = arith.constant 0 : i32
    %c0_i32_0 = arith.constant 0 : i32
    return %arg0, %c0_i32 : i32, i32
  }
  func.func @transform_1(%arg0: i32) -> (i32, i32) {
    %c0_i32 = arith.constant 0 : i32
    %c0_i32_0 = arith.constant 0 : i32
    return %arg0, %c0_i32 : i32, i32
  }
  func.func @transform_2(%arg0: i32) -> (i32, i32) {
    %c0_i32 = arith.constant 0 : i32
    %c0_i32_0 = arith.constant 0 : i32
    return %arg0, %c0_i32 : i32, i32
  }
  func.func @transform_3(%arg0: i32) -> (i32, i32) {
    %c0_i32 = arith.constant 0 : i32
    %c0_i32_0 = arith.constant 0 : i32
    return %arg0, %c0_i32 : i32, i32
  }
  func.func @transform_4(%arg0: i32) -> (i32, i32) {
    %c0_i32 = arith.constant 0 : i32
    %c0_i32_0 = arith.constant 0 : i32
    %c0_i32_1 = arith.constant 0 : i32
    return %c0_i32, %c0_i32_0 : i32, i32
  }
  func.func @transform_5(%arg0: i32) -> (i32, i32) {
    %c0_i32 = arith.constant 0 : i32
    %c0_i32_0 = arith.constant 0 : i32
    %c0_i32_1 = arith.constant 0 : i32
    return %c0_i32, %c0_i32_0 : i32, i32
  }
  func.func @transform_6(%arg0: i32) -> (i32, i32) {
    %c0_i32 = arith.constant 0 : i32
    %c0_i32_0 = arith.constant 0 : i32
    %c0_i32_1 = arith.constant 0 : i32
    return %c0_i32, %c0_i32_0 : i32, i32
  }
  func.func @transform_7(%arg0: i32) -> (i32, i32) {
    %c0_i32 = arith.constant 0 : i32
    %c0_i32_0 = arith.constant 0 : i32
    %c0_i32_1 = arith.constant 0 : i32
    return %c0_i32, %c0_i32_0 : i32, i32
  }
  func.func @transform_8(%arg0: i32) -> (i32, i32) {
    %c0_i32 = arith.constant 0 : i32
    %c0_i32_0 = arith.constant 0 : i32
    %c0_i32_1 = arith.constant 0 : i32
    return %c0_i32, %c0_i32_0 : i32, i32
  }
  func.func @transform_9(%arg0: i32) -> (i32, i32) {
    %c0_i32 = arith.constant 0 : i32
    %c0_i32_0 = arith.constant 0 : i32
    return %arg0, %c0_i32 : i32, i32
  }
}

module attributes {stable_mosaic.version = 11 : i64} {
  func.func @_multi_gcn_block_kernel(%arg0: i32, %arg1: memref<16x128xf32, #tpu.memory_space<vmem>>, %arg2: memref<2x1x8xf32, #tpu.memory_space<vmem>>, %arg3: memref<2x128x16xbf16, #tpu.memory_space<vmem>>, %arg4: memref<2x1x16xf32, #tpu.memory_space<vmem>>, %arg5: memref<2x128x16xbf16, #tpu.memory_space<vmem>>, %arg6: memref<2x1x16xf32, #tpu.memory_space<vmem>>, %arg7: memref<8x160x8xbf16, #tpu.memory_space<vmem>>, %arg8: memref<8x1x8xf32, #tpu.memory_space<vmem>>, %arg9: memref<2x160x128xbf16, #tpu.memory_space<vmem>>, %arg10: memref<1x128xf32, #tpu.memory_space<vmem>>, %arg11: memref<16x128xf32, #tpu.memory_space<vmem>>, %arg12: memref<16x160xf32, #tpu.memory_space<vmem>>, %arg13: memref<2x8x8xf32, #tpu.memory_space<vmem>>, %arg14: memref<16x128xf32, #tpu.memory_space<vmem>>) attributes {dimension_semantics = [#tpu.dimension_semantics<parallel>], iteration_bounds = array<i64: 1>, scalar_prefetch = 0 : i64, scratch_operands = 3 : i64, tpu.core_type = #tpu.core_type<tc>, window_params = [{transform_indices = @transform_0, window_bounds = array<i64: 16, 128>}, {transform_indices = @transform_1, window_bounds = array<i64: 2, 1, 8>}, {pipeline_mode = #tpu.pipeline_mode<synchronous>, transform_indices = @transform_2, window_bounds = array<i64: 2, 128, 16>}, {pipeline_mode = #tpu.pipeline_mode<synchronous>, transform_indices = @transform_3, window_bounds = array<i64: 2, 1, 16>}, {pipeline_mode = #tpu.pipeline_mode<synchronous>, transform_indices = @transform_4, window_bounds = array<i64: 2, 128, 16>}, {pipeline_mode = #tpu.pipeline_mode<synchronous>, transform_indices = @transform_5, window_bounds = array<i64: 2, 1, 16>}, {pipeline_mode = #tpu.pipeline_mode<synchronous>, transform_indices = @transform_6, window_bounds = array<i64: 8, 160, 8>}, {pipeline_mode = #tpu.pipeline_mode<synchronous>, transform_indices = @transform_7, window_bounds = array<i64: 8, 1, 8>}, {pipeline_mode = #tpu.pipeline_mode<synchronous>, transform_indices = @transform_8, window_bounds = array<i64: 2, 160, 128>}, {pipeline_mode = #tpu.pipeline_mode<synchronous>, transform_indices = @transform_9, window_bounds = array<i64: 1, 128>}, {transform_indices = @transform_10, window_bounds = array<i64: 16, 128>}]} {
    %c0 = arith.constant 0 : index
    %c0_0 = arith.constant 0 : index
    %0 = vector.load %arg1[%c0, %c0_0] : memref<16x128xf32, #tpu.memory_space<vmem>>, vector<16x128xf32>
    %1 = arith.truncf %0 : vector<16x128xf32> to vector<16x128xbf16>
    %c0_1 = arith.constant 0 : index
    %c0_2 = arith.constant 0 : index
    %2 = vector.load %arg12[%c0_1, %c0_2] : memref<16x160xf32, #tpu.memory_space<vmem>>, vector<16x128xf32>
    tpu.vector_store %arg12[%c0_1, %c0_2], %0 {strides = array<i32>} : memref<16x160xf32, #tpu.memory_space<vmem>>, vector<16x128xf32>,
    %c0_3 = arith.constant 0 : index
    %c0_4 = arith.constant 0 : index
    %c0_5 = arith.constant 0 : index
    %3 = vector.load %arg2[%c0_3, %c0_4, %c0_5] : memref<2x1x8xf32, #tpu.memory_space<vmem>>, vector<2x1x8xf32>
    %cst = arith.constant 0.000000e+00 : f32
    %4 = vector.broadcast %cst : f32 to vector<16x128xf32>
    %c0_6 = arith.constant 0 : index
    %c0_7 = arith.constant 0 : index
    %5 = vector.load %arg14[%c0_6, %c0_7] : memref<16x128xf32, #tpu.memory_space<vmem>>, vector<16x128xf32>
    tpu.vector_store %arg14[%c0_6, %c0_7], %4 {strides = array<i32>} : memref<16x128xf32, #tpu.memory_space<vmem>>, vector<16x128xf32>,
    %c0_8 = arith.constant 0 : index
    %c0_9 = arith.constant 0 : index
    %c0_10 = arith.constant 0 : index
    %6 = vector.load %arg3[%c0_8, %c0_9, %c0_10] : memref<2x128x16xbf16, #tpu.memory_space<vmem>>, vector<1x128x16xbf16>
    %7 = vector.shape_cast %6 : vector<1x128x16xbf16> to vector<128x16xbf16>
    %cst_11 = arith.constant dense<0.000000e+00> : vector<16x16xf32>
    %8 = tpu.matmul %1, %7, %cst_11 {dimension_numbers = #tpu.dot_dimension_numbers<[1], [0], [0], [1], [0, 0, 1, 1], [], []>} : vector<16x128xbf16>, vector<128x16xbf16>, vector<16x16xf32> -> vector<16x16xf32>
    %c0_12 = arith.constant 0 : index
    %c0_13 = arith.constant 0 : index
    %c0_14 = arith.constant 0 : index
    %9 = vector.load %arg4[%c0_12, %c0_13, %c0_14] : memref<2x1x16xf32, #tpu.memory_space<vmem>>, vector<1x1x16xf32>
    %10 = vector.shape_cast %9 : vector<1x1x16xf32> to vector<1x16xf32>
    %11 = vector.broadcast %10 : vector<1x16xf32> to vector<16x16xf32>
    %12 = arith.addf %8, %11 : vector<16x16xf32>
    %c0_15 = arith.constant 0 : index
    %c0_16 = arith.constant 0 : index
    %c0_17 = arith.constant 0 : index
    %13 = vector.load %arg5[%c0_15, %c0_16, %c0_17] : memref<2x128x16xbf16, #tpu.memory_space<vmem>>, vector<1x128x16xbf16>
    %14 = vector.shape_cast %13 : vector<1x128x16xbf16> to vector<128x16xbf16>
    %cst_18 = arith.constant dense<0.000000e+00> : vector<16x16xf32>
    %15 = tpu.matmul %1, %14, %cst_18 {dimension_numbers = #tpu.dot_dimension_numbers<[1], [0], [0], [1], [0, 0, 1, 1], [], []>} : vector<16x128xbf16>, vector<128x16xbf16>, vector<16x16xf32> -> vector<16x16xf32>
    %c0_19 = arith.constant 0 : index
    %c0_20 = arith.constant 0 : index
    %c0_21 = arith.constant 0 : index
    %16 = vector.load %arg6[%c0_19, %c0_20, %c0_21] : memref<2x1x16xf32, #tpu.memory_space<vmem>>, vector<1x1x16xf32>
    %17 = vector.shape_cast %16 : vector<1x1x16xf32> to vector<1x16xf32>
    %18 = vector.broadcast %17 : vector<1x16xf32> to vector<16x16xf32>
    %19 = arith.addf %15, %18 : vector<16x16xf32>
    %20 = arith.truncf %12 : vector<16x16xf32> to vector<16x16xbf16>
    %21 = arith.truncf %19 : vector<16x16xf32> to vector<16x16xbf16>
    %22 = vector.extract_strided_slice %20 {offsets = [0, 0], sizes = [8, 16], strides = [1, 1]} : vector<16x16xbf16> to vector<8x16xbf16>
    %23 = vector.extract_strided_slice %21 {offsets = [0, 0], sizes = [8, 16], strides = [1, 1]} : vector<16x16xbf16> to vector<8x16xbf16>
    %cst_22 = arith.constant dense<0.000000e+00> : vector<8x8xf32>
    %24 = tpu.matmul %22, %23, %cst_22 {dimension_numbers = #tpu.dot_dimension_numbers<[1], [1], [0], [0], [0, 0, 1, 0], [], []>} : vector<8x16xbf16>, vector<8x16xbf16>, vector<8x8xf32> -> vector<8x8xf32>
    %cst_23 = arith.constant 2.500000e-01 : f32
    %25 = vector.broadcast %cst_23 : f32 to vector<8x8xf32>
    %26 = arith.mulf %24, %25 : vector<8x8xf32>
    %27 = vector.extract_strided_slice %3 {offsets = [0, 0, 0], sizes = [1, 1, 8], strides = [1, 1, 1]} : vector<2x1x8xf32> to vector<1x1x8xf32>
    %28 = vector.shape_cast %27 : vector<1x1x8xf32> to vector<1x8xf32>
    %cst_24 = arith.constant 0.000000e+00 : f32
    %29 = vector.broadcast %cst_24 : f32 to vector<1x8xf32>
    %30 = arith.cmpf one, %28, %29 : vector<1x8xf32>
    %cst_25 = arith.constant -1.000000e+09 : f32
    %31 = vector.shape_cast %30 : vector<1x8xi1> to vector<1x8xi1>
    %32 = vector.broadcast %31 : vector<1x8xi1> to vector<8x8xi1>
    %33 = vector.broadcast %cst_25 : f32 to vector<8x8xf32>
    %34 = arith.select %32, %33, %26 : vector<8x8xi1>, vector<8x8xf32>
    %cst_26 = arith.constant dense<0xFF800000> : vector<8xf32>
    %35 = vector.multi_reduction <maximumf>, %34, %cst_26 [1] : vector<8x8xf32> to vector<8xf32>
    %36 = vector.shape_cast %35 : vector<8xf32> to vector<8x1xf32>
    %37 = vector.broadcast %36 : vector<8x1xf32> to vector<8x8xf32>
    %38 = arith.subf %34, %37 : vector<8x8xf32>
    %39 = math.exp %38 : vector<8x8xf32>
    %cst_27 = arith.constant dense<0.000000e+00> : vector<8xf32>
    %40 = vector.multi_reduction <add>, %39, %cst_27 [1] : vector<8x8xf32> to vector<8xf32>
    %41 = vector.shape_cast %40 : vector<8xf32> to vector<8x1xf32>
    %42 = tpu.reciprocal %41 {approx = true} : vector<8x1xf32> -> vector<8x1xf32>
    %43 = vector.broadcast %42 : vector<8x1xf32> to vector<8x8xf32>
    %44 = arith.mulf %39, %43 : vector<8x8xf32>
    %c0_28 = arith.constant 0 : index
    %c0_29 = arith.constant 0 : index
    %c0_30 = arith.constant 0 : index
    %45 = vector.load %arg13[%c0_28, %c0_29, %c0_30] : memref<2x8x8xf32, #tpu.memory_space<vmem>>, vector<1x8x8xf32>
    %46 = vector.shape_cast %45 : vector<1x8x8xf32> to vector<8x8xf32>
    %47 = vector.shape_cast %44 : vector<8x8xf32> to vector<1x8x8xf32>
    tpu.vector_store %arg13[%c0_28, %c0_29, %c0_30], %47 {strides = array<i32>} : memref<2x8x8xf32, #tpu.memory_space<vmem>>, vector<1x8x8xf32>,
    %48 = vector.extract_strided_slice %20 {offsets = [8, 0], sizes = [8, 16], strides = [1, 1]} : vector<16x16xbf16> to vector<8x16xbf16>
    %49 = vector.extract_strided_slice %21 {offsets = [8, 0], sizes = [8, 16], strides = [1, 1]} : vector<16x16xbf16> to vector<8x16xbf16>
    %cst_31 = arith.constant dense<0.000000e+00> : vector<8x8xf32>
    %50 = tpu.matmul %48, %49, %cst_31 {dimension_numbers = #tpu.dot_dimension_numbers<[1], [1], [0], [0], [0, 0, 1, 0], [], []>} : vector<8x16xbf16>, vector<8x16xbf16>, vector<8x8xf32> -> vector<8x8xf32>
    %cst_32 = arith.constant 2.500000e-01 : f32
    %51 = vector.broadcast %cst_32 : f32 to vector<8x8xf32>
    %52 = arith.mulf %50, %51 : vector<8x8xf32>
    %53 = vector.extract_strided_slice %3 {offsets = [1, 0, 0], sizes = [1, 1, 8], strides = [1, 1, 1]} : vector<2x1x8xf32> to vector<1x1x8xf32>
    %54 = vector.shape_cast %53 : vector<1x1x8xf32> to vector<1x8xf32>
    %cst_33 = arith.constant 0.000000e+00 : f32
    %55 = vector.broadcast %cst_33 : f32 to vector<1x8xf32>
    %56 = arith.cmpf one, %54, %55 : vector<1x8xf32>
    %cst_34 = arith.constant -1.000000e+09 : f32
    %57 = vector.shape_cast %56 : vector<1x8xi1> to vector<1x8xi1>
    %58 = vector.broadcast %57 : vector<1x8xi1> to vector<8x8xi1>
    %59 = vector.broadcast %cst_34 : f32 to vector<8x8xf32>
    %60 = arith.select %58, %59, %52 : vector<8x8xi1>, vector<8x8xf32>
    %cst_35 = arith.constant dense<0xFF800000> : vector<8xf32>
    %61 = vector.multi_reduction <maximumf>, %60, %cst_35 [1] : vector<8x8xf32> to vector<8xf32>
    %62 = vector.shape_cast %61 : vector<8xf32> to vector<8x1xf32>
    %63 = vector.broadcast %62 : vector<8x1xf32> to vector<8x8xf32>
    %64 = arith.subf %60, %63 : vector<8x8xf32>
    %65 = math.exp %64 : vector<8x8xf32>
    %cst_36 = arith.constant dense<0.000000e+00> : vector<8xf32>
    %66 = vector.multi_reduction <add>, %65, %cst_36 [1] : vector<8x8xf32> to vector<8xf32>
    %67 = vector.shape_cast %66 : vector<8xf32> to vector<8x1xf32>
    %68 = tpu.reciprocal %67 {approx = true} : vector<8x1xf32> -> vector<8x1xf32>
    %69 = vector.broadcast %68 : vector<8x1xf32> to vector<8x8xf32>
    %70 = arith.mulf %65, %69 : vector<8x8xf32>
    %c1 = arith.constant 1 : index
    %c0_37 = arith.constant 0 : index
    %c0_38 = arith.constant 0 : index
    %71 = vector.load %arg13[%c1, %c0_37, %c0_38] : memref<2x8x8xf32, #tpu.memory_space<vmem>>, vector<1x8x8xf32>
    %72 = vector.shape_cast %71 : vector<1x8x8xf32> to vector<8x8xf32>
    %73 = vector.shape_cast %70 : vector<8x8xf32> to vector<1x8x8xf32>
    tpu.vector_store %arg13[%c1, %c0_37, %c0_38], %73 {strides = array<i32>} : memref<2x8x8xf32, #tpu.memory_space<vmem>>, vector<1x8x8xf32>,
    %c0_39 = arith.constant 0 : index
    %c0_40 = arith.constant 0 : index
    %c0_41 = arith.constant 0 : index
    %74 = vector.load %arg7[%c0_39, %c0_40, %c0_41] : memref<8x160x8xbf16, #tpu.memory_space<vmem>>, vector<1x160x8xbf16>
    %75 = vector.shape_cast %74 : vector<1x160x8xbf16> to vector<160x8xbf16>
    %76 = vector.extract_strided_slice %75 {offsets = [0, 0], sizes = [128, 8], strides = [1, 1]} : vector<160x8xbf16> to vector<128x8xbf16>
    %c0_42 = arith.constant 0 : index
    %c0_43 = arith.constant 0 : index
    %77 = vector.load %arg12[%c0_42, %c0_43] : memref<16x160xf32, #tpu.memory_space<vmem>>, vector<16x128xf32>
    %78 = arith.truncf %77 : vector<16x128xf32> to vector<16x128xbf16>
    %cst_44 = arith.constant dense<0.000000e+00> : vector<16x8xf32>
    %79 = tpu.matmul %78, %76, %cst_44 {dimension_numbers = #tpu.dot_dimension_numbers<[1], [0], [0], [1], [0, 0, 1, 1], [], []>} : vector<16x128xbf16>, vector<128x8xbf16>, vector<16x8xf32> -> vector<16x8xf32>
    %c0_45 = arith.constant 0 : index
    %c0_46 = arith.constant 0 : index
    %c0_47 = arith.constant 0 : index
    %80 = vector.load %arg8[%c0_45, %c0_46, %c0_47] : memref<8x1x8xf32, #tpu.memory_space<vmem>>, vector<1x1x8xf32>
    %81 = vector.shape_cast %80 : vector<1x1x8xf32> to vector<1x8xf32>
    %82 = vector.extract_strided_slice %79 {offsets = [0, 0], sizes = [8, 8], strides = [1, 1]} : vector<16x8xf32> to vector<8x8xf32>
    %c0_48 = arith.constant 0 : index
    %c0_49 = arith.constant 0 : index
    %c0_50 = arith.constant 0 : index
    %83 = vector.load %arg13[%c0_48, %c0_49, %c0_50] : memref<2x8x8xf32, #tpu.memory_space<vmem>>, vector<1x8x8xf32>
    %84 = vector.shape_cast %83 : vector<1x8x8xf32> to vector<8x8xf32>
    %85 = arith.truncf %84 : vector<8x8xf32> to vector<8x8xbf16>
    %86 = arith.truncf %82 : vector<8x8xf32> to vector<8x8xbf16>
    %cst_51 = arith.constant dense<0.000000e+00> : vector<8x8xf32>
    %87 = tpu.matmul %85, %86, %cst_51 {dimension_numbers = #tpu.dot_dimension_numbers<[1], [0], [0], [1], [0, 0, 1, 1], [], []>} : vector<8x8xbf16>, vector<8x8xbf16>, vector<8x8xf32> -> vector<8x8xf32>
    %88 = arith.addf %87, %82 : vector<8x8xf32>
    %89 = vector.broadcast %81 : vector<1x8xf32> to vector<8x8xf32>
    %90 = arith.addf %88, %89 : vector<8x8xf32>
    %cst_52 = arith.constant 5.000000e-01 : f32
    %91 = vector.broadcast %cst_52 : f32 to vector<8x8xf32>
    %92 = arith.mulf %90, %91 : vector<8x8xf32>
    %cst_53 = arith.constant 0.000000e+00 : f32
    %93 = vector.broadcast %cst_53 : f32 to vector<8x8xf32>
    %94 = arith.maximumf %92, %93 : vector<8x8xf32>
    %c0_54 = arith.constant 0 : index
    %c128 = arith.constant 128 : index
    %95 = vector.load %arg12[%c0_54, %c128] : memref<16x160xf32, #tpu.memory_space<vmem>>, vector<8x8xf32>
    tpu.vector_store %arg12[%c0_54, %c128], %94 {strides = array<i32>} : memref<16x160xf32, #tpu.memory_space<vmem>>, vector<8x8xf32>,
    %96 = vector.extract_strided_slice %79 {offsets = [8, 0], sizes = [8, 8], strides = [1, 1]} : vector<16x8xf32> to vector<8x8xf32>
    %c1_55 = arith.constant 1 : index
    %c0_56 = arith.constant 0 : index
    %c0_57 = arith.constant 0 : index
    %97 = vector.load %arg13[%c1_55, %c0_56, %c0_57] : memref<2x8x8xf32, #tpu.memory_space<vmem>>, vector<1x8x8xf32>
    %98 = vector.shape_cast %97 : vector<1x8x8xf32> to vector<8x8xf32>
    %99 = arith.truncf %98 : vector<8x8xf32> to vector<8x8xbf16>
    %100 = arith.truncf %96 : vector<8x8xf32> to vector<8x8xbf16>
    %cst_58 = arith.constant dense<0.000000e+00> : vector<8x8xf32>
    %101 = tpu.matmul %99, %100, %cst_58 {dimension_numbers = #tpu.dot_dimension_numbers<[1], [0], [0], [1], [0, 0, 1, 1], [], []>} : vector<8x8xbf16>, vector<8x8xbf16>, vector<8x8xf32> -> vector<8x8xf32>
    %102 = arith.addf %101, %96 : vector<8x8xf32>
    %103 = vector.broadcast %81 : vector<1x8xf32> to vector<8x8xf32>
    %104 = arith.addf %102, %103 : vector<8x8xf32>
    %cst_59 = arith.constant 5.000000e-01 : f32
    %105 = vector.broadcast %cst_59 : f32 to vector<8x8xf32>
    %106 = arith.mulf %104, %105 : vector<8x8xf32>
    %cst_60 = arith.constant 0.000000e+00 : f32
    %107 = vector.broadcast %cst_60 : f32 to vector<8x8xf32>
    %108 = arith.maximumf %106, %107 : vector<8x8xf32>
    %c8 = arith.constant 8 : index
    %c128_61 = arith.constant 128 : index
    %109 = vector.load %arg12[%c8, %c128_61] : memref<16x160xf32, #tpu.memory_space<vmem>>, vector<8x8xf32>
    tpu.vector_store %arg12[%c8, %c128_61], %108 {strides = array<i32>} : memref<16x160xf32, #tpu.memory_space<vmem>>, vector<8x8xf32>,
    %c1_62 = arith.constant 1 : index
    %c0_63 = arith.constant 0 : index
    %c0_64 = arith.constant 0 : index
    %110 = vector.load %arg7[%c1_62, %c0_63, %c0_64] : memref<8x160x8xbf16, #tpu.memory_space<vmem>>, vector<1x160x8xbf16>
    %111 = vector.shape_cast %110 : vector<1x160x8xbf16> to vector<160x8xbf16>
    %112 = vector.extract_strided_slice %111 {offsets = [0, 0], sizes = [136, 8], strides = [1, 1]} : vector<160x8xbf16> to vector<136x8xbf16>
    %c0_65 = arith.constant 0 : index
    %c0_66 = arith.constant 0 : index
    %113 = vector.load %arg12[%c0_65, %c0_66] : memref<16x160xf32, #tpu.memory_space<vmem>>, vector<16x136xf32>
    %114 = arith.truncf %113 : vector<16x136xf32> to vector<16x136xbf16>
    %cst_67 = arith.constant dense<0.000000e+00> : vector<16x8xf32>
    %115 = tpu.matmul %114, %112, %cst_67 {dimension_numbers = #tpu.dot_dimension_numbers<[1], [0], [0], [1], [0, 0, 1, 1], [], []>} : vector<16x136xbf16>, vector<136x8xbf16>, vector<16x8xf32> -> vector<16x8xf32>
    %c1_68 = arith.constant 1 : index
    %c0_69 = arith.constant 0 : index
    %c0_70 = arith.constant 0 : index
    %116 = vector.load %arg8[%c1_68, %c0_69, %c0_70] : memref<8x1x8xf32, #tpu.memory_space<vmem>>, vector<1x1x8xf32>
    %117 = vector.shape_cast %116 : vector<1x1x8xf32> to vector<1x8xf32>
    %118 = vector.extract_strided_slice %115 {offsets = [0, 0], sizes = [8, 8], strides = [1, 1]} : vector<16x8xf32> to vector<8x8xf32>
    %c0_71 = arith.constant 0 : index
    %c0_72 = arith.constant 0 : index
    %c0_73 = arith.constant 0 : index
    %119 = vector.load %arg13[%c0_71, %c0_72, %c0_73] : memref<2x8x8xf32, #tpu.memory_space<vmem>>, vector<1x8x8xf32>
    %120 = vector.shape_cast %119 : vector<1x8x8xf32> to vector<8x8xf32>
    %121 = arith.truncf %120 : vector<8x8xf32> to vector<8x8xbf16>
    %122 = arith.truncf %118 : vector<8x8xf32> to vector<8x8xbf16>
    %cst_74 = arith.constant dense<0.000000e+00> : vector<8x8xf32>
    %123 = tpu.matmul %121, %122, %cst_74 {dimension_numbers = #tpu.dot_dimension_numbers<[1], [0], [0], [1], [0, 0, 1, 1], [], []>} : vector<8x8xbf16>, vector<8x8xbf16>, vector<8x8xf32> -> vector<8x8xf32>
    %124 = arith.addf %123, %118 : vector<8x8xf32>
    %125 = vector.broadcast %117 : vector<1x8xf32> to vector<8x8xf32>
    %126 = arith.addf %124, %125 : vector<8x8xf32>
    %cst_75 = arith.constant 5.000000e-01 : f32
    %127 = vector.broadcast %cst_75 : f32 to vector<8x8xf32>
    %128 = arith.mulf %126, %127 : vector<8x8xf32>
    %cst_76 = arith.constant 0.000000e+00 : f32
    %129 = vector.broadcast %cst_76 : f32 to vector<8x8xf32>
    %130 = arith.maximumf %128, %129 : vector<8x8xf32>
    %c0_77 = arith.constant 0 : index
    %c136 = arith.constant 136 : index
    %131 = vector.load %arg12[%c0_77, %c136] : memref<16x160xf32, #tpu.memory_space<vmem>>, vector<8x8xf32>
    tpu.vector_store %arg12[%c0_77, %c136], %130 {strides = array<i32>} : memref<16x160xf32, #tpu.memory_space<vmem>>, vector<8x8xf32>,
    %132 = vector.extract_strided_slice %115 {offsets = [8, 0], sizes = [8, 8], strides = [1, 1]} : vector<16x8xf32> to vector<8x8xf32>
    %c1_78 = arith.constant 1 : index
    %c0_79 = arith.constant 0 : index
    %c0_80 = arith.constant 0 : index
    %133 = vector.load %arg13[%c1_78, %c0_79, %c0_80] : memref<2x8x8xf32, #tpu.memory_space<vmem>>, vector<1x8x8xf32>
    %134 = vector.shape_cast %133 : vector<1x8x8xf32> to vector<8x8xf32>
    %135 = arith.truncf %134 : vector<8x8xf32> to vector<8x8xbf16>
    %136 = arith.truncf %132 : vector<8x8xf32> to vector<8x8xbf16>
    %cst_81 = arith.constant dense<0.000000e+00> : vector<8x8xf32>
    %137 = tpu.matmul %135, %136, %cst_81 {dimension_numbers = #tpu.dot_dimension_numbers<[1], [0], [0], [1], [0, 0, 1, 1], [], []>} : vector<8x8xbf16>, vector<8x8xbf16>, vector<8x8xf32> -> vector<8x8xf32>
    %138 = arith.addf %137, %132 : vector<8x8xf32>
    %139 = vector.broadcast %117 : vector<1x8xf32> to vector<8x8xf32>
    %140 = arith.addf %138, %139 : vector<8x8xf32>
    %cst_82 = arith.constant 5.000000e-01 : f32
    %141 = vector.broadcast %cst_82 : f32 to vector<8x8xf32>
    %142 = arith.mulf %140, %141 : vector<8x8xf32>
    %cst_83 = arith.constant 0.000000e+00 : f32
    %143 = vector.broadcast %cst_83 : f32 to vector<8x8xf32>
    %144 = arith.maximumf %142, %143 : vector<8x8xf32>
    %c8_84 = arith.constant 8 : index
    %c136_85 = arith.constant 136 : index
    %145 = vector.load %arg12[%c8_84, %c136_85] : memref<16x160xf32, #tpu.memory_space<vmem>>, vector<8x8xf32>
    tpu.vector_store %arg12[%c8_84, %c136_85], %144 {strides = array<i32>} : memref<16x160xf32, #tpu.memory_space<vmem>>, vector<8x8xf32>,
    %c2 = arith.constant 2 : index
    %c0_86 = arith.constant 0 : index
    %c0_87 = arith.constant 0 : index
    %146 = vector.load %arg7[%c2, %c0_86, %c0_87] : memref<8x160x8xbf16, #tpu.memory_space<vmem>>, vector<1x160x8xbf16>
    %147 = vector.shape_cast %146 : vector<1x160x8xbf16> to vector<160x8xbf16>
    %148 = vector.extract_strided_slice %147 {offsets = [0, 0], sizes = [144, 8], strides = [1, 1]} : vector<160x8xbf16> to vector<144x8xbf16>
    %c0_88 = arith.constant 0 : index
    %c0_89 = arith.constant 0 : index
    %149 = vector.load %arg12[%c0_88, %c0_89] : memref<16x160xf32, #tpu.memory_space<vmem>>, vector<16x144xf32>
    %150 = arith.truncf %149 : vector<16x144xf32> to vector<16x144xbf16>
    %cst_90 = arith.constant dense<0.000000e+00> : vector<16x8xf32>
    %151 = tpu.matmul %150, %148, %cst_90 {dimension_numbers = #tpu.dot_dimension_numbers<[1], [0], [0], [1], [0, 0, 1, 1], [], []>} : vector<16x144xbf16>, vector<144x8xbf16>, vector<16x8xf32> -> vector<16x8xf32>
    %c2_91 = arith.constant 2 : index
    %c0_92 = arith.constant 0 : index
    %c0_93 = arith.constant 0 : index
    %152 = vector.load %arg8[%c2_91, %c0_92, %c0_93] : memref<8x1x8xf32, #tpu.memory_space<vmem>>, vector<1x1x8xf32>
    %153 = vector.shape_cast %152 : vector<1x1x8xf32> to vector<1x8xf32>
    %154 = vector.extract_strided_slice %151 {offsets = [0, 0], sizes = [8, 8], strides = [1, 1]} : vector<16x8xf32> to vector<8x8xf32>
    %c0_94 = arith.constant 0 : index
    %c0_95 = arith.constant 0 : index
    %c0_96 = arith.constant 0 : index
    %155 = vector.load %arg13[%c0_94, %c0_95, %c0_96] : memref<2x8x8xf32, #tpu.memory_space<vmem>>, vector<1x8x8xf32>
    %156 = vector.shape_cast %155 : vector<1x8x8xf32> to vector<8x8xf32>
    %157 = arith.truncf %156 : vector<8x8xf32> to vector<8x8xbf16>
    %158 = arith.truncf %154 : vector<8x8xf32> to vector<8x8xbf16>
    %cst_97 = arith.constant dense<0.000000e+00> : vector<8x8xf32>
    %159 = tpu.matmul %157, %158, %cst_97 {dimension_numbers = #tpu.dot_dimension_numbers<[1], [0], [0], [1], [0, 0, 1, 1], [], []>} : vector<8x8xbf16>, vector<8x8xbf16>, vector<8x8xf32> -> vector<8x8xf32>
    %160 = arith.addf %159, %154 : vector<8x8xf32>
    %161 = vector.broadcast %153 : vector<1x8xf32> to vector<8x8xf32>
    %162 = arith.addf %160, %161 : vector<8x8xf32>
    %cst_98 = arith.constant 5.000000e-01 : f32
    %163 = vector.broadcast %cst_98 : f32 to vector<8x8xf32>
    %164 = arith.mulf %162, %163 : vector<8x8xf32>
    %cst_99 = arith.constant 0.000000e+00 : f32
    %165 = vector.broadcast %cst_99 : f32 to vector<8x8xf32>
    %166 = arith.maximumf %164, %165 : vector<8x8xf32>
    %c0_100 = arith.constant 0 : index
    %c144 = arith.constant 144 : index
    %167 = vector.load %arg12[%c0_100, %c144] : memref<16x160xf32, #tpu.memory_space<vmem>>, vector<8x8xf32>
    tpu.vector_store %arg12[%c0_100, %c144], %166 {strides = array<i32>} : memref<16x160xf32, #tpu.memory_space<vmem>>, vector<8x8xf32>,
    %168 = vector.extract_strided_slice %151 {offsets = [8, 0], sizes = [8, 8], strides = [1, 1]} : vector<16x8xf32> to vector<8x8xf32>
    %c1_101 = arith.constant 1 : index
    %c0_102 = arith.constant 0 : index
    %c0_103 = arith.constant 0 : index
    %169 = vector.load %arg13[%c1_101, %c0_102, %c0_103] : memref<2x8x8xf32, #tpu.memory_space<vmem>>, vector<1x8x8xf32>
    %170 = vector.shape_cast %169 : vector<1x8x8xf32> to vector<8x8xf32>
    %171 = arith.truncf %170 : vector<8x8xf32> to vector<8x8xbf16>
    %172 = arith.truncf %168 : vector<8x8xf32> to vector<8x8xbf16>
    %cst_104 = arith.constant dense<0.000000e+00> : vector<8x8xf32>
    %173 = tpu.matmul %171, %172, %cst_104 {dimension_numbers = #tpu.dot_dimension_numbers<[1], [0], [0], [1], [0, 0, 1, 1], [], []>} : vector<8x8xbf16>, vector<8x8xbf16>, vector<8x8xf32> -> vector<8x8xf32>
    %174 = arith.addf %173, %168 : vector<8x8xf32>
    %175 = vector.broadcast %153 : vector<1x8xf32> to vector<8x8xf32>
    %176 = arith.addf %174, %175 : vector<8x8xf32>
    %cst_105 = arith.constant 5.000000e-01 : f32
    %177 = vector.broadcast %cst_105 : f32 to vector<8x8xf32>
    %178 = arith.mulf %176, %177 : vector<8x8xf32>
    %cst_106 = arith.constant 0.000000e+00 : f32
    %179 = vector.broadcast %cst_106 : f32 to vector<8x8xf32>
    %180 = arith.maximumf %178, %179 : vector<8x8xf32>
    %c8_107 = arith.constant 8 : index
    %c144_108 = arith.constant 144 : index
    %181 = vector.load %arg12[%c8_107, %c144_108] : memref<16x160xf32, #tpu.memory_space<vmem>>, vector<8x8xf32>
    tpu.vector_store %arg12[%c8_107, %c144_108], %180 {strides = array<i32>} : memref<16x160xf32, #tpu.memory_space<vmem>>, vector<8x8xf32>,
    %c3 = arith.constant 3 : index
    %c0_109 = arith.constant 0 : index
    %c0_110 = arith.constant 0 : index
    %182 = vector.load %arg7[%c3, %c0_109, %c0_110] : memref<8x160x8xbf16, #tpu.memory_space<vmem>>, vector<1x160x8xbf16>
    %183 = vector.shape_cast %182 : vector<1x160x8xbf16> to vector<160x8xbf16>
    %184 = vector.extract_strided_slice %183 {offsets = [0, 0], sizes = [152, 8], strides = [1, 1]} : vector<160x8xbf16> to vector<152x8xbf16>
    %c0_111 = arith.constant 0 : index
    %c0_112 = arith.constant 0 : index
    %185 = vector.load %arg12[%c0_111, %c0_112] : memref<16x160xf32, #tpu.memory_space<vmem>>, vector<16x152xf32>
    %186 = arith.truncf %185 : vector<16x152xf32> to vector<16x152xbf16>
    %cst_113 = arith.constant dense<0.000000e+00> : vector<16x8xf32>
    %187 = tpu.matmul %186, %184, %cst_113 {dimension_numbers = #tpu.dot_dimension_numbers<[1], [0], [0], [1], [0, 0, 1, 1], [], []>} : vector<16x152xbf16>, vector<152x8xbf16>, vector<16x8xf32> -> vector<16x8xf32>
    %c3_114 = arith.constant 3 : index
    %c0_115 = arith.constant 0 : index
    %c0_116 = arith.constant 0 : index
    %188 = vector.load %arg8[%c3_114, %c0_115, %c0_116] : memref<8x1x8xf32, #tpu.memory_space<vmem>>, vector<1x1x8xf32>
    %189 = vector.shape_cast %188 : vector<1x1x8xf32> to vector<1x8xf32>
    %190 = vector.extract_strided_slice %187 {offsets = [0, 0], sizes = [8, 8], strides = [1, 1]} : vector<16x8xf32> to vector<8x8xf32>
    %c0_117 = arith.constant 0 : index
    %c0_118 = arith.constant 0 : index
    %c0_119 = arith.constant 0 : index
    %191 = vector.load %arg13[%c0_117, %c0_118, %c0_119] : memref<2x8x8xf32, #tpu.memory_space<vmem>>, vector<1x8x8xf32>
    %192 = vector.shape_cast %191 : vector<1x8x8xf32> to vector<8x8xf32>
    %193 = arith.truncf %192 : vector<8x8xf32> to vector<8x8xbf16>
    %194 = arith.truncf %190 : vector<8x8xf32> to vector<8x8xbf16>
    %cst_120 = arith.constant dense<0.000000e+00> : vector<8x8xf32>
    %195 = tpu.matmul %193, %194, %cst_120 {dimension_numbers = #tpu.dot_dimension_numbers<[1], [0], [0], [1], [0, 0, 1, 1], [], []>} : vector<8x8xbf16>, vector<8x8xbf16>, vector<8x8xf32> -> vector<8x8xf32>
    %196 = arith.addf %195, %190 : vector<8x8xf32>
    %197 = vector.broadcast %189 : vector<1x8xf32> to vector<8x8xf32>
    %198 = arith.addf %196, %197 : vector<8x8xf32>
    %cst_121 = arith.constant 5.000000e-01 : f32
    %199 = vector.broadcast %cst_121 : f32 to vector<8x8xf32>
    %200 = arith.mulf %198, %199 : vector<8x8xf32>
    %cst_122 = arith.constant 0.000000e+00 : f32
    %201 = vector.broadcast %cst_122 : f32 to vector<8x8xf32>
    %202 = arith.maximumf %200, %201 : vector<8x8xf32>
    %c0_123 = arith.constant 0 : index
    %c152 = arith.constant 152 : index
    %203 = vector.load %arg12[%c0_123, %c152] : memref<16x160xf32, #tpu.memory_space<vmem>>, vector<8x8xf32>
    tpu.vector_store %arg12[%c0_123, %c152], %202 {strides = array<i32>} : memref<16x160xf32, #tpu.memory_space<vmem>>, vector<8x8xf32>,
    %204 = vector.extract_strided_slice %187 {offsets = [8, 0], sizes = [8, 8], strides = [1, 1]} : vector<16x8xf32> to vector<8x8xf32>
    %c1_124 = arith.constant 1 : index
    %c0_125 = arith.constant 0 : index
    %c0_126 = arith.constant 0 : index
    %205 = vector.load %arg13[%c1_124, %c0_125, %c0_126] : memref<2x8x8xf32, #tpu.memory_space<vmem>>, vector<1x8x8xf32>
    %206 = vector.shape_cast %205 : vector<1x8x8xf32> to vector<8x8xf32>
    %207 = arith.truncf %206 : vector<8x8xf32> to vector<8x8xbf16>
    %208 = arith.truncf %204 : vector<8x8xf32> to vector<8x8xbf16>
    %cst_127 = arith.constant dense<0.000000e+00> : vector<8x8xf32>
    %209 = tpu.matmul %207, %208, %cst_127 {dimension_numbers = #tpu.dot_dimension_numbers<[1], [0], [0], [1], [0, 0, 1, 1], [], []>} : vector<8x8xbf16>, vector<8x8xbf16>, vector<8x8xf32> -> vector<8x8xf32>
    %210 = arith.addf %209, %204 : vector<8x8xf32>
    %211 = vector.broadcast %189 : vector<1x8xf32> to vector<8x8xf32>
    %212 = arith.addf %210, %211 : vector<8x8xf32>
    %cst_128 = arith.constant 5.000000e-01 : f32
    %213 = vector.broadcast %cst_128 : f32 to vector<8x8xf32>
    %214 = arith.mulf %212, %213 : vector<8x8xf32>
    %cst_129 = arith.constant 0.000000e+00 : f32
    %215 = vector.broadcast %cst_129 : f32 to vector<8x8xf32>
    %216 = arith.maximumf %214, %215 : vector<8x8xf32>
    %c8_130 = arith.constant 8 : index
    %c152_131 = arith.constant 152 : index
    %217 = vector.load %arg12[%c8_130, %c152_131] : memref<16x160xf32, #tpu.memory_space<vmem>>, vector<8x8xf32>
    tpu.vector_store %arg12[%c8_130, %c152_131], %216 {strides = array<i32>} : memref<16x160xf32, #tpu.memory_space<vmem>>, vector<8x8xf32>,
    %c0_132 = arith.constant 0 : index
    %c0_133 = arith.constant 0 : index
    %218 = vector.load %arg14[%c0_132, %c0_133] : memref<16x128xf32, #tpu.memory_space<vmem>>, vector<16x128xf32>
    %c0_134 = arith.constant 0 : index
    %c0_135 = arith.constant 0 : index
    %219 = vector.load %arg12[%c0_134, %c0_135] : memref<16x160xf32, #tpu.memory_space<vmem>>, vector<16x160xf32>
    %220 = arith.truncf %219 : vector<16x160xf32> to vector<16x160xbf16>
    %c0_136 = arith.constant 0 : index
    %c0_137 = arith.constant 0 : index
    %c0_138 = arith.constant 0 : index
    %221 = vector.load %arg9[%c0_136, %c0_137, %c0_138] : memref<2x160x128xbf16, #tpu.memory_space<vmem>>, vector<1x160x128xbf16>
    %222 = vector.shape_cast %221 : vector<1x160x128xbf16> to vector<160x128xbf16>
    %cst_139 = arith.constant dense<0.000000e+00> : vector<16x128xf32>
    %223 = tpu.matmul %220, %222, %cst_139 {dimension_numbers = #tpu.dot_dimension_numbers<[1], [0], [0], [1], [0, 0, 1, 1], [], []>} : vector<16x160xbf16>, vector<160x128xbf16>, vector<16x128xf32> -> vector<16x128xf32>
    %224 = arith.addf %218, %223 : vector<16x128xf32>
    %c0_140 = arith.constant 0 : index
    %c0_141 = arith.constant 0 : index
    %225 = vector.load %arg14[%c0_140, %c0_141] : memref<16x128xf32, #tpu.memory_space<vmem>>, vector<16x128xf32>
    tpu.vector_store %arg14[%c0_140, %c0_141], %224 {strides = array<i32>} : memref<16x128xf32, #tpu.memory_space<vmem>>, vector<16x128xf32>,
    %c1_142 = arith.constant 1 : index
    %c0_143 = arith.constant 0 : index
    %c0_144 = arith.constant 0 : index
    %226 = vector.load %arg3[%c1_142, %c0_143, %c0_144] : memref<2x128x16xbf16, #tpu.memory_space<vmem>>, vector<1x128x16xbf16>
    %227 = vector.shape_cast %226 : vector<1x128x16xbf16> to vector<128x16xbf16>
    %cst_145 = arith.constant dense<0.000000e+00> : vector<16x16xf32>
    %228 = tpu.matmul %1, %227, %cst_145 {dimension_numbers = #tpu.dot_dimension_numbers<[1], [0], [0], [1], [0, 0, 1, 1], [], []>} : vector<16x128xbf16>, vector<128x16xbf16>, vector<16x16xf32> -> vector<16x16xf32>
    %c1_146 = arith.constant 1 : index
    %c0_147 = arith.constant 0 : index
    %c0_148 = arith.constant 0 : index
    %229 = vector.load %arg4[%c1_146, %c0_147, %c0_148] : memref<2x1x16xf32, #tpu.memory_space<vmem>>, vector<1x1x16xf32>
    %230 = vector.shape_cast %229 : vector<1x1x16xf32> to vector<1x16xf32>
    %231 = vector.broadcast %230 : vector<1x16xf32> to vector<16x16xf32>
    %232 = arith.addf %228, %231 : vector<16x16xf32>
    %c1_149 = arith.constant 1 : index
    %c0_150 = arith.constant 0 : index
    %c0_151 = arith.constant 0 : index
    %233 = vector.load %arg5[%c1_149, %c0_150, %c0_151] : memref<2x128x16xbf16, #tpu.memory_space<vmem>>, vector<1x128x16xbf16>
    %234 = vector.shape_cast %233 : vector<1x128x16xbf16> to vector<128x16xbf16>
    %cst_152 = arith.constant dense<0.000000e+00> : vector<16x16xf32>
    %235 = tpu.matmul %1, %234, %cst_152 {dimension_numbers = #tpu.dot_dimension_numbers<[1], [0], [0], [1], [0, 0, 1, 1], [], []>} : vector<16x128xbf16>, vector<128x16xbf16>, vector<16x16xf32> -> vector<16x16xf32>
    %c1_153 = arith.constant 1 : index
    %c0_154 = arith.constant 0 : index
    %c0_155 = arith.constant 0 : index
    %236 = vector.load %arg6[%c1_153, %c0_154, %c0_155] : memref<2x1x16xf32, #tpu.memory_space<vmem>>, vector<1x1x16xf32>
    %237 = vector.shape_cast %236 : vector<1x1x16xf32> to vector<1x16xf32>
    %238 = vector.broadcast %237 : vector<1x16xf32> to vector<16x16xf32>
    %239 = arith.addf %235, %238 : vector<16x16xf32>
    %240 = arith.truncf %232 : vector<16x16xf32> to vector<16x16xbf16>
    %241 = arith.truncf %239 : vector<16x16xf32> to vector<16x16xbf16>
    %242 = vector.extract_strided_slice %240 {offsets = [0, 0], sizes = [8, 16], strides = [1, 1]} : vector<16x16xbf16> to vector<8x16xbf16>
    %243 = vector.extract_strided_slice %241 {offsets = [0, 0], sizes = [8, 16], strides = [1, 1]} : vector<16x16xbf16> to vector<8x16xbf16>
    %cst_156 = arith.constant dense<0.000000e+00> : vector<8x8xf32>
    %244 = tpu.matmul %242, %243, %cst_156 {dimension_numbers = #tpu.dot_dimension_numbers<[1], [1], [0], [0], [0, 0, 1, 0], [], []>} : vector<8x16xbf16>, vector<8x16xbf16>, vector<8x8xf32> -> vector<8x8xf32>
    %cst_157 = arith.constant 2.500000e-01 : f32
    %245 = vector.broadcast %cst_157 : f32 to vector<8x8xf32>
    %246 = arith.mulf %244, %245 : vector<8x8xf32>
    %247 = vector.extract_strided_slice %3 {offsets = [0, 0, 0], sizes = [1, 1, 8], strides = [1, 1, 1]} : vector<2x1x8xf32> to vector<1x1x8xf32>
    %248 = vector.shape_cast %247 : vector<1x1x8xf32> to vector<1x8xf32>
    %cst_158 = arith.constant 0.000000e+00 : f32
    %249 = vector.broadcast %cst_158 : f32 to vector<1x8xf32>
    %250 = arith.cmpf one, %248, %249 : vector<1x8xf32>
    %cst_159 = arith.constant -1.000000e+09 : f32
    %251 = vector.shape_cast %250 : vector<1x8xi1> to vector<1x8xi1>
    %252 = vector.broadcast %251 : vector<1x8xi1> to vector<8x8xi1>
    %253 = vector.broadcast %cst_159 : f32 to vector<8x8xf32>
    %254 = arith.select %252, %253, %246 : vector<8x8xi1>, vector<8x8xf32>
    %cst_160 = arith.constant dense<0xFF800000> : vector<8xf32>
    %255 = vector.multi_reduction <maximumf>, %254, %cst_160 [1] : vector<8x8xf32> to vector<8xf32>
    %256 = vector.shape_cast %255 : vector<8xf32> to vector<8x1xf32>
    %257 = vector.broadcast %256 : vector<8x1xf32> to vector<8x8xf32>
    %258 = arith.subf %254, %257 : vector<8x8xf32>
    %259 = math.exp %258 : vector<8x8xf32>
    %cst_161 = arith.constant dense<0.000000e+00> : vector<8xf32>
    %260 = vector.multi_reduction <add>, %259, %cst_161 [1] : vector<8x8xf32> to vector<8xf32>
    %261 = vector.shape_cast %260 : vector<8xf32> to vector<8x1xf32>
    %262 = tpu.reciprocal %261 {approx = true} : vector<8x1xf32> -> vector<8x1xf32>
    %263 = vector.broadcast %262 : vector<8x1xf32> to vector<8x8xf32>
    %264 = arith.mulf %259, %263 : vector<8x8xf32>
    %c0_162 = arith.constant 0 : index
    %c0_163 = arith.constant 0 : index
    %c0_164 = arith.constant 0 : index
    %265 = vector.load %arg13[%c0_162, %c0_163, %c0_164] : memref<2x8x8xf32, #tpu.memory_space<vmem>>, vector<1x8x8xf32>
    %266 = vector.shape_cast %265 : vector<1x8x8xf32> to vector<8x8xf32>
    %267 = vector.shape_cast %264 : vector<8x8xf32> to vector<1x8x8xf32>
    tpu.vector_store %arg13[%c0_162, %c0_163, %c0_164], %267 {strides = array<i32>} : memref<2x8x8xf32, #tpu.memory_space<vmem>>, vector<1x8x8xf32>,
    %268 = vector.extract_strided_slice %240 {offsets = [8, 0], sizes = [8, 16], strides = [1, 1]} : vector<16x16xbf16> to vector<8x16xbf16>
    %269 = vector.extract_strided_slice %241 {offsets = [8, 0], sizes = [8, 16], strides = [1, 1]} : vector<16x16xbf16> to vector<8x16xbf16>
    %cst_165 = arith.constant dense<0.000000e+00> : vector<8x8xf32>
    %270 = tpu.matmul %268, %269, %cst_165 {dimension_numbers = #tpu.dot_dimension_numbers<[1], [1], [0], [0], [0, 0, 1, 0], [], []>} : vector<8x16xbf16>, vector<8x16xbf16>, vector<8x8xf32> -> vector<8x8xf32>
    %cst_166 = arith.constant 2.500000e-01 : f32
    %271 = vector.broadcast %cst_166 : f32 to vector<8x8xf32>
    %272 = arith.mulf %270, %271 : vector<8x8xf32>
    %273 = vector.extract_strided_slice %3 {offsets = [1, 0, 0], sizes = [1, 1, 8], strides = [1, 1, 1]} : vector<2x1x8xf32> to vector<1x1x8xf32>
    %274 = vector.shape_cast %273 : vector<1x1x8xf32> to vector<1x8xf32>
    %cst_167 = arith.constant 0.000000e+00 : f32
    %275 = vector.broadcast %cst_167 : f32 to vector<1x8xf32>
    %276 = arith.cmpf one, %274, %275 : vector<1x8xf32>
    %cst_168 = arith.constant -1.000000e+09 : f32
    %277 = vector.shape_cast %276 : vector<1x8xi1> to vector<1x8xi1>
    %278 = vector.broadcast %277 : vector<1x8xi1> to vector<8x8xi1>
    %279 = vector.broadcast %cst_168 : f32 to vector<8x8xf32>
    %280 = arith.select %278, %279, %272 : vector<8x8xi1>, vector<8x8xf32>
    %cst_169 = arith.constant dense<0xFF800000> : vector<8xf32>
    %281 = vector.multi_reduction <maximumf>, %280, %cst_169 [1] : vector<8x8xf32> to vector<8xf32>
    %282 = vector.shape_cast %281 : vector<8xf32> to vector<8x1xf32>
    %283 = vector.broadcast %282 : vector<8x1xf32> to vector<8x8xf32>
    %284 = arith.subf %280, %283 : vector<8x8xf32>
    %285 = math.exp %284 : vector<8x8xf32>
    %cst_170 = arith.constant dense<0.000000e+00> : vector<8xf32>
    %286 = vector.multi_reduction <add>, %285, %cst_170 [1] : vector<8x8xf32> to vector<8xf32>
    %287 = vector.shape_cast %286 : vector<8xf32> to vector<8x1xf32>
    %288 = tpu.reciprocal %287 {approx = true} : vector<8x1xf32> -> vector<8x1xf32>
    %289 = vector.broadcast %288 : vector<8x1xf32> to vector<8x8xf32>
    %290 = arith.mulf %285, %289 : vector<8x8xf32>
    %c1_171 = arith.constant 1 : index
    %c0_172 = arith.constant 0 : index
    %c0_173 = arith.constant 0 : index
    %291 = vector.load %arg13[%c1_171, %c0_172, %c0_173] : memref<2x8x8xf32, #tpu.memory_space<vmem>>, vector<1x8x8xf32>
    %292 = vector.shape_cast %291 : vector<1x8x8xf32> to vector<8x8xf32>
    %293 = vector.shape_cast %290 : vector<8x8xf32> to vector<1x8x8xf32>
    tpu.vector_store %arg13[%c1_171, %c0_172, %c0_173], %293 {strides = array<i32>} : memref<2x8x8xf32, #tpu.memory_space<vmem>>, vector<1x8x8xf32>,
    %c4 = arith.constant 4 : index
    %c0_174 = arith.constant 0 : index
    %c0_175 = arith.constant 0 : index
    %294 = vector.load %arg7[%c4, %c0_174, %c0_175] : memref<8x160x8xbf16, #tpu.memory_space<vmem>>, vector<1x160x8xbf16>
    %295 = vector.shape_cast %294 : vector<1x160x8xbf16> to vector<160x8xbf16>
    %296 = vector.extract_strided_slice %295 {offsets = [0, 0], sizes = [128, 8], strides = [1, 1]} : vector<160x8xbf16> to vector<128x8xbf16>
    %c0_176 = arith.constant 0 : index
    %c0_177 = arith.constant 0 : index
    %297 = vector.load %arg12[%c0_176, %c0_177] : memref<16x160xf32, #tpu.memory_space<vmem>>, vector<16x128xf32>
    %298 = arith.truncf %297 : vector<16x128xf32> to vector<16x128xbf16>
    %cst_178 = arith.constant dense<0.000000e+00> : vector<16x8xf32>
    %299 = tpu.matmul %298, %296, %cst_178 {dimension_numbers = #tpu.dot_dimension_numbers<[1], [0], [0], [1], [0, 0, 1, 1], [], []>} : vector<16x128xbf16>, vector<128x8xbf16>, vector<16x8xf32> -> vector<16x8xf32>
    %c4_179 = arith.constant 4 : index
    %c0_180 = arith.constant 0 : index
    %c0_181 = arith.constant 0 : index
    %300 = vector.load %arg8[%c4_179, %c0_180, %c0_181] : memref<8x1x8xf32, #tpu.memory_space<vmem>>, vector<1x1x8xf32>
    %301 = vector.shape_cast %300 : vector<1x1x8xf32> to vector<1x8xf32>
    %302 = vector.extract_strided_slice %299 {offsets = [0, 0], sizes = [8, 8], strides = [1, 1]} : vector<16x8xf32> to vector<8x8xf32>
    %c0_182 = arith.constant 0 : index
    %c0_183 = arith.constant 0 : index
    %c0_184 = arith.constant 0 : index
    %303 = vector.load %arg13[%c0_182, %c0_183, %c0_184] : memref<2x8x8xf32, #tpu.memory_space<vmem>>, vector<1x8x8xf32>
    %304 = vector.shape_cast %303 : vector<1x8x8xf32> to vector<8x8xf32>
    %305 = arith.truncf %304 : vector<8x8xf32> to vector<8x8xbf16>
    %306 = arith.truncf %302 : vector<8x8xf32> to vector<8x8xbf16>
    %cst_185 = arith.constant dense<0.000000e+00> : vector<8x8xf32>
    %307 = tpu.matmul %305, %306, %cst_185 {dimension_numbers = #tpu.dot_dimension_numbers<[1], [0], [0], [1], [0, 0, 1, 1], [], []>} : vector<8x8xbf16>, vector<8x8xbf16>, vector<8x8xf32> -> vector<8x8xf32>
    %308 = arith.addf %307, %302 : vector<8x8xf32>
    %309 = vector.broadcast %301 : vector<1x8xf32> to vector<8x8xf32>
    %310 = arith.addf %308, %309 : vector<8x8xf32>
    %cst_186 = arith.constant 5.000000e-01 : f32
    %311 = vector.broadcast %cst_186 : f32 to vector<8x8xf32>
    %312 = arith.mulf %310, %311 : vector<8x8xf32>
    %cst_187 = arith.constant 0.000000e+00 : f32
    %313 = vector.broadcast %cst_187 : f32 to vector<8x8xf32>
    %314 = arith.maximumf %312, %313 : vector<8x8xf32>
    %c0_188 = arith.constant 0 : index
    %c128_189 = arith.constant 128 : index
    %315 = vector.load %arg12[%c0_188, %c128_189] : memref<16x160xf32, #tpu.memory_space<vmem>>, vector<8x8xf32>
    tpu.vector_store %arg12[%c0_188, %c128_189], %314 {strides = array<i32>} : memref<16x160xf32, #tpu.memory_space<vmem>>, vector<8x8xf32>,
    %316 = vector.extract_strided_slice %299 {offsets = [8, 0], sizes = [8, 8], strides = [1, 1]} : vector<16x8xf32> to vector<8x8xf32>
    %c1_190 = arith.constant 1 : index
    %c0_191 = arith.constant 0 : index
    %c0_192 = arith.constant 0 : index
    %317 = vector.load %arg13[%c1_190, %c0_191, %c0_192] : memref<2x8x8xf32, #tpu.memory_space<vmem>>, vector<1x8x8xf32>
    %318 = vector.shape_cast %317 : vector<1x8x8xf32> to vector<8x8xf32>
    %319 = arith.truncf %318 : vector<8x8xf32> to vector<8x8xbf16>
    %320 = arith.truncf %316 : vector<8x8xf32> to vector<8x8xbf16>
    %cst_193 = arith.constant dense<0.000000e+00> : vector<8x8xf32>
    %321 = tpu.matmul %319, %320, %cst_193 {dimension_numbers = #tpu.dot_dimension_numbers<[1], [0], [0], [1], [0, 0, 1, 1], [], []>} : vector<8x8xbf16>, vector<8x8xbf16>, vector<8x8xf32> -> vector<8x8xf32>
    %322 = arith.addf %321, %316 : vector<8x8xf32>
    %323 = vector.broadcast %301 : vector<1x8xf32> to vector<8x8xf32>
    %324 = arith.addf %322, %323 : vector<8x8xf32>
    %cst_194 = arith.constant 5.000000e-01 : f32
    %325 = vector.broadcast %cst_194 : f32 to vector<8x8xf32>
    %326 = arith.mulf %324, %325 : vector<8x8xf32>
    %cst_195 = arith.constant 0.000000e+00 : f32
    %327 = vector.broadcast %cst_195 : f32 to vector<8x8xf32>
    %328 = arith.maximumf %326, %327 : vector<8x8xf32>
    %c8_196 = arith.constant 8 : index
    %c128_197 = arith.constant 128 : index
    %329 = vector.load %arg12[%c8_196, %c128_197] : memref<16x160xf32, #tpu.memory_space<vmem>>, vector<8x8xf32>
    tpu.vector_store %arg12[%c8_196, %c128_197], %328 {strides = array<i32>} : memref<16x160xf32, #tpu.memory_space<vmem>>, vector<8x8xf32>,
    %c5 = arith.constant 5 : index
    %c0_198 = arith.constant 0 : index
    %c0_199 = arith.constant 0 : index
    %330 = vector.load %arg7[%c5, %c0_198, %c0_199] : memref<8x160x8xbf16, #tpu.memory_space<vmem>>, vector<1x160x8xbf16>
    %331 = vector.shape_cast %330 : vector<1x160x8xbf16> to vector<160x8xbf16>
    %332 = vector.extract_strided_slice %331 {offsets = [0, 0], sizes = [136, 8], strides = [1, 1]} : vector<160x8xbf16> to vector<136x8xbf16>
    %c0_200 = arith.constant 0 : index
    %c0_201 = arith.constant 0 : index
    %333 = vector.load %arg12[%c0_200, %c0_201] : memref<16x160xf32, #tpu.memory_space<vmem>>, vector<16x136xf32>
    %334 = arith.truncf %333 : vector<16x136xf32> to vector<16x136xbf16>
    %cst_202 = arith.constant dense<0.000000e+00> : vector<16x8xf32>
    %335 = tpu.matmul %334, %332, %cst_202 {dimension_numbers = #tpu.dot_dimension_numbers<[1], [0], [0], [1], [0, 0, 1, 1], [], []>} : vector<16x136xbf16>, vector<136x8xbf16>, vector<16x8xf32> -> vector<16x8xf32>
    %c5_203 = arith.constant 5 : index
    %c0_204 = arith.constant 0 : index
    %c0_205 = arith.constant 0 : index
    %336 = vector.load %arg8[%c5_203, %c0_204, %c0_205] : memref<8x1x8xf32, #tpu.memory_space<vmem>>, vector<1x1x8xf32>
    %337 = vector.shape_cast %336 : vector<1x1x8xf32> to vector<1x8xf32>
    %338 = vector.extract_strided_slice %335 {offsets = [0, 0], sizes = [8, 8], strides = [1, 1]} : vector<16x8xf32> to vector<8x8xf32>
    %c0_206 = arith.constant 0 : index
    %c0_207 = arith.constant 0 : index
    %c0_208 = arith.constant 0 : index
    %339 = vector.load %arg13[%c0_206, %c0_207, %c0_208] : memref<2x8x8xf32, #tpu.memory_space<vmem>>, vector<1x8x8xf32>
    %340 = vector.shape_cast %339 : vector<1x8x8xf32> to vector<8x8xf32>
    %341 = arith.truncf %340 : vector<8x8xf32> to vector<8x8xbf16>
    %342 = arith.truncf %338 : vector<8x8xf32> to vector<8x8xbf16>
    %cst_209 = arith.constant dense<0.000000e+00> : vector<8x8xf32>
    %343 = tpu.matmul %341, %342, %cst_209 {dimension_numbers = #tpu.dot_dimension_numbers<[1], [0], [0], [1], [0, 0, 1, 1], [], []>} : vector<8x8xbf16>, vector<8x8xbf16>, vector<8x8xf32> -> vector<8x8xf32>
    %344 = arith.addf %343, %338 : vector<8x8xf32>
    %345 = vector.broadcast %337 : vector<1x8xf32> to vector<8x8xf32>
    %346 = arith.addf %344, %345 : vector<8x8xf32>
    %cst_210 = arith.constant 5.000000e-01 : f32
    %347 = vector.broadcast %cst_210 : f32 to vector<8x8xf32>
    %348 = arith.mulf %346, %347 : vector<8x8xf32>
    %cst_211 = arith.constant 0.000000e+00 : f32
    %349 = vector.broadcast %cst_211 : f32 to vector<8x8xf32>
    %350 = arith.maximumf %348, %349 : vector<8x8xf32>
    %c0_212 = arith.constant 0 : index
    %c136_213 = arith.constant 136 : index
    %351 = vector.load %arg12[%c0_212, %c136_213] : memref<16x160xf32, #tpu.memory_space<vmem>>, vector<8x8xf32>
    tpu.vector_store %arg12[%c0_212, %c136_213], %350 {strides = array<i32>} : memref<16x160xf32, #tpu.memory_space<vmem>>, vector<8x8xf32>,
    %352 = vector.extract_strided_slice %335 {offsets = [8, 0], sizes = [8, 8], strides = [1, 1]} : vector<16x8xf32> to vector<8x8xf32>
    %c1_214 = arith.constant 1 : index
    %c0_215 = arith.constant 0 : index
    %c0_216 = arith.constant 0 : index
    %353 = vector.load %arg13[%c1_214, %c0_215, %c0_216] : memref<2x8x8xf32, #tpu.memory_space<vmem>>, vector<1x8x8xf32>
    %354 = vector.shape_cast %353 : vector<1x8x8xf32> to vector<8x8xf32>
    %355 = arith.truncf %354 : vector<8x8xf32> to vector<8x8xbf16>
    %356 = arith.truncf %352 : vector<8x8xf32> to vector<8x8xbf16>
    %cst_217 = arith.constant dense<0.000000e+00> : vector<8x8xf32>
    %357 = tpu.matmul %355, %356, %cst_217 {dimension_numbers = #tpu.dot_dimension_numbers<[1], [0], [0], [1], [0, 0, 1, 1], [], []>} : vector<8x8xbf16>, vector<8x8xbf16>, vector<8x8xf32> -> vector<8x8xf32>
    %358 = arith.addf %357, %352 : vector<8x8xf32>
    %359 = vector.broadcast %337 : vector<1x8xf32> to vector<8x8xf32>
    %360 = arith.addf %358, %359 : vector<8x8xf32>
    %cst_218 = arith.constant 5.000000e-01 : f32
    %361 = vector.broadcast %cst_218 : f32 to vector<8x8xf32>
    %362 = arith.mulf %360, %361 : vector<8x8xf32>
    %cst_219 = arith.constant 0.000000e+00 : f32
    %363 = vector.broadcast %cst_219 : f32 to vector<8x8xf32>
    %364 = arith.maximumf %362, %363 : vector<8x8xf32>
    %c8_220 = arith.constant 8 : index
    %c136_221 = arith.constant 136 : index
    %365 = vector.load %arg12[%c8_220, %c136_221] : memref<16x160xf32, #tpu.memory_space<vmem>>, vector<8x8xf32>
    tpu.vector_store %arg12[%c8_220, %c136_221], %364 {strides = array<i32>} : memref<16x160xf32, #tpu.memory_space<vmem>>, vector<8x8xf32>,
    %c6 = arith.constant 6 : index
    %c0_222 = arith.constant 0 : index
    %c0_223 = arith.constant 0 : index
    %366 = vector.load %arg7[%c6, %c0_222, %c0_223] : memref<8x160x8xbf16, #tpu.memory_space<vmem>>, vector<1x160x8xbf16>
    %367 = vector.shape_cast %366 : vector<1x160x8xbf16> to vector<160x8xbf16>
    %368 = vector.extract_strided_slice %367 {offsets = [0, 0], sizes = [144, 8], strides = [1, 1]} : vector<160x8xbf16> to vector<144x8xbf16>
    %c0_224 = arith.constant 0 : index
    %c0_225 = arith.constant 0 : index
    %369 = vector.load %arg12[%c0_224, %c0_225] : memref<16x160xf32, #tpu.memory_space<vmem>>, vector<16x144xf32>
    %370 = arith.truncf %369 : vector<16x144xf32> to vector<16x144xbf16>
    %cst_226 = arith.constant dense<0.000000e+00> : vector<16x8xf32>
    %371 = tpu.matmul %370, %368, %cst_226 {dimension_numbers = #tpu.dot_dimension_numbers<[1], [0], [0], [1], [0, 0, 1, 1], [], []>} : vector<16x144xbf16>, vector<144x8xbf16>, vector<16x8xf32> -> vector<16x8xf32>
    %c6_227 = arith.constant 6 : index
    %c0_228 = arith.constant 0 : index
    %c0_229 = arith.constant 0 : index
    %372 = vector.load %arg8[%c6_227, %c0_228, %c0_229] : memref<8x1x8xf32, #tpu.memory_space<vmem>>, vector<1x1x8xf32>
    %373 = vector.shape_cast %372 : vector<1x1x8xf32> to vector<1x8xf32>
    %374 = vector.extract_strided_slice %371 {offsets = [0, 0], sizes = [8, 8], strides = [1, 1]} : vector<16x8xf32> to vector<8x8xf32>
    %c0_230 = arith.constant 0 : index
    %c0_231 = arith.constant 0 : index
    %c0_232 = arith.constant 0 : index
    %375 = vector.load %arg13[%c0_230, %c0_231, %c0_232] : memref<2x8x8xf32, #tpu.memory_space<vmem>>, vector<1x8x8xf32>
    %376 = vector.shape_cast %375 : vector<1x8x8xf32> to vector<8x8xf32>
    %377 = arith.truncf %376 : vector<8x8xf32> to vector<8x8xbf16>
    %378 = arith.truncf %374 : vector<8x8xf32> to vector<8x8xbf16>
    %cst_233 = arith.constant dense<0.000000e+00> : vector<8x8xf32>
    %379 = tpu.matmul %377, %378, %cst_233 {dimension_numbers = #tpu.dot_dimension_numbers<[1], [0], [0], [1], [0, 0, 1, 1], [], []>} : vector<8x8xbf16>, vector<8x8xbf16>, vector<8x8xf32> -> vector<8x8xf32>
    %380 = arith.addf %379, %374 : vector<8x8xf32>
    %381 = vector.broadcast %373 : vector<1x8xf32> to vector<8x8xf32>
    %382 = arith.addf %380, %381 : vector<8x8xf32>
    %cst_234 = arith.constant 5.000000e-01 : f32
    %383 = vector.broadcast %cst_234 : f32 to vector<8x8xf32>
    %384 = arith.mulf %382, %383 : vector<8x8xf32>
    %cst_235 = arith.constant 0.000000e+00 : f32
    %385 = vector.broadcast %cst_235 : f32 to vector<8x8xf32>
    %386 = arith.maximumf %384, %385 : vector<8x8xf32>
    %c0_236 = arith.constant 0 : index
    %c144_237 = arith.constant 144 : index
    %387 = vector.load %arg12[%c0_236, %c144_237] : memref<16x160xf32, #tpu.memory_space<vmem>>, vector<8x8xf32>
    tpu.vector_store %arg12[%c0_236, %c144_237], %386 {strides = array<i32>} : memref<16x160xf32, #tpu.memory_space<vmem>>, vector<8x8xf32>,
    %388 = vector.extract_strided_slice %371 {offsets = [8, 0], sizes = [8, 8], strides = [1, 1]} : vector<16x8xf32> to vector<8x8xf32>
    %c1_238 = arith.constant 1 : index
    %c0_239 = arith.constant 0 : index
    %c0_240 = arith.constant 0 : index
    %389 = vector.load %arg13[%c1_238, %c0_239, %c0_240] : memref<2x8x8xf32, #tpu.memory_space<vmem>>, vector<1x8x8xf32>
    %390 = vector.shape_cast %389 : vector<1x8x8xf32> to vector<8x8xf32>
    %391 = arith.truncf %390 : vector<8x8xf32> to vector<8x8xbf16>
    %392 = arith.truncf %388 : vector<8x8xf32> to vector<8x8xbf16>
    %cst_241 = arith.constant dense<0.000000e+00> : vector<8x8xf32>
    %393 = tpu.matmul %391, %392, %cst_241 {dimension_numbers = #tpu.dot_dimension_numbers<[1], [0], [0], [1], [0, 0, 1, 1], [], []>} : vector<8x8xbf16>, vector<8x8xbf16>, vector<8x8xf32> -> vector<8x8xf32>
    %394 = arith.addf %393, %388 : vector<8x8xf32>
    %395 = vector.broadcast %373 : vector<1x8xf32> to vector<8x8xf32>
    %396 = arith.addf %394, %395 : vector<8x8xf32>
    %cst_242 = arith.constant 5.000000e-01 : f32
    %397 = vector.broadcast %cst_242 : f32 to vector<8x8xf32>
    %398 = arith.mulf %396, %397 : vector<8x8xf32>
    %cst_243 = arith.constant 0.000000e+00 : f32
    %399 = vector.broadcast %cst_243 : f32 to vector<8x8xf32>
    %400 = arith.maximumf %398, %399 : vector<8x8xf32>
    %c8_244 = arith.constant 8 : index
    %c144_245 = arith.constant 144 : index
    %401 = vector.load %arg12[%c8_244, %c144_245] : memref<16x160xf32, #tpu.memory_space<vmem>>, vector<8x8xf32>
    tpu.vector_store %arg12[%c8_244, %c144_245], %400 {strides = array<i32>} : memref<16x160xf32, #tpu.memory_space<vmem>>, vector<8x8xf32>,
    %c7 = arith.constant 7 : index
    %c0_246 = arith.constant 0 : index
    %c0_247 = arith.constant 0 : index
    %402 = vector.load %arg7[%c7, %c0_246, %c0_247] : memref<8x160x8xbf16, #tpu.memory_space<vmem>>, vector<1x160x8xbf16>
    %403 = vector.shape_cast %402 : vector<1x160x8xbf16> to vector<160x8xbf16>
    %404 = vector.extract_strided_slice %403 {offsets = [0, 0], sizes = [152, 8], strides = [1, 1]} : vector<160x8xbf16> to vector<152x8xbf16>
    %c0_248 = arith.constant 0 : index
    %c0_249 = arith.constant 0 : index
    %405 = vector.load %arg12[%c0_248, %c0_249] : memref<16x160xf32, #tpu.memory_space<vmem>>, vector<16x152xf32>
    %406 = arith.truncf %405 : vector<16x152xf32> to vector<16x152xbf16>
    %cst_250 = arith.constant dense<0.000000e+00> : vector<16x8xf32>
    %407 = tpu.matmul %406, %404, %cst_250 {dimension_numbers = #tpu.dot_dimension_numbers<[1], [0], [0], [1], [0, 0, 1, 1], [], []>} : vector<16x152xbf16>, vector<152x8xbf16>, vector<16x8xf32> -> vector<16x8xf32>
    %c7_251 = arith.constant 7 : index
    %c0_252 = arith.constant 0 : index
    %c0_253 = arith.constant 0 : index
    %408 = vector.load %arg8[%c7_251, %c0_252, %c0_253] : memref<8x1x8xf32, #tpu.memory_space<vmem>>, vector<1x1x8xf32>
    %409 = vector.shape_cast %408 : vector<1x1x8xf32> to vector<1x8xf32>
    %410 = vector.extract_strided_slice %407 {offsets = [0, 0], sizes = [8, 8], strides = [1, 1]} : vector<16x8xf32> to vector<8x8xf32>
    %c0_254 = arith.constant 0 : index
    %c0_255 = arith.constant 0 : index
    %c0_256 = arith.constant 0 : index
    %411 = vector.load %arg13[%c0_254, %c0_255, %c0_256] : memref<2x8x8xf32, #tpu.memory_space<vmem>>, vector<1x8x8xf32>
    %412 = vector.shape_cast %411 : vector<1x8x8xf32> to vector<8x8xf32>
    %413 = arith.truncf %412 : vector<8x8xf32> to vector<8x8xbf16>
    %414 = arith.truncf %410 : vector<8x8xf32> to vector<8x8xbf16>
    %cst_257 = arith.constant dense<0.000000e+00> : vector<8x8xf32>
    %415 = tpu.matmul %413, %414, %cst_257 {dimension_numbers = #tpu.dot_dimension_numbers<[1], [0], [0], [1], [0, 0, 1, 1], [], []>} : vector<8x8xbf16>, vector<8x8xbf16>, vector<8x8xf32> -> vector<8x8xf32>
    %416 = arith.addf %415, %410 : vector<8x8xf32>
    %417 = vector.broadcast %409 : vector<1x8xf32> to vector<8x8xf32>
    %418 = arith.addf %416, %417 : vector<8x8xf32>
    %cst_258 = arith.constant 5.000000e-01 : f32
    %419 = vector.broadcast %cst_258 : f32 to vector<8x8xf32>
    %420 = arith.mulf %418, %419 : vector<8x8xf32>
    %cst_259 = arith.constant 0.000000e+00 : f32
    %421 = vector.broadcast %cst_259 : f32 to vector<8x8xf32>
    %422 = arith.maximumf %420, %421 : vector<8x8xf32>
    %c0_260 = arith.constant 0 : index
    %c152_261 = arith.constant 152 : index
    %423 = vector.load %arg12[%c0_260, %c152_261] : memref<16x160xf32, #tpu.memory_space<vmem>>, vector<8x8xf32>
    tpu.vector_store %arg12[%c0_260, %c152_261], %422 {strides = array<i32>} : memref<16x160xf32, #tpu.memory_space<vmem>>, vector<8x8xf32>,
    %424 = vector.extract_strided_slice %407 {offsets = [8, 0], sizes = [8, 8], strides = [1, 1]} : vector<16x8xf32> to vector<8x8xf32>
    %c1_262 = arith.constant 1 : index
    %c0_263 = arith.constant 0 : index
    %c0_264 = arith.constant 0 : index
    %425 = vector.load %arg13[%c1_262, %c0_263, %c0_264] : memref<2x8x8xf32, #tpu.memory_space<vmem>>, vector<1x8x8xf32>
    %426 = vector.shape_cast %425 : vector<1x8x8xf32> to vector<8x8xf32>
    %427 = arith.truncf %426 : vector<8x8xf32> to vector<8x8xbf16>
    %428 = arith.truncf %424 : vector<8x8xf32> to vector<8x8xbf16>
    %cst_265 = arith.constant dense<0.000000e+00> : vector<8x8xf32>
    %429 = tpu.matmul %427, %428, %cst_265 {dimension_numbers = #tpu.dot_dimension_numbers<[1], [0], [0], [1], [0, 0, 1, 1], [], []>} : vector<8x8xbf16>, vector<8x8xbf16>, vector<8x8xf32> -> vector<8x8xf32>
    %430 = arith.addf %429, %424 : vector<8x8xf32>
    %431 = vector.broadcast %409 : vector<1x8xf32> to vector<8x8xf32>
    %432 = arith.addf %430, %431 : vector<8x8xf32>
    %cst_266 = arith.constant 5.000000e-01 : f32
    %433 = vector.broadcast %cst_266 : f32 to vector<8x8xf32>
    %434 = arith.mulf %432, %433 : vector<8x8xf32>
    %cst_267 = arith.constant 0.000000e+00 : f32
    %435 = vector.broadcast %cst_267 : f32 to vector<8x8xf32>
    %436 = arith.maximumf %434, %435 : vector<8x8xf32>
    %c8_268 = arith.constant 8 : index
    %c152_269 = arith.constant 152 : index
    %437 = vector.load %arg12[%c8_268, %c152_269] : memref<16x160xf32, #tpu.memory_space<vmem>>, vector<8x8xf32>
    tpu.vector_store %arg12[%c8_268, %c152_269], %436 {strides = array<i32>} : memref<16x160xf32, #tpu.memory_space<vmem>>, vector<8x8xf32>,
    %c0_270 = arith.constant 0 : index
    %c0_271 = arith.constant 0 : index
    %438 = vector.load %arg14[%c0_270, %c0_271] : memref<16x128xf32, #tpu.memory_space<vmem>>, vector<16x128xf32>
    %c0_272 = arith.constant 0 : index
    %c0_273 = arith.constant 0 : index
    %439 = vector.load %arg12[%c0_272, %c0_273] : memref<16x160xf32, #tpu.memory_space<vmem>>, vector<16x160xf32>
    %440 = arith.truncf %439 : vector<16x160xf32> to vector<16x160xbf16>
    %c1_274 = arith.constant 1 : index
    %c0_275 = arith.constant 0 : index
    %c0_276 = arith.constant 0 : index
    %441 = vector.load %arg9[%c1_274, %c0_275, %c0_276] : memref<2x160x128xbf16, #tpu.memory_space<vmem>>, vector<1x160x128xbf16>
    %442 = vector.shape_cast %441 : vector<1x160x128xbf16> to vector<160x128xbf16>
    %cst_277 = arith.constant dense<0.000000e+00> : vector<16x128xf32>
    %443 = tpu.matmul %440, %442, %cst_277 {dimension_numbers = #tpu.dot_dimension_numbers<[1], [0], [0], [1], [0, 0, 1, 1], [], []>} : vector<16x160xbf16>, vector<160x128xbf16>, vector<16x128xf32> -> vector<16x128xf32>
    %444 = arith.addf %438, %443 : vector<16x128xf32>
    %c0_278 = arith.constant 0 : index
    %c0_279 = arith.constant 0 : index
    %445 = vector.load %arg14[%c0_278, %c0_279] : memref<16x128xf32, #tpu.memory_space<vmem>>, vector<16x128xf32>
    tpu.vector_store %arg14[%c0_278, %c0_279], %444 {strides = array<i32>} : memref<16x128xf32, #tpu.memory_space<vmem>>, vector<16x128xf32>,
    %c0_280 = arith.constant 0 : index
    %c0_281 = arith.constant 0 : index
    %446 = vector.load %arg14[%c0_280, %c0_281] : memref<16x128xf32, #tpu.memory_space<vmem>>, vector<16x128xf32>
    %c0_282 = arith.constant 0 : index
    %c0_283 = arith.constant 0 : index
    %447 = vector.load %arg10[%c0_282, %c0_283] : memref<1x128xf32, #tpu.memory_space<vmem>>, vector<1x128xf32>
    %448 = vector.broadcast %447 : vector<1x128xf32> to vector<16x128xf32>
    %449 = arith.addf %446, %448 : vector<16x128xf32>
    %c0_284 = arith.constant 0 : index
    %c0_285 = arith.constant 0 : index
    %450 = vector.load %arg11[%c0_284, %c0_285] : memref<16x128xf32, #tpu.memory_space<vmem>>, vector<16x128xf32>
    tpu.vector_store %arg11[%c0_284, %c0_285], %449 {strides = array<i32>} : memref<16x128xf32, #tpu.memory_space<vmem>>, vector<16x128xf32>,
    return
  }
  func.func @transform_0(%arg0: i32) -> (i32, i32) {
    %c0_i32 = arith.constant 0 : i32
    %c0_i32_0 = arith.constant 0 : i32
    return %arg0, %c0_i32 : i32, i32
  }
  func.func @transform_1(%arg0: i32) -> (i32, i32, i32) {
    %c0_i32 = arith.constant 0 : i32
    %c0_i32_0 = arith.constant 0 : i32
    %c0_i32_1 = arith.constant 0 : i32
    return %arg0, %c0_i32, %c0_i32_0 : i32, i32, i32
  }
  func.func @transform_2(%arg0: i32) -> (i32, i32, i32) {
    %c0_i32 = arith.constant 0 : i32
    %c0_i32_0 = arith.constant 0 : i32
    %c0_i32_1 = arith.constant 0 : i32
    %c0_i32_2 = arith.constant 0 : i32
    return %c0_i32, %c0_i32_0, %c0_i32_1 : i32, i32, i32
  }
  func.func @transform_3(%arg0: i32) -> (i32, i32, i32) {
    %c0_i32 = arith.constant 0 : i32
    %c0_i32_0 = arith.constant 0 : i32
    %c0_i32_1 = arith.constant 0 : i32
    %c0_i32_2 = arith.constant 0 : i32
    return %c0_i32, %c0_i32_0, %c0_i32_1 : i32, i32, i32
  }
  func.func @transform_4(%arg0: i32) -> (i32, i32, i32) {
    %c0_i32 = arith.constant 0 : i32
    %c0_i32_0 = arith.constant 0 : i32
    %c0_i32_1 = arith.constant 0 : i32
    %c0_i32_2 = arith.constant 0 : i32
    return %c0_i32, %c0_i32_0, %c0_i32_1 : i32, i32, i32
  }
  func.func @transform_5(%arg0: i32) -> (i32, i32, i32) {
    %c0_i32 = arith.constant 0 : i32
    %c0_i32_0 = arith.constant 0 : i32
    %c0_i32_1 = arith.constant 0 : i32
    %c0_i32_2 = arith.constant 0 : i32
    return %c0_i32, %c0_i32_0, %c0_i32_1 : i32, i32, i32
  }
  func.func @transform_6(%arg0: i32) -> (i32, i32, i32) {
    %c0_i32 = arith.constant 0 : i32
    %c0_i32_0 = arith.constant 0 : i32
    %c0_i32_1 = arith.constant 0 : i32
    %c0_i32_2 = arith.constant 0 : i32
    return %c0_i32, %c0_i32_0, %c0_i32_1 : i32, i32, i32
  }
  func.func @transform_7(%arg0: i32) -> (i32, i32, i32) {
    %c0_i32 = arith.constant 0 : i32
    %c0_i32_0 = arith.constant 0 : i32
    %c0_i32_1 = arith.constant 0 : i32
    %c0_i32_2 = arith.constant 0 : i32
    return %c0_i32, %c0_i32_0, %c0_i32_1 : i32, i32, i32
  }
  func.func @transform_8(%arg0: i32) -> (i32, i32, i32) {
    %c0_i32 = arith.constant 0 : i32
    %c0_i32_0 = arith.constant 0 : i32
    %c0_i32_1 = arith.constant 0 : i32
    %c0_i32_2 = arith.constant 0 : i32
    return %c0_i32, %c0_i32_0, %c0_i32_1 : i32, i32, i32
  }
  func.func @transform_9(%arg0: i32) -> (i32, i32) {
    %c0_i32 = arith.constant 0 : i32
    %c0_i32_0 = arith.constant 0 : i32
    %c0_i32_1 = arith.constant 0 : i32
    return %c0_i32, %c0_i32_0 : i32, i32
  }
  func.func @transform_10(%arg0: i32) -> (i32, i32) {
    %c0_i32 = arith.constant 0 : i32
    %c0_i32_0 = arith.constant 0 : i32
    return %arg0, %c0_i32 : i32, i32
  }
}

module attributes {stable_mosaic.version = 11 : i64} {
  func.func @_pool_mlp_kernel(%arg0: i32, %arg1: memref<2x8x128xf32, #tpu.memory_space<vmem>>, %arg2: memref<2x8x1xf32, #tpu.memory_space<vmem>>, %arg3: memref<2x8x1xf32, #tpu.memory_space<vmem>>, %arg4: memref<2x8x1xf32, #tpu.memory_space<vmem>>, %arg5: memref<128x128xbf16, #tpu.memory_space<vmem>>, %arg6: memref<128x128xbf16, #tpu.memory_space<vmem>>, %arg7: memref<128x128xbf16, #tpu.memory_space<vmem>>, %arg8: memref<1x128xf32, #tpu.memory_space<vmem>>, %arg9: memref<128x128xbf16, #tpu.memory_space<vmem>>, %arg10: memref<1x128xf32, #tpu.memory_space<vmem>>, %arg11: memref<2x128xf32, #tpu.memory_space<vmem>>, %arg12: memref<2x128xf32, #tpu.memory_space<vmem>>) attributes {dimension_semantics = [#tpu.dimension_semantics<parallel>], iteration_bounds = array<i64: 1>, scalar_prefetch = 0 : i64, scratch_operands = 0 : i64, tpu.core_type = #tpu.core_type<tc>, window_params = [{transform_indices = @transform_0, window_bounds = array<i64: 2, 8, 128>}, {transform_indices = @transform_1, window_bounds = array<i64: 2, 8, 1>}, {transform_indices = @transform_2, window_bounds = array<i64: 2, 8, 1>}, {transform_indices = @transform_3, window_bounds = array<i64: 2, 8, 1>}, {pipeline_mode = #tpu.pipeline_mode<synchronous>, transform_indices = @transform_4, window_bounds = array<i64: 128, 128>}, {pipeline_mode = #tpu.pipeline_mode<synchronous>, transform_indices = @transform_5, window_bounds = array<i64: 128, 128>}, {pipeline_mode = #tpu.pipeline_mode<synchronous>, transform_indices = @transform_6, window_bounds = array<i64: 128, 128>}, {pipeline_mode = #tpu.pipeline_mode<synchronous>, transform_indices = @transform_7, window_bounds = array<i64: 1, 128>}, {pipeline_mode = #tpu.pipeline_mode<synchronous>, transform_indices = @transform_8, window_bounds = array<i64: 128, 128>}, {pipeline_mode = #tpu.pipeline_mode<synchronous>, transform_indices = @transform_9, window_bounds = array<i64: 1, 128>}, {transform_indices = @transform_10, window_bounds = array<i64: 2, 128>}, {transform_indices = @transform_11, window_bounds = array<i64: 2, 128>}]} {
    %c0 = arith.constant 0 : index
    %c0_0 = arith.constant 0 : index
    %c0_1 = arith.constant 0 : index
    %0 = vector.load %arg1[%c0, %c0_0, %c0_1] : memref<2x8x128xf32, #tpu.memory_space<vmem>>, vector<2x8x128xf32>
    %c0_2 = arith.constant 0 : index
    %c0_3 = arith.constant 0 : index
    %c0_4 = arith.constant 0 : index
    %1 = vector.load %arg2[%c0_2, %c0_3, %c0_4] : memref<2x8x1xf32, #tpu.memory_space<vmem>>, vector<2x8x1xf32>
    %cst = arith.constant 0.000000e+00 : f32
    %2 = vector.broadcast %cst : f32 to vector<2x8x1xf32>
    %3 = arith.cmpf one, %1, %2 : vector<2x8x1xf32>
    %cst_5 = arith.constant -9.99999995E+11 : f32
    %4 = vector.shape_cast %3 : vector<2x8x1xi1> to vector<2x8x1xi1>
    %5 = vector.broadcast %4 : vector<2x8x1xi1> to vector<2x8x128xi1>
    %6 = vector.broadcast %cst_5 : f32 to vector<2x8x128xf32>
    %7 = arith.select %5, %6, %0 : vector<2x8x128xi1>, vector<2x8x128xf32>
    %cst_6 = arith.constant dense<0xFF800000> : vector<2x128xf32>
    %8 = vector.multi_reduction <maximumf>, %7, %cst_6 [1] : vector<2x8x128xf32> to vector<2x128xf32>
    %c0_7 = arith.constant 0 : index
    %c0_8 = arith.constant 0 : index
    %c0_9 = arith.constant 0 : index
    %9 = vector.load %arg3[%c0_7, %c0_8, %c0_9] : memref<2x8x1xf32, #tpu.memory_space<vmem>>, vector<2x8x1xf32>
    %cst_10 = arith.constant 0.000000e+00 : f32
    %10 = vector.broadcast %cst_10 : f32 to vector<2x8x1xf32>
    %11 = arith.cmpf one, %9, %10 : vector<2x8x1xf32>
    %cst_11 = arith.constant -9.99999995E+11 : f32
    %12 = vector.shape_cast %11 : vector<2x8x1xi1> to vector<2x8x1xi1>
    %13 = vector.broadcast %12 : vector<2x8x1xi1> to vector<2x8x128xi1>
    %14 = vector.broadcast %cst_11 : f32 to vector<2x8x128xf32>
    %15 = arith.select %13, %14, %0 : vector<2x8x128xi1>, vector<2x8x128xf32>
    %cst_12 = arith.constant dense<0xFF800000> : vector<2x128xf32>
    %16 = vector.multi_reduction <maximumf>, %15, %cst_12 [1] : vector<2x8x128xf32> to vector<2x128xf32>
    %c0_13 = arith.constant 0 : index
    %c0_14 = arith.constant 0 : index
    %c0_15 = arith.constant 0 : index
    %17 = vector.load %arg4[%c0_13, %c0_14, %c0_15] : memref<2x8x1xf32, #tpu.memory_space<vmem>>, vector<2x8x1xf32>
    %cst_16 = arith.constant 0.000000e+00 : f32
    %18 = vector.broadcast %cst_16 : f32 to vector<2x8x1xf32>
    %19 = arith.cmpf one, %17, %18 : vector<2x8x1xf32>
    %cst_17 = arith.constant -9.99999995E+11 : f32
    %20 = vector.shape_cast %19 : vector<2x8x1xi1> to vector<2x8x1xi1>
    %21 = vector.broadcast %20 : vector<2x8x1xi1> to vector<2x8x128xi1>
    %22 = vector.broadcast %cst_17 : f32 to vector<2x8x128xf32>
    %23 = arith.select %21, %22, %0 : vector<2x8x128xi1>, vector<2x8x128xf32>
    %cst_18 = arith.constant dense<0xFF800000> : vector<2x128xf32>
    %24 = vector.multi_reduction <maximumf>, %23, %cst_18 [1] : vector<2x8x128xf32> to vector<2x128xf32>
    %c0_19 = arith.constant 0 : index
    %c0_20 = arith.constant 0 : index
    %25 = vector.load %arg8[%c0_19, %c0_20] : memref<1x128xf32, #tpu.memory_space<vmem>>, vector<1x128xf32>
    %26 = arith.truncf %8 : vector<2x128xf32> to vector<2x128xbf16>
    %c0_21 = arith.constant 0 : index
    %c0_22 = arith.constant 0 : index
    %27 = vector.load %arg5[%c0_21, %c0_22] : memref<128x128xbf16, #tpu.memory_space<vmem>>, vector<128x128xbf16>
    %cst_23 = arith.constant dense<0.000000e+00> : vector<2x128xf32>
    %28 = tpu.matmul %26, %27, %cst_23 {dimension_numbers = #tpu.dot_dimension_numbers<[1], [0], [0], [1], [0, 0, 1, 1], [], []>} : vector<2x128xbf16>, vector<128x128xbf16>, vector<2x128xf32> -> vector<2x128xf32>
    %29 = vector.broadcast %25 : vector<1x128xf32> to vector<2x128xf32>
    %30 = arith.addf %29, %28 : vector<2x128xf32>
    %31 = arith.truncf %16 : vector<2x128xf32> to vector<2x128xbf16>
    %c0_24 = arith.constant 0 : index
    %c0_25 = arith.constant 0 : index
    %32 = vector.load %arg6[%c0_24, %c0_25] : memref<128x128xbf16, #tpu.memory_space<vmem>>, vector<128x128xbf16>
    %cst_26 = arith.constant dense<0.000000e+00> : vector<2x128xf32>
    %33 = tpu.matmul %31, %32, %cst_26 {dimension_numbers = #tpu.dot_dimension_numbers<[1], [0], [0], [1], [0, 0, 1, 1], [], []>} : vector<2x128xbf16>, vector<128x128xbf16>, vector<2x128xf32> -> vector<2x128xf32>
    %34 = arith.addf %30, %33 : vector<2x128xf32>
    %35 = arith.truncf %24 : vector<2x128xf32> to vector<2x128xbf16>
    %c0_27 = arith.constant 0 : index
    %c0_28 = arith.constant 0 : index
    %36 = vector.load %arg7[%c0_27, %c0_28] : memref<128x128xbf16, #tpu.memory_space<vmem>>, vector<128x128xbf16>
    %cst_29 = arith.constant dense<0.000000e+00> : vector<2x128xf32>
    %37 = tpu.matmul %35, %36, %cst_29 {dimension_numbers = #tpu.dot_dimension_numbers<[1], [0], [0], [1], [0, 0, 1, 1], [], []>} : vector<2x128xbf16>, vector<128x128xbf16>, vector<2x128xf32> -> vector<2x128xf32>
    %38 = arith.addf %34, %37 : vector<2x128xf32>
    %cst_30 = arith.constant 0.000000e+00 : f32
    %39 = vector.broadcast %cst_30 : f32 to vector<2x128xf32>
    %40 = arith.maximumf %38, %39 : vector<2x128xf32>
    %c0_31 = arith.constant 0 : index
    %c0_32 = arith.constant 0 : index
    %41 = vector.load %arg9[%c0_31, %c0_32] : memref<128x128xbf16, #tpu.memory_space<vmem>>, vector<128x128xbf16>
    %c0_33 = arith.constant 0 : index
    %c0_34 = arith.constant 0 : index
    %42 = vector.load %arg10[%c0_33, %c0_34] : memref<1x128xf32, #tpu.memory_space<vmem>>, vector<1x128xf32>
    %43 = arith.truncf %40 : vector<2x128xf32> to vector<2x128xbf16>
    %cst_35 = arith.constant dense<0.000000e+00> : vector<2x128xf32>
    %44 = tpu.matmul %43, %41, %cst_35 {dimension_numbers = #tpu.dot_dimension_numbers<[1], [0], [0], [1], [0, 0, 1, 1], [], []>} : vector<2x128xbf16>, vector<128x128xbf16>, vector<2x128xf32> -> vector<2x128xf32>
    %45 = vector.broadcast %42 : vector<1x128xf32> to vector<2x128xf32>
    %46 = arith.addf %44, %45 : vector<2x128xf32>
    %cst_36 = arith.constant 0.000000e+00 : f32
    %47 = vector.broadcast %cst_36 : f32 to vector<2x128xf32>
    %48 = arith.maximumf %46, %47 : vector<2x128xf32>
    %c0_37 = arith.constant 0 : index
    %c0_38 = arith.constant 0 : index
    %49 = vector.load %arg11[%c0_37, %c0_38] : memref<2x128xf32, #tpu.memory_space<vmem>>, vector<2x128xf32>
    tpu.vector_store %arg11[%c0_37, %c0_38], %48 {strides = array<i32>} : memref<2x128xf32, #tpu.memory_space<vmem>>, vector<2x128xf32>,
    %c0_39 = arith.constant 0 : index
    %c0_40 = arith.constant 0 : index
    %50 = vector.load %arg12[%c0_39, %c0_40] : memref<2x128xf32, #tpu.memory_space<vmem>>, vector<2x128xf32>
    tpu.vector_store %arg12[%c0_39, %c0_40], %8 {strides = array<i32>} : memref<2x128xf32, #tpu.memory_space<vmem>>, vector<2x128xf32>,
    return
  }
  func.func @transform_0(%arg0: i32) -> (i32, i32, i32) {
    %c0_i32 = arith.constant 0 : i32
    %c0_i32_0 = arith.constant 0 : i32
    %c0_i32_1 = arith.constant 0 : i32
    return %arg0, %c0_i32, %c0_i32_0 : i32, i32, i32
  }
  func.func @transform_1(%arg0: i32) -> (i32, i32, i32) {
    %c0_i32 = arith.constant 0 : i32
    %c0_i32_0 = arith.constant 0 : i32
    %c0_i32_1 = arith.constant 0 : i32
    return %arg0, %c0_i32, %c0_i32_0 : i32, i32, i32
  }
  func.func @transform_2(%arg0: i32) -> (i32, i32, i32) {
    %c0_i32 = arith.constant 0 : i32
    %c0_i32_0 = arith.constant 0 : i32
    %c0_i32_1 = arith.constant 0 : i32
    return %arg0, %c0_i32, %c0_i32_0 : i32, i32, i32
  }
  func.func @transform_3(%arg0: i32) -> (i32, i32, i32) {
    %c0_i32 = arith.constant 0 : i32
    %c0_i32_0 = arith.constant 0 : i32
    %c0_i32_1 = arith.constant 0 : i32
    return %arg0, %c0_i32, %c0_i32_0 : i32, i32, i32
  }
  func.func @transform_4(%arg0: i32) -> (i32, i32) {
    %c0_i32 = arith.constant 0 : i32
    %c0_i32_0 = arith.constant 0 : i32
    %c0_i32_1 = arith.constant 0 : i32
    return %c0_i32, %c0_i32_0 : i32, i32
  }
  func.func @transform_5(%arg0: i32) -> (i32, i32) {
    %c0_i32 = arith.constant 0 : i32
    %c0_i32_0 = arith.constant 0 : i32
    %c0_i32_1 = arith.constant 0 : i32
    return %c0_i32, %c0_i32_0 : i32, i32
  }
  func.func @transform_6(%arg0: i32) -> (i32, i32) {
    %c0_i32 = arith.constant 0 : i32
    %c0_i32_0 = arith.constant 0 : i32
    %c0_i32_1 = arith.constant 0 : i32
    return %c0_i32, %c0_i32_0 : i32, i32
  }
  func.func @transform_7(%arg0: i32) -> (i32, i32) {
    %c0_i32 = arith.constant 0 : i32
    %c0_i32_0 = arith.constant 0 : i32
    %c0_i32_1 = arith.constant 0 : i32
    return %c0_i32, %c0_i32_0 : i32, i32
  }
  func.func @transform_8(%arg0: i32) -> (i32, i32) {
    %c0_i32 = arith.constant 0 : i32
    %c0_i32_0 = arith.constant 0 : i32
    %c0_i32_1 = arith.constant 0 : i32
    return %c0_i32, %c0_i32_0 : i32, i32
  }
  func.func @transform_9(%arg0: i32) -> (i32, i32) {
    %c0_i32 = arith.constant 0 : i32
    %c0_i32_0 = arith.constant 0 : i32
    %c0_i32_1 = arith.constant 0 : i32
    return %c0_i32, %c0_i32_0 : i32, i32
  }
  func.func @transform_10(%arg0: i32) -> (i32, i32) {
    %c0_i32 = arith.constant 0 : i32
    %c0_i32_0 = arith.constant 0 : i32
    return %arg0, %c0_i32 : i32, i32
  }
  func.func @transform_11(%arg0: i32) -> (i32, i32) {
    %c0_i32 = arith.constant 0 : i32
    %c0_i32_0 = arith.constant 0 : i32
    return %arg0, %c0_i32 : i32, i32
  }
}

</mosaic_0001>

<bundles_post_ra>
// kernel: _lambda_.7
= control target key start
LH: loop header
LB: loop body
LE: loop exit
PB: predicated region body
PF: predicated region fallthrough
CT: control target
= control target key end

     0   :  { %vm100_vm0 = vcmask 1041408   ;;  %v238_v0 = vmov 0.0   ;;  %vm239_vm1 = vmmov 0   ;;  %vm39_vm2 = vcmask 130048   ;;  %s321_s3 = inlined_call_operand.vmem [shape: bf16[16,128], index: 3, kind: input, shape index: {}]   ;;  %s322_s4 = inlined_call_operand.vmem [shape: bf16[4,128], index: 4, kind: input, shape index: {}]   ;;  %s323_s5 = inlined_call_operand.vmem [shape: bf16[4,128], index: 5, kind: input, shape index: {}]   ;;  %s324_s0 = inlined_call_operand.vmem [shape: f32[16,16], index: 0, kind: input, shape index: {}]   ;;  %s325_s1 = inlined_call_operand.vmem [shape: f32[16,4], index: 1, kind: input, shape index: {}]   ;;  %s326_s2 = inlined_call_operand.vmem [shape: f32[16,4], index: 2, kind: input, shape index: {}]   ;;  %s327_s6 = inlined_call_operand.vmem [shape: f32[1,128], index: 6, kind: input, shape index: {}]   ;;  %s328_s7 = inlined_call_operand.vmem [shape: f32[16,128], index: 7, kind: output, shape index: {}]  }
   0x1   :  { %217 = vmatprep.subr.bf16.mxu0 %v238_v0  ;;  %v237_v1 = vld [vmem:[%s321_s3] sm:$0xff]   ;;  %223 = vmatprep.subr.bf16.mxu1 %v238_v0  ;;  %v29_v6 = vld [vmem:[%s324_s0 + $0x8] sm:$0xff]  ;;  %vm96_vm3 = vcmask 31744  }
   0x2   :  { %v95_v2 = vld [vmem:[%s322_s4] sm:$0x3]  ;;  %219 = vmatprep.mubr.msk.bf16.mxu0 %vm239_vm1, %v238_v0  ;;  %225 = vmatprep.mubr.msk.bf16.mxu1 %vm239_vm1, %v238_v0  ;;  %v93_v8 = vld [vmem:[%s325_s1 + $0x8] sm:$0xff] }
   0x3   :  { %v150_v3 = vld [vmem:[%s323_s5] sm:$0x3]  ;;  %218 = vmatpush3.bf16.msra.mxu0 %v237_v1  ;;  %v102_v5 = vsel %vm100_vm0, %v95_v2, 0  ;;  %v148_v13 = vld [vmem:[%s326_s2 + $0x8] sm:$0xff] }
   0x4   :  { %v28_v4 = vld [vmem:[%s324_s0] sm:$0xff]  ;;  %224 = vmatpush3.bf16.msra.mxu1 %v102_v5  ;;  %v155_v9 = vsel %vm100_vm0, %v150_v3, 0  ;;  %229 = vmatprep.subr.bf16.mxu0 %v238_v0 }
   0x5   :  { %v92_v7 = vld [vmem:[%s325_s1] sm:$0xff]  ;;  %v30_v10 = vpack.c.bf16 %v29_v6, %v28_v4 }
   0x6   :  { %v94_v11 = vpack.c.bf16 %v93_v8, %v92_v7  ;;  %v147_v12 = vld [vmem:[%s326_s2] sm:$0xff] }
   0x7   :  { %220 = vmatmul.mubr.msk.bf16.vlgmr.msra.gmra.mxu0 %vm39_vm2, %v30_v10  ;;  %v149_v14 = vpack.c.bf16 %v148_v13, %v147_v12  ;;  %v208_v15 = vld [vmem:[%s327_s6] ss:$0 sm:$0xff] }
   0x8   :  { %226 = vmatmul.mubr.msk.bf16.vlgmr.msra.gmra.mxu1 %vm96_vm3, %v94_v11  ;;  %230 = vmatpush3.bf16.msra.mxu0 %v155_v9 }
   0x9   :  { %231 = vmatprep.mubr.msk.bf16.mxu0 %vm239_vm1, %v238_v0 }
   0xf   :  { %232 = vmatmul.mubr.msk.bf16.vlgmr.msra.gmra.mxu0 %vm96_vm3, %v149_v14 }
  0xc7   :  { %v77_v16 = vpop.f32.mrf.mxu0 }
  0xc8   :  { %v138_v17 = vpop.f32.mrf.mxu1  ;;  %v90_v19 = vadd.f32 %v208_v15, %v77_v16 }
  0xc9   :  { %v221_v18 = vpop.f32.mrf.mxu0 }
  0xca   :  { %v227_v20 = vpop.f32.mrf.mxu1  ;;  %v145_v24 = vadd.f32 %v138_v17, %v90_v19 }
  0xcb   :  { %v80_v21 = vpop.f32.mrf.mxu0 }
  0xcc   :  { %v141_v22 = vpop.f32.mrf.mxu1  ;;  %v91_v25 = vadd.f32 %v208_v15, %v80_v21 }
  0xcd   :  { %v222_v23 = vpop.f32.mrf.mxu0 }
  0xce   :  { %v228_v26 = vpop.f32.mrf.mxu1  ;;  %v146_v30 = vadd.f32 %v141_v22, %v91_v25 }
  0xcf   :  { %v191_v27 = vpop.f32.mrf.mxu0 }
  0xd0   :  { %v198_v28 = vadd.f32 %v191_v27, %v145_v24 }
  0xd1   :  { %v233_v29 = vpop.f32.mrf.mxu0 }
  0xd2   :  { %200 = vst [vmem:[%s328_s7] sm:$0xff] %v198_v28 }
  0xd3   :  { %v194_v31 = vpop.f32.mrf.mxu0 }
  0xd4   :  { %v199_v32 = vadd.f32 %v194_v31, %v146_v30 }
  0xd5   :  { %v234_v33 = vpop.f32.mrf.mxu0 }
  0xd6   :  { %201 = vst [vmem:[%s328_s7 + $0x8] sm:$0xff] %v199_v32 }

// kernel: _lambda_.8
= control target key start
LH: loop header
LB: loop body
LE: loop exit
PB: predicated region body
PF: predicated region fallthrough
CT: control target
= control target key end

     0   :  { %v793_v0 = vmov 0.0   ;;  %vm794_vm0 = vmmov 0   ;;  %vm32_vm1 = vcmask 64512   ;;  %v795_v16 = vmov 0   ;;  %s796_s9 = smov 16   ;;  %s1015_s2 = inlined_call_operand.vmem [shape: bf16[2,160,16], index: 2, kind: input, shape index: {}]   ;;  %s1016_s1 = inlined_call_operand.vmem [shape: f32[16,128], index: 1, kind: input, shape index: {}]   ;;  %s1017_s0 = inlined_call_operand.vmem [shape: f32[2,8,8], index: 0, kind: input, shape index: {}]   ;;  %s1018_s3 = inlined_call_operand.vmem [shape: f32[2,1,16], index: 3, kind: input, shape index: {}]   ;;  %s1019_s4 = inlined_call_operand.vmem [shape: bf16[160,128], index: 4, kind: input, shape index: {}]   ;;  %s1020_s5 = inlined_call_operand.vmem [shape: f32[1,128], index: 5, kind: input, shape index: {}]   ;;  %s1021_s6 = inlined_call_operand.vmem [shape: f32[16,128], index: 6, kind: output, shape index: {}]  }
   0x1   :  { %714 = vmatprep.subr.bf16.mxu0 %v793_v0  ;;  %v762_v1 = vld [vmem:[%s1015_s2 + $0x38] sm:$0xff]   ;;  %730 = vmatprep.mubr.msk.bf16.mxu0 %vm794_vm0, %v793_v0  ;;  %v763_v2 = vld [vmem:[%s1015_s2 + $0x30] sm:$0xff]   ;;  %v764_v3 = vld [vmem:[%s1015_s2 + $0x28] sm:$0xff]   ;;  %vm156_vm2 = vcmask 1043456   ;;  %vm209_vm3 = vcmask 130048   ;;  %vm444_vm4 = vcmask 261248  }
   0x2   :  { %734 = vmatprep.subr.bf16.mxu1 %v793_v0  ;;  %736 = vmatprep.mubr.msk.bf16.mxu1 %vm794_vm0, %v793_v0  ;;  %v765_v4 = vld [vmem:[%s1015_s2 + $0x20] sm:$0xff]   ;;  %v25_v6 = vld [vmem:[%s1016_s1 + $0x8] sm:$0xff]  ;;  %v766_v7 = vld [vmem:[%s1015_s2 + $0x18] sm:$0xff]   ;;  %vm591_vm5 = vcmask 261120  }
   0x3   :  { %715 = vmatpush3.bf16.msra.mxu0 %v762_v1  ;;  %v24_v5 = vld [vmem:[%s1016_s1] sm:$0xff]  ;;  %v767_v8 = vld [vmem:[%s1015_s2 + $0x10] sm:$0xff]   ;;  %v768_v9 = vld [vmem:[%s1015_s2 + $0x8] sm:$0xff]  }
   0x4   :  { %716 = vmatprep.subr.bf16.mxu0 %v793_v0  ;;  %v769_v10 = vld [vmem:[%s1015_s2] sm:$0xff]   ;;  %v875_v11 = vpack.c.bf16 %v25_v6, %v24_v5  ;;  %v29_v14 = vld [vmem:[%s1017_s0 + $0x8] sm:$0xff]  ;;  %v772_v29 = vld [vmem:[%s1015_s2 + $0x78] sm:$0xff]  }
   0x5   :  { %v28_v12 = vld [vmem:[%s1017_s0] sm:$0xff]  ;;  %v38_v15 = vsel %vm32_vm1, %v29_v14, 0.0  ;;  %v897_v26 = vpack.c.bf16 %v29_v14, %v29_v14  ;;  %v770_v27 = vld [vmem:[%s1015_s2 + $0x88] sm:$0xff]   ;;  %v773_v30 = vld [vmem:[%s1015_s2 + $0x70] sm:$0xff]  }
   0x6   :  { %v33_v13 = vsel %vm32_vm1, %v28_v12, 0.0  ;;  %v888_v21 = vpack.c.bf16 %v28_v12, %v28_v12  ;;  %v771_v28 = vld [vmem:[%s1015_s2 + $0x80] sm:$0xff]   ;;  %v774_v31 = vld [vmem:[%s1015_s2 + $0x68] sm:$0xff]   ;;  %v776_v33 = vld [vmem:[%s1015_s2 + $0x58] sm:$0xff]  }
   0x7   :  { %717 = vmatpush3.bf16.msra.mxu0 %v763_v2  ;;  %34 = vadd.xlane.f32.xlu0 %v33_v13  ;;  %v775_v32 = vld [vmem:[%s1015_s2 + $0x60] sm:$0xff]   ;;  %v777_v34 = vld [vmem:[%s1015_s2 + $0x50] sm:$0xff]   ;;  %v785_v13 = vld [vmem:[%s1019_s4 + $0x8] sm:$0xff]  }
   0x8   :  { %718 = vmatprep.subr.bf16.mxu0 %v793_v0  ;;  %v778_v35 = vld [vmem:[%s1015_s2 + $0x90] sm:$0xff]   ;;  %v651_v40 = vld [vmem:[%s1018_s3] ss:$0 sm:$0xff]  ;;  %v683_v14 = vld [vmem:[%s1018_s3 + $0x1] ss:$0 sm:$0xff] }
   0x9   :  { %v784_v12 = vld [vmem:[%s1019_s4 + $0x10] sm:$0xff]  }
   0xb   :  { %719 = vmatpush3.bf16.msra.mxu0 %v764_v3  ;;  %39 = vadd.xlane.f32.xlu0 %v38_v15 }
   0xc   :  { %720 = vmatprep.subr.bf16.mxu0 %v793_v0 }
   0xf   :  { %721 = vmatpush3.bf16.msra.mxu0 %v765_v4 }
  0x10   :  { %722 = vmatprep.subr.bf16.mxu0 %v793_v0 }
  0x13   :  { %723 = vmatpush3.bf16.msra.mxu0 %v766_v7  ;;  %v779_v7 = vld [vmem:[%s1019_s4 + $0x38] sm:$0xff]  }
  0x14   :  { %724 = vmatprep.subr.bf16.mxu0 %v793_v0 }
  0x17   :  { %725 = vmatpush3.bf16.msra.mxu0 %v767_v8  ;;  %v780_v8 = vld [vmem:[%s1019_s4 + $0x30] sm:$0xff]  }
  0x18   :  { %726 = vmatprep.subr.bf16.mxu0 %v793_v0 }
  0x1b   :  { %727 = vmatpush3.bf16.msra.mxu0 %v768_v9  ;;  %v781_v9 = vld [vmem:[%s1019_s4 + $0x28] sm:$0xff]  }
  0x1c   :  { %728 = vmatprep.subr.bf16.mxu0 %v793_v0 }
  0x1f   :  { %729 = vmatpush3.bf16.msra.mxu0 %v769_v10  ;;  %v783_v10 = vld [vmem:[%s1019_s4 + $0x18] sm:$0xff]  }
  0x20   :  { %595 = vmatprep.subr.bf16.mxu0 %v795_v16 }
  0x22   :  { %731 = vmatmul.mubr.bf16.vlgmr.msra.gmra.mxu0 %v875_v11 }
  0x23   :  { %596 = vmatpush1.bf16.msra.mxu0 %v779_v7 }
  0x24   :  { %597 = vmatprep.subr.bf16.mxu0 %v795_v16 }
  0x27   :  { %598 = vmatpush1.bf16.msra.mxu0 %v780_v8 }
  0x28   :  { %599 = vmatprep.subr.bf16.mxu0 %v795_v16 }
  0x2b   :  { %600 = vmatpush1.bf16.msra.mxu0 %v781_v9 }
  0x2c   :  { %601 = vmatprep.subr.bf16.mxu0 %v795_v16 }
  0x90   :  { %v35_v36 = vpop.xlane.xlu0 %34 }
  0x91   :  { %v36_v37 = vadd.f32 1.0, %v35_v36 }
  0x93   :  { %789 = vrcp.f32 %v36_v37 }
  0x94   :  { %v40_v38 = vpop.xlane.xlu0 %39 }
  0x95   :  { %v41_v39 = vadd.f32 1.0, %v40_v38 }
  0x97   :  { %791 = vrcp.f32 %v41_v39 }
  0xa0   :  { %v940_v43 = vpop.eup %789 }
  0xa4   :  { %v944_v52 = vpop.eup %791 }
  0xe2   :  { %v144_v17 = vpop.f32.mrf.mxu0 }
  0xe3   :  { %v152_v18 = vpack.c.bf16 %v144_v17, %v144_v17 }
  0xe4   :  { %v732_v19 = vpop.f32.mrf.mxu0 }
  0xe5   :  { %v158_v20 = vsel %vm156_vm2, %v152_v18, 0  ;;  %v786_v19 = vld [vmem:[%s1019_s4] sm:$0xff]  }
  0xe6   :  { %v147_v22 = vpop.f32.mrf.mxu0  ;;  %735 = vmatpush3.bf16.msra.mxu1 %v158_v20 }
  0xe7   :  { %v211_v23 = vpack.c.bf16 %v147_v22, %v147_v22  ;;  %740 = vmatprep.subr.bf16.mxu1 %v793_v0 }
  0xe8   :  { %v733_v24 = vpop.f32.mrf.mxu0 }
  0xe9   :  { %737 = vmatmul.mubr.msk.bf16.vlgmr.msra.gmra.mxu1 %vm32_vm1, %v888_v21  ;;  %v216_v25 = vsel %vm156_vm2, %v211_v23, 0 }
  0xea   :  { %741 = vmatpush3.bf16.msra.mxu1 %v216_v25  ;;  %742 = vmatprep.mubr.msk.bf16.mxu1 %vm794_vm0, %v793_v0 }
  0xeb   :  { %344 = vmatprep.subr.bf16.mxu1 %v795_v16 }
  0xf1   :  { %743 = vmatmul.mubr.msk.bf16.vlgmr.msra.gmra.mxu1 %vm32_vm1, %v897_v26 }
  0xf2   :  { %345 = vmatpush1.bf16.msra.mxu1 %v770_v27  ;;  %v788_v27 = vld [vmem:[%s1019_s4 + $0x40] sm:$0xff]  }
  0xf3   :  { %346 = vmatprep.subr.bf16.mxu1 %v795_v16 }
  0xf6   :  { %347 = vmatpush1.bf16.msra.mxu1 %v771_v28 }
  0xf7   :  { %348 = vmatprep.subr.bf16.mxu1 %v795_v16 }
  0xfa   :  { %349 = vmatpush1.bf16.msra.mxu1 %v772_v29 }
  0xfb   :  { %350 = vmatprep.subr.bf16.mxu1 %v795_v16 }
  0xfe   :  { %351 = vmatpush1.bf16.msra.mxu1 %v773_v30 }
  0xff   :  { %352 = vmatprep.subr.bf16.mxu1 %v795_v16 }
 0x102   :  { %353 = vmatpush1.bf16.msra.mxu1 %v774_v31 }
 0x103   :  { %354 = vmatprep.subr.bf16.mxu1 %v795_v16 }
 0x106   :  { %355 = vmatpush1.bf16.msra.mxu1 %v775_v32 }
 0x107   :  { %356 = vmatprep.subr.bf16.mxu1 %v795_v16 }
 0x10a   :  { %357 = vmatpush1.bf16.msra.mxu1 %v776_v33 }
 0x10b   :  { %358 = vmatprep.subr.bf16.mxu1 %v795_v16 }
 0x10e   :  { %359 = vmatpush1.bf16.msra.mxu1 %v777_v34 }
 0x10f   :  { %374 = vmatprep.subr.bf16.mxu1 %v795_v16 }
 0x112   :  { %375 = vmatpush2.bf16.msra.mxu1 %v778_v35 }
 0x113   :  { %746 = vmatprep.subr.bf16.mxu1 %v793_v0 }
 0x1a9   :  { %v194_v41 = vpop.f32.mrf.mxu1 }
 0x1aa   :  { %v195_v42 = vadd.f32 %v194_v41, %v144_v17 }
 0x1ab   :  { %v738_v44 = vpop.f32.mrf.mxu1 }
 0x1ac   :  { %v206_v45 = vadd.f32 %v651_v40, %v195_v42 }
 0x1ad   :  { %v197_v46 = vpop.f32.mrf.mxu1 }
 0x1ae   :  { %v207_v47 = vmul.f32 %v940_v43, %v206_v45 }
 0x1af   :  { %v739_v48 = vpop.f32.mrf.mxu1 }
 0x1b0   :  { %v208_v49 = vmax.f32 %v207_v47, 0.0 }
 0x1b1   :  { %v252_v50 = vpop.f32.mrf.mxu1 }
 0x1b2   :  { %v253_v51 = vadd.f32 %v252_v50, %v147_v22  ;;  %210 = vst.msk [vmem:[#allocation2 + $0x8] sm:$0xff] %vm209_vm3, %v208_v49  ;;  %v787_v22 = vld [vmem:[%s1019_s4 + $0x48] sm:$0xff]  }
 0x1b3   :  { %v744_v53 = vpop.f32.mrf.mxu1 }
 0x1b4   :  { %v258_v54 = vadd.f32 %v651_v40, %v253_v51 }
 0x1b5   :  { %v255_v55 = vpop.f32.mrf.mxu1 }
 0x1b6   :  { %v259_v56 = vmul.f32 %v944_v52, %v258_v54 }
 0x1b7   :  { %v745_v57 = vpop.f32.mrf.mxu1 }
 0x1b8   :  { %v260_v58 = vmax.f32 %v259_v56, 0.0 }
 0x1b9   :  { %v282_v59 = vld [vmem:[#allocation2 + $0x8] sm:$0xff] }
 0x1ba   :  { %261 = vst.msk [vmem:[#allocation2 + $0x18] sm:$0xff] %vm209_vm3, %v260_v58 }
 0x1c1   :  { %v284_v60 = vld [vmem:[#allocation2 + $0x18] sm:$0xff] }
 0x1c2   :  { %v286_v61 = vpack.c.bf16 %v284_v60, %v282_v59 }
 0x1c4   :  { %680 = vmatprep.mubr.msk.bf16.mxu1 %vm209_vm3, %v286_v61 }
 0x1c5   :  { %377 = vmatmul.mubr.bf16.vlgmr.msra.gmra.mxu1 %v875_v11 }
 0x1c6   :  { %748 = vmatprep.mubr.msk.bf16.mxu1 %vm794_vm0, %v793_v0 }
 0x285   :  { %v378_v62 = vpop.f32.mrf.mxu1 }
 0x286   :  { %v387_v63 = vpack.c.bf16 %v378_v62, %v378_v62 }
 0x287   :  { %v380_v1 = vpop.f32.mrf.mxu1 }
 0x288   :  { %v389_v2 = vsel %vm156_vm2, %v387_v63, 0 }
 0x289   :  { %v381_v3 = vpop.f32.mrf.mxu1  ;;  %747 = vmatpush3.bf16.msra.mxu1 %v389_v2 }
 0x28a   :  { %v446_v4 = vpack.c.bf16 %v381_v3, %v381_v3  ;;  %752 = vmatprep.subr.bf16.mxu1 %v793_v0 }
 0x28b   :  { %v383_v5 = vpop.f32.mrf.mxu1 }
 0x28c   :  { %749 = vmatmul.mubr.msk.bf16.vlgmr.msra.gmra.mxu1 %vm32_vm1, %v888_v21  ;;  %v448_v6 = vsel %vm156_vm2, %v446_v4, 0 }
 0x28d   :  { %753 = vmatpush3.bf16.msra.mxu1 %v448_v6  ;;  %754 = vmatprep.mubr.msk.bf16.mxu1 %vm794_vm0, %v793_v0  ;;  %v782_v0 = vld [vmem:[%s1019_s4 + $0x20] sm:$0xff]  }
 0x28e   :  { %602 = vmatpush1.bf16.msra.mxu0 %v782_v0 }
 0x28f   :  { %603 = vmatprep.subr.bf16.mxu0 %v795_v16 }
 0x292   :  { %604 = vmatpush1.bf16.msra.mxu0 %v783_v10 }
 0x293   :  { %605 = vmatprep.subr.bf16.mxu0 %v795_v16 }
 0x294   :  { %755 = vmatmul.mubr.msk.bf16.vlgmr.msra.gmra.mxu1 %vm32_vm1, %v897_v26 }
 0x296   :  { %606 = vmatpush1.bf16.msra.mxu0 %v784_v12 }
 0x297   :  { %607 = vmatprep.subr.bf16.mxu0 %v795_v16 }
 0x29a   :  { %608 = vmatpush1.bf16.msra.mxu0 %v785_v13 }
 0x29b   :  { %609 = vmatprep.subr.bf16.mxu0 %v795_v16 }
 0x29e   :  { %610 = vmatpush1.bf16.msra.mxu0 %v786_v19 }
 0x29f   :  { %623 = vmatprep.subr.bf16.mxu0 %v795_v16 }
 0x2a2   :  { %624 = vmatpush2.bf16.msra.mxu0 %v787_v22 }
 0x2a3   :  { %625 = vmatprep.subr.bf16.mxu0 %v795_v16  ;;  %v685_v16 = vld [vmem:[%s1020_s5] ss:$0 sm:$0xff] }
 0x2a6   :  { %626 = vmatpush2.bf16.msra.mxu0 %v788_v27 }
 0x34c   :  { %v425_v15 = vpop.f32.mrf.mxu1 }
 0x34d   :  { %v426_v17 = vadd.f32 %v425_v15, %v378_v62 }
 0x34e   :  { %v750_v18 = vpop.f32.mrf.mxu1 }
 0x34f   :  { %v437_v20 = vadd.f32 %v683_v14, %v426_v17 }
 0x350   :  { %v428_v21 = vpop.f32.mrf.mxu1 }
 0x351   :  { %v438_v23 = vmul.f32 %v940_v43, %v437_v20 }
 0x352   :  { %v751_v24 = vpop.f32.mrf.mxu1 }
 0x353   :  { %v439_v25 = vmax.f32 %v438_v23, 0.0 }
 0x354   :  { %v484_v26 = vpop.f32.mrf.mxu1 }
 0x355   :  { %v485_v28 = vadd.f32 %v484_v26, %v381_v3  ;;  %441 = vrot.lane.b32.xlu1 %v439_v25, %s796_s9 }
 0x356   :  { %v756_v29 = vpop.f32.mrf.mxu1 }
 0x357   :  { %v490_v30 = vadd.f32 %v683_v14, %v485_v28 }
 0x358   :  { %v487_v31 = vpop.f32.mrf.mxu1 }
 0x359   :  { %v491_v32 = vmul.f32 %v944_v52, %v490_v30 }
 0x35a   :  { %v757_v33 = vpop.f32.mrf.mxu1 }
 0x35b   :  { %v492_v34 = vmax.f32 %v491_v32, 0.0 }
 0x35d   :  { %494 = vrot.lane.b32.xlu1 %v492_v34, %s796_s9 }
 0x3c7   :  { %v442_v35 = vpop.permute.xlu1 %441 }
 0x3c8   :  { %445 = vst.msk [vmem:[#allocation2 + $0x8] sm:$0xff] %vm444_vm4, %v442_v35 }
 0x3cf   :  { %v495_v36 = vpop.permute.xlu1 %494  ;;  %v499_v37 = vld [vmem:[#allocation2 + $0x8] sm:$0xff] }
 0x3d0   :  { %497 = vst.msk [vmem:[#allocation2 + $0x18] sm:$0xff] %vm444_vm4, %v495_v36 }
 0x3d7   :  { %v501_v38 = vld [vmem:[#allocation2 + $0x18] sm:$0xff] }
 0x3d8   :  { %v503_v39 = vpack.c.bf16 %v501_v38, %v499_v37 }
 0x3da   :  { %696 = vmatprep.mubr.msk.bf16.mxu0 %vm591_vm5, %v503_v39 }
 0x3db   :  { %628 = vmatmul.mubr.bf16.vlgmr.msra.gmra.mxu0 %v875_v11 }
 0x49b   :  { %v629_v40 = vpop.f32.mrf.mxu0 }
 0x49c   :  { %v630_v41 = vadd.f32 %v685_v16, %v629_v40 }
 0x49d   :  { %v631_v42 = vpop.f32.mrf.mxu0 }
 0x49e   :  { %636 = vst [vmem:[%s1021_s6] sm:$0xff] %v630_v41 }
 0x49f   :  { %v632_v43 = vpop.f32.mrf.mxu0 }
 0x4a0   :  { %v633_v44 = vadd.f32 %v685_v16, %v632_v43 }
 0x4a1   :  { %v634_v45 = vpop.f32.mrf.mxu0 }
 0x4a2   :  { %637 = vst [vmem:[%s1021_s6 + $0x8] sm:$0xff] %v633_v44 }

// kernel: _lambda_.9
= control target key start
LH: loop header
LB: loop body
LE: loop exit
PB: predicated region body
PF: predicated region fallthrough
CT: control target
= control target key end

     0   :  { %11 = vsyncpa [#allocation4], 0  ;;  %s1430_s21 = smov [#allocation3]   ;;  %s1744_s0 = inlined_call_operand.vmem [shape: f32[2,8,8], index: 0, kind: input, shape index: {}]   ;;  %s1745_s1 = inlined_call_operand.vmem [shape: f32[16,128], index: 1, kind: input, shape index: {}]   ;;  %s1746_s2 = inlined_call_operand.vmem [shape: bf16[4,160,8], index: 2, kind: input, shape index: {}]   ;;  %s1747_s3 = inlined_call_operand.vmem [shape: f32[4,1,8], index: 3, kind: input, shape index: {}]   ;;  %s1748_s4 = inlined_call_operand.hbm [shape: bf16[160,128], index: 4, kind: input, shape index: {}]   ;;  %s1749_s5 = inlined_call_operand.vmem [shape: f32[1,128], index: 5, kind: input, shape index: {}]   ;;  %s1750_s6 = inlined_call_operand.vmem [shape: f32[16,128], index: 6, kind: output, shape index: {}]  }
   0x1   :  { %s25_s22 = sshll.u32 %s1430_s21, 4  ;;  %s26_s22 = int_to_ptr.vmem [resolvable:$true] %s25_s22 }
   0x2   :  { %s1416_s23 = scalar_lea.vmem %s26_s22, 1280  ;;  %p1421_p1 = scmp.lt.s32.totalorder %s26_s22, %s26_s22 }
   0x3   :  { %p1417_p0 = scmp.ne.s32.totalorder %s26_s22, %s1416_s23  ;;  %p1422_p2 = scmp.lt.s32.totalorder %s1416_s23, %s1416_s23 }
   0x5   :  { %p1423_p3 = por %p1422_p2, %p1421_p1 }
   0x7   :  { %p1424_p4 = pnand %p1423_p3, %p1417_p0 }
   0x9   :  { %1427 = shalt.err (!%p1424_p4)
}
   0xa   :  { %s1431_s24 = smov 64   ;;  %s1432_s25 = smov 4  }
   0xb   :  { %31 = dma.hbm_to_vmem [thread:$0]  %s1748_s4, 1280, %s26_s22, [#allocation4], %s1431_s24, %s1431_s24, %s1432_s25  }
   0xc   :  { %1428 = dma.done.wait [#allocation4], 1280  }
   0xd   :  { %1429 = vsyncadd [#allocation4], 4294966016  ;;  %v1433_v0 = vmov 0.0   ;;  %vm1434_vm0 = vmmov 0   ;;  %v1358_v1 = vld [vmem:[%s1746_s2 + $0x38] sm:$0xff]   ;;  %v1359_v2 = vld [vmem:[%s1746_s2 + $0x30] sm:$0xff]  }
   0xe   :  { %1281 = vmatprep.subr.bf16.mxu0 %v1433_v0  ;;  %1297 = vmatprep.mubr.msk.bf16.mxu0 %vm1434_vm0, %v1433_v0  ;;  %v1360_v3 = vld [vmem:[%s1746_s2 + $0x28] sm:$0xff]   ;;  %v1361_v4 = vld [vmem:[%s1746_s2 + $0x20] sm:$0xff]   ;;  %v1362_v7 = vld [vmem:[%s1746_s2 + $0x18] sm:$0xff]   ;;  %vm46_vm1 = vcmask 64512   ;;  %v1435_v16 = vmov 0   ;;  %vm170_vm2 = vcmask 1043456  }
   0xf   :  { %1301 = vmatprep.subr.bf16.mxu1 %v1433_v0  ;;  %1303 = vmatprep.mubr.msk.bf16.mxu1 %vm1434_vm0, %v1433_v0  ;;  %v38_v5 = vld [vmem:[%s1745_s1] sm:$0xff]  ;;  %v39_v6 = vld [vmem:[%s1745_s1 + $0x8] sm:$0xff]  ;;  %v1363_v8 = vld [vmem:[%s1746_s2 + $0x10] sm:$0xff]   ;;  %s1436_s13 = smov 8   ;;  %vm456_vm3 = vcmask 130112   ;;  %vm589_vm4 = vcmask 130048  }
  0x10   :  { %1282 = vmatpush3.bf16.msra.mxu0 %v1358_v1  ;;  %v1364_v9 = vld [vmem:[%s1746_s2 + $0x8] sm:$0xff]   ;;  %v1365_v10 = vld [vmem:[%s1746_s2] sm:$0xff]   ;;  %v1520_v11 = vpack.c.bf16 %v39_v6, %v38_v5  ;;  %v1368_v29 = vld [vmem:[%s1746_s2 + $0x78] sm:$0xff]   ;;  %s1437_s9 = smov 16   ;;  %vm693_vm5 = vcmask 195712   ;;  %vm830_vm6 = vcmask 195584  }
  0x11   :  { %1283 = vmatprep.subr.bf16.mxu0 %v1433_v0  ;;  %v42_v12 = vld [vmem:[%s1744_s0] sm:$0xff]  ;;  %v43_v14 = vld [vmem:[%s1744_s0 + $0x8] sm:$0xff]  ;;  %v1369_v30 = vld [vmem:[%s1746_s2 + $0x70] sm:$0xff]   ;;  %vm937_vm7 = vcmask 261312   ;;  %vm1084_vm8 = vcmask 261120  }
  0x12   :  { %v47_v13 = vsel %vm46_vm1, %v42_v12, 0.0  ;;  %v52_v15 = vsel %vm46_vm1, %v43_v14, 0.0  ;;  %v1533_v21 = vpack.c.bf16 %v42_v12, %v42_v12  ;;  %v1542_v26 = vpack.c.bf16 %v43_v14, %v43_v14  ;;  %v1366_v27 = vld [vmem:[%s1746_s2 + $0x88] sm:$0xff]   ;;  %v1367_v28 = vld [vmem:[%s1746_s2 + $0x80] sm:$0xff]   ;;  %v1372_v33 = vld [vmem:[%s1746_s2 + $0x58] sm:$0xff]  }
  0x13   :  { %48 = vadd.xlane.f32.xlu0 %v47_v13  ;;  %v1370_v31 = vld [vmem:[%s1746_s2 + $0x68] sm:$0xff]   ;;  %v1371_v32 = vld [vmem:[%s1746_s2 + $0x60] sm:$0xff]   ;;  %v1373_v34 = vld [vmem:[%s1746_s2 + $0x50] sm:$0xff]  }
  0x14   :  { %1284 = vmatpush3.bf16.msra.mxu0 %v1359_v2  ;;  %v1374_v35 = vld [vmem:[%s1746_s2 + $0x90] ss:$0 sps:$4 sm:$0xff]   ;;  %v1145_v41 = vld [vmem:[%s1747_s3] ss:$0 sm:$0xff]  ;;  %v1379_v13 = vld [vmem:[%s1746_s2 + $0xb8] sm:$0xff]  }
  0x15   :  { %1285 = vmatprep.subr.bf16.mxu0 %v1433_v0  ;;  %v354_v36 = vsel %vm170_vm2, %v1374_v35, 0  ;;  %v1378_v12 = vld [vmem:[%s1746_s2 + $0xc0] sm:$0xff]   ;;  %v1380_v14 = vld [vmem:[%s1746_s2 + $0xb0] sm:$0xff]  }
  0x17   :  { %53 = vadd.xlane.f32.xlu0 %v52_v15  ;;  %v1176_v15 = vld [vmem:[%s1747_s3 + $0x1] ss:$0 sm:$0xff] }
  0x18   :  { %1286 = vmatpush3.bf16.msra.mxu0 %v1360_v3 }
  0x19   :  { %1287 = vmatprep.subr.bf16.mxu0 %v1433_v0 }
  0x1c   :  { %1288 = vmatpush3.bf16.msra.mxu0 %v1361_v4 }
  0x1d   :  { %1289 = vmatprep.subr.bf16.mxu0 %v1433_v0 }
  0x20   :  { %1290 = vmatpush3.bf16.msra.mxu0 %v1362_v7 }
  0x21   :  { %1291 = vmatprep.subr.bf16.mxu0 %v1433_v0 }
  0x24   :  { %1292 = vmatpush3.bf16.msra.mxu0 %v1363_v8  ;;  %v1375_v8 = vld [vmem:[%s1746_s2 + $0xd8] sm:$0xff]  }
  0x25   :  { %1293 = vmatprep.subr.bf16.mxu0 %v1433_v0 }
  0x28   :  { %1294 = vmatpush3.bf16.msra.mxu0 %v1364_v9  ;;  %v1376_v9 = vld [vmem:[%s1746_s2 + $0xd0] sm:$0xff]  }
  0x29   :  { %1295 = vmatprep.subr.bf16.mxu0 %v1433_v0 }
  0x2c   :  { %1296 = vmatpush3.bf16.msra.mxu0 %v1365_v10  ;;  %v1377_v10 = vld [vmem:[%s1746_s2 + $0xc8] sm:$0xff]  }
  0x2d   :  { %593 = vmatprep.subr.bf16.mxu0 %v1435_v16 }
  0x2f   :  { %1298 = vmatmul.mubr.bf16.vlgmr.msra.gmra.mxu0 %v1520_v11 }
  0x30   :  { %594 = vmatpush1.bf16.msra.mxu0 %v1375_v8 }
  0x31   :  { %595 = vmatprep.subr.bf16.mxu0 %v1435_v16 }
  0x34   :  { %596 = vmatpush1.bf16.msra.mxu0 %v1376_v9 }
  0x35   :  { %597 = vmatprep.subr.bf16.mxu0 %v1435_v16 }
  0x38   :  { %598 = vmatpush1.bf16.msra.mxu0 %v1377_v10  ;;  %v1393_v10 = vld [vmem:[%s1746_s2 + $0x130] sm:$0xff]  }
  0x39   :  { %599 = vmatprep.subr.bf16.mxu0 %v1435_v16 }
  0x3c   :  { %600 = vmatpush1.bf16.msra.mxu0 %v1378_v12 }
  0x3d   :  { %601 = vmatprep.subr.bf16.mxu0 %v1435_v16 }
  0x40   :  { %602 = vmatpush1.bf16.msra.mxu0 %v1379_v13 }
  0x41   :  { %603 = vmatprep.subr.bf16.mxu0 %v1435_v16 }
  0x44   :  { %604 = vmatpush1.bf16.msra.mxu0 %v1380_v14 }
  0x45   :  { %605 = vmatprep.subr.bf16.mxu0 %v1435_v16 }
  0x9c   :  { %v49_v37 = vpop.xlane.xlu0 %48 }
  0x9d   :  { %v50_v38 = vadd.f32 1.0, %v49_v37 }
  0x9f   :  { %1404 = vrcp.f32 %v50_v38 }
  0xa0   :  { %v54_v39 = vpop.xlane.xlu0 %53 }
  0xa1   :  { %v55_v40 = vadd.f32 1.0, %v54_v39 }
  0xa3   :  { %1406 = vrcp.f32 %v55_v40 }
  0xac   :  { %v1586_v44 = vpop.eup %1404 }
  0xb0   :  { %v1590_v53 = vpop.eup %1406 }
  0xef   :  { %v158_v17 = vpop.f32.mrf.mxu0 }
  0xf0   :  { %v166_v18 = vpack.c.bf16 %v158_v17, %v158_v17 }
  0xf1   :  { %v1299_v19 = vpop.f32.mrf.mxu0 }
  0xf2   :  { %v172_v20 = vsel %vm170_vm2, %v166_v18, 0 }
  0xf3   :  { %v161_v22 = vpop.f32.mrf.mxu0  ;;  %1302 = vmatpush3.bf16.msra.mxu1 %v172_v20  ;;  %v1381_v20 = vld [vmem:[%s1746_s2 + $0xa8] sm:$0xff]  }
  0xf4   :  { %v224_v23 = vpack.c.bf16 %v161_v22, %v161_v22  ;;  %1307 = vmatprep.subr.bf16.mxu1 %v1433_v0  ;;  %606 = vmatpush1.bf16.msra.mxu0 %v1381_v20 }
  0xf5   :  { %v1300_v24 = vpop.f32.mrf.mxu0  ;;  %607 = vmatprep.subr.bf16.mxu0 %v1435_v16 }
  0xf6   :  { %1304 = vmatmul.mubr.msk.bf16.vlgmr.msra.gmra.mxu1 %vm46_vm1, %v1533_v21  ;;  %v229_v25 = vsel %vm170_vm2, %v224_v23, 0  ;;  %v1382_v24 = vld [vmem:[%s1746_s2 + $0xa0] sm:$0xff]  }
  0xf7   :  { %1308 = vmatpush3.bf16.msra.mxu1 %v229_v25  ;;  %1309 = vmatprep.mubr.msk.bf16.mxu1 %vm1434_vm0, %v1433_v0 }
  0xf8   :  { %356 = vmatprep.subr.bf16.mxu1 %v1435_v16  ;;  %608 = vmatpush1.bf16.msra.mxu0 %v1382_v24 }
  0xf9   :  { %623 = vmatprep.subr.bf16.mxu0 %v1435_v16 }
  0xfe   :  { %1310 = vmatmul.mubr.msk.bf16.vlgmr.msra.gmra.mxu1 %vm46_vm1, %v1542_v26 }
  0xff   :  { %357 = vmatpush1.bf16.msra.mxu1 %v1366_v27 }
 0x100   :  { %358 = vmatprep.subr.bf16.mxu1 %v1435_v16 }
 0x103   :  { %359 = vmatpush1.bf16.msra.mxu1 %v1367_v28 }
 0x104   :  { %360 = vmatprep.subr.bf16.mxu1 %v1435_v16 }
 0x107   :  { %361 = vmatpush1.bf16.msra.mxu1 %v1368_v29 }
 0x108   :  { %362 = vmatprep.subr.bf16.mxu1 %v1435_v16 }
 0x10b   :  { %363 = vmatpush1.bf16.msra.mxu1 %v1369_v30  ;;  %v1383_v30 = vld [vmem:[%s1746_s2 + $0xe0] sm:$0xff]  }
 0x10c   :  { %364 = vmatprep.subr.bf16.mxu1 %v1435_v16  ;;  %624 = vmatpush2.bf16.msra.mxu0 %v1383_v30 }
 0x10d   :  { %1337 = vmatprep.subr.bf16.mxu0 %v1433_v0 }
 0x10f   :  { %365 = vmatpush1.bf16.msra.mxu1 %v1370_v31 }
 0x110   :  { %366 = vmatprep.subr.bf16.mxu1 %v1435_v16 }
 0x113   :  { %367 = vmatpush1.bf16.msra.mxu1 %v1371_v32 }
 0x114   :  { %368 = vmatprep.subr.bf16.mxu1 %v1435_v16 }
 0x117   :  { %369 = vmatpush1.bf16.msra.mxu1 %v1372_v33 }
 0x118   :  { %370 = vmatprep.subr.bf16.mxu1 %v1435_v16 }
 0x11b   :  { %371 = vmatpush1.bf16.msra.mxu1 %v1373_v34 }
 0x11c   :  { %386 = vmatprep.subr.bf16.mxu1 %v1435_v16 }
 0x11f   :  { %387 = vmatpush2.bf16.msra.mxu1 %v354_v36 }
 0x120   :  { %1313 = vmatprep.subr.bf16.mxu1 %v1433_v0 }
 0x1b6   :  { %v208_v42 = vpop.f32.mrf.mxu1 }
 0x1b7   :  { %v209_v43 = vadd.f32 %v208_v42, %v158_v17 }
 0x1b8   :  { %v1305_v45 = vpop.f32.mrf.mxu1 }
 0x1b9   :  { %v220_v46 = vadd.f32 %v1145_v41, %v209_v43 }
 0x1ba   :  { %v211_v47 = vpop.f32.mrf.mxu1 }
 0x1bb   :  { %v221_v48 = vmul.f32 %v1586_v44, %v220_v46 }
 0x1bc   :  { %v1306_v49 = vpop.f32.mrf.mxu1 }
 0x1bd   :  { %v222_v50 = vmax.f32 %v221_v48, 0.0 }
 0x1be   :  { %v265_v51 = vpop.f32.mrf.mxu1 }
 0x1bf   :  { %223 = vst.msk [vmem:[#allocation2 + $0x8] sm:$0xff] %vm46_vm1, %v222_v50  ;;  %v266_v52 = vadd.f32 %v265_v51, %v161_v22 }
 0x1c0   :  { %v1311_v54 = vpop.f32.mrf.mxu1 }
 0x1c1   :  { %v271_v55 = vadd.f32 %v1145_v41, %v266_v52  ;;  %v1384_v52 = vld [vmem:[%s1746_s2 + $0x128] sm:$0xff]   ;;  %v1385_v54 = vld [vmem:[%s1746_s2 + $0x120] sm:$0xff]  }
 0x1c2   :  { %v268_v56 = vpop.f32.mrf.mxu1 }
 0x1c3   :  { %v272_v57 = vmul.f32 %v1590_v53, %v271_v55  ;;  %v1386_v55 = vld [vmem:[%s1746_s2 + $0x118] sm:$0xff]   ;;  %v1387_v56 = vld [vmem:[%s1746_s2 + $0x110] sm:$0xff]  }
 0x1c4   :  { %v1312_v58 = vpop.f32.mrf.mxu1 }
 0x1c5   :  { %v273_v59 = vmax.f32 %v272_v57, 0.0  ;;  %v1388_v57 = vld [vmem:[%s1746_s2 + $0x108] sm:$0xff]   ;;  %v1389_v58 = vld [vmem:[%s1746_s2 + $0x100] sm:$0xff]  }
 0x1c6   :  { %v294_v60 = vld [vmem:[#allocation2 + $0x8] sm:$0xff] }
 0x1c7   :  { %274 = vst.msk [vmem:[#allocation2 + $0x18] sm:$0xff] %vm46_vm1, %v273_v59  ;;  %v1390_v59 = vld [vmem:[%s1746_s2 + $0xf8] sm:$0xff]  }
 0x1ce   :  { %v296_v61 = vld [vmem:[#allocation2 + $0x18] sm:$0xff] }
 0x1cf   :  { %v298_v62 = vpack.c.bf16 %v296_v61, %v294_v60  ;;  %v1208_v60 = vld [vmem:[%s1747_s3 + $0x2] ss:$0 sm:$0xff] }
 0x1d1   :  { %1173 = vmatprep.mubr.msk.bf16.mxu1 %vm46_vm1, %v298_v62 }
 0x1d2   :  { %389 = vmatmul.mubr.bf16.vlgmr.msra.gmra.mxu1 %v1520_v11 }
 0x1d3   :  { %1315 = vmatprep.mubr.msk.bf16.mxu1 %vm1434_vm0, %v1433_v0 }
 0x292   :  { %v390_v63 = vpop.f32.mrf.mxu1 }
 0x293   :  { %v399_v1 = vpack.c.bf16 %v390_v63, %v390_v63 }
 0x294   :  { %v392_v2 = vpop.f32.mrf.mxu1 }
 0x295   :  { %v401_v3 = vsel %vm170_vm2, %v399_v1, 0  ;;  %v1391_v1 = vld [vmem:[%s1746_s2 + $0xf0] sm:$0xff]  }
 0x296   :  { %v393_v4 = vpop.f32.mrf.mxu1  ;;  %1314 = vmatpush3.bf16.msra.mxu1 %v401_v3 }
 0x297   :  { %v458_v5 = vpack.c.bf16 %v393_v4, %v393_v4  ;;  %1319 = vmatprep.subr.bf16.mxu1 %v1433_v0 }
 0x298   :  { %v395_v6 = vpop.f32.mrf.mxu1 }
 0x299   :  { %1316 = vmatmul.mubr.msk.bf16.vlgmr.msra.gmra.mxu1 %vm46_vm1, %v1533_v21  ;;  %v460_v7 = vsel %vm170_vm2, %v458_v5, 0 }
 0x29a   :  { %1320 = vmatpush3.bf16.msra.mxu1 %v460_v7  ;;  %1321 = vmatprep.mubr.msk.bf16.mxu1 %vm1434_vm0, %v1433_v0 }
 0x29b   :  { %1325 = vmatprep.subr.bf16.mxu1 %v1433_v0 }
 0x2a1   :  { %1322 = vmatmul.mubr.msk.bf16.vlgmr.msra.gmra.mxu1 %vm46_vm1, %v1542_v26 }
 0x2a2   :  { %1327 = vmatprep.mubr.msk.bf16.mxu1 %vm1434_vm0, %v1433_v0 }
 0x359   :  { %v437_v17 = vpop.f32.mrf.mxu1 }
 0x35a   :  { %v438_v18 = vadd.f32 %v437_v17, %v390_v63 }
 0x35b   :  { %v1317_v19 = vpop.f32.mrf.mxu1 }
 0x35c   :  { %v449_v22 = vadd.f32 %v1176_v15, %v438_v18 }
 0x35d   :  { %v440_v23 = vpop.f32.mrf.mxu1 }
 0x35e   :  { %v450_v25 = vmul.f32 %v1586_v44, %v449_v22 }
 0x35f   :  { %v1318_v27 = vpop.f32.mrf.mxu1 }
 0x360   :  { %v451_v28 = vmax.f32 %v450_v25, 0.0 }
 0x361   :  { %v496_v29 = vpop.f32.mrf.mxu1 }
 0x362   :  { %v497_v31 = vadd.f32 %v496_v29, %v393_v4  ;;  %453 = vrot.lane.b32.xlu1 %v451_v28, %s1436_s13  ;;  %v1392_v4 = vld [vmem:[%s1746_s2 + $0x138] ss:$0 sps:$4 sm:$0xff]  }
 0x363   :  { %v1323_v32 = vpop.f32.mrf.mxu1  ;;  %v835_v7 = vsel %vm170_vm2, %v1392_v4, 0 }
 0x364   :  { %v502_v33 = vadd.f32 %v1176_v15, %v497_v31 }
 0x365   :  { %v499_v34 = vpop.f32.mrf.mxu1 }
 0x366   :  { %v503_v35 = vmul.f32 %v1590_v53, %v502_v33 }
 0x367   :  { %v1324_v36 = vpop.f32.mrf.mxu1 }
 0x368   :  { %v504_v37 = vmax.f32 %v503_v35, 0.0  ;;  %v1394_v35 = vld [vmem:[#allocation3 + $0x38] sm:$0xff]   ;;  %v1395_v36 = vld [vmem:[#allocation3 + $0x30] sm:$0xff]  }
 0x36a   :  { %506 = vrot.lane.b32.xlu1 %v504_v37, %s1436_s13  ;;  %v1396_v37 = vld [vmem:[#allocation3 + $0x28] sm:$0xff]  }
 0x3d4   :  { %v454_v38 = vpop.permute.xlu1 %453 }
 0x3d5   :  { %457 = vst.msk [vmem:[#allocation2 + $0x8] sm:$0xff] %vm456_vm3, %v454_v38  ;;  %v1400_v38 = vld [vmem:[#allocation3 + $0x8] sm:$0xff]  }
 0x3dc   :  { %v507_v39 = vpop.permute.xlu1 %506  ;;  %v530_v40 = vld [vmem:[#allocation2 + $0x8] sm:$0xff] }
 0x3dd   :  { %509 = vst.msk [vmem:[#allocation2 + $0x18] sm:$0xff] %vm456_vm3, %v507_v39  ;;  %v1242_v39 = vld [vmem:[%s1747_s3 + $0x3] ss:$0 sm:$0xff]  ;;  %s1438_s3 = smov 24  }
 0x3e4   :  { %v532_v41 = vld [vmem:[#allocation2 + $0x18] sm:$0xff] }
 0x3e5   :  { %v534_v42 = vpack.c.bf16 %v532_v41, %v530_v40 }
 0x3e7   :  { %1205 = vmatprep.mubr.msk.bf16.mxu0 %vm589_vm4, %v534_v42 }
 0x3e8   :  { %626 = vmatmul.mubr.bf16.vlgmr.msra.gmra.mxu0 %v1520_v11 }
 0x3e9   :  { %1339 = vmatprep.mubr.msk.bf16.mxu0 %vm1434_vm0, %v1433_v0 }
 0x4a8   :  { %v627_v43 = vpop.f32.mrf.mxu0 }
 0x4a9   :  { %v636_v45 = vpack.c.bf16 %v627_v43, %v627_v43 }
 0x4aa   :  { %v629_v46 = vpop.f32.mrf.mxu0 }
 0x4ab   :  { %v638_v47 = vsel %vm170_vm2, %v636_v45, 0 }
 0x4ac   :  { %v630_v48 = vpop.f32.mrf.mxu0  ;;  %1326 = vmatpush3.bf16.msra.mxu1 %v638_v47  ;;  %v1402_v47 = vld [vmem:[#allocation3 + $0x48] sm:$0xff]  }
 0x4ad   :  { %v695_v49 = vpack.c.bf16 %v630_v48, %v630_v48  ;;  %1331 = vmatprep.subr.bf16.mxu1 %v1433_v0 }
 0x4ae   :  { %v632_v50 = vpop.f32.mrf.mxu0 }
 0x4af   :  { %1328 = vmatmul.mubr.msk.bf16.vlgmr.msra.gmra.mxu1 %vm46_vm1, %v1533_v21  ;;  %v697_v51 = vsel %vm170_vm2, %v695_v49, 0 }
 0x4b0   :  { %1332 = vmatpush3.bf16.msra.mxu1 %v697_v51  ;;  %1333 = vmatprep.mubr.msk.bf16.mxu1 %vm1434_vm0, %v1433_v0 }
 0x4b1   :  { %837 = vmatprep.subr.bf16.mxu1 %v1435_v16 }
 0x4b7   :  { %1334 = vmatmul.mubr.msk.bf16.vlgmr.msra.gmra.mxu1 %vm46_vm1, %v1542_v26 }
 0x4b8   :  { %838 = vmatpush1.bf16.msra.mxu1 %v1384_v52  ;;  %v1403_v52 = vld [vmem:[#allocation3 + $0x40] sm:$0xff]  }
 0x4b9   :  { %839 = vmatprep.subr.bf16.mxu1 %v1435_v16 }
 0x4bc   :  { %840 = vmatpush1.bf16.msra.mxu1 %v1385_v54 }
 0x4bd   :  { %841 = vmatprep.subr.bf16.mxu1 %v1435_v16 }
 0x4c0   :  { %842 = vmatpush1.bf16.msra.mxu1 %v1386_v55 }
 0x4c1   :  { %843 = vmatprep.subr.bf16.mxu1 %v1435_v16 }
 0x4c4   :  { %844 = vmatpush1.bf16.msra.mxu1 %v1387_v56 }
 0x4c5   :  { %845 = vmatprep.subr.bf16.mxu1 %v1435_v16 }
 0x4c8   :  { %846 = vmatpush1.bf16.msra.mxu1 %v1388_v57 }
 0x4c9   :  { %847 = vmatprep.subr.bf16.mxu1 %v1435_v16 }
 0x4cc   :  { %848 = vmatpush1.bf16.msra.mxu1 %v1389_v58 }
 0x4cd   :  { %849 = vmatprep.subr.bf16.mxu1 %v1435_v16 }
 0x4d0   :  { %850 = vmatpush1.bf16.msra.mxu1 %v1390_v59 }
 0x4d1   :  { %851 = vmatprep.subr.bf16.mxu1 %v1435_v16 }
 0x4d4   :  { %852 = vmatpush1.bf16.msra.mxu1 %v1391_v1 }
 0x4d5   :  { %865 = vmatprep.subr.bf16.mxu1 %v1435_v16 }
 0x4d8   :  { %866 = vmatpush2.bf16.msra.mxu1 %v835_v7 }
 0x4d9   :  { %867 = vmatprep.subr.bf16.mxu1 %v1435_v16 }
 0x4dc   :  { %868 = vmatpush2.bf16.msra.mxu1 %v1393_v10 }
 0x56f   :  { %v674_v61 = vpop.f32.mrf.mxu1 }
 0x570   :  { %v675_v62 = vadd.f32 %v674_v61, %v627_v43  ;;  %v1401_v43 = vld [vmem:[#allocation3] sm:$0xff]  }
 0x571   :  { %v1329_v63 = vpop.f32.mrf.mxu1 }
 0x572   :  { %v686_v2 = vadd.f32 %v1208_v60, %v675_v62 }
 0x573   :  { %v677_v3 = vpop.f32.mrf.mxu1 }
 0x574   :  { %v687_v5 = vmul.f32 %v1586_v44, %v686_v2 }
 0x575   :  { %v1330_v6 = vpop.f32.mrf.mxu1 }
 0x576   :  { %v688_v8 = vmax.f32 %v687_v5, 0.0 }
 0x577   :  { %v733_v9 = vpop.f32.mrf.mxu1 }
 0x578   :  { %v734_v12 = vadd.f32 %v733_v9, %v630_v48  ;;  %690 = vrot.lane.b32.xlu0 %v688_v8, %s1437_s9 }
 0x579   :  { %v1335_v13 = vpop.f32.mrf.mxu1 }
 0x57a   :  { %v739_v14 = vadd.f32 %v1208_v60, %v734_v12 }
 0x57b   :  { %v736_v15 = vpop.f32.mrf.mxu1 }
 0x57c   :  { %v740_v17 = vmul.f32 %v1590_v53, %v739_v14 }
 0x57d   :  { %v1336_v18 = vpop.f32.mrf.mxu1 }
 0x57e   :  { %v741_v19 = vmax.f32 %v740_v17, 0.0 }
 0x580   :  { %743 = vrot.lane.b32.xlu1 %v741_v19, %s1437_s9 }
 0x5ea   :  { %v691_v20 = vpop.permute.xlu0 %690 }
 0x5eb   :  { %694 = vst.msk [vmem:[#allocation2 + $0x8] sm:$0xff] %vm693_vm5, %v691_v20 }
 0x5f2   :  { %v744_v22 = vpop.permute.xlu1 %743  ;;  %v768_v23 = vld [vmem:[#allocation2 + $0x8] sm:$0xff] }
 0x5f3   :  { %746 = vst.msk [vmem:[#allocation2 + $0x18] sm:$0xff] %vm693_vm5, %v744_v22 }
 0x5fa   :  { %v770_v24 = vld [vmem:[#allocation2 + $0x18] sm:$0xff] }
 0x5fb   :  { %v772_v25 = vpack.c.bf16 %v770_v24, %v768_v23 }
 0x5fd   :  { %1239 = vmatprep.mubr.msk.bf16.mxu1 %vm830_vm6, %v772_v25 }
 0x5fe   :  { %870 = vmatmul.mubr.bf16.vlgmr.msra.gmra.mxu1 %v1520_v11 }
 0x6be   :  { %v871_v27 = vpop.f32.mrf.mxu1 }
 0x6bf   :  { %v880_v28 = vpack.c.bf16 %v871_v27, %v871_v27 }
 0x6c0   :  { %v873_v29 = vpop.f32.mrf.mxu1 }
 0x6c1   :  { %v882_v30 = vsel %vm170_vm2, %v880_v28, 0 }
 0x6c2   :  { %v874_v31 = vpop.f32.mrf.mxu1  ;;  %1338 = vmatpush3.bf16.msra.mxu0 %v882_v30 }
 0x6c3   :  { %v939_v32 = vpack.c.bf16 %v874_v31, %v874_v31  ;;  %1343 = vmatprep.subr.bf16.mxu0 %v1433_v0 }
 0x6c4   :  { %v876_v33 = vpop.f32.mrf.mxu1 }
 0x6c5   :  { %1340 = vmatmul.mubr.msk.bf16.vlgmr.msra.gmra.mxu0 %vm46_vm1, %v1533_v21  ;;  %v941_v34 = vsel %vm170_vm2, %v939_v32, 0  ;;  %v1397_v21 = vld [vmem:[#allocation3 + $0x20] sm:$0xff]  }
 0x6c6   :  { %1344 = vmatpush3.bf16.msra.mxu0 %v941_v34  ;;  %1345 = vmatprep.mubr.msk.bf16.mxu0 %vm1434_vm0, %v1433_v0  ;;  %v1398_v0 = vld [vmem:[#allocation3 + $0x18] sm:$0xff]  }
 0x6c7   :  { %1088 = vmatprep.subr.bf16.mxu0 %v1435_v16 }
 0x6cd   :  { %1346 = vmatmul.mubr.msk.bf16.vlgmr.msra.gmra.mxu0 %vm46_vm1, %v1542_v26  ;;  %v1399_v26 = vld [vmem:[#allocation3 + $0x10] sm:$0xff]  }
 0x6ce   :  { %1089 = vmatpush1.bf16.msra.mxu0 %v1394_v35 }
 0x6cf   :  { %1090 = vmatprep.subr.bf16.mxu0 %v1435_v16 }
 0x6d2   :  { %1091 = vmatpush1.bf16.msra.mxu0 %v1395_v36 }
 0x6d3   :  { %1092 = vmatprep.subr.bf16.mxu0 %v1435_v16 }
 0x6d6   :  { %1093 = vmatpush1.bf16.msra.mxu0 %v1396_v37 }
 0x6d7   :  { %1094 = vmatprep.subr.bf16.mxu0 %v1435_v16 }
 0x6da   :  { %1095 = vmatpush1.bf16.msra.mxu0 %v1397_v21 }
 0x6db   :  { %1096 = vmatprep.subr.bf16.mxu0 %v1435_v16 }
 0x6de   :  { %1097 = vmatpush1.bf16.msra.mxu0 %v1398_v0 }
 0x6df   :  { %1098 = vmatprep.subr.bf16.mxu0 %v1435_v16 }
 0x6e2   :  { %1099 = vmatpush1.bf16.msra.mxu0 %v1399_v26 }
 0x6e3   :  { %1100 = vmatprep.subr.bf16.mxu0 %v1435_v16 }
 0x6e6   :  { %1101 = vmatpush1.bf16.msra.mxu0 %v1400_v38 }
 0x6e7   :  { %1102 = vmatprep.subr.bf16.mxu0 %v1435_v16 }
 0x6ea   :  { %1103 = vmatpush1.bf16.msra.mxu0 %v1401_v43 }
 0x6eb   :  { %1116 = vmatprep.subr.bf16.mxu0 %v1435_v16 }
 0x6ee   :  { %1117 = vmatpush2.bf16.msra.mxu0 %v1402_v47 }
 0x6ef   :  { %1118 = vmatprep.subr.bf16.mxu0 %v1435_v16  ;;  %v1244_v16 = vld [vmem:[%s1749_s5] ss:$0 sm:$0xff] }
 0x6f2   :  { %1119 = vmatpush2.bf16.msra.mxu0 %v1403_v52 }
 0x785   :  { %v918_v40 = vpop.f32.mrf.mxu0 }
 0x786   :  { %v919_v41 = vadd.f32 %v918_v40, %v871_v27 }
 0x787   :  { %v1341_v42 = vpop.f32.mrf.mxu0 }
 0x788   :  { %v930_v45 = vadd.f32 %v1242_v39, %v919_v41 }
 0x789   :  { %v921_v46 = vpop.f32.mrf.mxu0 }
 0x78a   :  { %v931_v48 = vmul.f32 %v1586_v44, %v930_v45 }
 0x78b   :  { %v1342_v49 = vpop.f32.mrf.mxu0 }
 0x78c   :  { %v932_v50 = vmax.f32 %v931_v48, 0.0 }
 0x78d   :  { %v977_v51 = vpop.f32.mrf.mxu0 }
 0x78e   :  { %v978_v54 = vadd.f32 %v977_v51, %v874_v31  ;;  %934 = vrot.lane.b32.xlu1 %v932_v50, %s1438_s3 }
 0x78f   :  { %v1347_v55 = vpop.f32.mrf.mxu0 }
 0x790   :  { %v983_v56 = vadd.f32 %v1242_v39, %v978_v54 }
 0x791   :  { %v980_v57 = vpop.f32.mrf.mxu0 }
 0x792   :  { %v984_v58 = vmul.f32 %v1590_v53, %v983_v56 }
 0x793   :  { %v1348_v59 = vpop.f32.mrf.mxu0 }
 0x794   :  { %v985_v44 = vmax.f32 %v984_v58, 0.0 }
 0x796   :  { %987 = vrot.lane.b32.xlu1 %v985_v44, %s1438_s3 }
 0x800   :  { %v935_v60 = vpop.permute.xlu1 %934 }
 0x801   :  { %938 = vst.msk [vmem:[#allocation2 + $0x8] sm:$0xff] %vm937_vm7, %v935_v60 }
 0x808   :  { %v988_v61 = vpop.permute.xlu1 %987  ;;  %v992_v62 = vld [vmem:[#allocation2 + $0x8] sm:$0xff] }
 0x809   :  { %990 = vst.msk [vmem:[#allocation2 + $0x18] sm:$0xff] %vm937_vm7, %v988_v61 }
 0x810   :  { %v994_v63 = vld [vmem:[#allocation2 + $0x18] sm:$0xff] }
 0x811   :  { %v996_v1 = vpack.c.bf16 %v994_v63, %v992_v62 }
 0x813   :  { %1255 = vmatprep.mubr.msk.bf16.mxu0 %vm1084_vm8, %v996_v1 }
 0x814   :  { %1121 = vmatmul.mubr.bf16.vlgmr.msra.gmra.mxu0 %v1520_v11 }
 0x8d4   :  { %v1122_v53 = vpop.f32.mrf.mxu0 }
 0x8d5   :  { %v1123_v2 = vadd.f32 %v1244_v16, %v1122_v53 }
 0x8d6   :  { %v1124_v3 = vpop.f32.mrf.mxu0 }
 0x8d7   :  { %1129 = vst [vmem:[%s1750_s6] sm:$0xff] %v1123_v2 }
 0x8d8   :  { %v1125_v4 = vpop.f32.mrf.mxu0 }
 0x8d9   :  { %v1126_v5 = vadd.f32 %v1244_v16, %v1125_v4 }
 0x8da   :  { %v1127_v6 = vpop.f32.mrf.mxu0 }
 0x8db   :  { %1130 = vst [vmem:[%s1750_s6 + $0x8] sm:$0xff] %v1126_v5 }
 0x8dc   :  { %1135 = vsyncpa [#allocation4], 1 }

// kernel: _lambda_.10
= control target key start
LH: loop header
LB: loop body
LE: loop exit
PB: predicated region body
PF: predicated region fallthrough
CT: control target
= control target key end

     0   :  { %15 = vsyncpa [#allocation6], 0  ;;  %s2609_s13 = smov [#allocation5]   ;;  %s3174_s0 = inlined_call_operand.vmem [shape: f32[16,128], index: 0, kind: input, shape index: {}]   ;;  %s3175_s1 = inlined_call_operand.vmem [shape: f32[2,1,8], index: 1, kind: input, shape index: {}]   ;;  %s3176_s2 = inlined_call_operand.vmem [shape: bf16[2,128,16], index: 2, kind: input, shape index: {}]   ;;  %s3177_s3 = inlined_call_operand.vmem [shape: f32[2,1,16], index: 3, kind: input, shape index: {}]   ;;  %s3178_s4 = inlined_call_operand.vmem [shape: bf16[2,128,16], index: 4, kind: input, shape index: {}]   ;;  %s3179_s5 = inlined_call_operand.vmem [shape: f32[2,1,16], index: 5, kind: input, shape index: {}]   ;;  %s3180_s6 = inlined_call_operand.vmem [shape: bf16[4,160,16], index: 6, kind: input, shape index: {}]   ;;  %s3181_s7 = inlined_call_operand.vmem [shape: f32[4,1,16], index: 7, kind: input, shape index: {}]   ;;  %s3182_s8 = inlined_call_operand.hbm [shape: bf16[2,160,128], index: 8, kind: input, shape index: {}]   ;;  %s3183_s9 = inlined_call_operand.vmem [shape: f32[1,128], index: 9, kind: input, shape index: {}]   ;;  %s3184_s10 = inlined_call_operand.vmem [shape: f32[16,128], index: 10, kind: output, shape index: {}]  }
   0x1   :  { %s37_s14 = sshll.u32 %s2609_s13, 4  ;;  %s38_s14 = int_to_ptr.vmem [resolvable:$true] %s37_s14 }
   0x2   :  { %s2595_s15 = scalar_lea.vmem %s38_s14, 2560  ;;  %p2600_p1 = scmp.lt.s32.totalorder %s38_s14, %s38_s14 }
   0x3   :  { %p2596_p0 = scmp.ne.s32.totalorder %s38_s14, %s2595_s15  ;;  %p2601_p2 = scmp.lt.s32.totalorder %s2595_s15, %s2595_s15 }
   0x5   :  { %p2602_p3 = por %p2601_p2, %p2600_p1 }
   0x7   :  { %p2603_p4 = pnand %p2602_p3, %p2596_p0 }
   0x9   :  { %2606 = shalt.err (!%p2603_p4)
}
   0xa   :  { %s2610_s16 = smov 64   ;;  %s2611_s17 = smov 4  }
   0xb   :  { %43 = dma.hbm_to_vmem [thread:$0]  %s3182_s8, 2560, %s38_s14, [#allocation6], %s2610_s16, %s2610_s16, %s2611_s17  }
   0xc   :  { %2607 = dma.done.wait [#allocation6], 2560  }
   0xd   :  { %2608 = vsyncadd [#allocation6], 4294964736  ;;  %v2612_v0 = vmov 0.0   ;;  %vm2613_vm0 = vmmov 0   ;;  %v2485_v1 = vld [vmem:[%s3178_s4 + $0x38] sm:$0xff]   ;;  %v2487_v3 = vld [vmem:[%s3178_s4 + $0x30] sm:$0xff]   ;;  %v335_v48 = vlaneseq }
   0xe   :  { %2306 = vmatprep.subr.bf16.mxu1 %v2612_v0  ;;  %2286 = vmatprep.subr.bf16.mxu0 %v2612_v0  ;;  %v2486_v2 = vld [vmem:[%s3176_s2 + $0x38] sm:$0xff]   ;;  %v2488_v4 = vld [vmem:[%s3176_s2 + $0x30] sm:$0xff]   ;;  %v2489_v5 = vld [vmem:[%s3178_s4 + $0x28] sm:$0xff]   ;;  %vm285_vm1 = vcmask 130048   ;;  %v2614_v52 = vmov 0   ;;  %vm341_vm5 = vcmask 64512  }
   0xf   :  { %2322 = vmatprep.mubr.msk.bf16.mxu1 %vm2613_vm0, %v2612_v0  ;;  %2302 = vmatprep.mubr.msk.bf16.mxu0 %vm2613_vm0, %v2612_v0  ;;  %v2490_v6 = vld [vmem:[%s3176_s2 + $0x28] sm:$0xff]   ;;  %v2491_v7 = vld [vmem:[%s3178_s4 + $0x20] sm:$0xff]   ;;  %v2493_v9 = vld [vmem:[%s3178_s4 + $0x18] sm:$0xff]   ;;  %v336_v50 = vshrl.u32 %v335_v48, 7  ;;  %vm541_vm7 = vcmask 1043456   ;;  %vm835_vm8 = vcmask 261248  }
  0x10   :  { %2307 = vmatpush3.bf16.msra.mxu1 %v2485_v1  ;;  %2287 = vmatpush3.bf16.msra.mxu0 %v2486_v2  ;;  %v2492_v8 = vld [vmem:[%s3176_s2 + $0x20] sm:$0xff]   ;;  %v2494_v10 = vld [vmem:[%s3176_s2 + $0x18] sm:$0xff]   ;;  %v2495_v11 = vld [vmem:[%s3178_s4 + $0x10] sm:$0xff]   ;;  %vm982_vm9 = vcmask 261120  }
  0x11   :  { %2308 = vmatprep.subr.bf16.mxu1 %v2612_v0  ;;  %2288 = vmatprep.subr.bf16.mxu0 %v2612_v0  ;;  %v50_v12 = vld [vmem:[%s3174_s0] sm:$0xff]  ;;  %v51_v13 = vld [vmem:[%s3174_s0 + $0x8] sm:$0xff]  ;;  %v2496_v14 = vld [vmem:[%s3176_s2 + $0x10] sm:$0xff]   ;;  %v337_v51 = vsub.s32 0, %v336_v50 }
  0x12   :  { %53 = vst [vmem:[#allocation2] sm:$0xff] %v50_v12  ;;  %54 = vst [vmem:[#allocation2 + $0x10] sm:$0xff] %v51_v13  ;;  %v2497_v15 = vld [vmem:[%s3178_s4 + $0x8] sm:$0xff]   ;;  %v2499_v17 = vld [vmem:[%s3178_s4] sm:$0xff]   ;;  %v2748_v19 = vpack.c.bf16 %v51_v13, %v50_v12 }
  0x13   :  { %v2498_v16 = vld [vmem:[%s3176_s2 + $0x8] sm:$0xff]   ;;  %v2500_v18 = vld [vmem:[%s3176_s2] sm:$0xff]   ;;  %v2501_v40 = vld [vmem:[%s3180_s6 + $0x38] sm:$0xff]  }
  0x14   :  { %2309 = vmatpush3.bf16.msra.mxu1 %v2487_v3  ;;  %2289 = vmatpush3.bf16.msra.mxu0 %v2488_v4  ;;  %v2017_v22 = vld [vmem:[%s3179_s5] ss:$0 sm:$0xff]  ;;  %v2502_v41 = vld [vmem:[%s3180_s6 + $0x30] sm:$0xff]   ;;  %v2503_v42 = vld [vmem:[%s3180_s6 + $0x28] sm:$0xff]  }
  0x15   :  { %2310 = vmatprep.subr.bf16.mxu1 %v2612_v0  ;;  %2290 = vmatprep.subr.bf16.mxu0 %v2612_v0  ;;  %v2008_v32 = vld [vmem:[%s3177_s3] ss:$0 sm:$0xff]  ;;  %v2505_v44 = vld [vmem:[%s3180_s6 + $0x18] sm:$0xff]   ;;  %v2506_v45 = vld [vmem:[%s3180_s6 + $0x10] sm:$0xff]  }
  0x16   :  { %v2504_v43 = vld [vmem:[%s3180_s6 + $0x20] sm:$0xff]   ;;  %v2507_v46 = vld [vmem:[%s3180_s6 + $0x8] sm:$0xff]  }
  0x17   :  { %v2508_v47 = vld [vmem:[%s3180_s6] sm:$0xff]  }
  0x18   :  { %2311 = vmatpush3.bf16.msra.mxu1 %v2489_v5  ;;  %2291 = vmatpush3.bf16.msra.mxu0 %v2490_v6  ;;  %v55_v49 = vld [vmem:[%s3175_s1] sm:$0x1]  ;;  %v56_v54 = vld [vmem:[%s3175_s1 + $0x1] sm:$0x1] }
  0x19   :  { %2312 = vmatprep.subr.bf16.mxu1 %v2612_v0  ;;  %2292 = vmatprep.subr.bf16.mxu0 %v2612_v0  ;;  %vm333_vm2 = vcmp.ne.f32.partialorder %v55_v49, 0.0  ;;  %vm405_vm3 = vcmp.ne.f32.partialorder %v56_v54, 0.0 }
  0x1a   :  { %v334_v53 = vsel %vm333_vm2, 1, %v2614_v52  ;;  %v406_v58 = vsel %vm405_vm3, 1, %v2614_v52 }
  0x1b   :  { %v2816_v55 = vrot.slane %v334_v53, %v337_v51  ;;  %v2823_v63 = vrot.slane %v406_v58, %v337_v51 }
  0x1c   :  { %2313 = vmatpush3.bf16.msra.mxu1 %v2491_v7  ;;  %2293 = vmatpush3.bf16.msra.mxu0 %v2492_v8 }
  0x1d   :  { %2314 = vmatprep.subr.bf16.mxu1 %v2612_v0  ;;  %2294 = vmatprep.subr.bf16.mxu0 %v2612_v0  ;;  %vm339_vm4 = vcmp.eq.s32.totalorder %v2816_v55, 1  ;;  %vm411_vm6 = vcmp.eq.s32.totalorder %v2823_v63, 1 }
  0x20   :  { %2315 = vmatpush3.bf16.msra.mxu1 %v2493_v9  ;;  %2295 = vmatpush3.bf16.msra.mxu0 %v2494_v10 }
  0x21   :  { %2316 = vmatprep.subr.bf16.mxu1 %v2612_v0  ;;  %2296 = vmatprep.subr.bf16.mxu0 %v2612_v0 }
  0x24   :  { %2317 = vmatpush3.bf16.msra.mxu1 %v2495_v11  ;;  %2297 = vmatpush3.bf16.msra.mxu0 %v2496_v14 }
  0x25   :  { %2318 = vmatprep.subr.bf16.mxu1 %v2612_v0  ;;  %2298 = vmatprep.subr.bf16.mxu0 %v2612_v0 }
  0x28   :  { %2319 = vmatpush3.bf16.msra.mxu1 %v2497_v15  ;;  %2299 = vmatpush3.bf16.msra.mxu0 %v2498_v16 }
  0x29   :  { %2320 = vmatprep.subr.bf16.mxu1 %v2612_v0  ;;  %2300 = vmatprep.subr.bf16.mxu0 %v2612_v0 }
  0x2c   :  { %2321 = vmatpush3.bf16.msra.mxu1 %v2499_v17  ;;  %2301 = vmatpush3.bf16.msra.mxu0 %v2500_v18 }
  0x2d   :  { %2326 = vmatprep.subr.bf16.mxu1 %v2612_v0  ;;  %2338 = vmatprep.subr.bf16.mxu0 %v2612_v0 }
  0x2f   :  { %2323 = vmatmul.mubr.bf16.vlgmr.msra.gmra.mxu1 %v2748_v19  ;;  %2303 = vmatmul.mubr.bf16.vlgmr.msra.gmra.mxu0 %v2748_v19 }
  0x30   :  { %2328 = vmatprep.mubr.msk.bf16.mxu1 %vm2613_vm0, %v2612_v0  ;;  %2354 = vmatprep.mubr.msk.bf16.mxu0 %vm2613_vm0, %v2612_v0 }
  0x31   :  { %2339 = vmatpush3.bf16.msra.mxu0 %v2501_v40  ;;  %v2511_v40 = vld [vmem:[%s3180_s6 + $0x78] sm:$0xff]  }
  0x32   :  { %2340 = vmatprep.subr.bf16.mxu0 %v2612_v0 }
  0x35   :  { %2341 = vmatpush3.bf16.msra.mxu0 %v2502_v41  ;;  %v2512_v41 = vld [vmem:[%s3180_s6 + $0x70] sm:$0xff]  }
  0x36   :  { %2342 = vmatprep.subr.bf16.mxu0 %v2612_v0 }
  0x39   :  { %2343 = vmatpush3.bf16.msra.mxu0 %v2503_v42  ;;  %v2513_v42 = vld [vmem:[%s3180_s6 + $0x68] sm:$0xff]  }
  0x3a   :  { %2344 = vmatprep.subr.bf16.mxu0 %v2612_v0 }
  0x3d   :  { %2345 = vmatpush3.bf16.msra.mxu0 %v2504_v43  ;;  %v2514_v43 = vld [vmem:[%s3180_s6 + $0x60] sm:$0xff]  }
  0x3e   :  { %2346 = vmatprep.subr.bf16.mxu0 %v2612_v0 }
  0x41   :  { %2347 = vmatpush3.bf16.msra.mxu0 %v2505_v44  ;;  %v2515_v44 = vld [vmem:[%s3180_s6 + $0x58] sm:$0xff]  }
  0x42   :  { %2348 = vmatprep.subr.bf16.mxu0 %v2612_v0 }
  0x45   :  { %2349 = vmatpush3.bf16.msra.mxu0 %v2506_v45  ;;  %v2516_v45 = vld [vmem:[%s3180_s6 + $0x50] sm:$0xff]  }
  0x46   :  { %2350 = vmatprep.subr.bf16.mxu0 %v2612_v0 }
  0x49   :  { %2351 = vmatpush3.bf16.msra.mxu0 %v2507_v46  ;;  %v2517_v46 = vld [vmem:[%s3180_s6 + $0x90] sm:$0xff]  }
  0x4a   :  { %2352 = vmatprep.subr.bf16.mxu0 %v2612_v0 }
  0x4d   :  { %2353 = vmatpush3.bf16.msra.mxu0 %v2508_v47  ;;  %v2037_v47 = vld [vmem:[%s3181_s7] ss:$0 sm:$0xff] }
  0x4e   :  { %2370 = vmatprep.subr.bf16.mxu0 %v2612_v0 }
  0x50   :  { %2355 = vmatmul.mubr.bf16.vlgmr.msra.gmra.mxu0 %v2748_v19 }
  0x51   :  { %2372 = vmatprep.mubr.msk.bf16.mxu0 %vm2613_vm0, %v2612_v0 }
  0xef   :  { %v276_v20 = vpop.f32.mrf.mxu1  ;;  %v164_v21 = vpop.f32.mrf.mxu0 }
  0xf0   :  { %v277_v26 = vadd.f32 %v2017_v22, %v276_v20  ;;  %v165_v34 = vadd.f32 %v2008_v32, %v164_v21 }
  0xf1   :  { %v2324_v23 = vpop.f32.mrf.mxu1  ;;  %v2304_v24 = vpop.f32.mrf.mxu0 }
  0xf3   :  { %v279_v25 = vpop.f32.mrf.mxu1  ;;  %v167_v28 = vpop.f32.mrf.mxu0 }
  0xf4   :  { %v280_v27 = vadd.f32 %v2017_v22, %v279_v25  ;;  %v168_v35 = vadd.f32 %v2008_v32, %v167_v28 }
  0xf5   :  { %v2325_v29 = vpop.f32.mrf.mxu1  ;;  %v2305_v31 = vpop.f32.mrf.mxu0 }
  0xf6   :  { %v284_v30 = vpack.c.bf16 %v280_v27, %v277_v26  ;;  %v283_v37 = vpack.c.bf16 %v168_v35, %v165_v34 }
  0xf8   :  { %v290_v33 = vsel %vm285_vm1, %v284_v30, 0  ;;  %v357_v36 = vrot.slane %v284_v30, 4  ;;  %v355_v39 = vrot.slane %v283_v37, 4 }
  0xf9   :  { %2327 = vmatpush3.bf16.xpose.msra.mxu1 %v290_v33 }
  0xfa   :  { %2332 = vmatprep.subr.bf16.mxu1 %v2612_v0  ;;  %v362_v38 = vsel %vm285_vm1, %v357_v36, 0 }
 0x100   :  { %2329 = vmatmul.mubr.msk.bf16.vlgmr.msra.gmra.mxu1 %vm285_vm1, %v283_v37  ;;  %v2509_v37 = vld [vmem:[%s3180_s6 + $0x88] sm:$0xff]  }
 0x101   :  { %2333 = vmatpush3.bf16.xpose.msra.mxu1 %v362_v38  ;;  %2334 = vmatprep.mubr.msk.bf16.mxu1 %vm2613_vm0, %v2612_v0 }
 0x102   :  { %2358 = vmatprep.subr.bf16.mxu1 %v2612_v0 }
 0x108   :  { %2335 = vmatmul.mubr.msk.bf16.vlgmr.msra.gmra.mxu1 %vm285_vm1, %v355_v39  ;;  %v2510_v39 = vld [vmem:[%s3180_s6 + $0x80] sm:$0xff]  }
 0x109   :  { %2360 = vmatprep.mubr.msk.bf16.mxu1 %vm2613_vm0, %v2612_v0 }
 0x110   :  { %v527_v20 = vpop.f32.mrf.mxu0 }
 0x111   :  { %v537_v23 = vpack.c.bf16 %v527_v20, %v527_v20 }
 0x112   :  { %v2356_v21 = vpop.f32.mrf.mxu0 }
 0x113   :  { %v543_v25 = vsel %vm541_vm7, %v537_v23, 0  ;;  %v2531_v21 = vld [vmem:[%s3178_s4 + $0x50] sm:$0xff]   ;;  %v2533_v23 = vld [vmem:[%s3178_s4 + $0x40] sm:$0xff]  }
 0x114   :  { %v2831_v22 = vpop.f32.mrf.mxu0  ;;  %2359 = vmatpush3.bf16.msra.mxu1 %v543_v25 }
 0x115   :  { %2364 = vmatprep.subr.bf16.mxu1 %v2612_v0  ;;  %v597_v32 = vpack.c.bf16 %v2831_v22, %v2831_v22 }
 0x116   :  { %v2357_v24 = vpop.f32.mrf.mxu0 }
 0x117   :  { %v602_v35 = vsel %vm541_vm7, %v597_v32, 0  ;;  %v2534_v32 = vld [vmem:[#allocation5 + $0x38] sm:$0xff]  }
 0x1c0   :  { %v326_v56 = vpop.f32.mrf.mxu1 }
 0x1c1   :  { %v332_v57 = vmul.f32 0.25, %v326_v56 }
 0x1c2   :  { %v2330_v59 = vpop.f32.mrf.mxu1 }
 0x1c3   :  { %v340_v60 = vsel %vm339_vm4, -1e+09, %v332_v57 }
 0x1c4   :  { %v329_v61 = vpop.f32.mrf.mxu1  ;;  %v342_v62 = vsel %vm341_vm5, %v340_v60, -inf }
 0x1c5   :  { %343 = vmax.xlane.f32.xlu0 %v342_v62 }
 0x1c6   :  { %v2331_v1 = vpop.f32.mrf.mxu1 }
 0x1c8   :  { %v398_v2 = vpop.f32.mrf.mxu1 }
 0x1c9   :  { %v404_v3 = vmul.f32 0.25, %v398_v2 }
 0x1ca   :  { %v2336_v4 = vpop.f32.mrf.mxu1 }
 0x1cb   :  { %v412_v5 = vsel %vm411_vm6, -1e+09, %v404_v3 }
 0x1cc   :  { %v401_v6 = vpop.f32.mrf.mxu1  ;;  %v413_v7 = vsel %vm341_vm5, %v412_v5, -inf }
 0x1cd   :  { %414 = vmax.xlane.f32.xlu0 %v413_v7  ;;  %v2518_v7 = vld [vmem:[%s3176_s2 + $0x78] sm:$0xff]  }
 0x1ce   :  { %v2337_v8 = vpop.f32.mrf.mxu1 }
 0x1cf   :  { %v2519_v8 = vld [vmem:[%s3176_s2 + $0x70] sm:$0xff]  }
 0x24e   :  { %v344_v9 = vpop.xlane.xlu0 %343 }
 0x24f   :  { %v345_v10 = vsub.f32 %v340_v60, %v344_v9  ;;  %v2520_v9 = vld [vmem:[%s3176_s2 + $0x68] sm:$0xff]  }
 0x251   :  { %v346_v11 = vmul.f32 1.442695, %v345_v10  ;;  %v2521_v10 = vld [vmem:[%s3176_s2 + $0x60] sm:$0xff]  }
 0x253   :  { %2571 = vpow2.f32 %v346_v11  ;;  %v2522_v11 = vld [vmem:[%s3176_s2 + $0x58] sm:$0xff]  }
 0x256   :  { %v415_v12 = vpop.xlane.xlu0 %414 }
 0x257   :  { %v416_v13 = vsub.f32 %v412_v5, %v415_v12  ;;  %v2523_v12 = vld [vmem:[%s3176_s2 + $0x50] sm:$0xff]  }
 0x259   :  { %v417_v14 = vmul.f32 1.442695, %v416_v13  ;;  %v2524_v13 = vld [vmem:[%s3176_s2 + $0x48] sm:$0xff]  }
 0x25b   :  { %2573 = vpow2.f32 %v417_v14  ;;  %v2525_v14 = vld [vmem:[%s3176_s2 + $0x40] sm:$0xff]  }
 0x260   :  { %v2572_v15 = vpop.eup %2571 }
 0x261   :  { %v348_v16 = vsel %vm341_vm5, %v2572_v15, 0.0 }
 0x262   :  { %349 = vadd.xlane.f32.xlu1 %v348_v16  ;;  %v2527_v16 = vld [vmem:[%s3178_s4 + $0x70] sm:$0xff]  }
 0x268   :  { %v2574_v17 = vpop.eup %2573 }
 0x269   :  { %v419_v18 = vsel %vm341_vm5, %v2574_v17, 0.0 }
 0x26a   :  { %420 = vadd.xlane.f32.xlu1 %v419_v18  ;;  %v2529_v18 = vld [vmem:[%s3178_s4 + $0x60] sm:$0xff]  }
 0x2eb   :  { %v350_v26 = vpop.xlane.xlu1 %349 }
 0x2ec   :  { %2575 = vrcp.f32 %v350_v26 }
 0x2f3   :  { %v421_v27 = vpop.xlane.xlu1 %420 }
 0x2f4   :  { %2577 = vrcp.f32 %v421_v27 }
 0x2f9   :  { %v2576_v28 = vpop.eup %2575 }
 0x2fa   :  { %v352_v29 = vmul.f32 %v2576_v28, %v2572_v15  ;;  %v2526_v15 = vld [vmem:[%s3178_s4 + $0x78] sm:$0xff]  }
 0x2fc   :  { %353 = vst.msk [vmem:[#allocation3] sm:$0xff] %vm341_vm5, %v352_v29 }
 0x301   :  { %v2578_v30 = vpop.eup %2577 }
 0x302   :  { %v423_v31 = vmul.f32 %v2578_v30, %v2574_v17  ;;  %v2528_v17 = vld [vmem:[%s3178_s4 + $0x68] sm:$0xff]  }
 0x303   :  { %v535_v33 = vld [vmem:[#allocation3] sm:$0xff] }
 0x304   :  { %425 = vst.msk [vmem:[#allocation3 + $0x8] sm:$0xff] %vm341_vm5, %v423_v31  ;;  %v2839_v34 = vpack.c.bf16 %v535_v33, %v535_v33  ;;  %v2535_v33 = vld [vmem:[#allocation5 + $0x30] sm:$0xff]  }
 0x306   :  { %2361 = vmatmul.mubr.msk.bf16.vlgmr.msra.gmra.mxu1 %vm341_vm5, %v2839_v34 }
 0x307   :  { %2365 = vmatpush3.bf16.msra.mxu1 %v602_v35  ;;  %2366 = vmatprep.mubr.msk.bf16.mxu1 %vm2613_vm0, %v2612_v0  ;;  %v2536_v35 = vld [vmem:[#allocation5 + $0x28] sm:$0xff]  }
 0x308   :  { %730 = vmatprep.subr.bf16.mxu1 %v2614_v52 }
 0x30b   :  { %v595_v36 = vld [vmem:[#allocation3 + $0x8] sm:$0xff] }
 0x30c   :  { %v2850_v38 = vpack.c.bf16 %v595_v36, %v595_v36  ;;  %v2538_v36 = vld [vmem:[#allocation5 + $0x18] sm:$0xff]  }
 0x30e   :  { %2367 = vmatmul.mubr.msk.bf16.vlgmr.msra.gmra.mxu1 %vm341_vm5, %v2850_v38 }
 0x30f   :  { %731 = vmatpush1.bf16.msra.mxu1 %v2509_v37  ;;  %v2539_v37 = vld [vmem:[#allocation5 + $0x10] sm:$0xff]  }
 0x310   :  { %732 = vmatprep.subr.bf16.mxu1 %v2614_v52 }
 0x313   :  { %733 = vmatpush1.bf16.msra.mxu1 %v2510_v39 }
 0x314   :  { %734 = vmatprep.subr.bf16.mxu1 %v2614_v52 }
 0x317   :  { %735 = vmatpush1.bf16.msra.mxu1 %v2511_v40 }
 0x318   :  { %736 = vmatprep.subr.bf16.mxu1 %v2614_v52 }
 0x31b   :  { %737 = vmatpush1.bf16.msra.mxu1 %v2512_v41 }
 0x31c   :  { %738 = vmatprep.subr.bf16.mxu1 %v2614_v52 }
 0x31f   :  { %739 = vmatpush1.bf16.msra.mxu1 %v2513_v42 }
 0x320   :  { %740 = vmatprep.subr.bf16.mxu1 %v2614_v52 }
 0x323   :  { %741 = vmatpush1.bf16.msra.mxu1 %v2514_v43 }
 0x324   :  { %742 = vmatprep.subr.bf16.mxu1 %v2614_v52 }
 0x327   :  { %743 = vmatpush1.bf16.msra.mxu1 %v2515_v44 }
 0x328   :  { %744 = vmatprep.subr.bf16.mxu1 %v2614_v52 }
 0x32b   :  { %745 = vmatpush1.bf16.msra.mxu1 %v2516_v45 }
 0x32c   :  { %760 = vmatprep.subr.bf16.mxu1 %v2614_v52 }
 0x32f   :  { %761 = vmatpush2.bf16.msra.mxu1 %v2517_v46  ;;  %v2540_v46 = vld [vmem:[#allocation5 + $0x8] sm:$0xff]  }
 0x330   :  { %2382 = vmatprep.subr.bf16.mxu1 %v2612_v0 }
 0x3c6   :  { %v579_v48 = vpop.f32.mrf.mxu1 }
 0x3c7   :  { %v580_v49 = vadd.f32 %v579_v48, %v527_v20  ;;  %v2530_v20 = vld [vmem:[%s3178_s4 + $0x58] sm:$0xff]  }
 0x3c8   :  { %v2362_v50 = vpop.f32.mrf.mxu1 }
 0x3c9   :  { %v591_v51 = vadd.f32 %v2037_v47, %v580_v49  ;;  %v2541_v49 = vld [vmem:[#allocation5] sm:$0xff]   ;;  %v2069_v50 = vld [vmem:[%s3181_s7 + $0x1] ss:$0 sm:$0xff] }
 0x3ca   :  { %v582_v53 = vpop.f32.mrf.mxu1 }
 0x3cb   :  { %v592_v54 = vmul.f32 0.5, %v591_v51  ;;  %v2125_v53 = vld [vmem:[%s3179_s5 + $0x1] ss:$0 sm:$0xff]  ;;  %s2615_s5 = smov 16  }
 0x3cc   :  { %v2363_v56 = vpop.f32.mrf.mxu1 }
 0x3cd   :  { %v593_v57 = vmax.f32 %v592_v54, 0.0 }
 0x3ce   :  { %v638_v58 = vpop.f32.mrf.mxu1 }
 0x3cf   :  { %594 = vst.msk [vmem:[#allocation2 + $0x8] sm:$0xff] %vm285_vm1, %v593_v57  ;;  %v639_v59 = vadd.f32 %v638_v58, %v2831_v22  ;;  %v2532_v22 = vld [vmem:[%s3178_s4 + $0x48] sm:$0xff]  }
 0x3d0   :  { %v2368_v60 = vpop.f32.mrf.mxu1 }
 0x3d1   :  { %v644_v61 = vadd.f32 %v2037_v47, %v639_v59 }
 0x3d2   :  { %v641_v62 = vpop.f32.mrf.mxu1 }
 0x3d3   :  { %v645_v1 = vmul.f32 0.5, %v644_v61  ;;  %v2542_v61 = vld [vmem:[#allocation5 + $0x48] sm:$0xff]  }
 0x3d4   :  { %v2369_v2 = vpop.f32.mrf.mxu1 }
 0x3d5   :  { %v646_v3 = vmax.f32 %v645_v1, 0.0 }
 0x3d6   :  { %v668_v4 = vld [vmem:[#allocation2 + $0x8] sm:$0xff] }
 0x3d7   :  { %647 = vst.msk [vmem:[#allocation2 + $0x18] sm:$0xff] %vm285_vm1, %v646_v3 }
 0x3de   :  { %v670_v5 = vld [vmem:[#allocation2 + $0x18] sm:$0xff] }
 0x3df   :  { %v672_v6 = vpack.c.bf16 %v670_v5, %v668_v4  ;;  %v2543_v4 = vld [vmem:[#allocation5 + $0x40] sm:$0xff]  }
 0x3e1   :  { %2066 = vmatprep.mubr.msk.bf16.mxu1 %vm285_vm1, %v672_v6 }
 0x3e2   :  { %763 = vmatmul.mubr.bf16.vlgmr.msra.gmra.mxu1 %v2748_v19 }
 0x3e3   :  { %2398 = vmatprep.mubr.msk.bf16.mxu1 %vm2613_vm0, %v2612_v0  ;;  %2383 = vmatpush3.bf16.msra.mxu1 %v2518_v7 }
 0x3e4   :  { %2384 = vmatprep.subr.bf16.mxu1 %v2612_v0 }
 0x3e7   :  { %2385 = vmatpush3.bf16.msra.mxu1 %v2519_v8 }
 0x3e8   :  { %2386 = vmatprep.subr.bf16.mxu1 %v2612_v0 }
 0x3eb   :  { %2387 = vmatpush3.bf16.msra.mxu1 %v2520_v9 }
 0x3ec   :  { %2388 = vmatprep.subr.bf16.mxu1 %v2612_v0 }
 0x3ef   :  { %2389 = vmatpush3.bf16.msra.mxu1 %v2521_v10 }
 0x3f0   :  { %2390 = vmatprep.subr.bf16.mxu1 %v2612_v0 }
 0x3f3   :  { %2391 = vmatpush3.bf16.msra.mxu1 %v2522_v11 }
 0x3f4   :  { %2392 = vmatprep.subr.bf16.mxu1 %v2612_v0 }
 0x3f7   :  { %2393 = vmatpush3.bf16.msra.mxu1 %v2523_v12 }
 0x3f8   :  { %2394 = vmatprep.subr.bf16.mxu1 %v2612_v0 }
 0x3fb   :  { %2395 = vmatpush3.bf16.msra.mxu1 %v2524_v13 }
 0x3fc   :  { %2396 = vmatprep.subr.bf16.mxu1 %v2612_v0 }
 0x3ff   :  { %2397 = vmatpush3.bf16.msra.mxu1 %v2525_v14 }
 0x400   :  { %2402 = vmatprep.subr.bf16.mxu1 %v2612_v0 }
 0x402   :  { %2399 = vmatmul.mubr.bf16.vlgmr.msra.gmra.mxu1 %v2748_v19 }
 0x403   :  { %2403 = vmatpush3.bf16.msra.mxu1 %v2526_v15  ;;  %2418 = vmatprep.mubr.msk.bf16.mxu1 %vm2613_vm0, %v2612_v0 }
 0x404   :  { %2404 = vmatprep.subr.bf16.mxu1 %v2612_v0 }
 0x407   :  { %2405 = vmatpush3.bf16.msra.mxu1 %v2527_v16 }
 0x408   :  { %2406 = vmatprep.subr.bf16.mxu1 %v2612_v0 }
 0x40b   :  { %2407 = vmatpush3.bf16.msra.mxu1 %v2528_v17 }
 0x40c   :  { %2408 = vmatprep.subr.bf16.mxu1 %v2612_v0 }
 0x40f   :  { %2409 = vmatpush3.bf16.msra.mxu1 %v2529_v18 }
 0x410   :  { %2410 = vmatprep.subr.bf16.mxu1 %v2612_v0 }
 0x413   :  { %2411 = vmatpush3.bf16.msra.mxu1 %v2530_v20 }
 0x414   :  { %2412 = vmatprep.subr.bf16.mxu1 %v2612_v0 }
 0x417   :  { %2413 = vmatpush3.bf16.msra.mxu1 %v2531_v21 }
 0x418   :  { %2414 = vmatprep.subr.bf16.mxu1 %v2612_v0 }
 0x41b   :  { %2415 = vmatpush3.bf16.msra.mxu1 %v2532_v22 }
 0x41c   :  { %2416 = vmatprep.subr.bf16.mxu1 %v2612_v0 }
 0x41f   :  { %2417 = vmatpush3.bf16.msra.mxu1 %v2533_v23 }
 0x420   :  { %2454 = vmatprep.subr.bf16.mxu1 %v2612_v0 }
 0x422   :  { %2419 = vmatmul.mubr.bf16.vlgmr.msra.gmra.mxu1 %v2748_v19 }
 0x423   :  { %2456 = vmatprep.mubr.msk.bf16.mxu1 %vm2613_vm0, %v2612_v0 }
 0x4a2   :  { %v764_v24 = vpop.f32.mrf.mxu1 }
 0x4a3   :  { %v775_v25 = vpack.c.bf16 %v764_v24, %v764_v24 }
 0x4a4   :  { %v766_v26 = vpop.f32.mrf.mxu1 }
 0x4a5   :  { %v780_v27 = vsel %vm541_vm7, %v775_v25, 0  ;;  %v2544_v25 = vld [vmem:[%s3180_s6 + $0xd8] sm:$0xff]   ;;  %v2545_v26 = vld [vmem:[%s3180_s6 + $0xd0] sm:$0xff]  }
 0x4a6   :  { %v2968_v28 = vpop.f32.mrf.mxu1  ;;  %2371 = vmatpush3.bf16.msra.mxu0 %v780_v27  ;;  %v2546_v27 = vld [vmem:[%s3180_s6 + $0xc8] sm:$0xff]  }
 0x4a7   :  { %v839_v29 = vpack.c.bf16 %v2968_v28, %v2968_v28  ;;  %2376 = vmatprep.subr.bf16.mxu0 %v2612_v0 }
 0x4a8   :  { %v769_v30 = vpop.f32.mrf.mxu1 }
 0x4a9   :  { %2373 = vmatmul.mubr.msk.bf16.vlgmr.msra.gmra.mxu0 %vm341_vm5, %v2839_v34  ;;  %v844_v31 = vsel %vm541_vm7, %v839_v29, 0  ;;  %v2537_v34 = vld [vmem:[#allocation5 + $0x20] sm:$0xff]   ;;  %v2548_v29 = vld [vmem:[%s3180_s6 + $0xb8] sm:$0xff]  }
 0x4aa   :  { %2377 = vmatpush3.bf16.msra.mxu0 %v844_v31  ;;  %2378 = vmatprep.mubr.msk.bf16.mxu0 %vm2613_vm0, %v2612_v0  ;;  %v2549_v30 = vld [vmem:[%s3180_s6 + $0xb0] sm:$0xff]   ;;  %v2550_v31 = vld [vmem:[%s3180_s6 + $0xa8] sm:$0xff]  }
 0x4ab   :  { %986 = vmatprep.subr.bf16.mxu0 %v2614_v52 }
 0x4b1   :  { %2379 = vmatmul.mubr.msk.bf16.vlgmr.msra.gmra.mxu0 %vm341_vm5, %v2850_v38  ;;  %v2099_v38 = vld [vmem:[%s3177_s3 + $0x1] ss:$0 sm:$0xff] }
 0x4b2   :  { %987 = vmatpush1.bf16.msra.mxu0 %v2534_v32  ;;  %v2551_v32 = vld [vmem:[%s3180_s6 + $0xa0] sm:$0xff]  }
 0x4b3   :  { %988 = vmatprep.subr.bf16.mxu0 %v2614_v52 }
 0x4b6   :  { %989 = vmatpush1.bf16.msra.mxu0 %v2535_v33 }
 0x4b7   :  { %990 = vmatprep.subr.bf16.mxu0 %v2614_v52 }
 0x4ba   :  { %991 = vmatpush1.bf16.msra.mxu0 %v2536_v35 }
 0x4bb   :  { %992 = vmatprep.subr.bf16.mxu0 %v2614_v52 }
 0x4be   :  { %993 = vmatpush1.bf16.msra.mxu0 %v2537_v34 }
 0x4bf   :  { %994 = vmatprep.subr.bf16.mxu0 %v2614_v52 }
 0x4c2   :  { %995 = vmatpush1.bf16.msra.mxu0 %v2538_v36  ;;  %v1138_v39 = vpop.f32.mrf.mxu1 }
 0x4c3   :  { %996 = vmatprep.subr.bf16.mxu0 %v2614_v52  ;;  %v1139_v41 = vadd.f32 %v2099_v38, %v1138_v39 }
 0x4c4   :  { %v2400_v40 = vpop.f32.mrf.mxu1 }
 0x4c6   :  { %997 = vmatpush1.bf16.msra.mxu0 %v2539_v37  ;;  %v1141_v42 = vpop.f32.mrf.mxu1 }
 0x4c7   :  { %998 = vmatprep.subr.bf16.mxu0 %v2614_v52  ;;  %v1142_v43 = vadd.f32 %v2099_v38, %v1141_v42 }
 0x4c8   :  { %v2401_v44 = vpop.f32.mrf.mxu1 }
 0x4c9   :  { %v2990_v45 = vpack.c.bf16 %v1142_v43, %v1139_v41 }
 0x4ca   :  { %999 = vmatpush1.bf16.msra.mxu0 %v2540_v46 }
 0x4cb   :  { %1000 = vmatprep.subr.bf16.mxu0 %v2614_v52 }
 0x4ce   :  { %1001 = vmatpush1.bf16.msra.mxu0 %v2541_v49 }
 0x4cf   :  { %1014 = vmatprep.subr.bf16.mxu0 %v2614_v52 }
 0x4d2   :  { %1015 = vmatpush2.bf16.msra.mxu0 %v2542_v61 }
 0x4d3   :  { %1016 = vmatprep.subr.bf16.mxu0 %v2614_v52 }
 0x4d6   :  { %1017 = vmatpush2.bf16.msra.mxu0 %v2543_v4 }
 0x4d7   :  { %2422 = vmatprep.subr.bf16.mxu0 %v2612_v0 }
 0x4e2   :  { %v1252_v47 = vpop.f32.mrf.mxu1 }
 0x4e3   :  { %v1253_v58 = vadd.f32 %v2125_v53, %v1252_v47 }
 0x4e4   :  { %v2420_v48 = vpop.f32.mrf.mxu1 }
 0x4e6   :  { %v1255_v60 = vpop.f32.mrf.mxu1 }
 0x4e7   :  { %v1256_v1 = vadd.f32 %v2125_v53, %v1255_v60 }
 0x4e8   :  { %v2421_v3 = vpop.f32.mrf.mxu1 }
 0x4e9   :  { %v1260_v6 = vpack.c.bf16 %v1256_v1, %v1253_v58 }
 0x4eb   :  { %v1265_v21 = vsel %vm285_vm1, %v1260_v6, 0  ;;  %v1324_v22 = vrot.slane %v1260_v6, 4 }
 0x4ed   :  { %v1329_v23 = vsel %vm285_vm1, %v1324_v22, 0  ;;  %v2557_v22 = vld [vmem:[%s3180_s6 + $0x100] sm:$0xff]  }
 0x569   :  { %v816_v51 = vpop.f32.mrf.mxu0 }
 0x56a   :  { %v817_v54 = vadd.f32 %v816_v51, %v764_v24  ;;  %v1322_v24 = vrot.slane %v2990_v45, 4 }
 0x56b   :  { %v2374_v56 = vpop.f32.mrf.mxu0 }
 0x56c   :  { %v828_v57 = vadd.f32 %v2069_v50, %v817_v54 }
 0x56d   :  { %v819_v59 = vpop.f32.mrf.mxu0 }
 0x56e   :  { %v829_v62 = vmul.f32 0.5, %v828_v57 }
 0x56f   :  { %v2375_v2 = vpop.f32.mrf.mxu0 }
 0x570   :  { %v830_v5 = vmax.f32 %v829_v62, 0.0 }
 0x571   :  { %v880_v7 = vpop.f32.mrf.mxu0 }
 0x572   :  { %v881_v8 = vadd.f32 %v880_v7, %v2968_v28  ;;  %832 = vrot.lane.b32.xlu0 %v830_v5, %s2615_s5  ;;  %v2547_v28 = vld [vmem:[%s3180_s6 + $0xc0] sm:$0xff]  }
 0x573   :  { %v2380_v9 = vpop.f32.mrf.mxu0 }
 0x574   :  { %v886_v10 = vadd.f32 %v2069_v50, %v881_v8 }
 0x575   :  { %v883_v11 = vpop.f32.mrf.mxu0 }
 0x576   :  { %v887_v12 = vmul.f32 0.5, %v886_v10 }
 0x577   :  { %v2381_v13 = vpop.f32.mrf.mxu0 }
 0x578   :  { %v888_v14 = vmax.f32 %v887_v12, 0.0 }
 0x57a   :  { %890 = vrot.lane.b32.xlu1 %v888_v14, %s2615_s5 }
 0x5e4   :  { %v833_v15 = vpop.permute.xlu0 %832 }
 0x5e5   :  { %836 = vst.msk [vmem:[#allocation2 + $0x8] sm:$0xff] %vm835_vm8, %v833_v15  ;;  %v2552_v15 = vld [vmem:[%s3180_s6 + $0x128] sm:$0xff]  }
 0x5ec   :  { %v891_v16 = vpop.permute.xlu1 %890  ;;  %v897_v17 = vld [vmem:[#allocation2 + $0x8] sm:$0xff] }
 0x5ed   :  { %893 = vst.msk [vmem:[#allocation2 + $0x18] sm:$0xff] %vm835_vm8, %v891_v16 }
 0x5f4   :  { %v899_v18 = vld [vmem:[#allocation2 + $0x18] sm:$0xff] }
 0x5f5   :  { %v901_v20 = vpack.c.bf16 %v899_v18, %v897_v17  ;;  %v2553_v17 = vld [vmem:[%s3180_s6 + $0x120] sm:$0xff]   ;;  %v2554_v18 = vld [vmem:[%s3180_s6 + $0x118] sm:$0xff]  }
 0x5f7   :  { %2081 = vmatprep.mubr.msk.bf16.mxu0 %vm982_vm9, %v901_v20  ;;  %v2555_v20 = vld [vmem:[%s3180_s6 + $0x110] sm:$0xff]  }
 0x5f8   :  { %1019 = vmatmul.mubr.bf16.vlgmr.msra.gmra.mxu0 %v2748_v19 }
 0x5f9   :  { %2423 = vmatpush3.bf16.xpose.msra.mxu0 %v1265_v21  ;;  %2424 = vmatprep.mubr.msk.bf16.mxu0 %vm2613_vm0, %v2612_v0  ;;  %v2556_v21 = vld [vmem:[%s3180_s6 + $0x108] sm:$0xff]  }
 0x5fa   :  { %2428 = vmatprep.subr.bf16.mxu0 %v2612_v0 }
 0x600   :  { %2425 = vmatmul.mubr.msk.bf16.vlgmr.msra.gmra.mxu0 %vm285_vm1, %v2990_v45 }
 0x601   :  { %2429 = vmatpush3.bf16.xpose.msra.mxu0 %v1329_v23  ;;  %2430 = vmatprep.mubr.msk.bf16.mxu0 %vm2613_vm0, %v2612_v0  ;;  %v2558_v23 = vld [vmem:[%s3180_s6 + $0xf8] sm:$0xff]  }
 0x602   :  { %2434 = vmatprep.subr.bf16.mxu0 %v2612_v0 }
 0x608   :  { %2431 = vmatmul.mubr.msk.bf16.vlgmr.msra.gmra.mxu0 %vm285_vm1, %v1322_v24  ;;  %v2559_v24 = vld [vmem:[%s3180_s6 + $0xf0] sm:$0xff]  }
 0x609   :  { %2450 = vmatprep.mubr.msk.bf16.mxu0 %vm2613_vm0, %v2612_v0  ;;  %2435 = vmatpush3.bf16.msra.mxu0 %v2544_v25  ;;  %v2560_v25 = vld [vmem:[%s3180_s6 + $0x130] sm:$0xff]  }
 0x60a   :  { %2436 = vmatprep.subr.bf16.mxu0 %v2612_v0 }
 0x60d   :  { %2437 = vmatpush3.bf16.msra.mxu0 %v2545_v26  ;;  %v2162_v26 = vld [vmem:[%s3181_s7 + $0x2] ss:$0 sm:$0xff] }
 0x60e   :  { %2438 = vmatprep.subr.bf16.mxu0 %v2612_v0 }
 0x611   :  { %2439 = vmatpush3.bf16.msra.mxu0 %v2546_v27 }
 0x612   :  { %2440 = vmatprep.subr.bf16.mxu0 %v2612_v0 }
 0x615   :  { %2441 = vmatpush3.bf16.msra.mxu0 %v2547_v28 }
 0x616   :  { %2442 = vmatprep.subr.bf16.mxu0 %v2612_v0 }
 0x619   :  { %2443 = vmatpush3.bf16.msra.mxu0 %v2548_v29 }
 0x61a   :  { %2444 = vmatprep.subr.bf16.mxu0 %v2612_v0 }
 0x61d   :  { %2445 = vmatpush3.bf16.msra.mxu0 %v2549_v30 }
 0x61e   :  { %2446 = vmatprep.subr.bf16.mxu0 %v2612_v0 }
 0x621   :  { %2447 = vmatpush3.bf16.msra.mxu0 %v2550_v31 }
 0x622   :  { %2448 = vmatprep.subr.bf16.mxu0 %v2612_v0 }
 0x625   :  { %2449 = vmatpush3.bf16.msra.mxu0 %v2551_v32 }
 0x626   :  { %2466 = vmatprep.subr.bf16.mxu0 %v2612_v0 }
 0x628   :  { %2451 = vmatmul.mubr.bf16.vlgmr.msra.gmra.mxu0 %v2748_v19 }
 0x629   :  { %2468 = vmatprep.mubr.msk.bf16.mxu0 %vm2613_vm0, %v2612_v0 }
 0x6b8   :  { %v3058_v33 = vpop.f32.mrf.mxu0 }
 0x6ba   :  { %v1022_v35 = vpop.f32.mrf.mxu0 }
 0x6bc   :  { %v3060_v34 = vpop.f32.mrf.mxu0 }
 0x6be   :  { %v1025_v36 = vpop.f32.mrf.mxu0 }
 0x6c0   :  { %v1301_v37 = vpop.f32.mrf.mxu0 }
 0x6c1   :  { %v1307_v38 = vmul.f32 0.25, %v1301_v37 }
 0x6c2   :  { %v2426_v39 = vpop.f32.mrf.mxu0 }
 0x6c3   :  { %v1308_v40 = vsel %vm339_vm4, -1e+09, %v1307_v38 }
 0x6c4   :  { %v1304_v41 = vpop.f32.mrf.mxu0  ;;  %v1309_v42 = vsel %vm341_vm5, %v1308_v40, -inf }
 0x6c5   :  { %1310 = vmax.xlane.f32.xlu1 %v1309_v42 }
 0x6c6   :  { %v2427_v19 = vpop.f32.mrf.mxu0 }
 0x6c8   :  { %v1365_v43 = vpop.f32.mrf.mxu0 }
 0x6c9   :  { %v1371_v44 = vmul.f32 0.25, %v1365_v43 }
 0x6ca   :  { %v2432_v45 = vpop.f32.mrf.mxu0 }
 0x6cb   :  { %v1372_v46 = vsel %vm411_vm6, -1e+09, %v1371_v44  ;;  %v1627_v44 = vld [vmem:[#allocation2] sm:$0xff]  ;;  %v1629_v45 = vld [vmem:[#allocation2 + $0x10] sm:$0xff] }
 0x6cc   :  { %v1368_v47 = vpop.f32.mrf.mxu0  ;;  %v1373_v48 = vsel %vm341_vm5, %v1372_v46, -inf }
 0x6cd   :  { %1374 = vmax.xlane.f32.xlu0 %v1373_v48  ;;  %v3131_v48 = vpack.c.bf16 %v1629_v45, %v1627_v44 }
 0x6ce   :  { %v2433_v49 = vpop.f32.mrf.mxu0 }
 0x6e8   :  { %v1487_v60 = vpop.f32.mrf.mxu0 }
 0x6e9   :  { %v1498_v1 = vpack.c.bf16 %v1487_v60, %v1487_v60 }
 0x6ea   :  { %v2452_v61 = vpop.f32.mrf.mxu0 }
 0x6eb   :  { %v1503_v3 = vsel %vm541_vm7, %v1498_v1, 0  ;;  %v2564_v61 = vld [vmem:[#allocation5 + $0x70] sm:$0xff]   ;;  %v2567_v1 = vld [vmem:[#allocation5 + $0x58] sm:$0xff]  }
 0x6ec   :  { %v3070_v62 = vpop.f32.mrf.mxu0  ;;  %2455 = vmatpush3.bf16.msra.mxu1 %v1503_v3 }
 0x6ed   :  { %2460 = vmatprep.subr.bf16.mxu1 %v2612_v0  ;;  %v1557_v10 = vpack.c.bf16 %v3070_v62, %v3070_v62 }
 0x6ee   :  { %v2453_v2 = vpop.f32.mrf.mxu0 }
 0x6ef   :  { %v1562_v13 = vsel %vm541_vm7, %v1557_v10, 0  ;;  %v2194_v2 = vld [vmem:[%s3181_s7 + $0x3] ss:$0 sm:$0xff]  ;;  %v2569_v10 = vld [vmem:[#allocation5 + $0x98] sm:$0xff]  }
 0x74e   :  { %v1311_v50 = vpop.xlane.xlu1 %1310 }
 0x74f   :  { %v1312_v51 = vsub.f32 %v1308_v40, %v1311_v50 }
 0x751   :  { %v1313_v55 = vmul.f32 1.442695, %v1312_v51 }
 0x753   :  { %2579 = vpow2.f32 %v1313_v55 }
 0x756   :  { %v1375_v53 = vpop.xlane.xlu0 %1374 }
 0x757   :  { %v1376_v54 = vsub.f32 %v1372_v46, %v1375_v53 }
 0x759   :  { %v1377_v56 = vmul.f32 1.442695, %v1376_v54 }
 0x75b   :  { %2581 = vpow2.f32 %v1377_v56 }
 0x760   :  { %v2580_v57 = vpop.eup %2579 }
 0x761   :  { %v1315_v58 = vsel %vm341_vm5, %v2580_v57, 0.0 }
 0x762   :  { %1316 = vadd.xlane.f32.xlu0 %v1315_v58 }
 0x768   :  { %v2582_v59 = vpop.eup %2581 }
 0x769   :  { %v1379_v63 = vsel %vm341_vm5, %v2582_v59, 0.0 }
 0x76a   :  { %1380 = vadd.xlane.f32.xlu1 %v1379_v63  ;;  %v2562_v63 = vld [vmem:[#allocation5 + $0x80] sm:$0xff]  }
 0x7eb   :  { %v1317_v4 = vpop.xlane.xlu0 %1316 }
 0x7ec   :  { %2583 = vrcp.f32 %v1317_v4 }
 0x7f3   :  { %v1381_v5 = vpop.xlane.xlu1 %1380 }
 0x7f4   :  { %2585 = vrcp.f32 %v1381_v5 }
 0x7f9   :  { %v2584_v6 = vpop.eup %2583 }
 0x7fa   :  { %v1319_v7 = vmul.f32 %v2584_v6, %v2580_v57 }
 0x7fc   :  { %1320 = vst.msk [vmem:[#allocation3] sm:$0xff] %vm341_vm5, %v1319_v7  ;;  %v2568_v7 = vld [vmem:[#allocation5 + $0x50] sm:$0xff]  }
 0x801   :  { %v2586_v8 = vpop.eup %2585 }
 0x802   :  { %v1383_v9 = vmul.f32 %v2586_v8, %v2582_v59  ;;  %v2561_v59 = vld [vmem:[#allocation5 + $0x88] sm:$0xff]  }
 0x803   :  { %v1496_v11 = vld [vmem:[#allocation3] sm:$0xff] }
 0x804   :  { %1384 = vst.msk [vmem:[#allocation3 + $0x8] sm:$0xff] %vm341_vm5, %v1383_v9  ;;  %v3078_v12 = vpack.c.bf16 %v1496_v11, %v1496_v11 }
 0x806   :  { %2457 = vmatmul.mubr.msk.bf16.vlgmr.msra.gmra.mxu1 %vm341_vm5, %v3078_v12 }
 0x807   :  { %2461 = vmatpush3.bf16.msra.mxu1 %v1562_v13  ;;  %2462 = vmatprep.mubr.msk.bf16.mxu1 %vm2613_vm0, %v2612_v0 }
 0x808   :  { %1690 = vmatprep.subr.bf16.mxu1 %v2614_v52 }
 0x80b   :  { %v1555_v14 = vld [vmem:[#allocation3 + $0x8] sm:$0xff] }
 0x80c   :  { %v3089_v16 = vpack.c.bf16 %v1555_v14, %v1555_v14 }
 0x80e   :  { %2463 = vmatmul.mubr.msk.bf16.vlgmr.msra.gmra.mxu1 %vm341_vm5, %v3089_v16 }
 0x80f   :  { %1691 = vmatpush1.bf16.msra.mxu1 %v2552_v15  ;;  %v2570_v15 = vld [vmem:[#allocation5 + $0x90] sm:$0xff]  }
 0x810   :  { %1692 = vmatprep.subr.bf16.mxu1 %v2614_v52 }
 0x813   :  { %1693 = vmatpush1.bf16.msra.mxu1 %v2553_v17 }
 0x814   :  { %1694 = vmatprep.subr.bf16.mxu1 %v2614_v52 }
 0x817   :  { %1695 = vmatpush1.bf16.msra.mxu1 %v2554_v18 }
 0x818   :  { %1696 = vmatprep.subr.bf16.mxu1 %v2614_v52 }
 0x81b   :  { %1697 = vmatpush1.bf16.msra.mxu1 %v2555_v20 }
 0x81c   :  { %1698 = vmatprep.subr.bf16.mxu1 %v2614_v52 }
 0x81f   :  { %1699 = vmatpush1.bf16.msra.mxu1 %v2556_v21 }
 0x820   :  { %1700 = vmatprep.subr.bf16.mxu1 %v2614_v52 }
 0x823   :  { %1701 = vmatpush1.bf16.msra.mxu1 %v2557_v22 }
 0x824   :  { %1702 = vmatprep.subr.bf16.mxu1 %v2614_v52 }
 0x827   :  { %1703 = vmatpush1.bf16.msra.mxu1 %v2558_v23 }
 0x828   :  { %1704 = vmatprep.subr.bf16.mxu1 %v2614_v52 }
 0x82b   :  { %1705 = vmatpush1.bf16.msra.mxu1 %v2559_v24 }
 0x82c   :  { %1720 = vmatprep.subr.bf16.mxu1 %v2614_v52 }
 0x82f   :  { %1721 = vmatpush2.bf16.msra.mxu1 %v2560_v25 }
 0x8c6   :  { %v1539_v27 = vpop.f32.mrf.mxu1 }
 0x8c7   :  { %v1540_v28 = vadd.f32 %v1539_v27, %v1487_v60  ;;  %v2563_v60 = vld [vmem:[#allocation5 + $0x78] sm:$0xff]  }
 0x8c8   :  { %v2458_v29 = vpop.f32.mrf.mxu1 }
 0x8c9   :  { %v1551_v30 = vadd.f32 %v2162_v26, %v1540_v28  ;;  %v2207_v28 = vld [vmem:[%s3183_s9] ss:$0 sm:$0xff] }
 0x8ca   :  { %v1542_v31 = vpop.f32.mrf.mxu1 }
 0x8cb   :  { %v1552_v32 = vmul.f32 0.5, %v1551_v30 }
 0x8cc   :  { %v2459_v35 = vpop.f32.mrf.mxu1 }
 0x8cd   :  { %v1553_v36 = vmax.f32 %v1552_v32, 0.0 }
 0x8ce   :  { %v1598_v37 = vpop.f32.mrf.mxu1 }
 0x8cf   :  { %1554 = vst.msk [vmem:[#allocation2 + $0x8] sm:$0xff] %vm285_vm1, %v1553_v36  ;;  %v1599_v38 = vadd.f32 %v1598_v37, %v3070_v62  ;;  %v2566_v62 = vld [vmem:[#allocation5 + $0x60] sm:$0xff]  }
 0x8d0   :  { %v2464_v39 = vpop.f32.mrf.mxu1 }
 0x8d1   :  { %v1604_v40 = vadd.f32 %v2162_v26, %v1599_v38 }
 0x8d2   :  { %v1601_v41 = vpop.f32.mrf.mxu1 }
 0x8d3   :  { %v1605_v42 = vmul.f32 0.5, %v1604_v40 }
 0x8d4   :  { %v2465_v19 = vpop.f32.mrf.mxu1 }
 0x8d5   :  { %v1606_v43 = vmax.f32 %v1605_v42, 0.0 }
 0x8d6   :  { %v1628_v46 = vld [vmem:[#allocation2 + $0x8] sm:$0xff] }
 0x8d7   :  { %1607 = vst.msk [vmem:[#allocation2 + $0x18] sm:$0xff] %vm285_vm1, %v1606_v43 }
 0x8de   :  { %v1630_v47 = vld [vmem:[#allocation2 + $0x18] sm:$0xff] }
 0x8df   :  { %v1632_v49 = vpack.c.bf16 %v1630_v47, %v1628_v46 }
 0x8e1   :  { %2191 = vmatprep.mubr.msk.bf16.mxu1 %vm285_vm1, %v1632_v49 }
 0x8e2   :  { %1723 = vmatmul.mubr.bf16.vlgmr.msra.gmra.mxu1 %v3131_v48 }
 0x9a2   :  { %v1724_v50 = vpop.f32.mrf.mxu1 }
 0x9a3   :  { %v1735_v51 = vpack.c.bf16 %v1724_v50, %v1724_v50 }
 0x9a4   :  { %v1726_v55 = vpop.f32.mrf.mxu1 }
 0x9a5   :  { %v1740_v53 = vsel %vm541_vm7, %v1735_v51, 0 }
 0x9a6   :  { %v1727_v54 = vpop.f32.mrf.mxu1  ;;  %2467 = vmatpush3.bf16.msra.mxu0 %v1740_v53 }
 0x9a7   :  { %v1798_v56 = vpack.c.bf16 %v1727_v54, %v1727_v54  ;;  %2472 = vmatprep.subr.bf16.mxu0 %v2612_v0 }
 0x9a8   :  { %v1729_v57 = vpop.f32.mrf.mxu1 }
 0x9a9   :  { %2469 = vmatmul.mubr.msk.bf16.vlgmr.msra.gmra.mxu0 %vm341_vm5, %v3078_v12  ;;  %v1803_v58 = vsel %vm541_vm7, %v1798_v56, 0 }
 0x9aa   :  { %2473 = vmatpush3.bf16.msra.mxu0 %v1803_v58  ;;  %2474 = vmatprep.mubr.msk.bf16.mxu0 %vm2613_vm0, %v2612_v0  ;;  %v2565_v0 = vld [vmem:[#allocation5 + $0x68] sm:$0xff]  }
 0x9ab   :  { %1945 = vmatprep.subr.bf16.mxu0 %v2614_v52 }
 0x9b1   :  { %2475 = vmatmul.mubr.msk.bf16.vlgmr.msra.gmra.mxu0 %vm341_vm5, %v3089_v16 }
 0x9b2   :  { %1946 = vmatpush1.bf16.msra.mxu0 %v2561_v59 }
 0x9b3   :  { %1947 = vmatprep.subr.bf16.mxu0 %v2614_v52 }
 0x9b6   :  { %1948 = vmatpush1.bf16.msra.mxu0 %v2562_v63 }
 0x9b7   :  { %1949 = vmatprep.subr.bf16.mxu0 %v2614_v52 }
 0x9ba   :  { %1950 = vmatpush1.bf16.msra.mxu0 %v2563_v60 }
 0x9bb   :  { %1951 = vmatprep.subr.bf16.mxu0 %v2614_v52 }
 0x9be   :  { %1952 = vmatpush1.bf16.msra.mxu0 %v2564_v61 }
 0x9bf   :  { %1953 = vmatprep.subr.bf16.mxu0 %v2614_v52 }
 0x9c2   :  { %1954 = vmatpush1.bf16.msra.mxu0 %v2565_v0 }
 0x9c3   :  { %1955 = vmatprep.subr.bf16.mxu0 %v2614_v52 }
 0x9c6   :  { %1956 = vmatpush1.bf16.msra.mxu0 %v2566_v62 }
 0x9c7   :  { %1957 = vmatprep.subr.bf16.mxu0 %v2614_v52 }
 0x9ca   :  { %1958 = vmatpush1.bf16.msra.mxu0 %v2567_v1 }
 0x9cb   :  { %1959 = vmatprep.subr.bf16.mxu0 %v2614_v52 }
 0x9ce   :  { %1960 = vmatpush1.bf16.msra.mxu0 %v2568_v7 }
 0x9cf   :  { %1973 = vmatprep.subr.bf16.mxu0 %v2614_v52 }
 0x9d2   :  { %1974 = vmatpush2.bf16.msra.mxu0 %v2569_v10 }
 0x9d3   :  { %1975 = vmatprep.subr.bf16.mxu0 %v2614_v52 }
 0x9d6   :  { %1976 = vmatpush2.bf16.msra.mxu0 %v2570_v15 }
 0xa69   :  { %v1776_v3 = vpop.f32.mrf.mxu0 }
 0xa6a   :  { %v1777_v4 = vadd.f32 %v1776_v3, %v1724_v50 }
 0xa6b   :  { %v2470_v5 = vpop.f32.mrf.mxu0 }
 0xa6c   :  { %v1788_v6 = vadd.f32 %v2194_v2, %v1777_v4 }
 0xa6d   :  { %v1779_v8 = vpop.f32.mrf.mxu0 }
 0xa6e   :  { %v1789_v9 = vmul.f32 0.5, %v1788_v6 }
 0xa6f   :  { %v2471_v11 = vpop.f32.mrf.mxu0 }
 0xa70   :  { %v1790_v12 = vmax.f32 %v1789_v9, 0.0 }
 0xa71   :  { %v1839_v13 = vpop.f32.mrf.mxu0 }
 0xa72   :  { %v1840_v14 = vadd.f32 %v1839_v13, %v1727_v54  ;;  %1792 = vrot.lane.b32.xlu0 %v1790_v12, %s2615_s5 }
 0xa73   :  { %v2476_v16 = vpop.f32.mrf.mxu0 }
 0xa74   :  { %v1845_v17 = vadd.f32 %v2194_v2, %v1840_v14 }
 0xa75   :  { %v1842_v18 = vpop.f32.mrf.mxu0 }
 0xa76   :  { %v1846_v20 = vmul.f32 0.5, %v1845_v17 }
 0xa77   :  { %v2477_v21 = vpop.f32.mrf.mxu0 }
 0xa78   :  { %v1847_v22 = vmax.f32 %v1846_v20, 0.0 }
 0xa7a   :  { %1849 = vrot.lane.b32.xlu1 %v1847_v22, %s2615_s5 }
 0xae4   :  { %v1793_v23 = vpop.permute.xlu0 %1792 }
 0xae5   :  { %1795 = vst.msk [vmem:[#allocation2 + $0x8] sm:$0xff] %vm835_vm8, %v1793_v23 }
 0xaec   :  { %v1850_v24 = vpop.permute.xlu1 %1849  ;;  %v1856_v25 = vld [vmem:[#allocation2 + $0x8] sm:$0xff] }
 0xaed   :  { %1852 = vst.msk [vmem:[#allocation2 + $0x18] sm:$0xff] %vm835_vm8, %v1850_v24 }
 0xaf4   :  { %v1858_v26 = vld [vmem:[#allocation2 + $0x18] sm:$0xff] }
 0xaf5   :  { %v1860_v27 = vpack.c.bf16 %v1858_v26, %v1856_v25 }
 0xaf7   :  { %2206 = vmatprep.mubr.msk.bf16.mxu0 %vm982_vm9, %v1860_v27 }
 0xaf8   :  { %1978 = vmatmul.mubr.bf16.vlgmr.msra.gmra.mxu0 %v3131_v48 }
 0xbb8   :  { %v1979_v52 = vpop.f32.mrf.mxu0 }
 0xbb9   :  { %v1986_v29 = vadd.f32 %v1979_v52, %v3058_v33 }
 0xbba   :  { %v1981_v30 = vpop.f32.mrf.mxu0 }
 0xbbb   :  { %v1999_v31 = vadd.f32 %v2207_v28, %v1986_v29 }
 0xbbc   :  { %v1982_v32 = vpop.f32.mrf.mxu0 }
 0xbbd   :  { %2001 = vst [vmem:[%s3184_s10] sm:$0xff] %v1999_v31  ;;  %v1987_v35 = vadd.f32 %v1982_v32, %v3060_v34 }
 0xbbe   :  { %v1984_v36 = vpop.f32.mrf.mxu0 }
 0xbbf   :  { %v2000_v37 = vadd.f32 %v2207_v28, %v1987_v35 }
 0xbc1   :  { %2002 = vst [vmem:[%s3184_s10 + $0x8] sm:$0xff] %v2000_v37 }
 0xbc2   :  { %2007 = vsyncpa [#allocation6], 1 }

// kernel: _lambda_.12
= control target key start
LH: loop header
LB: loop body
LE: loop exit
PB: predicated region body
PF: predicated region fallthrough
CT: control target
= control target key end

     0   :  { %v669_v0 = vmov 0.0   ;;  %vm670_vm0 = vmmov 0   ;;  %s890_s4 = inlined_call_operand.vmem [shape: bf16[128,128], index: 4, kind: input, shape index: {}]   ;;  %s891_s5 = inlined_call_operand.vmem [shape: bf16[128,128], index: 5, kind: input, shape index: {}]   ;;  %s892_s6 = inlined_call_operand.vmem [shape: bf16[128,128], index: 6, kind: input, shape index: {}]   ;;  %s893_s7 = inlined_call_operand.vmem [shape: bf16[128,128], index: 7, kind: input, shape index: {}]   ;;  %s894_s0 = inlined_call_operand.vmem [shape: f32[16,128], index: 0, kind: input, shape index: {}]   ;;  %s895_s1 = inlined_call_operand.vmem [shape: f32[16,128], index: 1, kind: input, shape index: {}]   ;;  %s896_s2 = inlined_call_operand.vmem [shape: f32[16,128], index: 2, kind: input, shape index: {}]   ;;  %s897_s3 = inlined_call_operand.vmem [shape: f32[16,128], index: 3, kind: input, shape index: {}]   ;;  %s898_s8 = inlined_call_operand.vmem [shape: f32[1,128], index: 8, kind: input, shape index: {}]   ;;  %s899_s9 = inlined_call_operand.vmem [shape: f32[16,128], index: 9, kind: output, shape index: {}]  }
   0x1   :  { %555 = vmatprep.subr.bf16.mxu0 %v669_v0  ;;  %575 = vmatprep.subr.bf16.mxu1 %v669_v0  ;;  %v637_v1 = vld [vmem:[%s890_s4 + $0x38] sm:$0xff]   ;;  %v639_v3 = vld [vmem:[%s890_s4 + $0x30] sm:$0xff]   ;;  %v641_v5 = vld [vmem:[%s890_s4 + $0x28] sm:$0xff]  }
   0x2   :  { %v638_v2 = vld [vmem:[%s891_s5 + $0x38] sm:$0xff]   ;;  %571 = vmatprep.mubr.msk.bf16.mxu0 %vm670_vm0, %v669_v0  ;;  %591 = vmatprep.mubr.msk.bf16.mxu1 %vm670_vm0, %v669_v0  ;;  %v640_v4 = vld [vmem:[%s891_s5 + $0x30] sm:$0xff]   ;;  %v642_v6 = vld [vmem:[%s891_s5 + $0x28] sm:$0xff]  }
   0x3   :  { %556 = vmatpush3.bf16.msra.mxu0 %v637_v1  ;;  %576 = vmatpush3.bf16.msra.mxu1 %v638_v2  ;;  %v643_v7 = vld [vmem:[%s890_s4 + $0x20] sm:$0xff]   ;;  %v645_v9 = vld [vmem:[%s890_s4 + $0x18] sm:$0xff]   ;;  %v647_v11 = vld [vmem:[%s890_s4 + $0x10] sm:$0xff]  }
   0x4   :  { %557 = vmatprep.subr.bf16.mxu0 %v669_v0  ;;  %577 = vmatprep.subr.bf16.mxu1 %v669_v0  ;;  %v644_v8 = vld [vmem:[%s891_s5 + $0x20] sm:$0xff]   ;;  %v646_v10 = vld [vmem:[%s891_s5 + $0x18] sm:$0xff]   ;;  %v648_v12 = vld [vmem:[%s891_s5 + $0x10] sm:$0xff]  }
   0x5   :  { %v649_v13 = vld [vmem:[%s890_s4 + $0x8] sm:$0xff]   ;;  %v651_v15 = vld [vmem:[%s890_s4] sm:$0xff]   ;;  %v653_v23 = vld [vmem:[%s892_s6 + $0x38] sm:$0xff]  }
   0x6   :  { %v650_v14 = vld [vmem:[%s891_s5 + $0x8] sm:$0xff]   ;;  %v34_v16 = vld [vmem:[%s894_s0] sm:$0xff]  ;;  %v654_v24 = vld [vmem:[%s893_s7 + $0x38] sm:$0xff]  }
   0x7   :  { %558 = vmatpush3.bf16.msra.mxu0 %v639_v3  ;;  %578 = vmatpush3.bf16.msra.mxu1 %v640_v4  ;;  %v652_v17 = vld [vmem:[%s891_s5] sm:$0xff]   ;;  %v35_v18 = vld [vmem:[%s894_s0 + $0x8] sm:$0xff]  ;;  %v655_v25 = vld [vmem:[%s892_s6 + $0x30] sm:$0xff]  }
   0x8   :  { %559 = vmatprep.subr.bf16.mxu0 %v669_v0  ;;  %579 = vmatprep.subr.bf16.mxu1 %v669_v0  ;;  %v150_v19 = vld [vmem:[%s895_s1] sm:$0xff]  ;;  %v151_v20 = vld [vmem:[%s895_s1 + $0x8] sm:$0xff]  ;;  %v36_v21 = vpack.c.bf16 %v35_v18, %v34_v16  ;;  %v656_v26 = vld [vmem:[%s893_s7 + $0x30] sm:$0xff]  }
   0x9   :  { %v152_v22 = vpack.c.bf16 %v151_v20, %v150_v19  ;;  %v657_v27 = vld [vmem:[%s892_s6 + $0x28] sm:$0xff]   ;;  %v659_v29 = vld [vmem:[%s892_s6 + $0x20] sm:$0xff]   ;;  %v661_v31 = vld [vmem:[%s892_s6 + $0x18] sm:$0xff]  }
   0xa   :  { %v658_v28 = vld [vmem:[%s893_s7 + $0x28] sm:$0xff]   ;;  %v660_v30 = vld [vmem:[%s893_s7 + $0x20] sm:$0xff]   ;;  %v662_v32 = vld [vmem:[%s893_s7 + $0x18] sm:$0xff]  }
   0xb   :  { %560 = vmatpush3.bf16.msra.mxu0 %v641_v5  ;;  %580 = vmatpush3.bf16.msra.mxu1 %v642_v6  ;;  %v663_v33 = vld [vmem:[%s892_s6 + $0x10] sm:$0xff]   ;;  %v665_v35 = vld [vmem:[%s892_s6 + $0x8] sm:$0xff]   ;;  %v667_v37 = vld [vmem:[%s892_s6] sm:$0xff]  }
   0xc   :  { %561 = vmatprep.subr.bf16.mxu0 %v669_v0  ;;  %581 = vmatprep.subr.bf16.mxu1 %v669_v0  ;;  %v664_v34 = vld [vmem:[%s893_s7 + $0x10] sm:$0xff]   ;;  %v666_v36 = vld [vmem:[%s893_s7 + $0x8] sm:$0xff]   ;;  %v260_v38 = vld [vmem:[%s896_s2] sm:$0xff] }
   0xd   :  { %v261_v39 = vld [vmem:[%s896_s2 + $0x8] sm:$0xff]  ;;  %v668_v40 = vld [vmem:[%s893_s7] sm:$0xff]  }
   0xe   :  { %v370_v41 = vld [vmem:[%s897_s3] sm:$0xff]  ;;  %v371_v42 = vld [vmem:[%s897_s3 + $0x8] sm:$0xff]  ;;  %v262_v43 = vpack.c.bf16 %v261_v39, %v260_v38 }
   0xf   :  { %562 = vmatpush3.bf16.msra.mxu0 %v643_v7  ;;  %582 = vmatpush3.bf16.msra.mxu1 %v644_v8  ;;  %v372_v44 = vpack.c.bf16 %v371_v42, %v370_v41  ;;  %v494_v53 = vld [vmem:[%s898_s8] ss:$0 sm:$0xff] }
  0x10   :  { %563 = vmatprep.subr.bf16.mxu0 %v669_v0  ;;  %583 = vmatprep.subr.bf16.mxu1 %v669_v0 }
  0x13   :  { %564 = vmatpush3.bf16.msra.mxu0 %v645_v9  ;;  %584 = vmatpush3.bf16.msra.mxu1 %v646_v10 }
  0x14   :  { %565 = vmatprep.subr.bf16.mxu0 %v669_v0  ;;  %585 = vmatprep.subr.bf16.mxu1 %v669_v0 }
  0x17   :  { %566 = vmatpush3.bf16.msra.mxu0 %v647_v11  ;;  %586 = vmatpush3.bf16.msra.mxu1 %v648_v12 }
  0x18   :  { %567 = vmatprep.subr.bf16.mxu0 %v669_v0  ;;  %587 = vmatprep.subr.bf16.mxu1 %v669_v0 }
  0x1b   :  { %568 = vmatpush3.bf16.msra.mxu0 %v649_v13  ;;  %588 = vmatpush3.bf16.msra.mxu1 %v650_v14 }
  0x1c   :  { %569 = vmatprep.subr.bf16.mxu0 %v669_v0  ;;  %589 = vmatprep.subr.bf16.mxu1 %v669_v0 }
  0x1f   :  { %570 = vmatpush3.bf16.msra.mxu0 %v651_v15  ;;  %590 = vmatpush3.bf16.msra.mxu1 %v652_v17 }
  0x20   :  { %595 = vmatprep.subr.bf16.mxu0 %v669_v0  ;;  %615 = vmatprep.subr.bf16.mxu1 %v669_v0 }
  0x22   :  { %572 = vmatmul.mubr.bf16.vlgmr.msra.gmra.mxu0 %v36_v21  ;;  %592 = vmatmul.mubr.bf16.vlgmr.msra.gmra.mxu1 %v152_v22 }
  0x23   :  { %596 = vmatpush3.bf16.msra.mxu0 %v653_v23  ;;  %616 = vmatpush3.bf16.msra.mxu1 %v654_v24 }
  0x24   :  { %597 = vmatprep.subr.bf16.mxu0 %v669_v0  ;;  %617 = vmatprep.subr.bf16.mxu1 %v669_v0 }
  0x25   :  { %611 = vmatprep.mubr.msk.bf16.mxu0 %vm670_vm0, %v669_v0  ;;  %631 = vmatprep.mubr.msk.bf16.mxu1 %vm670_vm0, %v669_v0 }
  0x27   :  { %598 = vmatpush3.bf16.msra.mxu0 %v655_v25  ;;  %618 = vmatpush3.bf16.msra.mxu1 %v656_v26 }
  0x28   :  { %599 = vmatprep.subr.bf16.mxu0 %v669_v0  ;;  %619 = vmatprep.subr.bf16.mxu1 %v669_v0 }
  0x2b   :  { %600 = vmatpush3.bf16.msra.mxu0 %v657_v27  ;;  %620 = vmatpush3.bf16.msra.mxu1 %v658_v28 }
  0x2c   :  { %601 = vmatprep.subr.bf16.mxu0 %v669_v0  ;;  %621 = vmatprep.subr.bf16.mxu1 %v669_v0 }
  0x2f   :  { %602 = vmatpush3.bf16.msra.mxu0 %v659_v29  ;;  %622 = vmatpush3.bf16.msra.mxu1 %v660_v30 }
  0x30   :  { %603 = vmatprep.subr.bf16.mxu0 %v669_v0  ;;  %623 = vmatprep.subr.bf16.mxu1 %v669_v0 }
  0x33   :  { %604 = vmatpush3.bf16.msra.mxu0 %v661_v31  ;;  %624 = vmatpush3.bf16.msra.mxu1 %v662_v32 }
  0x34   :  { %605 = vmatprep.subr.bf16.mxu0 %v669_v0  ;;  %625 = vmatprep.subr.bf16.mxu1 %v669_v0 }
  0x37   :  { %606 = vmatpush3.bf16.msra.mxu0 %v663_v33  ;;  %626 = vmatpush3.bf16.msra.mxu1 %v664_v34 }
  0x38   :  { %607 = vmatprep.subr.bf16.mxu0 %v669_v0  ;;  %627 = vmatprep.subr.bf16.mxu1 %v669_v0 }
  0x3b   :  { %608 = vmatpush3.bf16.msra.mxu0 %v665_v35  ;;  %628 = vmatpush3.bf16.msra.mxu1 %v666_v36 }
  0x3c   :  { %609 = vmatprep.subr.bf16.mxu0 %v669_v0  ;;  %629 = vmatprep.subr.bf16.mxu1 %v669_v0 }
  0x3f   :  { %610 = vmatpush3.bf16.msra.mxu0 %v667_v37  ;;  %630 = vmatpush3.bf16.msra.mxu1 %v668_v40 }
  0x42   :  { %612 = vmatmul.mubr.bf16.vlgmr.msra.gmra.mxu0 %v262_v43  ;;  %632 = vmatmul.mubr.bf16.vlgmr.msra.gmra.mxu1 %v372_v44 }
  0xe2   :  { %v135_v45 = vpop.f32.mrf.mxu0  ;;  %v251_v46 = vpop.f32.mrf.mxu1 }
  0xe3   :  { %v148_v54 = vadd.f32 %v494_v53, %v135_v45 }
  0xe4   :  { %v573_v47 = vpop.f32.mrf.mxu0  ;;  %v593_v48 = vpop.f32.mrf.mxu1 }
  0xe5   :  { %v258_v55 = vadd.f32 %v251_v46, %v148_v54 }
  0xe6   :  { %v138_v49 = vpop.f32.mrf.mxu0  ;;  %v254_v50 = vpop.f32.mrf.mxu1 }
  0xe7   :  { %v149_v56 = vadd.f32 %v494_v53, %v138_v49 }
  0xe8   :  { %v574_v51 = vpop.f32.mrf.mxu0  ;;  %v594_v52 = vpop.f32.mrf.mxu1 }
  0xe9   :  { %v259_v61 = vadd.f32 %v254_v50, %v149_v56 }
 0x102   :  { %v361_v57 = vpop.f32.mrf.mxu0  ;;  %v471_v59 = vpop.f32.mrf.mxu1 }
 0x103   :  { %v368_v58 = vadd.f32 %v361_v57, %v258_v55 }
 0x104   :  { %v613_v60 = vpop.f32.mrf.mxu0  ;;  %v633_v63 = vpop.f32.mrf.mxu1 }
 0x105   :  { %v478_v62 = vadd.f32 %v471_v59, %v368_v58 }
 0x106   :  { %v364_v0 = vpop.f32.mrf.mxu0  ;;  %v474_v2 = vpop.f32.mrf.mxu1 }
 0x107   :  { %480 = vst [vmem:[%s899_s9] sm:$0xff] %v478_v62  ;;  %v369_v1 = vadd.f32 %v364_v0, %v259_v61 }
 0x108   :  { %v614_v3 = vpop.f32.mrf.mxu0  ;;  %v634_v5 = vpop.f32.mrf.mxu1 }
 0x109   :  { %v479_v4 = vadd.f32 %v474_v2, %v369_v1 }
 0x10b   :  { %481 = vst [vmem:[%s899_s9 + $0x8] sm:$0xff] %v479_v4 }

// kernel: _lambda_.13
= control target key start
LH: loop header
LB: loop body
LE: loop exit
PB: predicated region body
PF: predicated region fallthrough
CT: control target
= control target key end

     0   :  { %17 = vsyncpa [#allocation3], 0  ;;  %v857_v3 = vmov 0   ;;  %v858_v9 = vmov 0.0   ;;  %vm859_vm6 = vmmov 0   ;;  %s1098_s0 = inlined_call_operand.vmem [shape: f32[2,8,128], index: 0, kind: input, shape index: {}]   ;;  %s1099_s1 = inlined_call_operand.vmem [shape: f32[2,8,1], index: 1, kind: input, shape index: {}]   ;;  %s1100_s2 = inlined_call_operand.vmem [shape: f32[2,8,1], index: 2, kind: input, shape index: {}]   ;;  %s1101_s3 = inlined_call_operand.vmem [shape: f32[2,8,1], index: 3, kind: input, shape index: {}]   ;;  %s1102_s4 = inlined_call_operand.vmem [shape: bf16[128,128], index: 4, kind: input, shape index: {}]   ;;  %s1103_s5 = inlined_call_operand.vmem [shape: bf16[128,128], index: 5, kind: input, shape index: {}]   ;;  %s1104_s6 = inlined_call_operand.vmem [shape: bf16[128,128], index: 6, kind: input, shape index: {}]   ;;  %s1105_s7 = inlined_call_operand.vmem [shape: f32[1,128], index: 7, kind: input, shape index: {}]   ;;  %s1106_s8 = inlined_call_operand.vmem [shape: bf16[128,128], index: 8, kind: input, shape index: {}]   ;;  %s1107_s9 = inlined_call_operand.vmem [shape: f32[1,128], index: 9, kind: input, shape index: {}]   ;;  %s1108_s10 = inlined_call_operand.hbm [shape: f32[2,128], index: 10, kind: output, shape index: {0}]   ;;  %s1109_s11 = inlined_call_operand.hbm [shape: f32[2,128], index: 11, kind: output, shape index: {1}]  }
   0x1   :  { %v70_v0 = vld [vmem:[%s1100_s2] sm:$0xff]  ;;  %v71_v2 = vld [vmem:[%s1100_s2 + $0x8] sm:$0xff]  ;;  %780 = vset.pattern.permute.xlu1 %v857_v3  ;;  %779 = vset.pattern.permute.xlu0 %v857_v3  ;;  %v781_v11 = vld [vmem:[%s1102_s4 + $0x38] sm:$0xff]  }
   0x2   :  { %v42_v1 = vld [vmem:[%s1099_s1] sm:$0xff]  ;;  %vm72_vm0 = vcmp.ne.f32.partialorder %v70_v0, 0.0  ;;  %vm73_vm2 = vcmp.ne.f32.partialorder %v71_v2, 0.0  ;;  %v43_v4 = vld [vmem:[%s1099_s1 + $0x8] sm:$0xff]  ;;  %694 = vmatprep.subr.bf16.mxu0 %v858_v9  ;;  %714 = vmatprep.subr.bf16.mxu1 %v858_v9  ;;  %v782_v13 = vld [vmem:[%s1103_s5 + $0x38] sm:$0xff]  }
   0x3   :  { %vm44_vm1 = vcmp.ne.f32.partialorder %v42_v1, 0.0  ;;  %v99_v5 = vld [vmem:[%s1101_s3 + $0x8] sm:$0xff]  ;;  %v74_v6 = vsel %vm72_vm0, 1, %v857_v3  ;;  %vm45_vm3 = vcmp.ne.f32.partialorder %v43_v4, 0.0  ;;  %v98_v8 = vld [vmem:[%s1101_s3] sm:$0xff]  ;;  %v75_v10 = vsel %vm73_vm2, 1, %v857_v3  ;;  %695 = vmatpush3.bf16.msra.mxu0 %v781_v11  ;;  %715 = vmatpush3.bf16.msra.mxu1 %v782_v13 }
   0x4   :  { %v46_v7 = vsel %vm44_vm1, 1, %v857_v3  ;;  %77 = vperm.xlu1 %780, %v74_v6   ;;  %v47_v12 = vsel %vm45_vm3, 1, %v857_v3  ;;  %vm101_vm4 = vcmp.ne.f32.partialorder %v99_v5, 0.0  ;;  %vm100_vm5 = vcmp.ne.f32.partialorder %v98_v8, 0.0  ;;  %696 = vmatprep.subr.bf16.mxu0 %v858_v9  ;;  %v783_v14 = vld [vmem:[%s1102_s4 + $0x30] sm:$0xff]   ;;  %v785_v18 = vld [vmem:[%s1102_s4 + $0x28] sm:$0xff]  }
   0x5   :  { %49 = vperm.xlu0 %779, %v46_v7   ;;  %v103_v15 = vsel %vm101_vm4, 1, %v857_v3  ;;  %v102_v16 = vsel %vm100_vm5, 1, %v857_v3  ;;  %v784_v17 = vld [vmem:[%s1103_s5 + $0x30] sm:$0xff]   ;;  %716 = vmatprep.subr.bf16.mxu1 %v858_v9  ;;  %v786_v19 = vld [vmem:[%s1103_s5 + $0x28] sm:$0xff]   ;;  %v787_v20 = vld [vmem:[%s1102_s4 + $0x20] sm:$0xff]  }
   0x6   :  { %v788_v21 = vld [vmem:[%s1103_s5 + $0x20] sm:$0xff]   ;;  %v789_v22 = vld [vmem:[%s1102_s4 + $0x18] sm:$0xff]   ;;  %v791_v24 = vld [vmem:[%s1102_s4 + $0x10] sm:$0xff]   ;;  %710 = vmatprep.mubr.msk.bf16.mxu0 %vm859_vm6, %v858_v9  ;;  %730 = vmatprep.mubr.msk.bf16.mxu1 %vm859_vm6, %v858_v9 }
   0x7   :  { %697 = vmatpush3.bf16.msra.mxu0 %v783_v14  ;;  %717 = vmatpush3.bf16.msra.mxu1 %v784_v17  ;;  %v790_v23 = vld [vmem:[%s1103_s5 + $0x18] sm:$0xff]   ;;  %v792_v25 = vld [vmem:[%s1103_s5 + $0x10] sm:$0xff]   ;;  %v793_v26 = vld [vmem:[%s1102_s4 + $0x8] sm:$0xff]  }
   0x8   :  { %80 = vperm.xlu1 %780, %v75_v10   ;;  %698 = vmatprep.subr.bf16.mxu0 %v858_v9  ;;  %v794_v27 = vld [vmem:[%s1103_s5 + $0x8] sm:$0xff]   ;;  %v795_v28 = vld [vmem:[%s1102_s4] sm:$0xff]  }
   0x9   :  { %52 = vperm.xlu0 %779, %v47_v12   ;;  %718 = vmatprep.subr.bf16.mxu1 %v858_v9  ;;  %v796_v29 = vld [vmem:[%s1103_s5] sm:$0xff]  }
   0xb   :  { %699 = vmatpush3.bf16.msra.mxu0 %v785_v18  ;;  %719 = vmatpush3.bf16.msra.mxu1 %v786_v19 }
   0xc   :  { %108 = vperm.xlu1 %780, %v103_v15   ;;  %700 = vmatprep.subr.bf16.mxu0 %v858_v9 }
   0xd   :  { %105 = vperm.xlu0 %779, %v102_v16   ;;  %720 = vmatprep.subr.bf16.mxu1 %v858_v9 }
   0xf   :  { %701 = vmatpush3.bf16.msra.mxu0 %v787_v20  ;;  %721 = vmatpush3.bf16.msra.mxu1 %v788_v21 }
  0x10   :  { %702 = vmatprep.subr.bf16.mxu0 %v858_v9  ;;  %722 = vmatprep.subr.bf16.mxu1 %v858_v9 }
  0x13   :  { %703 = vmatpush3.bf16.msra.mxu0 %v789_v22  ;;  %723 = vmatpush3.bf16.msra.mxu1 %v790_v23 }
  0x14   :  { %704 = vmatprep.subr.bf16.mxu0 %v858_v9  ;;  %724 = vmatprep.subr.bf16.mxu1 %v858_v9 }
  0x17   :  { %705 = vmatpush3.bf16.msra.mxu0 %v791_v24  ;;  %725 = vmatpush3.bf16.msra.mxu1 %v792_v25 }
  0x18   :  { %706 = vmatprep.subr.bf16.mxu0 %v858_v9  ;;  %726 = vmatprep.subr.bf16.mxu1 %v858_v9 }
  0x1b   :  { %707 = vmatpush3.bf16.msra.mxu0 %v793_v26  ;;  %727 = vmatpush3.bf16.msra.mxu1 %v794_v27 }
  0x1c   :  { %708 = vmatprep.subr.bf16.mxu0 %v858_v9 }
  0x1d   :  { %18 = vsyncpa [#allocation5], 0  ;;  %728 = vmatprep.subr.bf16.mxu1 %v858_v9  ;;  %v40_v30 = vld [vmem:[%s1098_s0] sm:$0xff]  ;;  %v41_v37 = vld [vmem:[%s1098_s0 + $0x8] sm:$0xff]  ;;  %vm149_vm13 = vcmask 1041409  }
  0x1e   :  { %v797_v17 = vld [vmem:[%s1104_s6 + $0x38] sm:$0xff]   ;;  %v798_v23 = vld [vmem:[%s1104_s6 + $0x30] sm:$0xff]   ;;  %v799_v26 = vld [vmem:[%s1104_s6 + $0x28] sm:$0xff]  }
  0x1f   :  { %709 = vmatpush3.bf16.msra.mxu0 %v795_v28  ;;  %729 = vmatpush3.bf16.msra.mxu1 %v796_v29  ;;  %v800_v29 = vld [vmem:[%s1104_s6 + $0x20] sm:$0xff]  }
  0x20   :  { %734 = vmatprep.subr.bf16.mxu0 %v858_v9  ;;  %754 = vmatprep.subr.bf16.mxu1 %v858_v9 }
  0x7f   :  { %v78_v31 = vpop.permute.xlu1 %77 }
  0x80   :  { %v50_v32 = vpop.permute.xlu0 %49  ;;  %vm82_vm7 = vcmp.eq.s32.totalorder %v78_v31, 1 }
  0x81   :  { %vm54_vm8 = vcmp.eq.s32.totalorder %v50_v32, 1  ;;  %v84_v33 = vsel %vm82_vm7, -1e+12, %v40_v30  ;;  %v801_v32 = vld [vmem:[%s1104_s6 + $0x18] sm:$0xff]  }
  0x82   :  { %v56_v34 = vsel %vm54_vm8, -1e+12, %v40_v30  ;;  %v86_v35 = vrot.slane %v84_v33, 4 }
  0x83   :  { %v58_v36 = vrot.slane %v56_v34, 4  ;;  %v81_v38 = vpop.permute.xlu1 %80 }
  0x84   :  { %v53_v39 = vpop.permute.xlu0 %52  ;;  %v87_v40 = vmax.f32 %v84_v33, %v86_v35  ;;  %vm83_vm9 = vcmp.eq.s32.totalorder %v81_v38, 1  ;;  %v802_v35 = vld [vmem:[%s1104_s6 + $0x10] sm:$0xff]   ;;  %v803_v38 = vld [vmem:[%s1104_s6 + $0x8] sm:$0xff]  }
  0x85   :  { %v59_v41 = vmax.f32 %v56_v34, %v58_v36  ;;  %vm55_vm10 = vcmp.eq.s32.totalorder %v53_v39, 1  ;;  %v85_v42 = vsel %vm83_vm9, -1e+12, %v41_v37 }
  0x86   :  { %v57_v43 = vsel %vm55_vm10, -1e+12, %v41_v37  ;;  %v88_v44 = vrot.slane %v87_v40, 2  ;;  %v92_v46 = vrot.slane %v85_v42, 4 }
  0x87   :  { %v60_v45 = vrot.slane %v59_v41, 2  ;;  %v64_v47 = vrot.slane %v57_v43, 4  ;;  %v109_v56 = vpop.permute.xlu1 %108 }
  0x88   :  { %v89_v48 = vmax.f32 %v87_v40, %v88_v44  ;;  %v93_v50 = vmax.f32 %v85_v42, %v92_v46  ;;  %v106_v57 = vpop.permute.xlu0 %105  ;;  %vm111_vm11 = vcmp.eq.s32.totalorder %v109_v56, 1  ;;  %v805_v44 = vld [vmem:[%s1106_s8 + $0x38] sm:$0xff]   ;;  %v807_v46 = vld [vmem:[%s1106_s8 + $0x28] sm:$0xff]  }
  0x89   :  { %v61_v49 = vmax.f32 %v59_v41, %v60_v45  ;;  %v65_v51 = vmax.f32 %v57_v43, %v64_v47  ;;  %vm110_vm12 = vcmp.eq.s32.totalorder %v106_v57, 1  ;;  %v113_v4 = vsel %vm111_vm11, -1e+12, %v41_v37  ;;  %v804_v41 = vld [vmem:[%s1104_s6] sm:$0xff]   ;;  %v806_v45 = vld [vmem:[%s1106_s8 + $0x30] sm:$0xff]  }
  0x8a   :  { %v90_v52 = vrot.slane %v89_v48, 1  ;;  %v94_v54 = vrot.slane %v93_v50, 2  ;;  %v112_v5 = vsel %vm110_vm12, -1e+12, %v40_v30  ;;  %v120_v11 = vrot.slane %v113_v4, 4  ;;  %v808_v47 = vld [vmem:[%s1106_s8 + $0x20] sm:$0xff]  }
  0x8b   :  { %v62_v53 = vrot.slane %v61_v49, 1  ;;  %v66_v55 = vrot.slane %v65_v51, 2  ;;  %v114_v13 = vrot.slane %v112_v5, 4 }
  0x8c   :  { %v91_v58 = vmax.f32 %v89_v48, %v90_v52  ;;  %v95_v60 = vmax.f32 %v93_v50, %v94_v54  ;;  %v121_v21 = vmax.f32 %v113_v4, %v120_v11  ;;  %v809_v48 = vld [vmem:[%s1106_s8 + $0x18] sm:$0xff]   ;;  %v811_v50 = vld [vmem:[%s1106_s8 + $0x8] sm:$0xff]  }
  0x8d   :  { %v63_v59 = vmax.f32 %v61_v49, %v62_v53  ;;  %v67_v61 = vmax.f32 %v65_v51, %v66_v55  ;;  %v115_v22 = vmax.f32 %v112_v5, %v114_v13  ;;  %v810_v49 = vld [vmem:[%s1106_s8 + $0x10] sm:$0xff]   ;;  %v812_v51 = vld [vmem:[%s1106_s8] sm:$0xff]   ;;  %s860_s8 = smov [#allocation4]  }
  0x8e   :  { %v248_v62 = vpack.c.bf16 %v91_v58, %v91_v58  ;;  %v96_v63 = vrot.slane %v95_v60, 1  ;;  %v122_v24 = vrot.slane %v121_v21, 2  ;;  %s612_s26 = sshll.u32 %s860_s8, 4  ;;  %s613_s26 = int_to_ptr.vmem [resolvable:$true] %s612_s26 }
  0x8f   :  { %v68_v0 = vrot.slane %v67_v61, 1  ;;  %v127_v1 = vpack.c.bf16 %v63_v59, %v63_v59  ;;  %v116_v25 = vrot.slane %v115_v22, 2  ;;  %s813_s27 = scalar_lea.vmem %s613_s26, 32  ;;  %p818_p1 = scmp.lt.s32.totalorder %s613_s26, %s613_s26 }
  0x90   :  { %v97_v2 = vmax.f32 %v95_v60, %v96_v63  ;;  %v268_v6 = vunpack.c.l.b16 %v248_v62  ;;  %v123_v27 = vmax.f32 %v121_v21, %v122_v24  ;;  %v632_v60 = vld [vmem:[%s1105_s7] ss:$0 sm:$0xff]  ;;  %p814_p0 = scmp.ne.s32.totalorder %s613_s26, %s813_s27  ;;  %p819_p2 = scmp.lt.s32.totalorder %s813_s27, %s813_s27 }
  0x91   :  { %v69_v3 = vmax.f32 %v67_v61, %v68_v0  ;;  %v147_v14 = vunpack.c.l.b16 %v127_v1  ;;  %v117_v28 = vmax.f32 %v115_v22, %v116_v25 }
  0x92   :  { %v249_v7 = vpack.c.bf16 %v97_v2, %v97_v2  ;;  %v124_v30 = vrot.slane %v123_v27, 1  ;;  %p820_p3 = por %p819_p2, %p818_p1 }
  0x93   :  { %v128_v8 = vpack.c.bf16 %v69_v3, %v69_v3  ;;  %v593_v10 = vsel %vm149_vm13, %v69_v3, %v63_v59  ;;  %v118_v31 = vrot.slane %v117_v28, 1 }
  0x94   :  { %595 = vst [vmem:[#allocation4] sm:$0x3] %v593_v10  ;;  %v269_v12 = vunpack.c.l.b16 %v249_v7  ;;  %v125_v33 = vmax.f32 %v123_v27, %v124_v30  ;;  %p821_p4 = pnand %p820_p3, %p814_p0 }
  0x95   :  { %v148_v15 = vunpack.c.l.b16 %v128_v8  ;;  %v119_v34 = vmax.f32 %v117_v28, %v118_v31 }
  0x96   :  { %v270_v18 = vsel %vm149_vm13, %v269_v12, %v268_v6  ;;  %v363_v36 = vpack.c.bf16 %v125_v33, %v125_v33 }
  0x97   :  { %v150_v16 = vsel %vm149_vm13, %v148_v15, %v147_v14  ;;  %v271_v20 = vpack.c.b16 %v270_v18, %v270_v18  ;;  %v362_v37 = vpack.c.bf16 %v119_v34, %v119_v34 }
  0x98   :  { %v151_v19 = vpack.c.b16 %v150_v16, %v150_v16  ;;  %v383_v39 = vunpack.c.l.b16 %v363_v36 }
  0x99   :  { %731 = vmatmul.mubr.bf16.vlgmr.msra.gmra.mxu1 %v271_v20  ;;  %v382_v40 = vunpack.c.l.b16 %v362_v37 }
  0x9a   :  { %711 = vmatmul.mubr.bf16.vlgmr.msra.gmra.mxu0 %v151_v19  ;;  %770 = vmatprep.mubr.msk.bf16.mxu1 %vm859_vm6, %v858_v9 }
  0x9b   :  { %735 = vmatpush3.bf16.msra.mxu0 %v797_v17  ;;  %750 = vmatprep.mubr.msk.bf16.mxu0 %vm859_vm6, %v858_v9  ;;  %v384_v42 = vsel %vm149_vm13, %v383_v39, %v382_v40 }
  0x9c   :  { %736 = vmatprep.subr.bf16.mxu0 %v858_v9  ;;  %v385_v43 = vpack.c.b16 %v384_v42, %v384_v42  ;;  %755 = vmatpush3.bf16.msra.mxu1 %v805_v44 }
  0x9d   :  { %756 = vmatprep.subr.bf16.mxu1 %v858_v9 }
  0x9f   :  { %737 = vmatpush3.bf16.msra.mxu0 %v798_v23 }
  0xa0   :  { %738 = vmatprep.subr.bf16.mxu0 %v858_v9  ;;  %757 = vmatpush3.bf16.msra.mxu1 %v806_v45 }
  0xa1   :  { %758 = vmatprep.subr.bf16.mxu1 %v858_v9 }
  0xa3   :  { %739 = vmatpush3.bf16.msra.mxu0 %v799_v26 }
  0xa4   :  { %740 = vmatprep.subr.bf16.mxu0 %v858_v9  ;;  %759 = vmatpush3.bf16.msra.mxu1 %v807_v46 }
  0xa5   :  { %760 = vmatprep.subr.bf16.mxu1 %v858_v9 }
  0xa7   :  { %741 = vmatpush3.bf16.msra.mxu0 %v800_v29 }
  0xa8   :  { %742 = vmatprep.subr.bf16.mxu0 %v858_v9  ;;  %761 = vmatpush3.bf16.msra.mxu1 %v808_v47 }
  0xa9   :  { %762 = vmatprep.subr.bf16.mxu1 %v858_v9 }
  0xab   :  { %743 = vmatpush3.bf16.msra.mxu0 %v801_v32 }
  0xac   :  { %744 = vmatprep.subr.bf16.mxu0 %v858_v9  ;;  %763 = vmatpush3.bf16.msra.mxu1 %v809_v48 }
  0xad   :  { %764 = vmatprep.subr.bf16.mxu1 %v858_v9 }
  0xaf   :  { %745 = vmatpush3.bf16.msra.mxu0 %v802_v35 }
  0xb0   :  { %746 = vmatprep.subr.bf16.mxu0 %v858_v9  ;;  %765 = vmatpush3.bf16.msra.mxu1 %v810_v49 }
  0xb1   :  { %766 = vmatprep.subr.bf16.mxu1 %v858_v9 }
  0xb3   :  { %747 = vmatpush3.bf16.msra.mxu0 %v803_v38 }
  0xb4   :  { %748 = vmatprep.subr.bf16.mxu0 %v858_v9  ;;  %767 = vmatpush3.bf16.msra.mxu1 %v811_v50 }
  0xb5   :  { %768 = vmatprep.subr.bf16.mxu1 %v858_v9 }
  0xb7   :  { %749 = vmatpush3.bf16.msra.mxu0 %v804_v41 }
  0xb8   :  { %769 = vmatpush3.bf16.msra.mxu1 %v812_v51 }
  0xba   :  { %751 = vmatmul.mubr.bf16.vlgmr.msra.gmra.mxu0 %v385_v43 }
 0x159   :  { %v355_v53 = vpop.f32.mrf.mxu1 }
 0x15a   :  { %v235_v52 = vpop.f32.mrf.mxu0 }
 0x15b   :  { %v732_v55 = vpop.f32.mrf.mxu1  ;;  %v247_v61 = vadd.f32 %v632_v60, %v235_v52 }
 0x15c   :  { %v712_v54 = vpop.f32.mrf.mxu0 }
 0x15d   :  { %v358_v57 = vpop.f32.mrf.mxu1  ;;  %v361_v62 = vadd.f32 %v355_v53, %v247_v61 }
 0x15e   :  { %v238_v56 = vpop.f32.mrf.mxu0 }
 0x15f   :  { %v733_v59 = vpop.f32.mrf.mxu1 }
 0x160   :  { %v713_v58 = vpop.f32.mrf.mxu0 }
 0x17a   :  { %v469_v9 = vpop.f32.mrf.mxu0 }
 0x17b   :  { %v475_v63 = vadd.f32 %v469_v9, %v361_v62 }
 0x17c   :  { %v752_v0 = vpop.f32.mrf.mxu0 }
 0x17d   :  { %v476_v1 = vmax.f32 %v475_v63, 0.0 }
 0x17e   :  { %v472_v2 = vpop.f32.mrf.mxu0 }
 0x17f   :  { %v494_v3 = vpack.c.bf16 %v476_v1, %v476_v1 }
 0x180   :  { %v753_v4 = vpop.f32.mrf.mxu0 }
 0x181   :  { %771 = vmatmul.mubr.bf16.vlgmr.msra.gmra.mxu1 %v494_v3 }
 0x182   :  { %824 = shalt.err (!%p821_p4)
}
 0x183   :  { %615 = dma.vmem_to_hbm [thread:$0]  %s613_s26, 32, %s1109_s11, [#allocation5]   ;;  %v649_v5 = vld [vmem:[%s1107_s9] ss:$0 sm:$0xff] }
 0x184   :  { %s861_s29 = smov [#allocation2]  }
 0x185   :  { %s602_s30 = sshll.u32 %s861_s29, 4  ;;  %s603_s30 = int_to_ptr.vmem [resolvable:$true] %s602_s30 }
 0x186   :  { %s833_s3 = scalar_lea.vmem %s603_s30, 32  ;;  %p838_p6 = scmp.lt.s32.totalorder %s603_s30, %s603_s30 }
 0x187   :  { %p834_p5 = scmp.ne.s32.totalorder %s603_s30, %s833_s3  ;;  %p839_p7 = scmp.lt.s32.totalorder %s833_s3, %s833_s3 }
 0x189   :  { %p840_p8 = por %p839_p7, %p838_p6 }
 0x18b   :  { %p841_p9 = pnand %p840_p8, %p834_p5 }
 0x241   :  { %v583_v6 = vpop.f32.mrf.mxu1 }
 0x242   :  { %v584_v7 = vadd.f32 %v649_v5, %v583_v6 }
 0x243   :  { %v772_v8 = vpop.f32.mrf.mxu1 }
 0x244   :  { %v589_v10 = vmax.f32 %v584_v7, 0.0 }
 0x245   :  { %v586_v11 = vpop.f32.mrf.mxu1 }
 0x246   :  { %590 = vst [vmem:[#allocation2] sm:$0x3] %v589_v10 }
 0x247   :  { %v773_v12 = vpop.f32.mrf.mxu1 }
 0x248   :  { %844 = shalt.err (!%p841_p9)
}
 0x249   :  { %605 = dma.vmem_to_hbm [thread:$0]  %s603_s30, 32, %s1108_s10, [#allocation3]  }
 0x24a   :  { %853 = dma.done.wait [#allocation3], 32  }
 0x24b   :  { %854 = vsyncadd [#allocation3], 4294967264 }
 0x24c   :  { %855 = dma.done.wait [#allocation5], 32  }
 0x24d   :  { %856 = vsyncadd [#allocation5], 4294967264 }
 0x24e   :  { %622 = vsyncpa [#allocation3], 1 }
 0x24f   :  { %623 = vsyncpa [#allocation5], 1 }

// kernel: _lambda_.11
= control target key start
LH: loop header
LB: loop body
LE: loop exit
PB: predicated region body
PF: predicated region fallthrough
CT: control target
= control target key end

     0   :  { %v3818_v0 = vmov 0.0   ;;  %vm3819_vm0 = vmmov 0   ;;  %vm271_vm1 = vcmask 130048   ;;  %v321_v48 = vlaneseq  ;;  %s3821_s25 = smov 8   ;;  %s3822_s27 = smov 16   ;;  %s4669_s4 = inlined_call_operand.vmem [shape: bf16[2,128,16], index: 4, kind: input, shape index: {}]   ;;  %s4670_s2 = inlined_call_operand.vmem [shape: bf16[2,128,16], index: 2, kind: input, shape index: {}]   ;;  %s4671_s0 = inlined_call_operand.vmem [shape: f32[16,128], index: 0, kind: input, shape index: {}]   ;;  %s4672_s5 = inlined_call_operand.vmem [shape: f32[2,1,16], index: 5, kind: input, shape index: {}]   ;;  %s4673_s3 = inlined_call_operand.vmem [shape: f32[2,1,16], index: 3, kind: input, shape index: {}]   ;;  %s4674_s6 = inlined_call_operand.vmem [shape: bf16[8,160,8], index: 6, kind: input, shape index: {}]   ;;  %s4675_s1 = inlined_call_operand.vmem [shape: f32[2,1,8], index: 1, kind: input, shape index: {}]   ;;  %s4676_s7 = inlined_call_operand.vmem [shape: f32[8,1,8], index: 7, kind: input, shape index: {}]   ;;  %s4677_s8 = inlined_call_operand.vmem [shape: bf16[2,160,128], index: 8, kind: input, shape index: {}]   ;;  %s4678_s9 = inlined_call_operand.vmem [shape: f32[1,128], index: 9, kind: input, shape index: {}]   ;;  %s4679_s10 = inlined_call_operand.vmem [shape: f32[16,128], index: 10, kind: output, shape index: {}]  }
   0x1   :  { %3452 = vmatprep.subr.bf16.mxu1 %v3818_v0  ;;  %v3678_v1 = vld [vmem:[%s4669_s4 + $0x38] sm:$0xff]   ;;  %3432 = vmatprep.subr.bf16.mxu0 %v3818_v0  ;;  %v3680_v3 = vld [vmem:[%s4669_s4 + $0x30] sm:$0xff]   ;;  %v3682_v5 = vld [vmem:[%s4669_s4 + $0x28] sm:$0xff]   ;;  %v3820_v52 = vmov 0   ;;  %vm327_vm5 = vcmask 64512   ;;  %vm527_vm7 = vcmask 1043456  }
   0x2   :  { %v3679_v2 = vld [vmem:[%s4670_s2 + $0x38] sm:$0xff]   ;;  %3468 = vmatprep.mubr.msk.bf16.mxu1 %vm3819_vm0, %v3818_v0  ;;  %3448 = vmatprep.mubr.msk.bf16.mxu0 %vm3819_vm0, %v3818_v0  ;;  %v3681_v4 = vld [vmem:[%s4670_s2 + $0x30] sm:$0xff]   ;;  %v3683_v6 = vld [vmem:[%s4670_s2 + $0x28] sm:$0xff]   ;;  %v322_v50 = vshrl.u32 %v321_v48, 7  ;;  %vm820_vm8 = vcmask 130112   ;;  %vm1066_vm9 = vcmask 195712  }
   0x3   :  { %3453 = vmatpush3.bf16.msra.mxu1 %v3678_v1  ;;  %3433 = vmatpush3.bf16.msra.mxu0 %v3679_v2  ;;  %v3684_v7 = vld [vmem:[%s4669_s4 + $0x20] sm:$0xff]   ;;  %v3686_v9 = vld [vmem:[%s4669_s4 + $0x18] sm:$0xff]   ;;  %v3688_v11 = vld [vmem:[%s4669_s4 + $0x10] sm:$0xff]   ;;  %vm1208_vm10 = vcmask 195584   ;;  %s3823_s11 = smov 24   ;;  %vm1320_vm11 = vcmask 261312  }
   0x4   :  { %3454 = vmatprep.subr.bf16.mxu1 %v3818_v0  ;;  %3434 = vmatprep.subr.bf16.mxu0 %v3818_v0  ;;  %v3685_v8 = vld [vmem:[%s4670_s2 + $0x20] sm:$0xff]   ;;  %v3687_v10 = vld [vmem:[%s4670_s2 + $0x18] sm:$0xff]   ;;  %v37_v13 = vld [vmem:[%s4671_s0 + $0x8] sm:$0xff]  ;;  %v323_v51 = vsub.s32 0, %v322_v50  ;;  %vm1467_vm12 = vcmask 261120  }
   0x5   :  { %v36_v12 = vld [vmem:[%s4671_s0] sm:$0xff]  ;;  %v3689_v14 = vld [vmem:[%s4670_s2 + $0x10] sm:$0xff]   ;;  %40 = vst [vmem:[#allocation2 + $0x10] sm:$0xff] %v37_v13  ;;  %v3690_v15 = vld [vmem:[%s4669_s4 + $0x8] sm:$0xff]  }
   0x6   :  { %39 = vst [vmem:[#allocation2] sm:$0xff] %v36_v12  ;;  %v3691_v16 = vld [vmem:[%s4670_s2 + $0x8] sm:$0xff]   ;;  %v3692_v17 = vld [vmem:[%s4669_s4] sm:$0xff]   ;;  %v3953_v19 = vpack.c.bf16 %v37_v13, %v36_v12  ;;  %v3694_v40 = vld [vmem:[%s4674_s6 + $0x38] sm:$0xff]  }
   0x7   :  { %3455 = vmatpush3.bf16.msra.mxu1 %v3680_v3  ;;  %3435 = vmatpush3.bf16.msra.mxu0 %v3681_v4  ;;  %v3693_v18 = vld [vmem:[%s4670_s2] sm:$0xff]   ;;  %v3695_v41 = vld [vmem:[%s4674_s6 + $0x30] sm:$0xff]   ;;  %v3696_v42 = vld [vmem:[%s4674_s6 + $0x28] sm:$0xff]  }
   0x8   :  { %3456 = vmatprep.subr.bf16.mxu1 %v3818_v0  ;;  %3436 = vmatprep.subr.bf16.mxu0 %v3818_v0  ;;  %v2997_v22 = vld [vmem:[%s4672_s5] ss:$0 sm:$0xff]  ;;  %v3698_v44 = vld [vmem:[%s4674_s6 + $0x18] sm:$0xff]   ;;  %v3699_v45 = vld [vmem:[%s4674_s6 + $0x10] sm:$0xff]  }
   0x9   :  { %v2988_v32 = vld [vmem:[%s4673_s3] ss:$0 sm:$0xff]  ;;  %v3700_v46 = vld [vmem:[%s4674_s6 + $0x8] sm:$0xff]   ;;  %v42_v54 = vld [vmem:[%s4675_s1 + $0x1] sm:$0x1] }
   0xa   :  { %v3697_v43 = vld [vmem:[%s4674_s6 + $0x20] sm:$0xff]   ;;  %vm391_vm3 = vcmp.ne.f32.partialorder %v42_v54, 0.0 }
   0xb   :  { %3457 = vmatpush3.bf16.msra.mxu1 %v3682_v5  ;;  %3437 = vmatpush3.bf16.msra.mxu0 %v3683_v6  ;;  %v3701_v47 = vld [vmem:[%s4674_s6] sm:$0xff]   ;;  %v392_v58 = vsel %vm391_vm3, 1, %v3820_v52 }
   0xc   :  { %3458 = vmatprep.subr.bf16.mxu1 %v3818_v0  ;;  %3438 = vmatprep.subr.bf16.mxu0 %v3818_v0  ;;  %v41_v49 = vld [vmem:[%s4675_s1] sm:$0x1]  ;;  %v4028_v63 = vrot.slane %v392_v58, %v323_v51 }
   0xd   :  { %vm319_vm2 = vcmp.ne.f32.partialorder %v41_v49, 0.0  ;;  %v3017_v48 = vld [vmem:[%s4676_s7] ss:$0 sm:$0xff] }
   0xe   :  { %v320_v53 = vsel %vm319_vm2, 1, %v3820_v52  ;;  %vm397_vm6 = vcmp.eq.s32.totalorder %v4028_v63, 1 }
   0xf   :  { %3459 = vmatpush3.bf16.msra.mxu1 %v3684_v7  ;;  %3439 = vmatpush3.bf16.msra.mxu0 %v3685_v8  ;;  %v4021_v55 = vrot.slane %v320_v53, %v323_v51 }
  0x10   :  { %3460 = vmatprep.subr.bf16.mxu1 %v3818_v0  ;;  %3440 = vmatprep.subr.bf16.mxu0 %v3818_v0 }
  0x11   :  { %vm325_vm4 = vcmp.eq.s32.totalorder %v4021_v55, 1 }
  0x13   :  { %3461 = vmatpush3.bf16.msra.mxu1 %v3686_v9  ;;  %3441 = vmatpush3.bf16.msra.mxu0 %v3687_v10 }
  0x14   :  { %3462 = vmatprep.subr.bf16.mxu1 %v3818_v0  ;;  %3442 = vmatprep.subr.bf16.mxu0 %v3818_v0 }
  0x17   :  { %3463 = vmatpush3.bf16.msra.mxu1 %v3688_v11  ;;  %3443 = vmatpush3.bf16.msra.mxu0 %v3689_v14 }
  0x18   :  { %3464 = vmatprep.subr.bf16.mxu1 %v3818_v0  ;;  %3444 = vmatprep.subr.bf16.mxu0 %v3818_v0 }
  0x1b   :  { %3465 = vmatpush3.bf16.msra.mxu1 %v3690_v15  ;;  %3445 = vmatpush3.bf16.msra.mxu0 %v3691_v16 }
  0x1c   :  { %3466 = vmatprep.subr.bf16.mxu1 %v3818_v0  ;;  %3446 = vmatprep.subr.bf16.mxu0 %v3818_v0 }
  0x1f   :  { %3467 = vmatpush3.bf16.msra.mxu1 %v3692_v17  ;;  %3447 = vmatpush3.bf16.msra.mxu0 %v3693_v18 }
  0x20   :  { %3504 = vmatprep.subr.bf16.mxu1 %v3818_v0  ;;  %3472 = vmatprep.subr.bf16.mxu0 %v3818_v0 }
  0x22   :  { %3469 = vmatmul.mubr.bf16.vlgmr.msra.gmra.mxu1 %v3953_v19  ;;  %3449 = vmatmul.mubr.bf16.vlgmr.msra.gmra.mxu0 %v3953_v19 }
  0x23   :  { %3506 = vmatprep.mubr.msk.bf16.mxu1 %vm3819_vm0, %v3818_v0  ;;  %3474 = vmatprep.mubr.msk.bf16.mxu0 %vm3819_vm0, %v3818_v0 }
  0xe2   :  { %v262_v20 = vpop.f32.mrf.mxu1  ;;  %v150_v21 = vpop.f32.mrf.mxu0 }
  0xe3   :  { %v263_v26 = vadd.f32 %v2997_v22, %v262_v20  ;;  %v151_v34 = vadd.f32 %v2988_v32, %v150_v21 }
  0xe4   :  { %v3470_v23 = vpop.f32.mrf.mxu1  ;;  %v3450_v24 = vpop.f32.mrf.mxu0 }
  0xe6   :  { %v265_v25 = vpop.f32.mrf.mxu1  ;;  %v153_v28 = vpop.f32.mrf.mxu0 }
  0xe7   :  { %v266_v27 = vadd.f32 %v2997_v22, %v265_v25  ;;  %v154_v35 = vadd.f32 %v2988_v32, %v153_v28 }
  0xe8   :  { %v3471_v29 = vpop.f32.mrf.mxu1  ;;  %v3451_v31 = vpop.f32.mrf.mxu0 }
  0xe9   :  { %v270_v30 = vpack.c.bf16 %v266_v27, %v263_v26  ;;  %v269_v37 = vpack.c.bf16 %v154_v35, %v151_v34 }
  0xeb   :  { %v276_v33 = vsel %vm271_vm1, %v270_v30, 0  ;;  %v343_v36 = vrot.slane %v270_v30, 4  ;;  %v341_v39 = vrot.slane %v269_v37, 4 }
  0xec   :  { %3473 = vmatpush3.bf16.xpose.msra.mxu0 %v276_v33 }
  0xed   :  { %3478 = vmatprep.subr.bf16.mxu0 %v3818_v0  ;;  %v348_v38 = vsel %vm271_vm1, %v343_v36, 0 }
  0xf3   :  { %3475 = vmatmul.mubr.msk.bf16.vlgmr.msra.gmra.mxu0 %vm271_vm1, %v269_v37  ;;  %v3702_v37 = vld [vmem:[%s4674_s6 + $0x88] sm:$0xff]  }
  0xf4   :  { %3479 = vmatpush3.bf16.xpose.msra.mxu0 %v348_v38  ;;  %3480 = vmatprep.mubr.msk.bf16.mxu0 %vm3819_vm0, %v3818_v0 }
  0xf5   :  { %3484 = vmatprep.subr.bf16.mxu0 %v3818_v0 }
  0xfb   :  { %3481 = vmatmul.mubr.msk.bf16.vlgmr.msra.gmra.mxu0 %vm271_vm1, %v341_v39  ;;  %v3703_v39 = vld [vmem:[%s4674_s6 + $0x80] sm:$0xff]  }
  0xfc   :  { %3500 = vmatprep.mubr.msk.bf16.mxu0 %vm3819_vm0, %v3818_v0  ;;  %3485 = vmatpush3.bf16.msra.mxu0 %v3694_v40  ;;  %v3704_v40 = vld [vmem:[%s4674_s6 + $0x78] sm:$0xff]  }
  0xfd   :  { %3486 = vmatprep.subr.bf16.mxu0 %v3818_v0 }
 0x100   :  { %3487 = vmatpush3.bf16.msra.mxu0 %v3695_v41  ;;  %v3705_v41 = vld [vmem:[%s4674_s6 + $0x70] sm:$0xff]  }
 0x101   :  { %3488 = vmatprep.subr.bf16.mxu0 %v3818_v0 }
 0x104   :  { %3489 = vmatpush3.bf16.msra.mxu0 %v3696_v42  ;;  %v3706_v42 = vld [vmem:[%s4674_s6 + $0x68] sm:$0xff]  }
 0x105   :  { %3490 = vmatprep.subr.bf16.mxu0 %v3818_v0 }
 0x108   :  { %3491 = vmatpush3.bf16.msra.mxu0 %v3697_v43  ;;  %v3707_v43 = vld [vmem:[%s4674_s6 + $0x60] sm:$0xff]  }
 0x109   :  { %3492 = vmatprep.subr.bf16.mxu0 %v3818_v0 }
 0x10c   :  { %3493 = vmatpush3.bf16.msra.mxu0 %v3698_v44  ;;  %v3708_v44 = vld [vmem:[%s4674_s6 + $0x58] sm:$0xff]  }
 0x10d   :  { %3494 = vmatprep.subr.bf16.mxu0 %v3818_v0 }
 0x110   :  { %3495 = vmatpush3.bf16.msra.mxu0 %v3699_v45  ;;  %v3709_v45 = vld [vmem:[%s4674_s6 + $0x50] sm:$0xff]  }
 0x111   :  { %3496 = vmatprep.subr.bf16.mxu0 %v3818_v0 }
 0x114   :  { %3497 = vmatpush3.bf16.msra.mxu0 %v3700_v46  ;;  %v3710_v46 = vld [vmem:[%s4674_s6 + $0x90] ss:$0 sps:$4 sm:$0xff]  }
 0x115   :  { %3498 = vmatprep.subr.bf16.mxu0 %v3818_v0 }
 0x118   :  { %3499 = vmatpush3.bf16.msra.mxu0 %v3701_v47  ;;  %v713_v47 = vsel %vm527_vm7, %v3710_v46, 0 }
 0x119   :  { %3516 = vmatprep.subr.bf16.mxu0 %v3818_v0 }
 0x11b   :  { %3501 = vmatmul.mubr.bf16.vlgmr.msra.gmra.mxu0 %v3953_v19 }
 0x11c   :  { %3518 = vmatprep.mubr.msk.bf16.mxu0 %vm3819_vm0, %v3818_v0 }
 0x1b3   :  { %v312_v56 = vpop.f32.mrf.mxu0 }
 0x1b4   :  { %v318_v57 = vmul.f32 0.25, %v312_v56 }
 0x1b5   :  { %v3476_v59 = vpop.f32.mrf.mxu0 }
 0x1b6   :  { %v326_v60 = vsel %vm325_vm4, -1e+09, %v318_v57 }
 0x1b7   :  { %v315_v61 = vpop.f32.mrf.mxu0  ;;  %v328_v62 = vsel %vm327_vm5, %v326_v60, -inf }
 0x1b8   :  { %329 = vmax.xlane.f32.xlu0 %v328_v62 }
 0x1b9   :  { %v3477_v1 = vpop.f32.mrf.mxu0 }
 0x1bb   :  { %v384_v2 = vpop.f32.mrf.mxu0 }
 0x1bc   :  { %v390_v3 = vmul.f32 0.25, %v384_v2 }
 0x1bd   :  { %v3482_v4 = vpop.f32.mrf.mxu0 }
 0x1be   :  { %v398_v5 = vsel %vm397_vm6, -1e+09, %v390_v3 }
 0x1bf   :  { %v387_v6 = vpop.f32.mrf.mxu0  ;;  %v399_v7 = vsel %vm327_vm5, %v398_v5, -inf }
 0x1c0   :  { %400 = vmax.xlane.f32.xlu0 %v399_v7 }
 0x1c1   :  { %v3483_v8 = vpop.f32.mrf.mxu0 }
 0x1db   :  { %v513_v20 = vpop.f32.mrf.mxu0 }
 0x1dc   :  { %v523_v23 = vpack.c.bf16 %v513_v20, %v513_v20 }
 0x1dd   :  { %v3502_v21 = vpop.f32.mrf.mxu0 }
 0x1de   :  { %v529_v25 = vsel %vm527_vm7, %v523_v23, 0  ;;  %v3715_v21 = vld [vmem:[%s4674_s6 + $0xb8] sm:$0xff]   ;;  %v3048_v23 = vld [vmem:[%s4676_s7 + $0x1] ss:$0 sm:$0xff] }
 0x1df   :  { %v4036_v22 = vpop.f32.mrf.mxu0  ;;  %3505 = vmatpush3.bf16.msra.mxu1 %v529_v25 }
 0x1e0   :  { %3510 = vmatprep.subr.bf16.mxu1 %v3818_v0  ;;  %v583_v32 = vpack.c.bf16 %v4036_v22, %v4036_v22 }
 0x1e1   :  { %v3503_v24 = vpop.f32.mrf.mxu0 }
 0x1e2   :  { %v588_v35 = vsel %vm527_vm7, %v583_v32, 0 }
 0x241   :  { %v330_v9 = vpop.xlane.xlu0 %329 }
 0x242   :  { %v331_v10 = vsub.f32 %v326_v60, %v330_v9 }
 0x244   :  { %v332_v11 = vmul.f32 1.442695, %v331_v10 }
 0x246   :  { %3802 = vpow2.f32 %v332_v11 }
 0x249   :  { %v401_v12 = vpop.xlane.xlu0 %400 }
 0x24a   :  { %v402_v13 = vsub.f32 %v398_v5, %v401_v12 }
 0x24c   :  { %v403_v14 = vmul.f32 1.442695, %v402_v13 }
 0x24e   :  { %3804 = vpow2.f32 %v403_v14 }
 0x253   :  { %v3803_v15 = vpop.eup %3802 }
 0x254   :  { %v334_v16 = vsel %vm327_vm5, %v3803_v15, 0.0 }
 0x255   :  { %335 = vadd.xlane.f32.xlu1 %v334_v16  ;;  %v3711_v16 = vld [vmem:[%s4674_s6 + $0xd8] sm:$0xff]  }
 0x25b   :  { %v3805_v17 = vpop.eup %3804 }
 0x25c   :  { %v405_v18 = vsel %vm327_vm5, %v3805_v17, 0.0 }
 0x25d   :  { %406 = vadd.xlane.f32.xlu1 %v405_v18  ;;  %v3713_v18 = vld [vmem:[%s4674_s6 + $0xc8] sm:$0xff]  }
 0x2de   :  { %v336_v26 = vpop.xlane.xlu1 %335 }
 0x2df   :  { %3806 = vrcp.f32 %v336_v26 }
 0x2e6   :  { %v407_v27 = vpop.xlane.xlu1 %406 }
 0x2e7   :  { %3808 = vrcp.f32 %v407_v27 }
 0x2ec   :  { %v3807_v28 = vpop.eup %3806 }
 0x2ed   :  { %v338_v29 = vmul.f32 %v3807_v28, %v3803_v15  ;;  %v3717_v28 = vld [vmem:[%s4674_s6 + $0xa8] sm:$0xff]  }
 0x2ef   :  { %339 = vst.msk [vmem:[#allocation3] sm:$0xff] %vm327_vm5, %v338_v29 }
 0x2f4   :  { %v3809_v30 = vpop.eup %3808 }
 0x2f5   :  { %v409_v31 = vmul.f32 %v3809_v30, %v3805_v17  ;;  %v3712_v17 = vld [vmem:[%s4674_s6 + $0xd0] sm:$0xff]  }
 0x2f6   :  { %v521_v33 = vld [vmem:[#allocation3] sm:$0xff] }
 0x2f7   :  { %411 = vst.msk [vmem:[#allocation3 + $0x8] sm:$0xff] %vm327_vm5, %v409_v31  ;;  %v4044_v34 = vpack.c.bf16 %v521_v33, %v521_v33  ;;  %v3718_v31 = vld [vmem:[%s4674_s6 + $0xa0] sm:$0xff]  }
 0x2f9   :  { %3507 = vmatmul.mubr.msk.bf16.vlgmr.msra.gmra.mxu1 %vm327_vm5, %v4044_v34 }
 0x2fa   :  { %3511 = vmatpush3.bf16.msra.mxu1 %v588_v35  ;;  %3512 = vmatprep.mubr.msk.bf16.mxu1 %vm3819_vm0, %v3818_v0 }
 0x2fb   :  { %715 = vmatprep.subr.bf16.mxu1 %v3820_v52 }
 0x2fe   :  { %v581_v36 = vld [vmem:[#allocation3 + $0x8] sm:$0xff] }
 0x2ff   :  { %v4055_v38 = vpack.c.bf16 %v581_v36, %v581_v36 }
 0x301   :  { %3513 = vmatmul.mubr.msk.bf16.vlgmr.msra.gmra.mxu1 %vm327_vm5, %v4055_v38 }
 0x302   :  { %716 = vmatpush1.bf16.msra.mxu1 %v3702_v37  ;;  %v3719_v37 = vld [vmem:[%s4674_s6 + $0xe0] sm:$0xff]  }
 0x303   :  { %717 = vmatprep.subr.bf16.mxu1 %v3820_v52 }
 0x306   :  { %718 = vmatpush1.bf16.msra.mxu1 %v3703_v39 }
 0x307   :  { %719 = vmatprep.subr.bf16.mxu1 %v3820_v52 }
 0x30a   :  { %720 = vmatpush1.bf16.msra.mxu1 %v3704_v40 }
 0x30b   :  { %721 = vmatprep.subr.bf16.mxu1 %v3820_v52 }
 0x30e   :  { %722 = vmatpush1.bf16.msra.mxu1 %v3705_v41 }
 0x30f   :  { %723 = vmatprep.subr.bf16.mxu1 %v3820_v52 }
 0x312   :  { %724 = vmatpush1.bf16.msra.mxu1 %v3706_v42 }
 0x313   :  { %725 = vmatprep.subr.bf16.mxu1 %v3820_v52 }
 0x316   :  { %726 = vmatpush1.bf16.msra.mxu1 %v3707_v43 }
 0x317   :  { %727 = vmatprep.subr.bf16.mxu1 %v3820_v52 }
 0x31a   :  { %728 = vmatpush1.bf16.msra.mxu1 %v3708_v44 }
 0x31b   :  { %729 = vmatprep.subr.bf16.mxu1 %v3820_v52 }
 0x31e   :  { %730 = vmatpush1.bf16.msra.mxu1 %v3709_v45 }
 0x31f   :  { %745 = vmatprep.subr.bf16.mxu1 %v3820_v52 }
 0x322   :  { %746 = vmatpush2.bf16.msra.mxu1 %v713_v47 }
 0x323   :  { %3528 = vmatprep.subr.bf16.mxu1 %v3818_v0 }
 0x3b9   :  { %v565_v49 = vpop.f32.mrf.mxu1 }
 0x3ba   :  { %v566_v50 = vadd.f32 %v565_v49, %v513_v20  ;;  %v3714_v20 = vld [vmem:[%s4674_s6 + $0xc0] sm:$0xff]  }
 0x3bb   :  { %v3508_v51 = vpop.f32.mrf.mxu1 }
 0x3bc   :  { %v577_v53 = vadd.f32 %v3017_v48, %v566_v50 }
 0x3bd   :  { %v568_v54 = vpop.f32.mrf.mxu1 }
 0x3be   :  { %v578_v56 = vmul.f32 0.5, %v577_v53 }
 0x3bf   :  { %v3509_v57 = vpop.f32.mrf.mxu1 }
 0x3c0   :  { %v579_v58 = vmax.f32 %v578_v56, 0.0 }
 0x3c1   :  { %v624_v59 = vpop.f32.mrf.mxu1 }
 0x3c2   :  { %580 = vst.msk [vmem:[#allocation2 + $0x8] sm:$0xff] %vm327_vm5, %v579_v58  ;;  %v625_v60 = vadd.f32 %v624_v59, %v4036_v22  ;;  %v3716_v22 = vld [vmem:[%s4674_s6 + $0xb0] sm:$0xff]  }
 0x3c3   :  { %v3514_v61 = vpop.f32.mrf.mxu1 }
 0x3c4   :  { %v630_v62 = vadd.f32 %v3017_v48, %v625_v60  ;;  %v3720_v60 = vld [vmem:[%s4674_s6 + $0x128] sm:$0xff]   ;;  %v3721_v61 = vld [vmem:[%s4674_s6 + $0x120] sm:$0xff]  }
 0x3c5   :  { %v627_v1 = vpop.f32.mrf.mxu1 }
 0x3c6   :  { %v631_v2 = vmul.f32 0.5, %v630_v62  ;;  %v3722_v62 = vld [vmem:[%s4674_s6 + $0x118] sm:$0xff]   ;;  %v3723_v1 = vld [vmem:[%s4674_s6 + $0x110] sm:$0xff]  }
 0x3c7   :  { %v3515_v3 = vpop.f32.mrf.mxu1 }
 0x3c8   :  { %v632_v4 = vmax.f32 %v631_v2, 0.0  ;;  %v3724_v2 = vld [vmem:[%s4674_s6 + $0x108] sm:$0xff]   ;;  %v3725_v3 = vld [vmem:[%s4674_s6 + $0x100] sm:$0xff]  }
 0x3c9   :  { %v653_v5 = vld [vmem:[#allocation2 + $0x8] sm:$0xff] }
 0x3ca   :  { %633 = vst.msk [vmem:[#allocation2 + $0x18] sm:$0xff] %vm327_vm5, %v632_v4  ;;  %v3726_v4 = vld [vmem:[%s4674_s6 + $0xf8] sm:$0xff]  }
 0x3d1   :  { %v655_v6 = vld [vmem:[#allocation2 + $0x18] sm:$0xff] }
 0x3d2   :  { %v657_v7 = vpack.c.bf16 %v655_v6, %v653_v5  ;;  %v3080_v5 = vld [vmem:[%s4676_s7 + $0x2] ss:$0 sm:$0xff] }
 0x3d4   :  { %3045 = vmatprep.mubr.msk.bf16.mxu1 %vm327_vm5, %v657_v7 }
 0x3d5   :  { %748 = vmatmul.mubr.bf16.vlgmr.msra.gmra.mxu1 %v3953_v19 }
 0x3d6   :  { %3530 = vmatprep.mubr.msk.bf16.mxu1 %vm3819_vm0, %v3818_v0 }
 0x495   :  { %v749_v8 = vpop.f32.mrf.mxu1 }
 0x496   :  { %v760_v9 = vpack.c.bf16 %v749_v8, %v749_v8 }
 0x497   :  { %v751_v10 = vpop.f32.mrf.mxu1 }
 0x498   :  { %v765_v11 = vsel %vm527_vm7, %v760_v9, 0  ;;  %v3727_v10 = vld [vmem:[%s4674_s6 + $0xf0] sm:$0xff]  }
 0x499   :  { %v752_v12 = vpop.f32.mrf.mxu1  ;;  %3517 = vmatpush3.bf16.msra.mxu0 %v765_v11 }
 0x49a   :  { %v824_v13 = vpack.c.bf16 %v752_v12, %v752_v12  ;;  %3522 = vmatprep.subr.bf16.mxu0 %v3818_v0 }
 0x49b   :  { %v754_v14 = vpop.f32.mrf.mxu1 }
 0x49c   :  { %3519 = vmatmul.mubr.msk.bf16.vlgmr.msra.gmra.mxu0 %vm327_vm5, %v4044_v34  ;;  %v829_v15 = vsel %vm527_vm7, %v824_v13, 0 }
 0x49d   :  { %3523 = vmatpush3.bf16.msra.mxu0 %v829_v15  ;;  %3524 = vmatprep.mubr.msk.bf16.mxu0 %vm3819_vm0, %v3818_v0 }
 0x49e   :  { %961 = vmatprep.subr.bf16.mxu0 %v3820_v52 }
 0x4a4   :  { %3525 = vmatmul.mubr.msk.bf16.vlgmr.msra.gmra.mxu0 %vm327_vm5, %v4055_v38 }
 0x4a5   :  { %962 = vmatpush1.bf16.msra.mxu0 %v3711_v16 }
 0x4a6   :  { %963 = vmatprep.subr.bf16.mxu0 %v3820_v52 }
 0x4a9   :  { %964 = vmatpush1.bf16.msra.mxu0 %v3712_v17 }
 0x4aa   :  { %965 = vmatprep.subr.bf16.mxu0 %v3820_v52 }
 0x4ad   :  { %966 = vmatpush1.bf16.msra.mxu0 %v3713_v18 }
 0x4ae   :  { %967 = vmatprep.subr.bf16.mxu0 %v3820_v52 }
 0x4b1   :  { %968 = vmatpush1.bf16.msra.mxu0 %v3714_v20  ;;  %v3729_v20 = vld [vmem:[%s4674_s6 + $0x130] sm:$0xff]  }
 0x4b2   :  { %969 = vmatprep.subr.bf16.mxu0 %v3820_v52 }
 0x4b5   :  { %970 = vmatpush1.bf16.msra.mxu0 %v3715_v21 }
 0x4b6   :  { %971 = vmatprep.subr.bf16.mxu0 %v3820_v52 }
 0x4b9   :  { %972 = vmatpush1.bf16.msra.mxu0 %v3716_v22 }
 0x4ba   :  { %973 = vmatprep.subr.bf16.mxu0 %v3820_v52 }
 0x4bd   :  { %974 = vmatpush1.bf16.msra.mxu0 %v3717_v28 }
 0x4be   :  { %975 = vmatprep.subr.bf16.mxu0 %v3820_v52 }
 0x4c1   :  { %976 = vmatpush1.bf16.msra.mxu0 %v3718_v31 }
 0x4c2   :  { %991 = vmatprep.subr.bf16.mxu0 %v3820_v52 }
 0x4c5   :  { %992 = vmatpush2.bf16.msra.mxu0 %v3719_v37 }
 0x4c6   :  { %3540 = vmatprep.subr.bf16.mxu0 %v3818_v0 }
 0x55c   :  { %v801_v24 = vpop.f32.mrf.mxu0 }
 0x55d   :  { %v802_v25 = vadd.f32 %v801_v24, %v749_v8 }
 0x55e   :  { %v3520_v26 = vpop.f32.mrf.mxu0 }
 0x55f   :  { %v813_v27 = vadd.f32 %v3048_v23, %v802_v25 }
 0x560   :  { %v804_v29 = vpop.f32.mrf.mxu0 }
 0x561   :  { %v814_v30 = vmul.f32 0.5, %v813_v27 }
 0x562   :  { %v3521_v32 = vpop.f32.mrf.mxu0 }
 0x563   :  { %v815_v33 = vmax.f32 %v814_v30, 0.0 }
 0x564   :  { %v865_v35 = vpop.f32.mrf.mxu0 }
 0x565   :  { %v866_v36 = vadd.f32 %v865_v35, %v752_v12  ;;  %817 = vrot.lane.b32.xlu0 %v815_v33, %s3821_s25  ;;  %v3728_v12 = vld [vmem:[%s4674_s6 + $0x138] ss:$0 sps:$4 sm:$0xff]  }
 0x566   :  { %v3526_v39 = vpop.f32.mrf.mxu0  ;;  %v1213_v15 = vsel %vm527_vm7, %v3728_v12, 0  ;;  %v3751_v12 = vld [vmem:[%s4670_s2 + $0x50] sm:$0xff]  }
 0x567   :  { %v871_v40 = vadd.f32 %v3048_v23, %v866_v36 }
 0x568   :  { %v868_v41 = vpop.f32.mrf.mxu0 }
 0x569   :  { %v872_v42 = vmul.f32 0.5, %v871_v40 }
 0x56a   :  { %v3527_v43 = vpop.f32.mrf.mxu0 }
 0x56b   :  { %v873_v44 = vmax.f32 %v872_v42, 0.0  ;;  %v3730_v42 = vld [vmem:[%s4677_s8 + $0x38] sm:$0xff]   ;;  %v3732_v43 = vld [vmem:[%s4677_s8 + $0x28] sm:$0xff]  }
 0x56d   :  { %875 = vrot.lane.b32.xlu1 %v873_v44, %s3821_s25  ;;  %v3734_v44 = vld [vmem:[%s4677_s8 + $0x18] sm:$0xff]  }
 0x5d7   :  { %v818_v45 = vpop.permute.xlu0 %817 }
 0x5d8   :  { %821 = vst.msk [vmem:[#allocation2 + $0x8] sm:$0xff] %vm820_vm8, %v818_v45  ;;  %v3735_v45 = vld [vmem:[%s4677_s8 + $0x10] sm:$0xff]  }
 0x5df   :  { %v876_v46 = vpop.permute.xlu1 %875  ;;  %v899_v47 = vld [vmem:[#allocation2 + $0x8] sm:$0xff] }
 0x5e0   :  { %878 = vst.msk [vmem:[#allocation2 + $0x18] sm:$0xff] %vm820_vm8, %v876_v46  ;;  %v3736_v46 = vld [vmem:[%s4677_s8 + $0x8] sm:$0xff]  }
 0x5e7   :  { %v901_v48 = vld [vmem:[#allocation2 + $0x18] sm:$0xff] }
 0x5e8   :  { %v903_v49 = vpack.c.bf16 %v901_v48, %v899_v47  ;;  %v3737_v47 = vld [vmem:[%s4677_s8] sm:$0xff]  }
 0x5e9   :  { %v3114_v48 = vld [vmem:[%s4676_s7 + $0x3] ss:$0 sm:$0xff] }
 0x5ea   :  { %3077 = vmatprep.mubr.msk.bf16.mxu0 %vm271_vm1, %v903_v49 }
 0x5eb   :  { %994 = vmatmul.mubr.bf16.vlgmr.msra.gmra.mxu0 %v3953_v19 }
 0x5ec   :  { %3542 = vmatprep.mubr.msk.bf16.mxu0 %vm3819_vm0, %v3818_v0 }
 0x6ab   :  { %v995_v50 = vpop.f32.mrf.mxu0 }
 0x6ac   :  { %v1006_v51 = vpack.c.bf16 %v995_v50, %v995_v50 }
 0x6ad   :  { %v997_v53 = vpop.f32.mrf.mxu0 }
 0x6ae   :  { %v1011_v54 = vsel %vm527_vm7, %v1006_v51, 0 }
 0x6af   :  { %v998_v56 = vpop.f32.mrf.mxu0  ;;  %3529 = vmatpush3.bf16.msra.mxu1 %v1011_v54 }
 0x6b0   :  { %v1070_v57 = vpack.c.bf16 %v998_v56, %v998_v56  ;;  %3534 = vmatprep.subr.bf16.mxu1 %v3818_v0 }
 0x6b1   :  { %v1000_v58 = vpop.f32.mrf.mxu0 }
 0x6b2   :  { %3531 = vmatmul.mubr.msk.bf16.vlgmr.msra.gmra.mxu1 %vm327_vm5, %v4044_v34  ;;  %v1075_v59 = vsel %vm527_vm7, %v1070_v57, 0 }
 0x6b3   :  { %3535 = vmatpush3.bf16.msra.mxu1 %v1075_v59  ;;  %3536 = vmatprep.mubr.msk.bf16.mxu1 %vm3819_vm0, %v3818_v0  ;;  %v3739_v59 = vld [vmem:[%s4677_s8 + $0x40] sm:$0xff]  }
 0x6b4   :  { %1215 = vmatprep.subr.bf16.mxu1 %v3820_v52 }
 0x6ba   :  { %3537 = vmatmul.mubr.msk.bf16.vlgmr.msra.gmra.mxu1 %vm327_vm5, %v4055_v38 }
 0x6bb   :  { %1216 = vmatpush1.bf16.msra.mxu1 %v3720_v60 }
 0x6bc   :  { %1217 = vmatprep.subr.bf16.mxu1 %v3820_v52 }
 0x6bf   :  { %1218 = vmatpush1.bf16.msra.mxu1 %v3721_v61 }
 0x6c0   :  { %1219 = vmatprep.subr.bf16.mxu1 %v3820_v52 }
 0x6c3   :  { %1220 = vmatpush1.bf16.msra.mxu1 %v3722_v62 }
 0x6c4   :  { %1221 = vmatprep.subr.bf16.mxu1 %v3820_v52 }
 0x6c7   :  { %1222 = vmatpush1.bf16.msra.mxu1 %v3723_v1 }
 0x6c8   :  { %1223 = vmatprep.subr.bf16.mxu1 %v3820_v52 }
 0x6cb   :  { %1224 = vmatpush1.bf16.msra.mxu1 %v3724_v2 }
 0x6cc   :  { %1225 = vmatprep.subr.bf16.mxu1 %v3820_v52 }
 0x6cf   :  { %1226 = vmatpush1.bf16.msra.mxu1 %v3725_v3 }
 0x6d0   :  { %1227 = vmatprep.subr.bf16.mxu1 %v3820_v52 }
 0x6d3   :  { %1228 = vmatpush1.bf16.msra.mxu1 %v3726_v4 }
 0x6d4   :  { %1229 = vmatprep.subr.bf16.mxu1 %v3820_v52 }
 0x6d7   :  { %1230 = vmatpush1.bf16.msra.mxu1 %v3727_v10  ;;  %v3747_v10 = vld [vmem:[%s4670_s2 + $0x60] sm:$0xff]  }
 0x6d8   :  { %1243 = vmatprep.subr.bf16.mxu1 %v3820_v52 }
 0x6db   :  { %1244 = vmatpush2.bf16.msra.mxu1 %v1213_v15 }
 0x6dc   :  { %1245 = vmatprep.subr.bf16.mxu1 %v3820_v52 }
 0x6df   :  { %1246 = vmatpush2.bf16.msra.mxu1 %v3729_v20 }
 0x6e0   :  { %3552 = vmatprep.subr.bf16.mxu1 %v3818_v0 }
 0x772   :  { %v1047_v6 = vpop.f32.mrf.mxu1 }
 0x773   :  { %v1048_v7 = vadd.f32 %v1047_v6, %v995_v50 }
 0x774   :  { %v3532_v8 = vpop.f32.mrf.mxu1 }
 0x775   :  { %v1059_v9 = vadd.f32 %v3080_v5, %v1048_v7  ;;  %v3741_v7 = vld [vmem:[%s4670_s2 + $0x78] sm:$0xff]   ;;  %v3743_v8 = vld [vmem:[%s4670_s2 + $0x70] sm:$0xff]  }
 0x776   :  { %v1050_v11 = vpop.f32.mrf.mxu1 }
 0x777   :  { %v1060_v13 = vmul.f32 0.5, %v1059_v9  ;;  %v3745_v9 = vld [vmem:[%s4670_s2 + $0x68] sm:$0xff]   ;;  %v3749_v11 = vld [vmem:[%s4670_s2 + $0x58] sm:$0xff]  }
 0x778   :  { %v3533_v14 = vpop.f32.mrf.mxu1 }
 0x779   :  { %v1061_v16 = vmax.f32 %v1060_v13, 0.0  ;;  %v3753_v13 = vld [vmem:[%s4670_s2 + $0x48] sm:$0xff]   ;;  %v3755_v14 = vld [vmem:[%s4670_s2 + $0x40] sm:$0xff]  }
 0x77a   :  { %v1111_v17 = vpop.f32.mrf.mxu1 }
 0x77b   :  { %v1112_v18 = vadd.f32 %v1111_v17, %v998_v56  ;;  %1063 = vrot.lane.b32.xlu1 %v1061_v16, %s3822_s27  ;;  %v3738_v56 = vld [vmem:[%s4677_s8 + $0x48] sm:$0xff]   ;;  %v1381_v17 = vld [vmem:[#allocation2] sm:$0xff] }
 0x77c   :  { %v3538_v21 = vpop.f32.mrf.mxu1 }
 0x77d   :  { %v1117_v22 = vadd.f32 %v3080_v5, %v1112_v18  ;;  %v1383_v18 = vld [vmem:[#allocation2 + $0x10] sm:$0xff] }
 0x77e   :  { %v1114_v23 = vpop.f32.mrf.mxu1 }
 0x77f   :  { %v1118_v24 = vmul.f32 0.5, %v1117_v22  ;;  %v4314_v22 = vpack.c.bf16 %v1383_v18, %v1381_v17 }
 0x780   :  { %v3539_v25 = vpop.f32.mrf.mxu1 }
 0x781   :  { %v1119_v26 = vmax.f32 %v1118_v24, 0.0  ;;  %v3740_v24 = vld [vmem:[%s4669_s4 + $0x78] sm:$0xff]   ;;  %v3742_v25 = vld [vmem:[%s4669_s4 + $0x70] sm:$0xff]  }
 0x783   :  { %1121 = vrot.lane.b32.xlu1 %v1119_v26, %s3822_s27  ;;  %v3744_v26 = vld [vmem:[%s4669_s4 + $0x68] sm:$0xff]  }
 0x7ed   :  { %v1064_v27 = vpop.permute.xlu1 %1063 }
 0x7ee   :  { %1067 = vst.msk [vmem:[#allocation2 + $0x8] sm:$0xff] %vm1066_vm9, %v1064_v27  ;;  %v3746_v27 = vld [vmem:[%s4669_s4 + $0x60] sm:$0xff]  }
 0x7f5   :  { %v1122_v28 = vpop.permute.xlu1 %1121  ;;  %v1146_v29 = vld [vmem:[#allocation2 + $0x8] sm:$0xff] }
 0x7f6   :  { %1124 = vst.msk [vmem:[#allocation2 + $0x18] sm:$0xff] %vm1066_vm9, %v1122_v28  ;;  %v3748_v28 = vld [vmem:[%s4669_s4 + $0x58] sm:$0xff]  }
 0x7fd   :  { %v1148_v30 = vld [vmem:[#allocation2 + $0x18] sm:$0xff] }
 0x7fe   :  { %v1150_v31 = vpack.c.bf16 %v1148_v30, %v1146_v29  ;;  %v3750_v29 = vld [vmem:[%s4669_s4 + $0x50] sm:$0xff]   ;;  %v3752_v30 = vld [vmem:[%s4669_s4 + $0x48] sm:$0xff]  }
 0x800   :  { %3111 = vmatprep.mubr.msk.bf16.mxu1 %vm1208_vm10, %v1150_v31  ;;  %v3754_v31 = vld [vmem:[%s4669_s4 + $0x40] sm:$0xff]  }
 0x801   :  { %1248 = vmatmul.mubr.bf16.vlgmr.msra.gmra.mxu1 %v3953_v19 }
 0x802   :  { %3568 = vmatprep.mubr.msk.bf16.mxu1 %vm3819_vm0, %v3818_v0  ;;  %3553 = vmatpush3.bf16.msra.mxu1 %v3741_v7 }
 0x803   :  { %3554 = vmatprep.subr.bf16.mxu1 %v3818_v0 }
 0x806   :  { %3555 = vmatpush3.bf16.msra.mxu1 %v3743_v8 }
 0x807   :  { %3556 = vmatprep.subr.bf16.mxu1 %v3818_v0 }
 0x80a   :  { %3557 = vmatpush3.bf16.msra.mxu1 %v3745_v9 }
 0x80b   :  { %3558 = vmatprep.subr.bf16.mxu1 %v3818_v0 }
 0x80e   :  { %3559 = vmatpush3.bf16.msra.mxu1 %v3747_v10 }
 0x80f   :  { %3560 = vmatprep.subr.bf16.mxu1 %v3818_v0 }
 0x812   :  { %3561 = vmatpush3.bf16.msra.mxu1 %v3749_v11 }
 0x813   :  { %3562 = vmatprep.subr.bf16.mxu1 %v3818_v0 }
 0x816   :  { %3563 = vmatpush3.bf16.msra.mxu1 %v3751_v12 }
 0x817   :  { %3564 = vmatprep.subr.bf16.mxu1 %v3818_v0 }
 0x81a   :  { %3565 = vmatpush3.bf16.msra.mxu1 %v3753_v13 }
 0x81b   :  { %3566 = vmatprep.subr.bf16.mxu1 %v3818_v0 }
 0x81e   :  { %3567 = vmatpush3.bf16.msra.mxu1 %v3755_v14 }
 0x81f   :  { %3592 = vmatprep.subr.bf16.mxu1 %v3818_v0 }
 0x821   :  { %3569 = vmatmul.mubr.bf16.vlgmr.msra.gmra.mxu1 %v3953_v19 }
 0x822   :  { %3594 = vmatprep.mubr.msk.bf16.mxu1 %vm3819_vm0, %v3818_v0 }
 0x8c1   :  { %v1249_v32 = vpop.f32.mrf.mxu1 }
 0x8c2   :  { %v1260_v33 = vpack.c.bf16 %v1249_v32, %v1249_v32 }
 0x8c3   :  { %v1251_v35 = vpop.f32.mrf.mxu1 }
 0x8c4   :  { %v1265_v36 = vsel %vm527_vm7, %v1260_v33, 0  ;;  %v3144_v33 = vld [vmem:[%s4673_s3 + $0x1] ss:$0 sm:$0xff] }
 0x8c5   :  { %v1252_v37 = vpop.f32.mrf.mxu1  ;;  %3541 = vmatpush3.bf16.msra.mxu0 %v1265_v36 }
 0x8c6   :  { %v1324_v39 = vpack.c.bf16 %v1252_v37, %v1252_v37  ;;  %3546 = vmatprep.subr.bf16.mxu0 %v3818_v0 }
 0x8c7   :  { %v1254_v40 = vpop.f32.mrf.mxu1 }
 0x8c8   :  { %3543 = vmatmul.mubr.msk.bf16.vlgmr.msra.gmra.mxu0 %vm327_vm5, %v4044_v34  ;;  %v1329_v41 = vsel %vm527_vm7, %v1324_v39, 0  ;;  %v3731_v34 = vld [vmem:[%s4677_s8 + $0x30] sm:$0xff]  }
 0x8c9   :  { %3547 = vmatpush3.bf16.msra.mxu0 %v1329_v41  ;;  %3548 = vmatprep.mubr.msk.bf16.mxu0 %vm3819_vm0, %v3818_v0 }
 0x8ca   :  { %1471 = vmatprep.subr.bf16.mxu0 %v3820_v52 }
 0x8d0   :  { %3549 = vmatmul.mubr.msk.bf16.vlgmr.msra.gmra.mxu0 %vm327_vm5, %v4055_v38  ;;  %v3733_v38 = vld [vmem:[%s4677_s8 + $0x20] sm:$0xff]  }
 0x8d1   :  { %1472 = vmatpush1.bf16.msra.mxu0 %v3730_v42 }
 0x8d2   :  { %1473 = vmatprep.subr.bf16.mxu0 %v3820_v52 }
 0x8d5   :  { %1474 = vmatpush1.bf16.msra.mxu0 %v3731_v34 }
 0x8d6   :  { %1475 = vmatprep.subr.bf16.mxu0 %v3820_v52 }
 0x8d9   :  { %1476 = vmatpush1.bf16.msra.mxu0 %v3732_v43 }
 0x8da   :  { %1477 = vmatprep.subr.bf16.mxu0 %v3820_v52 }
 0x8dd   :  { %1478 = vmatpush1.bf16.msra.mxu0 %v3733_v38 }
 0x8de   :  { %1479 = vmatprep.subr.bf16.mxu0 %v3820_v52 }
 0x8e1   :  { %1480 = vmatpush1.bf16.msra.mxu0 %v3734_v44  ;;  %v3170_v44 = vld [vmem:[%s4672_s5 + $0x1] ss:$0 sm:$0xff] }
 0x8e2   :  { %1481 = vmatprep.subr.bf16.mxu0 %v3820_v52 }
 0x8e5   :  { %1482 = vmatpush1.bf16.msra.mxu0 %v3735_v45 }
 0x8e6   :  { %1483 = vmatprep.subr.bf16.mxu0 %v3820_v52 }
 0x8e9   :  { %1484 = vmatpush1.bf16.msra.mxu0 %v3736_v46 }
 0x8ea   :  { %1485 = vmatprep.subr.bf16.mxu0 %v3820_v52 }
 0x8ed   :  { %1486 = vmatpush1.bf16.msra.mxu0 %v3737_v47 }
 0x8ee   :  { %1499 = vmatprep.subr.bf16.mxu0 %v3820_v52 }
 0x8f1   :  { %1500 = vmatpush2.bf16.msra.mxu0 %v3738_v56 }
 0x8f2   :  { %1501 = vmatprep.subr.bf16.mxu0 %v3820_v52 }
 0x8f5   :  { %1502 = vmatpush2.bf16.msra.mxu0 %v3739_v59  ;;  %v3758_v59 = vld [vmem:[%s4674_s6 + $0x168] sm:$0xff]  }
 0x8f6   :  { %3572 = vmatprep.subr.bf16.mxu0 %v3818_v0 }
 0x988   :  { %v1301_v49 = vpop.f32.mrf.mxu0 }
 0x989   :  { %v1302_v50 = vadd.f32 %v1301_v49, %v1249_v32  ;;  %v1623_v32 = vpop.f32.mrf.mxu1 }
 0x98a   :  { %v3544_v51 = vpop.f32.mrf.mxu0 }
 0x98b   :  { %v1313_v53 = vadd.f32 %v3114_v48, %v1302_v50  ;;  %v3570_v35 = vpop.f32.mrf.mxu1 }
 0x98c   :  { %v1304_v54 = vpop.f32.mrf.mxu0 }
 0x98d   :  { %v1314_v57 = vmul.f32 0.5, %v1313_v53  ;;  %v1626_v36 = vpop.f32.mrf.mxu1 }
 0x98e   :  { %v3545_v58 = vpop.f32.mrf.mxu0  ;;  %v1627_v40 = vadd.f32 %v3144_v33, %v1626_v36 }
 0x98f   :  { %v1315_v60 = vmax.f32 %v1314_v57, 0.0  ;;  %v3571_v39 = vpop.f32.mrf.mxu1  ;;  %v3756_v57 = vld [vmem:[%s4674_s6 + $0x178] sm:$0xff]   ;;  %v3757_v58 = vld [vmem:[%s4674_s6 + $0x170] sm:$0xff]  }
 0x990   :  { %v1365_v61 = vpop.f32.mrf.mxu0 }
 0x991   :  { %v1366_v62 = vadd.f32 %v1365_v61, %v1252_v37  ;;  %1317 = vrot.lane.b32.xlu0 %v1315_v60, %s3823_s11  ;;  %v1624_v37 = vadd.f32 %v3144_v33, %v1623_v32  ;;  %v3759_v60 = vld [vmem:[%s4674_s6 + $0x160] sm:$0xff]   ;;  %v3760_v61 = vld [vmem:[%s4674_s6 + $0x158] sm:$0xff]  }
 0x992   :  { %v3550_v1 = vpop.f32.mrf.mxu0 }
 0x993   :  { %v1371_v2 = vadd.f32 %v3114_v48, %v1366_v62  ;;  %v1744_v41 = vpack.c.bf16 %v1627_v40, %v1624_v37  ;;  %v3761_v62 = vld [vmem:[%s4674_s6 + $0x150] sm:$0xff]   ;;  %v3762_v1 = vld [vmem:[%s4674_s6 + $0x148] sm:$0xff]  }
 0x994   :  { %v1368_v3 = vpop.f32.mrf.mxu0 }
 0x995   :  { %v1372_v4 = vmul.f32 0.5, %v1371_v2  ;;  %v1807_v56 = vrot.slane %v1744_v41, 4  ;;  %v3763_v2 = vld [vmem:[%s4674_s6 + $0x140] sm:$0xff]  }
 0x996   :  { %v3551_v5 = vpop.f32.mrf.mxu0 }
 0x997   :  { %v1373_v6 = vmax.f32 %v1372_v4, 0.0 }
 0x999   :  { %1375 = vrot.lane.b32.xlu1 %v1373_v6, %s3823_s11 }
 0xa03   :  { %v1318_v15 = vpop.permute.xlu0 %1317 }
 0xa04   :  { %1321 = vst.msk [vmem:[#allocation2 + $0x8] sm:$0xff] %vm1320_vm11, %v1318_v15 }
 0xa0b   :  { %v1376_v16 = vpop.permute.xlu1 %1375  ;;  %v1382_v20 = vld [vmem:[#allocation2 + $0x8] sm:$0xff] }
 0xa0c   :  { %1378 = vst.msk [vmem:[#allocation2 + $0x18] sm:$0xff] %vm1320_vm11, %v1376_v16 }
 0xa13   :  { %v1384_v21 = vld [vmem:[#allocation2 + $0x18] sm:$0xff] }
 0xa14   :  { %v1386_v23 = vpack.c.bf16 %v1384_v21, %v1382_v20 }
 0xa16   :  { %3126 = vmatprep.mubr.msk.bf16.mxu0 %vm1467_vm12, %v1386_v23 }
 0xa17   :  { %1504 = vmatmul.mubr.bf16.vlgmr.msra.gmra.mxu0 %v4314_v22 }
 0xa18   :  { %3573 = vmatpush3.bf16.msra.mxu0 %v3740_v24  ;;  %3588 = vmatprep.mubr.msk.bf16.mxu0 %vm3819_vm0, %v3818_v0 }
 0xa19   :  { %3574 = vmatprep.subr.bf16.mxu0 %v3818_v0 }
 0xa1c   :  { %3575 = vmatpush3.bf16.msra.mxu0 %v3742_v25 }
 0xa1d   :  { %3576 = vmatprep.subr.bf16.mxu0 %v3818_v0 }
 0xa20   :  { %3577 = vmatpush3.bf16.msra.mxu0 %v3744_v26 }
 0xa21   :  { %3578 = vmatprep.subr.bf16.mxu0 %v3818_v0 }
 0xa24   :  { %3579 = vmatpush3.bf16.msra.mxu0 %v3746_v27 }
 0xa25   :  { %3580 = vmatprep.subr.bf16.mxu0 %v3818_v0 }
 0xa28   :  { %3581 = vmatpush3.bf16.msra.mxu0 %v3748_v28 }
 0xa29   :  { %3582 = vmatprep.subr.bf16.mxu0 %v3818_v0 }
 0xa2c   :  { %3583 = vmatpush3.bf16.msra.mxu0 %v3750_v29 }
 0xa2d   :  { %3584 = vmatprep.subr.bf16.mxu0 %v3818_v0 }
 0xa30   :  { %3585 = vmatpush3.bf16.msra.mxu0 %v3752_v30 }
 0xa31   :  { %3586 = vmatprep.subr.bf16.mxu0 %v3818_v0 }
 0xa34   :  { %3587 = vmatpush3.bf16.msra.mxu0 %v3754_v31 }
 0xa35   :  { %3624 = vmatprep.subr.bf16.mxu0 %v3818_v0 }
 0xa37   :  { %3589 = vmatmul.mubr.bf16.vlgmr.msra.gmra.mxu0 %v3953_v19 }
 0xa38   :  { %3626 = vmatprep.mubr.msk.bf16.mxu0 %vm3819_vm0, %v3818_v0 }
 0xad7   :  { %v4358_v42 = vpop.f32.mrf.mxu0 }
 0xad9   :  { %v1507_v34 = vpop.f32.mrf.mxu0 }
 0xadb   :  { %v4360_v43 = vpop.f32.mrf.mxu0 }
 0xadd   :  { %v1510_v19 = vpop.f32.mrf.mxu0 }
 0xaf7   :  { %v1737_v38 = vpop.f32.mrf.mxu0 }
 0xaf8   :  { %v1738_v47 = vadd.f32 %v3170_v44, %v1737_v38 }
 0xaf9   :  { %v3590_v45 = vpop.f32.mrf.mxu0 }
 0xafa   :  { %v3764_v45 = vld [vmem:[%s4674_s6 + $0x1c8] sm:$0xff]  }
 0xafb   :  { %v1740_v46 = vpop.f32.mrf.mxu0 }
 0xafc   :  { %v1741_v48 = vadd.f32 %v3170_v44, %v1740_v46 }
 0xafd   :  { %v3591_v49 = vpop.f32.mrf.mxu0 }
 0xafe   :  { %v1745_v50 = vpack.c.bf16 %v1741_v48, %v1738_v47  ;;  %v3765_v47 = vld [vmem:[%s4674_s6 + $0x1c0] sm:$0xff]   ;;  %v3766_v48 = vld [vmem:[%s4674_s6 + $0x1b8] sm:$0xff]   ;;  %v3767_v49 = vld [vmem:[%s4674_s6 + $0x1b0] sm:$0xff]  }
 0xb00   :  { %v1750_v51 = vsel %vm271_vm1, %v1745_v50, 0  ;;  %v1809_v53 = vrot.slane %v1745_v50, 4  ;;  %v3768_v50 = vld [vmem:[%s4674_s6 + $0x1a8] sm:$0xff]  }
 0xb01   :  { %3593 = vmatpush3.bf16.xpose.msra.mxu1 %v1750_v51  ;;  %v3769_v51 = vld [vmem:[%s4674_s6 + $0x1a0] sm:$0xff]  }
 0xb02   :  { %3598 = vmatprep.subr.bf16.mxu1 %v3818_v0  ;;  %v1814_v54 = vsel %vm271_vm1, %v1809_v53, 0  ;;  %v3770_v53 = vld [vmem:[%s4674_s6 + $0x198] sm:$0xff]  }
 0xb08   :  { %3595 = vmatmul.mubr.msk.bf16.vlgmr.msra.gmra.mxu1 %vm271_vm1, %v1744_v41 }
 0xb09   :  { %3599 = vmatpush3.bf16.xpose.msra.mxu1 %v1814_v54  ;;  %3600 = vmatprep.mubr.msk.bf16.mxu1 %vm3819_vm0, %v3818_v0  ;;  %v3771_v54 = vld [vmem:[%s4674_s6 + $0x190] sm:$0xff]  }
 0xb0a   :  { %3604 = vmatprep.subr.bf16.mxu1 %v3818_v0 }
 0xb10   :  { %3601 = vmatmul.mubr.msk.bf16.vlgmr.msra.gmra.mxu1 %vm271_vm1, %v1807_v56  ;;  %v3772_v56 = vld [vmem:[%s4674_s6 + $0x1d0] ss:$0 sps:$4 sm:$0xff]  }
 0xb11   :  { %3620 = vmatprep.mubr.msk.bf16.mxu1 %vm3819_vm0, %v3818_v0  ;;  %3605 = vmatpush3.bf16.msra.mxu1 %v3756_v57  ;;  %v2172_v57 = vsel %vm527_vm7, %v3772_v56, 0 }
 0xb12   :  { %3606 = vmatprep.subr.bf16.mxu1 %v3818_v0 }
 0xb15   :  { %3607 = vmatpush3.bf16.msra.mxu1 %v3757_v58  ;;  %v3207_v58 = vld [vmem:[%s4676_s7 + $0x4] ss:$0 sm:$0xff] }
 0xb16   :  { %3608 = vmatprep.subr.bf16.mxu1 %v3818_v0 }
 0xb19   :  { %3609 = vmatpush3.bf16.msra.mxu1 %v3758_v59 }
 0xb1a   :  { %3610 = vmatprep.subr.bf16.mxu1 %v3818_v0 }
 0xb1d   :  { %3611 = vmatpush3.bf16.msra.mxu1 %v3759_v60 }
 0xb1e   :  { %3612 = vmatprep.subr.bf16.mxu1 %v3818_v0 }
 0xb21   :  { %3613 = vmatpush3.bf16.msra.mxu1 %v3760_v61 }
 0xb22   :  { %3614 = vmatprep.subr.bf16.mxu1 %v3818_v0 }
 0xb25   :  { %3615 = vmatpush3.bf16.msra.mxu1 %v3761_v62 }
 0xb26   :  { %3616 = vmatprep.subr.bf16.mxu1 %v3818_v0 }
 0xb29   :  { %3617 = vmatpush3.bf16.msra.mxu1 %v3762_v1 }
 0xb2a   :  { %3618 = vmatprep.subr.bf16.mxu1 %v3818_v0 }
 0xb2d   :  { %3619 = vmatpush3.bf16.msra.mxu1 %v3763_v2 }
 0xb2e   :  { %3636 = vmatprep.subr.bf16.mxu1 %v3818_v0 }
 0xb30   :  { %3621 = vmatmul.mubr.bf16.vlgmr.msra.gmra.mxu1 %v4314_v22 }
 0xb31   :  { %3638 = vmatprep.mubr.msk.bf16.mxu1 %vm3819_vm0, %v3818_v0 }
 0xbc8   :  { %v1786_v3 = vpop.f32.mrf.mxu1 }
 0xbc9   :  { %v1792_v4 = vmul.f32 0.25, %v1786_v3 }
 0xbca   :  { %v3596_v5 = vpop.f32.mrf.mxu1 }
 0xbcb   :  { %v1793_v6 = vsel %vm325_vm4, -1e+09, %v1792_v4 }
 0xbcc   :  { %v1789_v7 = vpop.f32.mrf.mxu1  ;;  %v1794_v8 = vsel %vm327_vm5, %v1793_v6, -inf }
 0xbcd   :  { %1795 = vmax.xlane.f32.xlu0 %v1794_v8 }
 0xbce   :  { %v3597_v9 = vpop.f32.mrf.mxu1 }
 0xbd0   :  { %v1850_v10 = vpop.f32.mrf.mxu1 }
 0xbd1   :  { %v1856_v11 = vmul.f32 0.25, %v1850_v10 }
 0xbd2   :  { %v3602_v12 = vpop.f32.mrf.mxu1 }
 0xbd3   :  { %v1857_v13 = vsel %vm397_vm6, -1e+09, %v1856_v11 }
 0xbd4   :  { %v1853_v14 = vpop.f32.mrf.mxu1  ;;  %v1858_v15 = vsel %vm327_vm5, %v1857_v13, -inf }
 0xbd5   :  { %1859 = vmax.xlane.f32.xlu1 %v1858_v15 }
 0xbd6   :  { %v3603_v16 = vpop.f32.mrf.mxu1 }
 0xbf0   :  { %v1972_v27 = vpop.f32.mrf.mxu1 }
 0xbf1   :  { %v1983_v30 = vpack.c.bf16 %v1972_v27, %v1972_v27 }
 0xbf2   :  { %v3622_v28 = vpop.f32.mrf.mxu1 }
 0xbf3   :  { %v1988_v32 = vsel %vm527_vm7, %v1983_v30, 0  ;;  %v3777_v28 = vld [vmem:[%s4674_s6 + $0x1f8] sm:$0xff]   ;;  %v3238_v30 = vld [vmem:[%s4676_s7 + $0x5] ss:$0 sm:$0xff] }
 0xbf4   :  { %v4418_v29 = vpop.f32.mrf.mxu1  ;;  %3625 = vmatpush3.bf16.msra.mxu0 %v1988_v32 }
 0xbf5   :  { %3630 = vmatprep.subr.bf16.mxu0 %v3818_v0  ;;  %v2042_v41 = vpack.c.bf16 %v4418_v29, %v4418_v29 }
 0xbf6   :  { %v3623_v31 = vpop.f32.mrf.mxu1 }
 0xbf7   :  { %v2047_v38 = vsel %vm527_vm7, %v2042_v41, 0 }
 0xc56   :  { %v1796_v17 = vpop.xlane.xlu0 %1795 }
 0xc57   :  { %v1797_v18 = vsub.f32 %v1793_v6, %v1796_v17 }
 0xc59   :  { %v1798_v55 = vmul.f32 1.442695, %v1797_v18 }
 0xc5b   :  { %3810 = vpow2.f32 %v1798_v55 }
 0xc5e   :  { %v1860_v20 = vpop.xlane.xlu1 %1859 }
 0xc5f   :  { %v1861_v21 = vsub.f32 %v1857_v13, %v1860_v20 }
 0xc61   :  { %v1862_v23 = vmul.f32 1.442695, %v1861_v21 }
 0xc63   :  { %3812 = vpow2.f32 %v1862_v23 }
 0xc68   :  { %v3811_v24 = vpop.eup %3810 }
 0xc69   :  { %v1800_v25 = vsel %vm327_vm5, %v3811_v24, 0.0 }
 0xc6a   :  { %1801 = vadd.xlane.f32.xlu0 %v1800_v25  ;;  %v3773_v25 = vld [vmem:[%s4674_s6 + $0x218] sm:$0xff]  }
 0xc70   :  { %v3813_v26 = vpop.eup %3812 }
 0xc71   :  { %v1864_v63 = vsel %vm327_vm5, %v3813_v26, 0.0 }
 0xc72   :  { %1865 = vadd.xlane.f32.xlu0 %v1864_v63  ;;  %v3775_v63 = vld [vmem:[%s4674_s6 + $0x208] sm:$0xff]  }
 0xcf3   :  { %v1802_v33 = vpop.xlane.xlu0 %1801 }
 0xcf4   :  { %3814 = vrcp.f32 %v1802_v33 }
 0xcfb   :  { %v1866_v35 = vpop.xlane.xlu0 %1865 }
 0xcfc   :  { %3816 = vrcp.f32 %v1866_v35 }
 0xd01   :  { %v3815_v36 = vpop.eup %3814 }
 0xd02   :  { %v1804_v37 = vmul.f32 %v3815_v36, %v3811_v24  ;;  %v3779_v36 = vld [vmem:[%s4674_s6 + $0x1e8] sm:$0xff]  }
 0xd04   :  { %1805 = vst.msk [vmem:[#allocation3] sm:$0xff] %vm327_vm5, %v1804_v37 }
 0xd09   :  { %v3817_v39 = vpop.eup %3816 }
 0xd0a   :  { %v1868_v40 = vmul.f32 %v3817_v39, %v3813_v26  ;;  %v3774_v26 = vld [vmem:[%s4674_s6 + $0x210] sm:$0xff]  }
 0xd0b   :  { %v1981_v34 = vld [vmem:[#allocation3] sm:$0xff] }
 0xd0c   :  { %1869 = vst.msk [vmem:[#allocation3 + $0x8] sm:$0xff] %vm327_vm5, %v1868_v40  ;;  %v4426_v19 = vpack.c.bf16 %v1981_v34, %v1981_v34  ;;  %v3780_v40 = vld [vmem:[%s4674_s6 + $0x1e0] sm:$0xff]  }
 0xd0e   :  { %3627 = vmatmul.mubr.msk.bf16.vlgmr.msra.gmra.mxu0 %vm327_vm5, %v4426_v19 }
 0xd0f   :  { %3631 = vmatpush3.bf16.msra.mxu0 %v2047_v38  ;;  %3632 = vmatprep.mubr.msk.bf16.mxu0 %vm3819_vm0, %v3818_v0 }
 0xd10   :  { %2174 = vmatprep.subr.bf16.mxu0 %v3820_v52 }
 0xd13   :  { %v2040_v44 = vld [vmem:[#allocation3 + $0x8] sm:$0xff] }
 0xd14   :  { %v4437_v46 = vpack.c.bf16 %v2040_v44, %v2040_v44 }
 0xd16   :  { %3633 = vmatmul.mubr.msk.bf16.vlgmr.msra.gmra.mxu0 %vm327_vm5, %v4437_v46 }
 0xd17   :  { %2175 = vmatpush1.bf16.msra.mxu0 %v3764_v45  ;;  %v3781_v45 = vld [vmem:[%s4674_s6 + $0x220] sm:$0xff]  }
 0xd18   :  { %2176 = vmatprep.subr.bf16.mxu0 %v3820_v52 }
 0xd1b   :  { %2177 = vmatpush1.bf16.msra.mxu0 %v3765_v47 }
 0xd1c   :  { %2178 = vmatprep.subr.bf16.mxu0 %v3820_v52 }
 0xd1f   :  { %2179 = vmatpush1.bf16.msra.mxu0 %v3766_v48 }
 0xd20   :  { %2180 = vmatprep.subr.bf16.mxu0 %v3820_v52 }
 0xd23   :  { %2181 = vmatpush1.bf16.msra.mxu0 %v3767_v49 }
 0xd24   :  { %2182 = vmatprep.subr.bf16.mxu0 %v3820_v52 }
 0xd27   :  { %2183 = vmatpush1.bf16.msra.mxu0 %v3768_v50 }
 0xd28   :  { %2184 = vmatprep.subr.bf16.mxu0 %v3820_v52 }
 0xd2b   :  { %2185 = vmatpush1.bf16.msra.mxu0 %v3769_v51 }
 0xd2c   :  { %2186 = vmatprep.subr.bf16.mxu0 %v3820_v52 }
 0xd2f   :  { %2187 = vmatpush1.bf16.msra.mxu0 %v3770_v53 }
 0xd30   :  { %2188 = vmatprep.subr.bf16.mxu0 %v3820_v52 }
 0xd33   :  { %2189 = vmatpush1.bf16.msra.mxu0 %v3771_v54 }
 0xd34   :  { %2204 = vmatprep.subr.bf16.mxu0 %v3820_v52 }
 0xd37   :  { %2205 = vmatpush2.bf16.msra.mxu0 %v2172_v57 }
 0xd38   :  { %3648 = vmatprep.subr.bf16.mxu0 %v3818_v0 }
 0xdce   :  { %v2024_v59 = vpop.f32.mrf.mxu0 }
 0xdcf   :  { %v2025_v60 = vadd.f32 %v2024_v59, %v1972_v27  ;;  %v3776_v27 = vld [vmem:[%s4674_s6 + $0x200] sm:$0xff]  }
 0xdd0   :  { %v3628_v61 = vpop.f32.mrf.mxu0 }
 0xdd1   :  { %v2036_v62 = vadd.f32 %v3207_v58, %v2025_v60 }
 0xdd2   :  { %v2027_v1 = vpop.f32.mrf.mxu0 }
 0xdd3   :  { %v2037_v2 = vmul.f32 0.5, %v2036_v62 }
 0xdd4   :  { %v3629_v3 = vpop.f32.mrf.mxu0 }
 0xdd5   :  { %v2038_v4 = vmax.f32 %v2037_v2, 0.0 }
 0xdd6   :  { %v2083_v5 = vpop.f32.mrf.mxu0 }
 0xdd7   :  { %2039 = vst.msk [vmem:[#allocation2 + $0x8] sm:$0xff] %vm327_vm5, %v2038_v4  ;;  %v2084_v6 = vadd.f32 %v2083_v5, %v4418_v29  ;;  %v3778_v29 = vld [vmem:[%s4674_s6 + $0x1f0] sm:$0xff]  }
 0xdd8   :  { %v3634_v7 = vpop.f32.mrf.mxu0 }
 0xdd9   :  { %v2089_v8 = vadd.f32 %v3207_v58, %v2084_v6  ;;  %v3782_v6 = vld [vmem:[%s4674_s6 + $0x268] sm:$0xff]   ;;  %v3783_v7 = vld [vmem:[%s4674_s6 + $0x260] sm:$0xff]  }
 0xdda   :  { %v2086_v9 = vpop.f32.mrf.mxu0 }
 0xddb   :  { %v2090_v10 = vmul.f32 0.5, %v2089_v8  ;;  %v3784_v8 = vld [vmem:[%s4674_s6 + $0x258] sm:$0xff]   ;;  %v3785_v9 = vld [vmem:[%s4674_s6 + $0x250] sm:$0xff]  }
 0xddc   :  { %v3635_v11 = vpop.f32.mrf.mxu0 }
 0xddd   :  { %v2091_v12 = vmax.f32 %v2090_v10, 0.0  ;;  %v3786_v10 = vld [vmem:[%s4674_s6 + $0x248] sm:$0xff]   ;;  %v3787_v11 = vld [vmem:[%s4674_s6 + $0x240] sm:$0xff]  }
 0xdde   :  { %v2112_v13 = vld [vmem:[#allocation2 + $0x8] sm:$0xff] }
 0xddf   :  { %2092 = vst.msk [vmem:[#allocation2 + $0x18] sm:$0xff] %vm327_vm5, %v2091_v12  ;;  %v3788_v12 = vld [vmem:[%s4674_s6 + $0x238] sm:$0xff]  }
 0xde6   :  { %v2114_v14 = vld [vmem:[#allocation2 + $0x18] sm:$0xff] }
 0xde7   :  { %v2116_v15 = vpack.c.bf16 %v2114_v14, %v2112_v13  ;;  %v3270_v13 = vld [vmem:[%s4676_s7 + $0x6] ss:$0 sm:$0xff] }
 0xde9   :  { %3235 = vmatprep.mubr.msk.bf16.mxu0 %vm327_vm5, %v2116_v15 }
 0xdea   :  { %2207 = vmatmul.mubr.bf16.vlgmr.msra.gmra.mxu0 %v4314_v22 }
 0xdeb   :  { %3650 = vmatprep.mubr.msk.bf16.mxu0 %vm3819_vm0, %v3818_v0 }
 0xeaa   :  { %v2208_v16 = vpop.f32.mrf.mxu0 }
 0xeab   :  { %v2219_v17 = vpack.c.bf16 %v2208_v16, %v2208_v16 }
 0xeac   :  { %v2210_v18 = vpop.f32.mrf.mxu0 }
 0xead   :  { %v2224_v55 = vsel %vm527_vm7, %v2219_v17, 0  ;;  %v3789_v18 = vld [vmem:[%s4674_s6 + $0x230] sm:$0xff]  }
 0xeae   :  { %v2211_v20 = vpop.f32.mrf.mxu0  ;;  %3637 = vmatpush3.bf16.msra.mxu1 %v2224_v55 }
 0xeaf   :  { %v2282_v21 = vpack.c.bf16 %v2211_v20, %v2211_v20  ;;  %3642 = vmatprep.subr.bf16.mxu1 %v3818_v0 }
 0xeb0   :  { %v2213_v23 = vpop.f32.mrf.mxu0 }
 0xeb1   :  { %3639 = vmatmul.mubr.msk.bf16.vlgmr.msra.gmra.mxu1 %vm327_vm5, %v4426_v19  ;;  %v2287_v24 = vsel %vm527_vm7, %v2282_v21, 0 }
 0xeb2   :  { %3643 = vmatpush3.bf16.msra.mxu1 %v2287_v24  ;;  %3644 = vmatprep.mubr.msk.bf16.mxu1 %vm3819_vm0, %v3818_v0 }
 0xeb3   :  { %2419 = vmatprep.subr.bf16.mxu1 %v3820_v52 }
 0xeb9   :  { %3645 = vmatmul.mubr.msk.bf16.vlgmr.msra.gmra.mxu1 %vm327_vm5, %v4437_v46 }
 0xeba   :  { %2420 = vmatpush1.bf16.msra.mxu1 %v3773_v25 }
 0xebb   :  { %2421 = vmatprep.subr.bf16.mxu1 %v3820_v52 }
 0xebe   :  { %2422 = vmatpush1.bf16.msra.mxu1 %v3774_v26 }
 0xebf   :  { %2423 = vmatprep.subr.bf16.mxu1 %v3820_v52 }
 0xec2   :  { %2424 = vmatpush1.bf16.msra.mxu1 %v3775_v63 }
 0xec3   :  { %2425 = vmatprep.subr.bf16.mxu1 %v3820_v52 }
 0xec6   :  { %2426 = vmatpush1.bf16.msra.mxu1 %v3776_v27  ;;  %v3791_v27 = vld [vmem:[%s4674_s6 + $0x270] sm:$0xff]  }
 0xec7   :  { %2427 = vmatprep.subr.bf16.mxu1 %v3820_v52 }
 0xeca   :  { %2428 = vmatpush1.bf16.msra.mxu1 %v3777_v28 }
 0xecb   :  { %2429 = vmatprep.subr.bf16.mxu1 %v3820_v52 }
 0xece   :  { %2430 = vmatpush1.bf16.msra.mxu1 %v3778_v29 }
 0xecf   :  { %2431 = vmatprep.subr.bf16.mxu1 %v3820_v52 }
 0xed2   :  { %2432 = vmatpush1.bf16.msra.mxu1 %v3779_v36 }
 0xed3   :  { %2433 = vmatprep.subr.bf16.mxu1 %v3820_v52 }
 0xed6   :  { %2434 = vmatpush1.bf16.msra.mxu1 %v3780_v40 }
 0xed7   :  { %2449 = vmatprep.subr.bf16.mxu1 %v3820_v52 }
 0xeda   :  { %2450 = vmatpush2.bf16.msra.mxu1 %v3781_v45 }
 0xedb   :  { %3660 = vmatprep.subr.bf16.mxu1 %v3818_v0 }
 0xf71   :  { %v2260_v31 = vpop.f32.mrf.mxu1 }
 0xf72   :  { %v2261_v32 = vadd.f32 %v2260_v31, %v2208_v16 }
 0xf73   :  { %v3640_v33 = vpop.f32.mrf.mxu1 }
 0xf74   :  { %v2272_v35 = vadd.f32 %v3238_v30, %v2261_v32 }
 0xf75   :  { %v2263_v37 = vpop.f32.mrf.mxu1 }
 0xf76   :  { %v2273_v39 = vmul.f32 0.5, %v2272_v35 }
 0xf77   :  { %v3641_v41 = vpop.f32.mrf.mxu1 }
 0xf78   :  { %v2274_v34 = vmax.f32 %v2273_v39, 0.0 }
 0xf79   :  { %v2323_v38 = vpop.f32.mrf.mxu1 }
 0xf7a   :  { %v2324_v44 = vadd.f32 %v2323_v38, %v2211_v20  ;;  %2276 = vrot.lane.b32.xlu0 %v2274_v34, %s3821_s25  ;;  %v3790_v20 = vld [vmem:[%s4674_s6 + $0x278] ss:$0 sps:$4 sm:$0xff]  }
 0xf7b   :  { %v3646_v47 = vpop.f32.mrf.mxu1  ;;  %v2669_v24 = vsel %vm527_vm7, %v3790_v20, 0 }
 0xf7c   :  { %v2329_v48 = vadd.f32 %v3238_v30, %v2324_v44 }
 0xf7d   :  { %v2326_v49 = vpop.f32.mrf.mxu1 }
 0xf7e   :  { %v2330_v50 = vmul.f32 0.5, %v2329_v48 }
 0xf7f   :  { %v3647_v51 = vpop.f32.mrf.mxu1 }
 0xf80   :  { %v2331_v53 = vmax.f32 %v2330_v50, 0.0  ;;  %v3796_v50 = vld [vmem:[%s4677_s8 + $0x68] sm:$0xff]   ;;  %v3797_v51 = vld [vmem:[%s4677_s8 + $0x60] sm:$0xff]  }
 0xf82   :  { %2333 = vrot.lane.b32.xlu1 %v2331_v53, %s3821_s25  ;;  %v3798_v53 = vld [vmem:[%s4677_s8 + $0x58] sm:$0xff]  }
 0xfec   :  { %v2277_v54 = vpop.permute.xlu0 %2276 }
 0xfed   :  { %2279 = vst.msk [vmem:[#allocation2 + $0x8] sm:$0xff] %vm820_vm8, %v2277_v54  ;;  %v3304_v54 = vld [vmem:[%s4676_s7 + $0x7] ss:$0 sm:$0xff] }
 0xff4   :  { %v2334_v56 = vpop.permute.xlu1 %2333  ;;  %v2357_v57 = vld [vmem:[#allocation2 + $0x8] sm:$0xff] }
 0xff5   :  { %2336 = vst.msk [vmem:[#allocation2 + $0x18] sm:$0xff] %vm820_vm8, %v2334_v56 }
 0xffc   :  { %v2359_v58 = vld [vmem:[#allocation2 + $0x18] sm:$0xff] }
 0xffd   :  { %v2361_v59 = vpack.c.bf16 %v2359_v58, %v2357_v57 }
 0xfff   :  { %3267 = vmatprep.mubr.msk.bf16.mxu1 %vm271_vm1, %v2361_v59 }
0x1000   :  { %2452 = vmatmul.mubr.bf16.vlgmr.msra.gmra.mxu1 %v4314_v22 }
0x1001   :  { %3662 = vmatprep.mubr.msk.bf16.mxu1 %vm3819_vm0, %v3818_v0 }
0x10c0   :  { %v2453_v60 = vpop.f32.mrf.mxu1 }
0x10c1   :  { %v2464_v61 = vpack.c.bf16 %v2453_v60, %v2453_v60 }
0x10c2   :  { %v2455_v62 = vpop.f32.mrf.mxu1 }
0x10c3   :  { %v2469_v1 = vsel %vm527_vm7, %v2464_v61, 0 }
0x10c4   :  { %v2456_v2 = vpop.f32.mrf.mxu1  ;;  %3649 = vmatpush3.bf16.msra.mxu0 %v2469_v1  ;;  %v3800_v1 = vld [vmem:[%s4677_s8 + $0x98] sm:$0xff]  }
0x10c5   :  { %v2527_v3 = vpack.c.bf16 %v2456_v2, %v2456_v2  ;;  %3654 = vmatprep.subr.bf16.mxu0 %v3818_v0 }
0x10c6   :  { %v2458_v4 = vpop.f32.mrf.mxu1 }
0x10c7   :  { %3651 = vmatmul.mubr.msk.bf16.vlgmr.msra.gmra.mxu0 %vm327_vm5, %v4426_v19  ;;  %v2532_v5 = vsel %vm527_vm7, %v2527_v3, 0 }
0x10c8   :  { %3655 = vmatpush3.bf16.msra.mxu0 %v2532_v5  ;;  %3656 = vmatprep.mubr.msk.bf16.mxu0 %vm3819_vm0, %v3818_v0 }
0x10c9   :  { %2671 = vmatprep.subr.bf16.mxu0 %v3820_v52 }
0x10cf   :  { %3657 = vmatmul.mubr.msk.bf16.vlgmr.msra.gmra.mxu0 %vm327_vm5, %v4437_v46 }
0x10d0   :  { %2672 = vmatpush1.bf16.msra.mxu0 %v3782_v6  ;;  %v3801_v6 = vld [vmem:[%s4677_s8 + $0x90] sm:$0xff]  }
0x10d1   :  { %2673 = vmatprep.subr.bf16.mxu0 %v3820_v52 }
0x10d4   :  { %2674 = vmatpush1.bf16.msra.mxu0 %v3783_v7 }
0x10d5   :  { %2675 = vmatprep.subr.bf16.mxu0 %v3820_v52 }
0x10d8   :  { %2676 = vmatpush1.bf16.msra.mxu0 %v3784_v8 }
0x10d9   :  { %2677 = vmatprep.subr.bf16.mxu0 %v3820_v52 }
0x10dc   :  { %2678 = vmatpush1.bf16.msra.mxu0 %v3785_v9 }
0x10dd   :  { %2679 = vmatprep.subr.bf16.mxu0 %v3820_v52 }
0x10e0   :  { %2680 = vmatpush1.bf16.msra.mxu0 %v3786_v10 }
0x10e1   :  { %2681 = vmatprep.subr.bf16.mxu0 %v3820_v52 }
0x10e4   :  { %2682 = vmatpush1.bf16.msra.mxu0 %v3787_v11 }
0x10e5   :  { %2683 = vmatprep.subr.bf16.mxu0 %v3820_v52 }
0x10e8   :  { %2684 = vmatpush1.bf16.msra.mxu0 %v3788_v12 }
0x10e9   :  { %2685 = vmatprep.subr.bf16.mxu0 %v3820_v52 }
0x10ec   :  { %2686 = vmatpush1.bf16.msra.mxu0 %v3789_v18 }
0x10ed   :  { %2699 = vmatprep.subr.bf16.mxu0 %v3820_v52 }
0x10f0   :  { %2700 = vmatpush2.bf16.msra.mxu0 %v2669_v24 }
0x10f1   :  { %2701 = vmatprep.subr.bf16.mxu0 %v3820_v52 }
0x10f4   :  { %2702 = vmatpush2.bf16.msra.mxu0 %v3791_v27 }
0x1187   :  { %v2505_v14 = vpop.f32.mrf.mxu0 }
0x1188   :  { %v2506_v15 = vadd.f32 %v2505_v14, %v2453_v60  ;;  %v3799_v60 = vld [vmem:[%s4677_s8 + $0x50] sm:$0xff]  }
0x1189   :  { %v3652_v16 = vpop.f32.mrf.mxu0 }
0x118a   :  { %v2517_v17 = vadd.f32 %v3270_v13, %v2506_v15  ;;  %v2836_v15 = vld [vmem:[#allocation2] sm:$0xff]  ;;  %v2838_v16 = vld [vmem:[#allocation2 + $0x10] sm:$0xff] }
0x118b   :  { %v2508_v55 = vpop.f32.mrf.mxu0 }
0x118c   :  { %v2518_v21 = vmul.f32 0.5, %v2517_v17  ;;  %v2840_v55 = vpack.c.bf16 %v2838_v16, %v2836_v15 }
0x118d   :  { %v3653_v23 = vpop.f32.mrf.mxu0 }
0x118e   :  { %v2519_v25 = vmax.f32 %v2518_v21, 0.0  ;;  %v3337_v21 = vld [vmem:[%s4678_s9] ss:$0 sm:$0xff] }
0x118f   :  { %v2568_v26 = vpop.f32.mrf.mxu0 }
0x1190   :  { %v2569_v63 = vadd.f32 %v2568_v26, %v2456_v2  ;;  %2521 = vrot.lane.b32.xlu1 %v2519_v25, %s3822_s27 }
0x1191   :  { %v3658_v28 = vpop.f32.mrf.mxu0 }
0x1192   :  { %v2574_v29 = vadd.f32 %v3270_v13, %v2569_v63 }
0x1193   :  { %v2571_v30 = vpop.f32.mrf.mxu0 }
0x1194   :  { %v2575_v31 = vmul.f32 0.5, %v2574_v29 }
0x1195   :  { %v3659_v32 = vpop.f32.mrf.mxu0 }
0x1196   :  { %v2576_v33 = vmax.f32 %v2575_v31, 0.0 }
0x1198   :  { %2578 = vrot.lane.b32.xlu1 %v2576_v33, %s3822_s27 }
0x1202   :  { %v2522_v35 = vpop.permute.xlu1 %2521 }
0x1203   :  { %2524 = vst.msk [vmem:[#allocation2 + $0x8] sm:$0xff] %vm1066_vm9, %v2522_v35 }
0x120a   :  { %v2579_v36 = vpop.permute.xlu1 %2578  ;;  %v2603_v37 = vld [vmem:[#allocation2 + $0x8] sm:$0xff] }
0x120b   :  { %2581 = vst.msk [vmem:[#allocation2 + $0x18] sm:$0xff] %vm1066_vm9, %v2579_v36 }
0x1212   :  { %v2605_v39 = vld [vmem:[#allocation2 + $0x18] sm:$0xff] }
0x1213   :  { %v2607_v40 = vpack.c.bf16 %v2605_v39, %v2603_v37 }
0x1215   :  { %3301 = vmatprep.mubr.msk.bf16.mxu0 %vm1208_vm10, %v2607_v40 }
0x1216   :  { %2704 = vmatmul.mubr.bf16.vlgmr.msra.gmra.mxu0 %v4314_v22  ;;  %v3792_v22 = vld [vmem:[%s4677_s8 + $0x88] sm:$0xff]  }
0x12d6   :  { %v2705_v41 = vpop.f32.mrf.mxu0 }
0x12d7   :  { %v2716_v34 = vpack.c.bf16 %v2705_v41, %v2705_v41 }
0x12d8   :  { %v2707_v38 = vpop.f32.mrf.mxu0 }
0x12d9   :  { %v2721_v44 = vsel %vm527_vm7, %v2716_v34, 0 }
0x12da   :  { %v2708_v45 = vpop.f32.mrf.mxu0  ;;  %3661 = vmatpush3.bf16.msra.mxu1 %v2721_v44 }
0x12db   :  { %v2779_v47 = vpack.c.bf16 %v2708_v45, %v2708_v45  ;;  %3666 = vmatprep.subr.bf16.mxu1 %v3818_v0 }
0x12dc   :  { %v2710_v48 = vpop.f32.mrf.mxu0 }
0x12dd   :  { %3663 = vmatmul.mubr.msk.bf16.vlgmr.msra.gmra.mxu1 %vm327_vm5, %v4426_v19  ;;  %v2784_v49 = vsel %vm527_vm7, %v2779_v47, 0  ;;  %v3793_v19 = vld [vmem:[%s4677_s8 + $0x80] sm:$0xff]  }
0x12de   :  { %3667 = vmatpush3.bf16.msra.mxu1 %v2784_v49  ;;  %3668 = vmatprep.mubr.msk.bf16.mxu1 %vm3819_vm0, %v3818_v0  ;;  %v3794_v0 = vld [vmem:[%s4677_s8 + $0x78] sm:$0xff]  }
0x12df   :  { %2926 = vmatprep.subr.bf16.mxu1 %v3820_v52 }
0x12e5   :  { %3669 = vmatmul.mubr.msk.bf16.vlgmr.msra.gmra.mxu1 %vm327_vm5, %v4437_v46  ;;  %v3795_v46 = vld [vmem:[%s4677_s8 + $0x70] sm:$0xff]  }
0x12e6   :  { %2927 = vmatpush1.bf16.msra.mxu1 %v3792_v22 }
0x12e7   :  { %2928 = vmatprep.subr.bf16.mxu1 %v3820_v52 }
0x12ea   :  { %2929 = vmatpush1.bf16.msra.mxu1 %v3793_v19 }
0x12eb   :  { %2930 = vmatprep.subr.bf16.mxu1 %v3820_v52 }
0x12ee   :  { %2931 = vmatpush1.bf16.msra.mxu1 %v3794_v0 }
0x12ef   :  { %2932 = vmatprep.subr.bf16.mxu1 %v3820_v52 }
0x12f2   :  { %2933 = vmatpush1.bf16.msra.mxu1 %v3795_v46 }
0x12f3   :  { %2934 = vmatprep.subr.bf16.mxu1 %v3820_v52 }
0x12f6   :  { %2935 = vmatpush1.bf16.msra.mxu1 %v3796_v50 }
0x12f7   :  { %2936 = vmatprep.subr.bf16.mxu1 %v3820_v52 }
0x12fa   :  { %2937 = vmatpush1.bf16.msra.mxu1 %v3797_v51 }
0x12fb   :  { %2938 = vmatprep.subr.bf16.mxu1 %v3820_v52 }
0x12fe   :  { %2939 = vmatpush1.bf16.msra.mxu1 %v3798_v53 }
0x12ff   :  { %2940 = vmatprep.subr.bf16.mxu1 %v3820_v52 }
0x1302   :  { %2941 = vmatpush1.bf16.msra.mxu1 %v3799_v60 }
0x1303   :  { %2954 = vmatprep.subr.bf16.mxu1 %v3820_v52 }
0x1306   :  { %2955 = vmatpush2.bf16.msra.mxu1 %v3800_v1 }
0x1307   :  { %2956 = vmatprep.subr.bf16.mxu1 %v3820_v52 }
0x130a   :  { %2957 = vmatpush2.bf16.msra.mxu1 %v3801_v6 }
0x139d   :  { %v2757_v56 = vpop.f32.mrf.mxu1 }
0x139e   :  { %v2758_v57 = vadd.f32 %v2757_v56, %v2705_v41 }
0x139f   :  { %v3664_v58 = vpop.f32.mrf.mxu1 }
0x13a0   :  { %v2769_v59 = vadd.f32 %v3304_v54, %v2758_v57 }
0x13a1   :  { %v2760_v61 = vpop.f32.mrf.mxu1 }
0x13a2   :  { %v2770_v62 = vmul.f32 0.5, %v2769_v59 }
0x13a3   :  { %v3665_v2 = vpop.f32.mrf.mxu1 }
0x13a4   :  { %v2771_v3 = vmax.f32 %v2770_v62, 0.0 }
0x13a5   :  { %v2820_v4 = vpop.f32.mrf.mxu1 }
0x13a6   :  { %v2821_v5 = vadd.f32 %v2820_v4, %v2708_v45  ;;  %2773 = vrot.lane.b32.xlu0 %v2771_v3, %s3823_s11 }
0x13a7   :  { %v3670_v7 = vpop.f32.mrf.mxu1 }
0x13a8   :  { %v2826_v8 = vadd.f32 %v3304_v54, %v2821_v5 }
0x13a9   :  { %v2823_v9 = vpop.f32.mrf.mxu1 }
0x13aa   :  { %v2827_v10 = vmul.f32 0.5, %v2826_v8 }
0x13ab   :  { %v3671_v11 = vpop.f32.mrf.mxu1 }
0x13ac   :  { %v2828_v12 = vmax.f32 %v2827_v10, 0.0 }
0x13ae   :  { %2830 = vrot.lane.b32.xlu1 %v2828_v12, %s3823_s11 }
0x1418   :  { %v2774_v13 = vpop.permute.xlu0 %2773 }
0x1419   :  { %2776 = vst.msk [vmem:[#allocation2 + $0x8] sm:$0xff] %vm1320_vm11, %v2774_v13 }
0x1420   :  { %v2831_v14 = vpop.permute.xlu1 %2830  ;;  %v2837_v17 = vld [vmem:[#allocation2 + $0x8] sm:$0xff] }
0x1421   :  { %2833 = vst.msk [vmem:[#allocation2 + $0x18] sm:$0xff] %vm1320_vm11, %v2831_v14 }
0x1428   :  { %v2839_v18 = vld [vmem:[#allocation2 + $0x18] sm:$0xff] }
0x1429   :  { %v2841_v52 = vpack.c.bf16 %v2839_v18, %v2837_v17 }
0x142b   :  { %3336 = vmatprep.mubr.msk.bf16.mxu1 %vm1467_vm12, %v2841_v52 }
0x142c   :  { %2959 = vmatmul.mubr.bf16.vlgmr.msra.gmra.mxu1 %v2840_v55 }
0x14ec   :  { %v2960_v20 = vpop.f32.mrf.mxu1 }
0x14ed   :  { %v2967_v23 = vadd.f32 %v2960_v20, %v4358_v42 }
0x14ee   :  { %v2962_v24 = vpop.f32.mrf.mxu1 }
0x14ef   :  { %v2980_v25 = vadd.f32 %v3337_v21, %v2967_v23 }
0x14f0   :  { %v2963_v26 = vpop.f32.mrf.mxu1 }
0x14f1   :  { %2982 = vst [vmem:[%s4679_s10] sm:$0xff] %v2980_v25  ;;  %v2968_v63 = vadd.f32 %v2963_v26, %v4360_v43 }
0x14f2   :  { %v2965_v27 = vpop.f32.mrf.mxu1 }
0x14f3   :  { %v2981_v28 = vadd.f32 %v3337_v21, %v2968_v63 }
0x14f5   :  { %2983 = vst [vmem:[%s4679_s10 + $0x8] sm:$0xff] %v2981_v28 }

</bundles_post_ra>
